<compile_context>
chip_gen: v5e
topology: v5e:2x2
jax: 0.10.0
libtpu: 0.0.40
codegen_flags: <defaults>
</compile_context>

<pallas_src>
import math

import jax
import jax.numpy as jnp
from jax.experimental import pallas as pl
from jax.experimental.pallas import tpu as pltpu

DEGREE = 1  # matches module default `degree = 1`
# TODO(synk): DEGREE is baked at trace time; a per-instance `degree` attribute
# of the PyTorch module is not plumbed through.


def _round_up(v, k):
    return ((v + k - 1) // k) * k


def _relu_resnet_kernel(x_ref, scal_ref, wstack_ref, wout_ref, out_ref):
    cdt = wstack_ref.dtype                    # matmul compute dtype (bf16)
    x = x_ref[...].astype(jnp.float32)        # (tb, 2) f32
    tb = x.shape[0]
    m = scal_ref.shape[1]

    # Packed f32 slab: rows 0-1 = fc1 weight rows, rows 2-7 = b1..b6.
    scal = scal_ref[...]
    w1_0 = scal[0:1, :]
    w1_1 = scal[1:2, :]
    b1, b2, b3, b4, b5, b6 = (scal[r:r + 1, :] for r in range(2, 8))

    def act(h):
        # F.relu(h ** degree); degree == 1 special-cased at trace time.
        if DEGREE == 1:
            return jnp.maximum(h, 0.0)
        return jnp.maximum(h ** DEGREE, 0.0)

    def mm(h, idx, b):
        # bf16 MXU matmul, f32 accumulation, f32 bias add.
        r = jnp.dot(h.astype(cdt), wstack_ref[idx],
                    preferred_element_type=jnp.float32)
        return r + b

    # Hoisted lane-broadcasts of the two input columns; reused for both the
    # identity embedding `s` and the fc1 multiply-adds.
    x0_b = jnp.broadcast_to(x[:, 0:1], (tb, m))
    x1_b = jnp.broadcast_to(x[:, 1:2], (tb, m))

    # s = x @ Ix : Ix only has ones at [0,0] and [1,1] -> pure-VPU selects.
    col = jax.lax.broadcasted_iota(jnp.int32, (tb, m), 1)
    s = jnp.where(col == 0, x0_b, jnp.where(col == 1, x1_b, 0.0))

    # fc1: K=dim(=2) contraction as VPU broadcast multiply-adds.
    y = act(b1 + x0_b * w1_0 + x1_b * w1_1)

    y = act(mm(y, 0, b2)) + s
    s = y
    y = act(mm(y, 1, b3))
    y = act(mm(y, 2, b4)) + s
    s = y
    y = act(mm(y, 3, b5))
    y = act(mm(y, 4, b6)) + s

    # outlayer (no bias): plain (tb, m) @ (m, 1) MXU matmul -> (tb, 1).
    # No transposed operands anywhere, so no hidden XLU transpose of y; the
    # host flattens the (N, 1) result.
    out_ref[...] = jnp.dot(y.astype(cdt), wout_ref[...],
                           preferred_element_type=jnp.float32)


def relu_resnet_forward(x, params, *, boundary_control_type="none", tb=1024):
    """Residual-MLP forward via one Pallas kernel; the tiny elementwise
    boundary-control glue stays in plain JAX."""
    x = jnp.asarray(x, jnp.float32)
    N, dim = x.shape
    m = params["wstack"].shape[1]
    assert dim == 2, "module hardcodes a 2-D input (Ix has exactly two ones)"
    assert tb % 128 == 0 and tb >= 128, "tb must be a positive multiple of 128"

    # Clamp tb so the grid keeps >= 2 steps on small N (both v7x TensorCores
    # get work), while staying a multiple of 128.
    tb_eff = min(tb, max(128, _round_up(-(-N // 2), 128)))

    n_pad = (-N) % tb_eff
    x_p = jnp.pad(x, ((0, n_pad), (0, 0))) if n_pad else x
    num_tiles = x_p.shape[0] // tb_eff

    def weight_spec(shape, zero_map):
        # Grid-invariant (weight) blocks: index_map always returns block 0.
        # Single-buffer them once the weight footprint is actually large.
        if m > 512:
            return pl.BlockSpec(shape, zero_map, pipeline_mode=pl.Buffered(1))
        return pl.BlockSpec(shape, zero_map)

    in_specs = [
        pl.BlockSpec((tb_eff, dim), lambda i: (i, 0)),       # x, tiled batch
        weight_spec((8, m), lambda i: (0, 0)),               # w1 rows + biases
        weight_spec((5, m, m), lambda i: (0, 0, 0)),         # fc2..fc6 weights
        weight_spec((m, 1), lambda i: (0, 0)),               # outlayer column
    ]
    out_spec = pl.BlockSpec((tb_eff, 1), lambda i: (i, 0))

    w_itemsize = jnp.dtype(params["wstack"].dtype).itemsize
    weight_bytes = (5 * m * m + m) * w_itemsize + 8 * m * 4
    flops = 2 * x_p.shape[0] * (dim * m + 5 * m * m + m)
    bytes_accessed = int(weight_bytes + x_p.size * 4 + x_p.shape[0] * 4)

    wbuf = 1 if m > 512 else 2                      # weight pipeline depth
    vmem_est = (wbuf * 5 * m * m * w_itemsize       # stacked weights
                + 2 * 8 * max(m, 128) * 4           # bias/w1 slab
                + 2 * m * 128 * w_itemsize          # wout (lane-padded)
                + 2 * tb_eff * 128 * 4              # x blocks (lane-padded)
                + 2 * tb_eff * 128 * 4              # out blocks (lane-padded)
                + 8 * tb_eff * m * 4                # live f32 activation tiles
                + (4 << 20))                        # headroom
    try:
        vmem_cap = int(getattr(pltpu.get_tpu_info(), "vmem_capacity_bytes",
                               64 << 20))
    except Exception:
        vmem_cap = 64 << 20
    vmem_ceiling = (vmem_cap * 13) // 16            # ~81%: compiler headroom
    vmem_limit = int(min(max(vmem_est, 16 << 20), vmem_ceiling))

    out2d = pl.pallas_call(
        _relu_resnet_kernel,
        out_shape=jax.ShapeDtypeStruct((num_tiles * tb_eff, 1), jnp.float32),
        grid_spec=pltpu.PrefetchScalarGridSpec(
            num_scalar_prefetch=0,
            grid=(num_tiles,),
            in_specs=in_specs,
            out_specs=out_spec,
        ),
        compiler_params=pltpu.CompilerParams(
            dimension_semantics=("parallel",),
            vmem_limit_bytes=vmem_limit,
        ),
        cost_estimate=pl.CostEstimate(
            flops=int(flops), transcendentals=0,
            bytes_accessed=bytes_accessed),
    )(x_p, params["scal"], params["wstack"], params["wout"])

    y = out2d.reshape(-1)[:N]            # == outlayer(y).squeeze(1)

    if boundary_control_type == "none":
        return y
    elif boundary_control_type == "v_net":
        c = (jnp.cos(jnp.pi / 4 + jnp.pi / 4 * x[:, 0])
             * jnp.cos(jnp.pi / 4 + jnp.pi / 4 * x[:, 1]))
        return c * y
    elif boundary_control_type == "u_net":
        x1, x2 = x[:, 0], x[:, 1]
        mask = x2 > -0.4 + 0.5 * x1
        base_vals = (jnp.exp(-5.0 * (x1 ** 2 + (-1.0 - 0.9 * x1) ** 2))
                     + jnp.exp(-5.0 * (1.0 + (x2 + 0.9) ** 2))
                     - math.exp(-5.0 * (1.0 + (-1.0 + 0.9) ** 2)))
        base = jnp.where(mask, 0.0, base_vals)
        c = (jnp.cos(-jnp.pi / 4 + jnp.pi / 4 * x1)
             * jnp.cos(-jnp.pi / 4 + jnp.pi / 4 * x2))
        return c * y + base
    else:
        # TODO(synk): PyTorch forward implicitly returns None for the default
        # 'cube' type with base_function=None; no meaningful output to produce.
        raise ValueError(f"unsupported boundary_control_type: {boundary_control_type}")


def init_params(key, dim, m, *, param_dtype=jnp.bfloat16):
    """PyTorch-Linear-style init, pre-packed for the kernel:
       scal   : (8, m)  f32  -- rows 0-1 = fc1 weight rows, rows 2-7 = b1..b6
       wstack : (5,m,m) bf16 -- fc2..fc6 weights stored [in, out]
       wout   : (m, 1)  bf16 -- outlayer column (no bias)."""
    assert dim == 2
    keys = jax.random.split(key, 14)

    def linear(kw, kb, fan_in, fan_out, bias=True):
        bound = 1.0 / math.sqrt(fan_in)
        w = jax.random.uniform(kw, (fan_in, fan_out), jnp.float32, -bound, bound)
        b = (jax.random.uniform(kb, (1, fan_out), jnp.float32, -bound, bound)
             if bias else None)
        return w, b

    w1, b1 = linear(keys[0], keys[1], dim, m)
    w2, b2 = linear(keys[2], keys[3], m, m)
    w3, b3 = linear(keys[4], keys[5], m, m)
    w4, b4 = linear(keys[6], keys[7], m, m)
    w5, b5 = linear(keys[8], keys[9], m, m)
    w6, b6 = linear(keys[10], keys[11], m, m)
    wout, _ = linear(keys[12], keys[13], m, 1, bias=False)

    scal = jnp.concatenate([w1, b1, b2, b3, b4, b5, b6], axis=0)   # (8, m)
    wstack = jnp.stack([w2, w3, w4, w5, w6]).astype(param_dtype)   # (5, m, m)
    return {"scal": scal, "wstack": wstack, "wout": wout.astype(param_dtype)}


def _reference_forward(x, params):
    """Pure-JAX mirror of the kernel math (same bf16/f32 mix) for validation."""
    cdt = params["wstack"].dtype
    scal = params["scal"]
    w1 = scal[0:2, :]
    b = [scal[r:r + 1, :] for r in range(2, 8)]
    m = scal.shape[1]
    n = x.shape[0]

    def act(h):
        return jnp.maximum(h if DEGREE == 1 else h ** DEGREE, 0.0)

    def mm(h, idx, bias):
        return jnp.dot(h.astype(cdt), params["wstack"][idx],
                       preferred_element_type=jnp.float32) + bias

    s = jnp.concatenate([x, jnp.zeros((n, m - 2), jnp.float32)], axis=1)
    y = act(x @ w1 + b[0])
    y = act(mm(y, 0, b[1])) + s
    s = y
    y = act(mm(y, 1, b[2]))
    y = act(mm(y, 2, b[3])) + s
    s = y
    y = act(mm(y, 3, b[4]))
    y = act(mm(y, 4, b[5])) + s
    out = jnp.dot(y.astype(cdt), params["wout"],
                  preferred_element_type=jnp.float32)
    return out[:, 0]


if __name__ == "__main__":
    N, DIM, M, TB = 4096, 2, 128, 1024      # 4 grid steps of 1024 rows
    key = jax.random.PRNGKey(0)
    kx, kp = jax.random.split(key)
    x = jax.random.uniform(kx, (N, DIM), jnp.float32, -1.0, 1.0)
    params = init_params(kp, DIM, M)

    out = relu_resnet_forward(x, params, boundary_control_type="none", tb=TB)
    jax.block_until_ready(out)
    assert out.shape == (N,)
    assert bool(jnp.all(jnp.isfinite(out)))

    ref = _reference_forward(x, params)
    max_err = float(jnp.max(jnp.abs(out - ref)))
    tol = 2e-2 * (1.0 + float(jnp.max(jnp.abs(ref))))
    assert max_err <= tol, f"mismatch vs reference: {max_err} > {tol}"
    print("KERNEL_OK")
</pallas_src>

<mosaic_0001>
module attributes {stable_mosaic.version = 11 : i64} {
  func.func @_relu_resnet_kernel(%arg0: i32, %arg1: memref<1024x2xf32, #tpu.memory_space<vmem>>, %arg2: memref<8x128xf32, #tpu.memory_space<vmem>>, %arg3: memref<5x128x128xbf16, #tpu.memory_space<vmem>>, %arg4: memref<128x1xbf16, #tpu.memory_space<vmem>>, %arg5: memref<1024x1xf32, #tpu.memory_space<vmem>>) attributes {dimension_semantics = [#tpu.dimension_semantics<parallel>], iteration_bounds = array<i64: 4>, scalar_prefetch = 0 : i64, scratch_operands = 0 : i64, tpu.core_type = #tpu.core_type<tc>, window_params = [{transform_indices = @transform_0, window_bounds = array<i64: 1024, 2>}, {pipeline_mode = #tpu.pipeline_mode<synchronous>, transform_indices = @transform_1, window_bounds = array<i64: 8, 128>}, {pipeline_mode = #tpu.pipeline_mode<synchronous>, transform_indices = @transform_2, window_bounds = array<i64: 5, 128, 128>}, {pipeline_mode = #tpu.pipeline_mode<synchronous>, transform_indices = @transform_3, window_bounds = array<i64: 128, 1>}, {transform_indices = @transform_4, window_bounds = array<i64: 1024, 1>}]} {
    %c0 = arith.constant 0 : index
    %c0_0 = arith.constant 0 : index
    %0 = vector.load %arg1[%c0, %c0_0] : memref<1024x2xf32, #tpu.memory_space<vmem>>, vector<1024x2xf32>
    %c0_1 = arith.constant 0 : index
    %c0_2 = arith.constant 0 : index
    %1 = vector.load %arg2[%c0_1, %c0_2] : memref<8x128xf32, #tpu.memory_space<vmem>>, vector<8x128xf32>
    %2 = vector.extract_strided_slice %1 {offsets = [0, 0], sizes = [1, 128], strides = [1, 1]} : vector<8x128xf32> to vector<1x128xf32>
    %3 = vector.extract_strided_slice %1 {offsets = [1, 0], sizes = [1, 128], strides = [1, 1]} : vector<8x128xf32> to vector<1x128xf32>
    %4 = vector.extract_strided_slice %1 {offsets = [2, 0], sizes = [1, 128], strides = [1, 1]} : vector<8x128xf32> to vector<1x128xf32>
    %5 = vector.extract_strided_slice %1 {offsets = [3, 0], sizes = [1, 128], strides = [1, 1]} : vector<8x128xf32> to vector<1x128xf32>
    %6 = vector.extract_strided_slice %1 {offsets = [4, 0], sizes = [1, 128], strides = [1, 1]} : vector<8x128xf32> to vector<1x128xf32>
    %7 = vector.extract_strided_slice %1 {offsets = [5, 0], sizes = [1, 128], strides = [1, 1]} : vector<8x128xf32> to vector<1x128xf32>
    %8 = vector.extract_strided_slice %1 {offsets = [6, 0], sizes = [1, 128], strides = [1, 1]} : vector<8x128xf32> to vector<1x128xf32>
    %9 = vector.extract_strided_slice %1 {offsets = [7, 0], sizes = [1, 128], strides = [1, 1]} : vector<8x128xf32> to vector<1x128xf32>
    %10 = vector.extract_strided_slice %0 {offsets = [0, 0], sizes = [1024, 1], strides = [1, 1]} : vector<1024x2xf32> to vector<1024x1xf32>
    %11 = vector.shape_cast %10 : vector<1024x1xf32> to vector<1024x1xf32>
    %12 = vector.broadcast %11 : vector<1024x1xf32> to vector<1024x128xf32>
    %13 = vector.extract_strided_slice %0 {offsets = [0, 1], sizes = [1024, 1], strides = [1, 1]} : vector<1024x2xf32> to vector<1024x1xf32>
    %14 = vector.shape_cast %13 : vector<1024x1xf32> to vector<1024x1xf32>
    %15 = vector.broadcast %14 : vector<1024x1xf32> to vector<1024x128xf32>
    %16 = tpu.iota {dimensions = array<i32: 1>} : vector<1024x128xi32>
    %c0_i32 = arith.constant 0 : i32
    %17 = vector.broadcast %c0_i32 : i32 to vector<1024x128xi32>
    %18 = arith.cmpi eq, %16, %17 : vector<1024x128xi32>
    %c1_i32 = arith.constant 1 : i32
    %19 = vector.broadcast %c1_i32 : i32 to vector<1024x128xi32>
    %20 = arith.cmpi eq, %16, %19 : vector<1024x128xi32>
    %cst = arith.constant 0.000000e+00 : f32
    %21 = vector.broadcast %cst : f32 to vector<1024x128xf32>
    %22 = arith.select %20, %15, %21 : vector<1024x128xi1>, vector<1024x128xf32>
    %23 = arith.select %18, %12, %22 : vector<1024x128xi1>, vector<1024x128xf32>
    %24 = vector.broadcast %2 : vector<1x128xf32> to vector<1024x128xf32>
    %25 = arith.mulf %12, %24 : vector<1024x128xf32>
    %26 = vector.broadcast %4 : vector<1x128xf32> to vector<1024x128xf32>
    %27 = arith.addf %26, %25 : vector<1024x128xf32>
    %28 = vector.broadcast %3 : vector<1x128xf32> to vector<1024x128xf32>
    %29 = arith.mulf %15, %28 : vector<1024x128xf32>
    %30 = arith.addf %27, %29 : vector<1024x128xf32>
    %cst_3 = arith.constant 0.000000e+00 : f32
    %31 = vector.broadcast %cst_3 : f32 to vector<1024x128xf32>
    %32 = arith.maximumf %30, %31 : vector<1024x128xf32>
    %33 = arith.truncf %32 : vector<1024x128xf32> to vector<1024x128xbf16>
    %c0_4 = arith.constant 0 : index
    %c0_5 = arith.constant 0 : index
    %c0_6 = arith.constant 0 : index
    %34 = vector.load %arg3[%c0_4, %c0_5, %c0_6] : memref<5x128x128xbf16, #tpu.memory_space<vmem>>, vector<1x128x128xbf16>
    %35 = vector.shape_cast %34 : vector<1x128x128xbf16> to vector<128x128xbf16>
    %cst_7 = arith.constant dense<0.000000e+00> : vector<1024x128xf32>
    %36 = tpu.matmul %33, %35, %cst_7 {dimension_numbers = #tpu.dot_dimension_numbers<[1], [0], [0], [1], [0, 0, 1, 1], [], []>} : vector<1024x128xbf16>, vector<128x128xbf16>, vector<1024x128xf32> -> vector<1024x128xf32>
    %37 = vector.broadcast %5 : vector<1x128xf32> to vector<1024x128xf32>
    %38 = arith.addf %36, %37 : vector<1024x128xf32>
    %cst_8 = arith.constant 0.000000e+00 : f32
    %39 = vector.broadcast %cst_8 : f32 to vector<1024x128xf32>
    %40 = arith.maximumf %38, %39 : vector<1024x128xf32>
    %41 = arith.addf %40, %23 : vector<1024x128xf32>
    %42 = arith.truncf %41 : vector<1024x128xf32> to vector<1024x128xbf16>
    %c1 = arith.constant 1 : index
    %c0_9 = arith.constant 0 : index
    %c0_10 = arith.constant 0 : index
    %43 = vector.load %arg3[%c1, %c0_9, %c0_10] : memref<5x128x128xbf16, #tpu.memory_space<vmem>>, vector<1x128x128xbf16>
    %44 = vector.shape_cast %43 : vector<1x128x128xbf16> to vector<128x128xbf16>
    %cst_11 = arith.constant dense<0.000000e+00> : vector<1024x128xf32>
    %45 = tpu.matmul %42, %44, %cst_11 {dimension_numbers = #tpu.dot_dimension_numbers<[1], [0], [0], [1], [0, 0, 1, 1], [], []>} : vector<1024x128xbf16>, vector<128x128xbf16>, vector<1024x128xf32> -> vector<1024x128xf32>
    %46 = vector.broadcast %6 : vector<1x128xf32> to vector<1024x128xf32>
    %47 = arith.addf %45, %46 : vector<1024x128xf32>
    %cst_12 = arith.constant 0.000000e+00 : f32
    %48 = vector.broadcast %cst_12 : f32 to vector<1024x128xf32>
    %49 = arith.maximumf %47, %48 : vector<1024x128xf32>
    %50 = arith.truncf %49 : vector<1024x128xf32> to vector<1024x128xbf16>
    %c2 = arith.constant 2 : index
    %c0_13 = arith.constant 0 : index
    %c0_14 = arith.constant 0 : index
    %51 = vector.load %arg3[%c2, %c0_13, %c0_14] : memref<5x128x128xbf16, #tpu.memory_space<vmem>>, vector<1x128x128xbf16>
    %52 = vector.shape_cast %51 : vector<1x128x128xbf16> to vector<128x128xbf16>
    %cst_15 = arith.constant dense<0.000000e+00> : vector<1024x128xf32>
    %53 = tpu.matmul %50, %52, %cst_15 {dimension_numbers = #tpu.dot_dimension_numbers<[1], [0], [0], [1], [0, 0, 1, 1], [], []>} : vector<1024x128xbf16>, vector<128x128xbf16>, vector<1024x128xf32> -> vector<1024x128xf32>
    %54 = vector.broadcast %7 : vector<1x128xf32> to vector<1024x128xf32>
    %55 = arith.addf %53, %54 : vector<1024x128xf32>
    %cst_16 = arith.constant 0.000000e+00 : f32
    %56 = vector.broadcast %cst_16 : f32 to vector<1024x128xf32>
    %57 = arith.maximumf %55, %56 : vector<1024x128xf32>
    %58 = arith.addf %57, %41 : vector<1024x128xf32>
    %59 = arith.truncf %58 : vector<1024x128xf32> to vector<1024x128xbf16>
    %c3 = arith.constant 3 : index
    %c0_17 = arith.constant 0 : index
    %c0_18 = arith.constant 0 : index
    %60 = vector.load %arg3[%c3, %c0_17, %c0_18] : memref<5x128x128xbf16, #tpu.memory_space<vmem>>, vector<1x128x128xbf16>
    %61 = vector.shape_cast %60 : vector<1x128x128xbf16> to vector<128x128xbf16>
    %cst_19 = arith.constant dense<0.000000e+00> : vector<1024x128xf32>
    %62 = tpu.matmul %59, %61, %cst_19 {dimension_numbers = #tpu.dot_dimension_numbers<[1], [0], [0], [1], [0, 0, 1, 1], [], []>} : vector<1024x128xbf16>, vector<128x128xbf16>, vector<1024x128xf32> -> vector<1024x128xf32>
    %63 = vector.broadcast %8 : vector<1x128xf32> to vector<1024x128xf32>
    %64 = arith.addf %62, %63 : vector<1024x128xf32>
    %cst_20 = arith.constant 0.000000e+00 : f32
    %65 = vector.broadcast %cst_20 : f32 to vector<1024x128xf32>
    %66 = arith.maximumf %64, %65 : vector<1024x128xf32>
    %67 = arith.truncf %66 : vector<1024x128xf32> to vector<1024x128xbf16>
    %c4 = arith.constant 4 : index
    %c0_21 = arith.constant 0 : index
    %c0_22 = arith.constant 0 : index
    %68 = vector.load %arg3[%c4, %c0_21, %c0_22] : memref<5x128x128xbf16, #tpu.memory_space<vmem>>, vector<1x128x128xbf16>
    %69 = vector.shape_cast %68 : vector<1x128x128xbf16> to vector<128x128xbf16>
    %cst_23 = arith.constant dense<0.000000e+00> : vector<1024x128xf32>
    %70 = tpu.matmul %67, %69, %cst_23 {dimension_numbers = #tpu.dot_dimension_numbers<[1], [0], [0], [1], [0, 0, 1, 1], [], []>} : vector<1024x128xbf16>, vector<128x128xbf16>, vector<1024x128xf32> -> vector<1024x128xf32>
    %71 = vector.broadcast %9 : vector<1x128xf32> to vector<1024x128xf32>
    %72 = arith.addf %70, %71 : vector<1024x128xf32>
    %cst_24 = arith.constant 0.000000e+00 : f32
    %73 = vector.broadcast %cst_24 : f32 to vector<1024x128xf32>
    %74 = arith.maximumf %72, %73 : vector<1024x128xf32>
    %75 = arith.addf %74, %58 : vector<1024x128xf32>
    %76 = arith.truncf %75 : vector<1024x128xf32> to vector<1024x128xbf16>
    %c0_25 = arith.constant 0 : index
    %c0_26 = arith.constant 0 : index
    %77 = vector.load %arg4[%c0_25, %c0_26] : memref<128x1xbf16, #tpu.memory_space<vmem>>, vector<128x1xbf16>
    %cst_27 = arith.constant dense<0.000000e+00> : vector<1024x1xf32>
    %78 = tpu.matmul %76, %77, %cst_27 {dimension_numbers = #tpu.dot_dimension_numbers<[1], [0], [0], [1], [0, 0, 1, 1], [], []>} : vector<1024x128xbf16>, vector<128x1xbf16>, vector<1024x1xf32> -> vector<1024x1xf32>
    %c0_28 = arith.constant 0 : index
    %c0_29 = arith.constant 0 : index
    %79 = vector.load %arg5[%c0_28, %c0_29] : memref<1024x1xf32, #tpu.memory_space<vmem>>, vector<1024x1xf32>
    tpu.vector_store %arg5[%c0_28, %c0_29], %78 {strides = array<i32>} : memref<1024x1xf32, #tpu.memory_space<vmem>>, vector<1024x1xf32>,
    return
  }
  func.func @transform_0(%arg0: i32) -> (i32, i32) {
    %c0_i32 = arith.constant 0 : i32
    %c0_i32_0 = arith.constant 0 : i32
    return %arg0, %c0_i32 : i32, i32
  }
  func.func @transform_1(%arg0: i32) -> (i32, i32) {
    %c0_i32 = arith.constant 0 : i32
    %c0_i32_0 = arith.constant 0 : i32
    %c0_i32_1 = arith.constant 0 : i32
    return %c0_i32, %c0_i32_0 : i32, i32
  }
  func.func @transform_2(%arg0: i32) -> (i32, i32, i32) {
    %c0_i32 = arith.constant 0 : i32
    %c0_i32_0 = arith.constant 0 : i32
    %c0_i32_1 = arith.constant 0 : i32
    %c0_i32_2 = arith.constant 0 : i32
    return %c0_i32, %c0_i32_0, %c0_i32_1 : i32, i32, i32
  }
  func.func @transform_3(%arg0: i32) -> (i32, i32) {
    %c0_i32 = arith.constant 0 : i32
    %c0_i32_0 = arith.constant 0 : i32
    %c0_i32_1 = arith.constant 0 : i32
    return %c0_i32, %c0_i32_0 : i32, i32
  }
  func.func @transform_4(%arg0: i32) -> (i32, i32) {
    %c0_i32 = arith.constant 0 : i32
    %c0_i32_0 = arith.constant 0 : i32
    return %arg0, %c0_i32 : i32, i32
  }
}

</mosaic_0001>

<bundles_post_ra>
// kernel: tpu_custom_call.1
= control target key start
LH: loop header
LB: loop body
LE: loop exit
PB: predicated region body
PF: predicated region fallthrough
CT: control target
= control target key end

     0   :  { %s6870_s15 = smov 0   ;;  %s11553_s0 = inlined_call_operand.vmem [shape: f32[4096,2], index: 0, kind: input, shape index: {}]   ;;  %s11554_s1 = inlined_call_operand.vmem [shape: f32[8,128], index: 1, kind: input, shape index: {}]   ;;  %s11555_s2 = inlined_call_operand.vmem [shape: bf16[5,128,128], index: 2, kind: input, shape index: {}]   ;;  %s11556_s3 = inlined_call_operand.vmem [shape: bf16[128,1], index: 3, kind: input, shape index: {}]   ;;  %s11557_s4 = inlined_call_operand.vmem [shape: f32[4096,1], index: 4, kind: output, shape index: {}]  }
   0x1 LB: > { %s6345_s16 = sadd.s32 4294967295, %s6841_s15   ;;  %p6349_p0 = scmp.ge.s32.totalorder %s6841_s15, 1  ;;  %s6841_s15 = sphi %s6870_s15, %s14_s15  }
   0x2   : > { %p163_p1 = scmp.lt.s32.totalorder %s6841_s15, 5 }
   0x4   : > { %p164_p2 = pnand %p6349_p0, %p163_p1 }
   0x6   : > { %167 = sbr.rel (%p164_p2) target bundleno = 2373 (0x945), region = 36 }
   0xb   : > { %s6350_s17 = sshll.u32 %s6345_s16, 7  ;;  %v11558_v0 = vmov 1   ;;  %v11560_v1 = vmov 0   ;;  %v6619_v15 = vld [vmem:[%s11555_s2 + $0x38] sm:$0xff]  ;;  %v6618_v18 = vld [vmem:[%s11555_s2 + $0x30] sm:$0xff]  ;;  %v6617_v19 = vld [vmem:[%s11555_s2 + $0x28] sm:$0xff] }
   0xc   : > { %6687 = vset.pattern.permute.xlu1 %v11558_v0  ;;  %6688 = vset.pattern.permute.xlu2 %v11560_v1  ;;  %p190_p3 = scmp.lt.s32.totalorder %s6350_s17, 511  ;;  %v6616_v21 = vld [vmem:[%s11555_s2 + $0x20] sm:$0xff]  ;;  %v6615_v24 = vld [vmem:[%s11555_s2 + $0x18] sm:$0xff]  ;;  %v6614_v25 = vld [vmem:[%s11555_s2 + $0x10] sm:$0xff]  ;;  %vm6160_vm2 = vcmask 7168  }
   0xd   : > { %6686 = vset.pattern.permute.xlu0 %v11560_v1  ;;  %6660 = vmatpush.bf16.msra.mxu2 %v6619_v15  ;;  %v6613_v29 = vld [vmem:[%s11555_s2 + $0x8] sm:$0xff]  ;;  %v6612_v30 = vld [vmem:[%s11555_s2] sm:$0xff] }
   0xe   : > { %s12258_s17 = smov (!%p190_p3, %s6350_s17), 511  ;;  %2514 = vmatpush.bf16.msra.mxu0 %v6619_v15  ;;  %v6968_v36 = vld [vmem:[%s11554_s1] sm:$0xff] }
   0xf   : > { %s6351_s18 = sshll.u32 %s12258_s17, 3  ;;  %v6973_v37 = vperm.slane %v6968_v36, 0  ;;  %v6983_v42 = vperm.slane %v6968_v36, 2  ;;  %v6992_v45 = vperm.slane %v6968_v36, 1 }
  0x10   : > { %s6889_s21 = scalar_lea.vmem %s11553_s0, %s6351_s18  ;;  %s10504_s12 = scalar_lea.vmem %s11557_s4, %s6351_s18 }
  0x11   : > { %v267_v2 = vld [vmem:[%s6889_s21 + $0x210] sm:$0xff]  ;;  %v265_v3 = vld [vmem:[%s6889_s21 + $0x200] sm:$0xff]  ;;  %v268_v4 = vld [vmem:[%s6889_s21 + $0x218] sm:$0xff]  ;;  %6661 = vmatpush.bf16.msra.mxu2 %v6618_v18 }
  0x12   : > { %662 = vperm.xlu2 %6688, %v267_v2   ;;  %1227 = vperm.xlu1 %6687, %v265_v3   ;;  %v266_v5 = vld [vmem:[%s6889_s21 + $0x208] sm:$0xff]  ;;  %v269_v6 = vld [vmem:[%s6889_s21 + $0x220] sm:$0xff]  ;;  %v271_v8 = vld [vmem:[%s6889_s21 + $0x230] sm:$0xff] }
  0x13   : > { %652 = vperm.xlu0 %6686, %v265_v3   ;;  %v270_v7 = vld [vmem:[%s6889_s21 + $0x228] sm:$0xff]  ;;  %v272_v9 = vld [vmem:[%s6889_s21 + $0x238] sm:$0xff]  ;;  %v273_v10 = vld [vmem:[%s6889_s21 + $0x240] sm:$0xff]  ;;  %2515 = vmatpush.bf16.msra.mxu0 %v6618_v18 }
  0x14   : > { %v274_v11 = vld [vmem:[%s6889_s21 + $0x248] sm:$0xff]  ;;  %v275_v12 = vld [vmem:[%s6889_s21 + $0x250] sm:$0xff]  ;;  %v276_v13 = vld [vmem:[%s6889_s21 + $0x258] sm:$0xff] }
  0x15   : > { %v278_v14 = vld [vmem:[%s6889_s21 + $0x268] sm:$0xff]  ;;  %v277_v16 = vld [vmem:[%s6889_s21 + $0x260] sm:$0xff]  ;;  %v279_v17 = vld [vmem:[%s6889_s21 + $0x270] sm:$0xff]  ;;  %6662 = vmatpush.bf16.msra.mxu2 %v6617_v19 }
  0x16   : > { %v282_v20 = vld [vmem:[%s6889_s21 + $0x288] sm:$0xff]  ;;  %v280_v22 = vld [vmem:[%s6889_s21 + $0x278] sm:$0xff]  ;;  %v283_v23 = vld [vmem:[%s6889_s21 + $0x290] sm:$0xff] }
  0x17   : > { %2516 = vmatpush.bf16.msra.mxu0 %v6617_v19  ;;  %v281_v27 = vld [vmem:[%s6889_s21 + $0x280] sm:$0xff]  ;;  %v286_v28 = vld [vmem:[%s6889_s21 + $0x2a8] sm:$0xff]  ;;  %v287_v32 = vld [vmem:[%s6889_s21 + $0x2b0] sm:$0xff] }
  0x18   : > { %v284_v34 = vld [vmem:[%s6889_s21 + $0x298] sm:$0xff]  ;;  %v6962_v35 = vld [vmem:[%s6889_s21 + $0x2d0] sm:$0xff]  ;;  %v285_v41 = vld [vmem:[%s6889_s21 + $0x2a0] sm:$0xff] }
  0x19   : > { %6663 = vmatpush.bf16.msra.mxu2 %v6616_v21  ;;  %v6989_v44 = vld [vmem:[%s6889_s21 + $0x2c8] sm:$0xff]  ;;  %v7011_v55 = vld [vmem:[%s6889_s21 + $0x2f8] sm:$0xff] }
  0x1a   : > { %667 = vperm.xlu2 %6688, %v268_v4   ;;  %1231 = vperm.xlu1 %6687, %v266_v5   ;;  %v288_v3 = vld [vmem:[%s6889_s21 + $0x2b8] sm:$0xff] }
  0x1b   : > { %657 = vperm.xlu0 %6686, %v266_v5   ;;  %2517 = vmatpush.bf16.msra.mxu0 %v6616_v21 }
  0x1d   : > { %6664 = vmatpush.bf16.msra.mxu2 %v6615_v24 }
  0x1f   : > { %2518 = vmatpush.bf16.msra.mxu0 %v6615_v24 }
  0x21   : > { %6665 = vmatpush.bf16.msra.mxu2 %v6614_v25 }
  0x22   : > { %672 = vperm.xlu2 %6688, %v269_v6   ;;  %1239 = vperm.xlu1 %6687, %v268_v4   ;;  %v7028_v4 = vld [vmem:[%s6889_s21 + $0x318] sm:$0xff] }
  0x23   : > { %6689 = vset.pattern.permute.xlu0 %v11558_v0  ;;  %2519 = vmatpush.bf16.msra.mxu0 %v6614_v25  ;;  %v308_v25 = vld [vmem:[%s6889_s21 + $0x358] sm:$0xff] }
  0x24   : > { %1235 = vperm.xlu0 %6689, %v267_v2  }
  0x25   : > { %6666 = vmatpush.bf16.msra.mxu2 %v6613_v29 }
  0x27   : > { %2520 = vmatpush.bf16.msra.mxu0 %v6613_v29 }
  0x29   : > { %6667 = vmatpush.bf16.msra.mxu2 %v6612_v30 }
  0x2a   : > { %6691 = vset.pattern.permute.xlu2 %v11558_v0  ;;  %6690 = vset.pattern.permute.xlu1 %v11560_v1 }
  0x2b   : > { %1243 = vperm.xlu2 %6691, %v269_v6   ;;  %677 = vperm.xlu1 %6690, %v270_v7  }
  0x2c   : > { %1247 = vperm.xlu0 %6689, %v270_v7   ;;  %2521 = vmatpush.bf16.msra.mxu0 %v6612_v30 }
  0x33   : > { %6692 = vset.pattern.permute.xlu2 %v11560_v1  ;;  %682 = vperm.xlu1 %6690, %v271_v8  }
  0x34   : > { %1251 = vperm.xlu0 %6689, %v271_v8   ;;  %687 = vperm.xlu2 %6692, %v272_v9  }
  0x3b   : > { %6693 = vset.pattern.permute.xlu1 %v11558_v0 }
  0x3c   : > { %692 = vperm.xlu2 %6692, %v273_v10   ;;  %1255 = vperm.xlu1 %6693, %v272_v9  }
  0x3d   : > { %6694 = vset.pattern.permute.xlu0 %v11560_v1 }
  0x3e   : > { %697 = vperm.xlu0 %6694, %v274_v11  }
  0x44   : > { %6695 = vset.pattern.permute.xlu2 %v11558_v0  ;;  %1259 = vperm.xlu1 %6693, %v273_v10  }
  0x45   : > { %1263 = vperm.xlu2 %6695, %v274_v11  }
  0x46   : > { %6698 = vset.pattern.permute.xlu0 %v11558_v0 }
  0x47   : > { %1267 = vperm.xlu0 %6698, %v275_v12  }
  0x4c   : > { %6696 = vset.pattern.permute.xlu1 %v11560_v1 }
  0x4d   : > { %6697 = vset.pattern.permute.xlu2 %v11560_v1  ;;  %702 = vperm.xlu1 %6696, %v275_v12  }
  0x4e   : > { %707 = vperm.xlu2 %6697, %v276_v13  }
  0x4f   : > { %1279 = vperm.xlu0 %6698, %v278_v14  }
  0x55   : > { %6699 = vset.pattern.permute.xlu1 %v11558_v0 }
  0x56   : > { %712 = vperm.xlu2 %6697, %v277_v16   ;;  %1271 = vperm.xlu1 %6699, %v276_v13   ;;  %v289_v13 = vld [vmem:[%s6889_s21 + $0x2c0] sm:$0xff] }
  0x57   : > { %1283 = vperm.xlu0 %6698, %v279_v17  }
  0x5e   : > { %6701 = vset.pattern.permute.xlu2 %v11558_v0  ;;  %6700 = vset.pattern.permute.xlu1 %v11560_v1 }
  0x5f   : > { %1275 = vperm.xlu2 %6701, %v277_v16   ;;  %717 = vperm.xlu1 %6700, %v278_v14   ;;  %v7044_v16 = vld [vmem:[%s6889_s21 + $0x338] sm:$0xff] }
  0x60   : > { %6704 = vset.pattern.permute.xlu0 %v11560_v1 }
  0x61   : > { %737 = vperm.xlu0 %6704, %v282_v20  }
  0x67   : > { %6702 = vset.pattern.permute.xlu2 %v11560_v1  ;;  %722 = vperm.xlu1 %6700, %v279_v17  }
  0x68   : > { %727 = vperm.xlu2 %6702, %v280_v22  }
  0x69   : > { %6708 = vset.pattern.permute.xlu0 %v11558_v0 }
  0x6a   : > { %1299 = vperm.xlu0 %6708, %v283_v23  }
  0x6c   : > { %v6943_v26 = vpop.permute.xlu2 %662 }
  0x6d   : > { %v1809_v63 = vmul.f32 %v6973_v37, %v6943_v26 }
  0x6f   : > { %6703 = vset.pattern.permute.xlu1 %v11558_v0  ;;  %v1938_v7 = vadd.f32 %v6983_v42, %v1809_v63 }
  0x70   : > { %732 = vperm.xlu2 %6702, %v281_v27   ;;  %1287 = vperm.xlu1 %6703, %v280_v22  }
  0x72   : > { %1311 = vperm.xlu0 %6708, %v286_v28  }
  0x74   : > { %v6954_v31 = vpop.permute.xlu2 %667 }
  0x75   : > { %v1810_v2 = vmul.f32 %v6973_v37, %v6954_v31 }
  0x77   : > { %v1939_v8 = vadd.f32 %v6983_v42, %v1810_v2 }
  0x78   : > { %6705 = vset.pattern.permute.xlu2 %v11558_v0  ;;  %1291 = vperm.xlu1 %6703, %v281_v27  }
  0x79   : > { %1295 = vperm.xlu2 %6705, %v282_v20  }
  0x7a   : > { %1315 = vperm.xlu0 %6708, %v287_v32  }
  0x7c   : > { %v6958_v33 = vpop.permute.xlu2 %672 }
  0x7d   : > { %v1811_v21 = vmul.f32 %v6973_v37, %v6958_v33 }
  0x7f   : > { %v1940_v27 = vadd.f32 %v6983_v42, %v1811_v21 }
  0x80   : > { %6706 = vset.pattern.permute.xlu1 %v11560_v1 }
  0x81   : > { %6707 = vset.pattern.permute.xlu2 %v11560_v1  ;;  %742 = vperm.xlu1 %6706, %v283_v23  }
  0x82   : > { %747 = vperm.xlu2 %6707, %v284_v34   ;;  %1331 = vperm.xlu0 %6708, %v6962_v35  }
  0x84   : > { %v6975_v38 = vpop.permute.xlu1 %1227 }
  0x85   : > { %v6977_v39 = vpop.permute.xlu0 %652  ;;  %v6979_v40 = vpop.permute.xlu2 %1243  ;;  %v2065_v49 = vmul.f32 %v6992_v45, %v6975_v38 }
  0x86   : > { %v1807_v43 = vmul.f32 %v6973_v37, %v6977_v39 }
  0x88   : > { %v1936_v46 = vadd.f32 %v6983_v42, %v1807_v43 }
  0x89   : > { %6709 = vset.pattern.permute.xlu1 %v11558_v0 }
  0x8a   : > { %752 = vperm.xlu2 %6707, %v285_v41   ;;  %1303 = vperm.xlu1 %6709, %v284_v34   ;;  %v2193_v54 = vadd.f32 %v2065_v49, %v1936_v46  ;;  %v292_v46 = vld [vmem:[%s6889_s21 + $0x2d8] sm:$0xff] }
  0x8b   : > { %6717 = vset.pattern.permute.xlu0 %v11560_v1 }
  0x8c   : > { %v6996_v47 = vpop.permute.xlu1 %1231  ;;  %777 = vperm.xlu0 %6717, %v6989_v44   ;;  %v2321_v58 = vmax.f32 %v2193_v54, 0.0 }
  0x8d   : > { %v6999_v48 = vpop.permute.xlu0 %657  ;;  %v2066_v52 = vmul.f32 %v6992_v45, %v6996_v47 }
  0x8e   : > { %v1808_v50 = vmul.f32 %v6973_v37, %v6999_v48  ;;  %v7005_v51 = vpop.permute.xlu2 %687 }
  0x90   : > { %v1937_v53 = vadd.f32 %v6983_v42, %v1808_v50  ;;  %v294_v50 = vld [vmem:[%s6889_s21 + $0x2e8] sm:$0xff] }
  0x92   : > { %6711 = vset.pattern.permute.xlu2 %v11558_v0  ;;  %6710 = vset.pattern.permute.xlu1 %v11560_v1  ;;  %v2194_v56 = vadd.f32 %v2066_v52, %v1937_v53 }
  0x93   : > { %1307 = vperm.xlu2 %6711, %v285_v41   ;;  %757 = vperm.xlu1 %6710, %v286_v28   ;;  %v2069_v28 = vmul.f32 %v6992_v45, %v6979_v40 }
  0x94   : > { %v7015_v57 = vpop.permute.xlu1 %1239  ;;  %v2322_v59 = vmax.f32 %v2194_v56, 0.0  ;;  %807 = vperm.xlu0 %6717, %v7011_v55  }
  0x95   : > { %v2068_v5 = vmul.f32 %v6992_v45, %v7015_v57  ;;  %v2197_v34 = vadd.f32 %v2069_v28, %v1940_v27 }
  0x96   : > { %v2417_v60 = vpack.c.bf16 %v2322_v59, %v2321_v58  ;;  %v7018_v61 = vpop.permute.xlu2 %692  ;;  %v7020_v62 = vpop.permute.xlu0 %1235 }
  0x97   : > { %v2067_v6 = vmul.f32 %v6992_v45, %v7020_v62  ;;  %v2196_v11 = vadd.f32 %v2068_v5, %v1939_v8  ;;  %v2325_v49 = vmax.f32 %v2197_v34, 0.0  ;;  %v202_v34 = vld [vmem:[%s6889_s21 + $0x8] sm:$0xff] }
  0x98   : > { %2682 = vmatmul.bf16.vlgmr.msra.gmra.mxu2 %v2417_v60  ;;  %v293_v60 = vld [vmem:[%s6889_s21 + $0x2e0] sm:$0xff] }
  0x99   : > { %v2195_v10 = vadd.f32 %v2067_v6, %v1938_v7  ;;  %v2324_v15 = vmax.f32 %v2196_v11, 0.0 }
  0x9b   : > { %6712 = vset.pattern.permute.xlu2 %v11560_v1  ;;  %762 = vperm.xlu1 %6710, %v287_v32   ;;  %v2323_v14 = vmax.f32 %v2195_v10, 0.0 }
  0x9c   : > { %767 = vperm.xlu2 %6712, %v288_v3   ;;  %827 = vperm.xlu0 %6717, %v7028_v4  }
  0x9d   : > { %v7038_v9 = vpop.permute.xlu1 %677  ;;  %v2418_v20 = vpack.c.bf16 %v2324_v15, %v2323_v14 }
  0x9e   : > { %v7047_v17 = vpop.permute.xlu0 %1247  ;;  %v1812_v19 = vmul.f32 %v6973_v37, %v7038_v9 }
  0x9f   : > { %v7040_v12 = vpop.permute.xlu2 %1263  ;;  %v2070_v24 = vmul.f32 %v6992_v45, %v7047_v17 }
  0xa0   : > { %v1941_v23 = vadd.f32 %v6983_v42, %v1812_v19 }
  0xa2   : > { %v2198_v30 = vadd.f32 %v2070_v24, %v1941_v23  ;;  %v203_v23 = vld [vmem:[%s6889_s21 + $0x10] sm:$0xff]  ;;  %v2074_v24 = vmul.f32 %v6992_v45, %v7040_v12 }
  0xa3   : > { %6713 = vset.pattern.permute.xlu1 %v11558_v0 }
  0xa4   : > { %772 = vperm.xlu2 %6712, %v289_v13   ;;  %1319 = vperm.xlu1 %6713, %v288_v3   ;;  %v2326_v43 = vmax.f32 %v2198_v30, 0.0  ;;  %v201_v3 = vld [vmem:[%s6889_s21] sm:$0xff] }
  0xa5   : > { %v7049_v18 = vpop.permute.xlu1 %682  ;;  %847 = vperm.xlu0 %6717, %v7044_v16  }
  0xa6   : > { %v7069_v32 = vpop.permute.xlu0 %1251  ;;  %v2419_v53 = vpack.c.bf16 %v2326_v43, %v2325_v49  ;;  %v1813_v56 = vmul.f32 %v6973_v37, %v7049_v18 }
  0xa7   : > { %v2071_v2 = vmul.f32 %v6992_v45, %v7069_v32 }
  0xa8   : > { %2687 = vmatmul.bf16.gmra.mxu2 %v2418_v20  ;;  %v7056_v22 = vpop.permute.xlu2 %707  ;;  %v1942_v63 = vadd.f32 %v6983_v42, %v1813_v56  ;;  %v1815_v20 = vmul.f32 %v6973_v37, %v7018_v61 }
  0xa9   : > { %11754 = vst [vmem:[#allocation2_spill] sm:$0xff] %v7056_v22 }
  0xaa   : > { %v2199_v8 = vadd.f32 %v2071_v2, %v1942_v63  ;;  %v1944_v30 = vadd.f32 %v6983_v42, %v1815_v20 }
  0xac   : > { %6714 = vset.pattern.permute.xlu2 %v11558_v0  ;;  %1323 = vperm.xlu1 %6713, %v289_v13   ;;  %v2327_v13 = vmax.f32 %v2199_v8, 0.0 }
  0xad   : > { %1327 = vperm.xlu2 %6714, %v6989_v44   ;;  %867 = vperm.xlu0 %6717, %v308_v25   ;;  %v1814_v44 = vmul.f32 %v6973_v37, %v7005_v51 }
  0xae   : > { %v7067_v29 = vpop.permute.xlu1 %1255 }
  0xaf   : > { %v1943_v58 = vadd.f32 %v6983_v42, %v1814_v44 }
  0xb0   : > { %v7071_v41 = vpop.permute.xlu2 %712  ;;  %v7083_v54 = vpop.permute.xlu0 %697 }
  0xb1   : > { %11755 = vst [vmem:[#allocation3_spill] sm:$0xff] %v7071_v41  ;;  %v1816_v14 = vmul.f32 %v6973_v37, %v7083_v54 }
  0xb3   : > { %v1945_v25 = vadd.f32 %v6983_v42, %v1816_v14 }
  0xb4   : > { %6715 = vset.pattern.permute.xlu1 %v11560_v1 }
  0xb5   : > { %6716 = vset.pattern.permute.xlu2 %v11560_v1  ;;  %782 = vperm.xlu1 %6715, %v6962_v35   ;;  %v2072_v35 = vmul.f32 %v6992_v45, %v7067_v29 }
  0xb6   : > { %787 = vperm.xlu2 %6716, %v292_v46   ;;  %v7080_v52 = vpop.permute.xlu1 %1259  ;;  %6747 = vset.pattern.permute.xlu0 %v11558_v0 }
  0xb7   : > { %1343 = vperm.xlu0 %6747, %v294_v50   ;;  %v2200_v5 = vadd.f32 %v2072_v35, %v1943_v58  ;;  %v2073_v27 = vmul.f32 %v6992_v45, %v7080_v52  ;;  %v295_v58 = vld [vmem:[%s6889_s21 + $0x2f0] sm:$0xff]  ;;  %v1818_v35 = vmul.f32 %v6973_v37, %v7056_v22  ;;  %v7315_v22 = vld [vmem:[%s6889_s21 + $0x348] sm:$0xff] }
  0xb8   : > { %2692 = vmatmul.bf16.gmra.mxu2 %v2419_v53 }
  0xb9   : > { %v7090_v59 = vpop.permute.xlu2 %1275  ;;  %v7098_v6 = vpop.permute.xlu0 %1267  ;;  %v2328_v10 = vmax.f32 %v2200_v5, 0.0  ;;  %v2201_v43 = vadd.f32 %v2073_v27, %v1944_v30  ;;  %v1947_v5 = vadd.f32 %v6983_v42, %v1818_v35  ;;  %v204_v35 = vld [vmem:[%s6889_s21 + $0x18] sm:$0xff] }
  0xba   : > { %11756 = vst [vmem:[#allocation4_spill] sm:$0xff] %v7090_v59 }
  0xbb   : > { %v2420_v15 = vpack.c.bf16 %v2328_v10, %v2327_v13  ;;  %v2329_v44 = vmax.f32 %v2201_v43, 0.0  ;;  %v7145_v10 = vld [vmem:[%s6889_s21 + $0x308] sm:$0xff]  ;;  %v2075_v13 = vmul.f32 %v6992_v45, %v7098_v6 }
  0xbd   : > { %6718 = vset.pattern.permute.xlu1 %v11558_v0 }
  0xbe   : > { %792 = vperm.xlu2 %6716, %v293_v60   ;;  %1335 = vperm.xlu1 %6718, %v292_v46   ;;  %v2202_v46 = vadd.f32 %v2074_v24, %v1945_v25  ;;  %v7155_v25 = vld [vmem:[%s6889_s21 + $0x20] sm:$0xff] }
  0xbf   : > { %v7100_v7 = vpop.permute.xlu1 %702  ;;  %971 = vperm.xlu0 %6747, %v201_v3  }
  0xc0   : > { %11757 = vst [vmem:[#allocation5_spill] sm:$0xff] %v7100_v7  ;;  %v2330_v53 = vmax.f32 %v2202_v46, 0.0  ;;  %v1817_v63 = vmul.f32 %v6973_v37, %v7100_v7 }
  0xc1   : > { %v7108_v19 = vpop.permute.xlu0 %1279 }
  0xc2   : > { %v7102_v11 = vpop.permute.xlu2 %727  ;;  %11759 = vst [vmem:[#allocation7_spill] sm:$0xff] %v7108_v19  ;;  %v1946_v14 = vadd.f32 %v6983_v42, %v1817_v63 }
  0xc3   : > { %11758 = vst [vmem:[#allocation6_spill] sm:$0xff] %v7102_v11 }
  0xc4   : > { %v2203_v24 = vadd.f32 %v2075_v13, %v1946_v14  ;;  %v2077_v13 = vmul.f32 %v6992_v45, %v7090_v59  ;;  %v208_v59 = vld [vmem:[%s6889_s21 + $0x38] sm:$0xff] }
  0xc6   : > { %6720 = vset.pattern.permute.xlu2 %v11558_v0  ;;  %6719 = vset.pattern.permute.xlu1 %v11560_v1  ;;  %v2331_v43 = vmax.f32 %v2203_v24, 0.0 }
  0xc7   : > { %1339 = vperm.xlu2 %6720, %v293_v60   ;;  %797 = vperm.xlu1 %6719, %v294_v50   ;;  %v2421_v60 = vpack.c.bf16 %v2330_v53, %v2329_v44 }
  0xc8   : > { %2697 = vmatmul.bf16.gmra.mxu2 %v2420_v15  ;;  %v7112_v21 = vpop.permute.xlu1 %1271  ;;  %979 = vperm.xlu0 %6747, %v203_v23  }
  0xc9   : > { %v7127_v50 = vpop.permute.xlu0 %1283  ;;  %v2076_v8 = vmul.f32 %v6992_v45, %v7112_v21 }
  0xca   : > { %v7120_v28 = vpop.permute.xlu2 %732  ;;  %11762 = vst [vmem:[#allocation10_spill] sm:$0xff] %v7127_v50 }
  0xcb   : > { %11760 = vst [vmem:[#allocation8_spill] sm:$0xff] %v7120_v28  ;;  %v2204_v20 = vadd.f32 %v2076_v8, %v1947_v5  ;;  %v6627_v5 = vld [vmem:[%s11555_s2 + $0x78] sm:$0xff] }
  0xcc   : > { %6668 = vmatpush.bf16.msra.mxu3 %v6627_v5  ;;  %3229 = vmatpush.bf16.msra.mxu1 %v6627_v5 }
  0xcd   : > { %v2332_v30 = vmax.f32 %v2204_v20, 0.0 }
  0xcf   : > { %6721 = vset.pattern.permute.xlu2 %v11560_v1  ;;  %332 = vperm.xlu1 %6719, %v201_v3   ;;  %v2422_v53 = vpack.c.bf16 %v2332_v30, %v2331_v43  ;;  %v6626_v30 = vld [vmem:[%s11555_s2 + $0x70] sm:$0xff] }
  0xd0   : > { %337 = vperm.xlu2 %6721, %v202_v34   ;;  %1359 = vperm.xlu0 %6747, %v7145_v10  }
  0xd1   : > { %v7125_v49 = vpop.permute.xlu1 %717  ;;  %6669 = vmatpush.bf16.msra.mxu3 %v6626_v30  ;;  %3230 = vmatpush.bf16.msra.mxu1 %v6626_v30  ;;  %v6624_v30 = vld [vmem:[%s11555_s2 + $0x60] sm:$0xff] }
  0xd2   : > { %11761 = vst [vmem:[#allocation9_spill] sm:$0xff] %v7125_v49  ;;  %v1820_v44 = vmul.f32 %v6973_v37, %v7125_v49 }
  0xd3   : > { %v7129_v56 = vpop.permute.xlu2 %1295  ;;  %v7139_v3 = vpop.permute.xlu0 %737 }
  0xd4   : > { %11763 = vst [vmem:[#allocation11_spill] sm:$0xff] %v7129_v56 }
  0xd5   : > { %11765 = vst [vmem:[#allocation13_spill] sm:$0xff] %v7139_v3 }
  0xd7   : > { %6722 = vset.pattern.permute.xlu1 %v11558_v0 }
  0xd8   : > { %2702 = vmatmul.bf16.gmra.mxu2 %v2421_v60  ;;  %802 = vperm.xlu2 %6721, %v295_v58   ;;  %v1949_v60 = vadd.f32 %v6983_v42, %v1820_v44  ;;  %v6625_v44 = vld [vmem:[%s11555_s2 + $0x68] sm:$0xff] }
  0xd9   : > { %975 = vperm.xlu1 %6722, %v202_v34   ;;  %v7137_v2 = vpop.permute.xlu1 %722  ;;  %987 = vperm.xlu0 %6747, %v7155_v25  }
  0xda   : > { %11764 = vst [vmem:[#allocation12_spill] sm:$0xff] %v7137_v2  ;;  %6670 = vmatpush.bf16.msra.mxu3 %v6625_v44  ;;  %3231 = vmatpush.bf16.msra.mxu1 %v6625_v44 }
  0xdc   : > { %v7151_v15 = vpop.permute.xlu2 %747  ;;  %v7160_v34 = vpop.permute.xlu0 %1299 }
  0xdd   : > { %11766 = vst [vmem:[#allocation14_spill] sm:$0xff] %v7151_v15 }
  0xde   : > { %11768 = vst [vmem:[#allocation16_spill] sm:$0xff] %v7160_v34  ;;  %6671 = vmatpush.bf16.msra.mxu3 %v6624_v30  ;;  %3232 = vmatpush.bf16.msra.mxu1 %v6624_v30  ;;  %v7226_v30 = vld [vmem:[%s6889_s21 + $0x30] sm:$0xff] }
  0xe0   : > { %6723 = vset.pattern.permute.xlu2 %v11558_v0 }
  0xe1   : > { %1347 = vperm.xlu1 %6722, %v295_v58   ;;  %1351 = vperm.xlu2 %6723, %v7011_v55   ;;  %v1819_v58 = vmul.f32 %v6973_v37, %v7071_v41  ;;  %v2078_v55 = vmul.f32 %v6992_v45, %v7108_v19 }
  0xe2   : > { %v7158_v27 = vpop.permute.xlu1 %1287  ;;  %995 = vperm.xlu0 %6747, %v7226_v30  }
  0xe3   : > { %11767 = vst [vmem:[#allocation15_spill] sm:$0xff] %v7158_v27  ;;  %v1948_v8 = vadd.f32 %v6983_v42, %v1819_v58  ;;  %v2206_v20 = vadd.f32 %v2078_v55, %v1949_v60  ;;  %v1822_v60 = vmul.f32 %v6973_v37, %v7102_v11  ;;  %v2080_v44 = vmul.f32 %v6992_v45, %v7158_v27  ;;  %v206_v11 = vld [vmem:[%s6889_s21 + $0x28] sm:$0xff]  ;;  %v299_v27 = vld [vmem:[%s6889_s21 + $0x310] sm:$0xff] }
  0xe4   : > { %v7163_v46 = vpop.permute.xlu2 %752  ;;  %v7183_v14 = vpop.permute.xlu0 %1311 }
  0xe5   : > { %11769 = vst [vmem:[#allocation17_spill] sm:$0xff] %v7163_v46  ;;  %v2205_v43 = vadd.f32 %v2077_v13, %v1948_v8 }
  0xe7   : > { %v2333_v55 = vmax.f32 %v2205_v43, 0.0  ;;  %v1951_v43 = vadd.f32 %v6983_v42, %v1822_v60 }
  0xe8   : > { %2707 = vmatmul.bf16.gmra.mxu2 %v2422_v53  ;;  %v2334_v53 = vmax.f32 %v2206_v20, 0.0  ;;  %v6635_v20 = vld [vmem:[%s11555_s2 + $0xb8] sm:$0xff] }
  0xe9   : > { %6724 = vset.pattern.permute.xlu1 %v11560_v1  ;;  %6725 = vset.pattern.permute.xlu2 %v11560_v1 }
  0xea   : > { %342 = vperm.xlu1 %6724, %v203_v23   ;;  %v7175_v63 = vpop.permute.xlu1 %1291  ;;  %347 = vperm.xlu2 %6725, %v204_v35   ;;  %v297_v23 = vld [vmem:[%s6889_s21 + $0x300] sm:$0xff]  ;;  %v2423_v5 = vpack.c.bf16 %v2334_v53, %v2333_v55  ;;  %v6623_v53 = vld [vmem:[%s11555_s2 + $0x58] sm:$0xff]  ;;  %v2079_v55 = vmul.f32 %v6992_v45, %v7127_v50 }
  0xeb   : > { %11770 = vst [vmem:[#allocation18_spill] sm:$0xff] %v7175_v63  ;;  %3816 = vmatpush.bf16.msrb.mxu2 %v6635_v20  ;;  %6672 = vmatpush.bf16.msra.mxu3 %v6623_v53  ;;  %v2208_v20 = vadd.f32 %v2080_v44, %v1951_v43  ;;  %v6621_v43 = vld [vmem:[%s11555_s2 + $0x48] sm:$0xff] }
  0xec   : > { %v7201_v13 = vpop.permute.xlu0 %1315  ;;  %3233 = vmatpush.bf16.msra.mxu1 %v6623_v53 }
  0xed   : > { %v7185_v24 = vpop.permute.xlu2 %1307 }
  0xf2   : > { %6726 = vset.pattern.permute.xlu1 %v11558_v0  ;;  %812 = vperm.xlu2 %6725, %v297_v23  }
  0xf3   : > { %983 = vperm.xlu1 %6726, %v204_v35   ;;  %v7195_v58 = vpop.permute.xlu1 %742  ;;  %v1821_v35 = vmul.f32 %v6973_v37, %v7137_v2  ;;  %v11775_v2 = vmov 0  }
  0xf4   : > { %11771 = vst [vmem:[#allocation19_spill] sm:$0xff] %v7195_v58 }
  0xf6   : > { %v7199_v8 = vpop.permute.xlu2 %767 }
  0xf7   : > { %11772 = vst [vmem:[#allocation20_spill] sm:$0xff] %v7199_v8 }
  0xf8   : > { %2712 = vmatmul.bf16.gmra.mxu2 %v2423_v5  ;;  %v1950_v5 = vadd.f32 %v6983_v42, %v1821_v35  ;;  %v7235_v35 = vpop.permute.xlu0 %1331 }
  0xfa   : > { %6728 = vset.pattern.permute.xlu2 %v11558_v0  ;;  %v6622_v0 = vld [vmem:[%s11555_s2 + $0x50] sm:$0xff] }
  0xfb   : > { %6727 = vset.pattern.permute.xlu1 %v11560_v1  ;;  %1355 = vperm.xlu2 %6728, %v297_v23   ;;  %v2207_v1 = vadd.f32 %v2079_v55, %v1950_v5  ;;  %v1824_v55 = vmul.f32 %v6973_v37, %v7139_v3 }
  0xfc   : > { %817 = vperm.xlu1 %6727, %v7145_v10   ;;  %v7223_v60 = vpop.permute.xlu1 %1303  ;;  %6673 = vmatpush.bf16.msra.mxu3 %v6622_v0  ;;  %v2336_v10 = vmax.f32 %v2208_v20, 0.0  ;;  %v6620_v20 = vld [vmem:[%s11555_s2 + $0x40] sm:$0xff] }
  0xfd   : > { %11773 = vst [vmem:[#allocation21_spill] sm:$0xff] %v7223_v60  ;;  %3234 = vmatpush.bf16.msra.mxu1 %v6622_v0  ;;  %v2335_v44 = vmax.f32 %v2207_v1, 0.0  ;;  %v2082_v1 = vmul.f32 %v6992_v45, %v7129_v56  ;;  %v1953_v50 = vadd.f32 %v6983_v42, %v1824_v55 }
  0xfe   : > { %v7229_v23 = vpop.permute.xlu2 %772 }
  0xff   : > { %11774 = vst [vmem:[#allocation22_spill] sm:$0xff] %v7229_v23  ;;  %v2424_v5 = vpack.c.bf16 %v2336_v10, %v2335_v44  ;;  %v2081_v10 = vmul.f32 %v6992_v45, %v7175_v63  ;;  %v2210_v56 = vadd.f32 %v2082_v1, %v1953_v50  ;;  %v1826_v50 = vmul.f32 %v6973_v37, %v7151_v15 }
 0x100   : > { %6674 = vmatpush.bf16.msra.mxu3 %v6621_v43  ;;  %v7262_v44 = vpop.permute.xlu0 %777 }
 0x101   : > { %3235 = vmatpush.bf16.msra.mxu1 %v6621_v43  ;;  %v7260_v43 = vld [vmem:[%s6889_s21 + $0x328] sm:$0xff]  ;;  %11778 = vst [vmem:[#allocation25_spill] sm:$0xff] %v7262_v44  ;;  %v2338_v49 = vmax.f32 %v2210_v56, 0.0  ;;  %v1482_v56 = vlaneseq }
 0x102   : > { %1375 = vperm.xlu0 %6747, %v7260_v43  }
 0x103   : > { %6729 = vset.pattern.permute.xlu2 %v11775_v2  ;;  %v7295_v15 = vand.u32 127, %v1482_v56 }
 0x104   : > { %352 = vperm.xlu1 %6727, %v7155_v25   ;;  %357 = vperm.xlu2 %6729, %v206_v11   ;;  %v1823_v25 = vmul.f32 %v6973_v37, %v7120_v28  ;;  %v11779_v28 = vmov 1  }
 0x105   : > { %v7242_v53 = vpop.permute.xlu1 %757  ;;  %6675 = vmatpush.bf16.msra.mxu3 %v6620_v20  ;;  %3236 = vmatpush.bf16.msra.mxu1 %v6620_v20  ;;  %v7272_v20 = vld [vmem:[%s6889_s21 + $0x40] sm:$0xff]  ;;  %vm1485_vm0 = vcmp.eq.s32.totalorder %v7295_v15, 1  ;;  %vm1484_vm1 = vcmp.eq.s32.totalorder %v7295_v15, 0 }
 0x106   : > { %11776 = vst [vmem:[#allocation23_spill] sm:$0xff] %v7242_v53 }
 0x107   : > { %v7246_v0 = vpop.permute.xlu2 %1327 }
 0x108   : > { %11777 = vst [vmem:[#allocation24_spill] sm:$0xff] %v7246_v0  ;;  %2717 = vmatmul.bf16.gmra.mxu2 %v2424_v5  ;;  %v1952_v5 = vadd.f32 %v6983_v42, %v1823_v25 }
 0x10a   : > { %v2209_v55 = vadd.f32 %v2081_v10, %v1952_v5  ;;  %1003 = vperm.xlu0 %6747, %v7272_v20   ;;  %v1825_v10 = vmul.f32 %v6973_v37, %v7195_v58 }
 0x10c   : > { %6730 = vset.pattern.permute.xlu1 %v11779_v28  ;;  %822 = vperm.xlu2 %6729, %v299_v27   ;;  %v2337_v63 = vmax.f32 %v2209_v55, 0.0  ;;  %v1955_v55 = vadd.f32 %v6983_v42, %v1826_v50 }
 0x10d   : > { %991 = vperm.xlu1 %6730, %v206_v11   ;;  %v7267_v3 = vpop.permute.xlu1 %762  ;;  %v7277_v11 = vpop.permute.xlu0 %807 }
 0x10e   : > { %11780 = vst [vmem:[#allocation26_spill] sm:$0xff] %v7267_v3  ;;  %v2425_v1 = vpack.c.bf16 %v2338_v49, %v2337_v63  ;;  %v2083_v49 = vmul.f32 %v6992_v45, %v7160_v34  ;;  %v1954_v63 = vadd.f32 %v6983_v42, %v1825_v10 }
 0x10f   : > { %11781 = vst [vmem:[#allocation27_spill] sm:$0xff] %v7277_v11 }
 0x110   : > { %v7269_v41 = vpop.permute.xlu2 %787 }
 0x114   : > { %6731 = vset.pattern.permute.xlu2 %v11779_v28 }
 0x115   : > { %1363 = vperm.xlu1 %6730, %v299_v27   ;;  %1367 = vperm.xlu2 %6731, %v7028_v4   ;;  %v2084_v4 = vmul.f32 %v6992_v45, %v7223_v60  ;;  %v7291_v27 = vld [vmem:[%s6889_s21 + $0x50] sm:$0xff]  ;;  %v7308_v58 = vpop.permute.xlu0 %827  ;;  %v2211_v60 = vadd.f32 %v2083_v49, %v1954_v63 }
 0x116   : > { %v7281_v25 = vpop.permute.xlu1 %1319  ;;  %1011 = vperm.xlu0 %6747, %v7291_v27   ;;  %11783 = vst [vmem:[#allocation29_spill] sm:$0xff] %v7308_v58 }
 0x117   : > { %v2212_v56 = vadd.f32 %v2084_v4, %v1955_v55  ;;  %v301_v55 = vld [vmem:[%s6889_s21 + $0x320] sm:$0xff]  ;;  %v2339_v63 = vmax.f32 %v2211_v60, 0.0  ;;  %v1827_v60 = vmul.f32 %v6973_v37, %v7163_v46 }
 0x118   : > { %2722 = vmatmul.bf16.gmra.mxu2 %v2425_v1  ;;  %v7285_v5 = vpop.permute.xlu2 %792  ;;  %v7301_v1 = vperm.slane %v6968_v36, 3 }
 0x119   : > { %v2340_v36 = vmax.f32 %v2212_v56, 0.0  ;;  %v1828_v56 = vmul.f32 %v6973_v37, %v7242_v53  ;;  %v210_v53 = vld [vmem:[%s6889_s21 + $0x48] sm:$0xff] }
 0x11b   : > { %v2683_v19 = vpop.f32.mrf.mxu2 }
 0x11c   : > { %v2684_v10 = vadd.f32 %v2683_v19, %v7301_v1  ;;  %v1551_v19 = vsel %vm1485_vm0, %v6996_v47, 0.0 }
 0x11d   : > { %6732 = vset.pattern.permute.xlu1 %v11775_v2  ;;  %6733 = vset.pattern.permute.xlu2 %v11775_v2  ;;  %v1679_v47 = vsel %vm1484_vm1, %v6999_v48, %v1551_v19  ;;  %v7354_v19 = vld [vmem:[%s6889_s21 + $0x60] sm:$0xff] }
 0x11e   : > { %362 = vperm.xlu1 %6732, %v7226_v30   ;;  %v7306_v50 = vpop.permute.xlu1 %1323  ;;  %367 = vperm.xlu2 %6733, %v208_v59   ;;  %v1550_v30 = vsel %vm1485_vm0, %v6975_v38, 0.0  ;;  %v2907_v4 = vmax.f32 %v2684_v10, 0.0  ;;  %v2426_v38 = vpack.c.bf16 %v2340_v36, %v2339_v63  ;;  %v7344_v36 = vpop.permute.xlu0 %847 }
 0x11f   : > { %11782 = vst [vmem:[#allocation28_spill] sm:$0xff] %v7306_v50  ;;  %1391 = vperm.xlu0 %6747, %v7315_v22   ;;  %v1678_v11 = vsel %vm1484_vm1, %v6977_v39, %v1550_v30  ;;  %v2086_v39 = vmul.f32 %v6992_v45, %v7183_v14  ;;  %v1957_v30 = vadd.f32 %v6983_v42, %v1828_v56 }
 0x120   : > { %v7340_v10 = vadd.f32 %v2907_v4, %v1678_v11  ;;  %v2085_v4 = vmul.f32 %v6992_v45, %v7185_v24 }
 0x121   : > { %v7312_v34 = vpop.permute.xlu2 %1339  ;;  %v2214_v63 = vadd.f32 %v2086_v39, %v1957_v30  ;;  %v1553_v39 = vsel %vm1485_vm0, %v7015_v57, 0.0 }
 0x122   : > { %11784 = vst [vmem:[#allocation30_spill] sm:$0xff] %v7340_v10 }
 0x123   : > { %v2685_v7 = vpop.f32.mrf.mxu2 }
 0x124   : > { %v2686_v49 = vadd.f32 %v2685_v7, %v7301_v1 }
 0x126   : > { %v2908_v58 = vmax.f32 %v2686_v49, 0.0  ;;  %6734 = vset.pattern.permute.xlu1 %v11779_v28  ;;  %832 = vperm.xlu2 %6733, %v301_v55   ;;  %v7374_v30 = vpop.permute.xlu0 %867 }
 0x127   : > { %999 = vperm.xlu1 %6734, %v208_v59   ;;  %v7336_v7 = vpop.permute.xlu1 %782  ;;  %1019 = vperm.xlu0 %6747, %v7354_v19   ;;  %11787 = vst [vmem:[#allocation33_spill] sm:$0xff] %v7374_v30  ;;  %v7425_v30 = vld [vmem:[%s6889_s21 + $0x80] sm:$0xff] }
 0x128   : > { %2727 = vmatmul.bf16.gmra.mxu2 %v2426_v38  ;;  %v7342_v49 = vadd.f32 %v2908_v58, %v1679_v47  ;;  %v1956_v58 = vadd.f32 %v6983_v42, %v1827_v60 }
 0x12a   : > { %11785 = vst [vmem:[#allocation31_spill] sm:$0xff] %v7342_v49  ;;  %v3131_v48 = vpack.c.bf16 %v7342_v49, %v7340_v10  ;;  %v7351_v59 = vpop.permute.xlu2 %337  ;;  %v2213_v47 = vadd.f32 %v2085_v4, %v1956_v58  ;;  %v2342_v49 = vmax.f32 %v2214_v63, 0.0  ;;  %v7369_v10 = vld [vmem:[%s6889_s21 + $0x70] sm:$0xff]  ;;  %v1830_v4 = vmul.f32 %v6973_v37, %v7199_v8 }
 0x12b   : > { %v2688_v11 = vpop.f32.mrf.mxu2 }
 0x12c   : > { %3397 = vmatmul.bf16.vlgmr.msra.gmra.mxu3 %v3131_v48  ;;  %v2689_v56 = vadd.f32 %v2688_v11, %v7301_v1  ;;  %v2341_v58 = vmax.f32 %v2213_v47, 0.0 }
 0x12e   : > { %6736 = vset.pattern.permute.xlu2 %v11779_v28  ;;  %v2909_v48 = vmax.f32 %v2689_v56, 0.0  ;;  %v2427_v46 = vpack.c.bf16 %v2342_v49, %v2341_v58  ;;  %v1829_v56 = vmul.f32 %v6973_v37, %v7267_v3  ;;  %v1831_v3 = vmul.f32 %v6973_v37, %v7229_v23 }
 0x12f   : > { %6735 = vset.pattern.permute.xlu1 %v11775_v2  ;;  %1371 = vperm.xlu2 %6736, %v301_v55  }
 0x130   : > { %837 = vperm.xlu1 %6735, %v7260_v43   ;;  %v7364_v38 = vpop.permute.xlu1 %1335  ;;  %1027 = vperm.xlu0 %6747, %v7369_v10   ;;  %v1552_v43 = vsel %vm1485_vm0, %v7020_v62, 0.0  ;;  %v1681_v62 = vsel %vm1484_vm1, %v6954_v31, %v1553_v39  ;;  %v1959_v31 = vadd.f32 %v6983_v42, %v1830_v4  ;;  %v2088_v39 = vmul.f32 %v6992_v45, %v7281_v25  ;;  %v7417_v4 = vpop.permute.xlu0 %1343 }
 0x131   : > { %v1680_v57 = vsel %vm1484_vm1, %v6943_v26, %v1552_v43  ;;  %v6634_v26 = vld [vmem:[%s11555_s2 + $0xb0] sm:$0xff]  ;;  %v1958_v58 = vadd.f32 %v6983_v42, %v1829_v56  ;;  %v1554_v56 = vsel %vm1485_vm0, %v6979_v40, 0.0  ;;  %v1744_v40 = vmul.f32 %v6973_v37, %v7351_v59 }
 0x132   : > { %v7366_v60 = vpop.permute.xlu2 %802  ;;  %v7393_v47 = vadd.f32 %v2909_v48, %v1680_v57  ;;  %3817 = vmatpush.bf16.msrb.mxu2 %v6634_v26  ;;  %v2216_v57 = vadd.f32 %v2088_v39, %v1959_v31  ;;  %v1555_v31 = vsel %vm1485_vm0, %v7047_v17, 0.0 }
 0x133   : > { %11786 = vst [vmem:[#allocation32_spill] sm:$0xff] %v7366_v60  ;;  %v2690_v55 = vpop.f32.mrf.mxu2 }
 0x134   : > { %v2691_v11 = vadd.f32 %v2690_v55, %v7301_v1  ;;  %11788 = vst [vmem:[#allocation34_spill] sm:$0xff] %v7393_v47 }
 0x136   : > { %v2910_v63 = vmax.f32 %v2691_v11, 0.0  ;;  %v2087_v11 = vmul.f32 %v6992_v45, %v7201_v13 }
 0x137   : > { %6737 = vset.pattern.permute.xlu2 %v11775_v2 }
 0x138   : > { %2732 = vmatmul.bf16.gmra.mxu2 %v2427_v46  ;;  %372 = vperm.xlu1 %6735, %v7272_v20   ;;  %v7396_v49 = vadd.f32 %v2910_v63, %v1681_v62  ;;  %v7409_v20 = vld [vmem:[%s6889_s21 + $0x368] sm:$0xff]  ;;  %v303_v63 = vld [vmem:[%s6889_s21 + $0x330] sm:$0xff]  ;;  %v2215_v26 = vadd.f32 %v2087_v11, %v1958_v58 }
 0x139   : > { %377 = vperm.xlu2 %6737, %v210_v53   ;;  %v7401_v55 = vpop.permute.xlu1 %797  ;;  %1407 = vperm.xlu0 %6747, %v7409_v20  }
 0x13a   : > { %11789 = vst [vmem:[#allocation35_spill] sm:$0xff] %v7396_v49  ;;  %v3132_v46 = vpack.c.bf16 %v7396_v49, %v7393_v47  ;;  %v2344_v47 = vmax.f32 %v2216_v57, 0.0  ;;  %v2343_v11 = vmax.f32 %v2215_v26, 0.0  ;;  %v1832_v57 = vmul.f32 %v6973_v37, %v7262_v44 }
 0x13b   : > { %v2693_v43 = vpop.f32.mrf.mxu2  ;;  %v7411_v48 = vpop.permute.xlu2 %1351  ;;  %v1683_v26 = vsel %vm1484_vm1, %v7038_v9, %v1555_v31  ;;  %v2089_v9 = vmul.f32 %v6992_v45, %v7306_v50  ;;  %v7471_v31 = vld [vmem:[%s6889_s21 + $0x90] sm:$0xff] }
 0x13c   : > { %11790 = vst [vmem:[#allocation36_spill] sm:$0xff] %v7411_v48  ;;  %3402 = vmatmul.bf16.gmra.mxu3 %v3132_v46  ;;  %v2694_v62 = vadd.f32 %v2693_v43, %v7301_v1  ;;  %v2428_v17 = vpack.c.bf16 %v2344_v47, %v2343_v11  ;;  %v1961_v23 = vadd.f32 %v6983_v42, %v1832_v57 }
 0x13e   : > { %v2911_v46 = vmax.f32 %v2694_v62, 0.0  ;;  %v1682_v62 = vsel %vm1484_vm1, %v6958_v33, %v1554_v56  ;;  %v2090_v33 = vmul.f32 %v6992_v45, %v7246_v0  ;;  %v1873_v56 = vadd.f32 %v6983_v42, %v1744_v40 }
 0x140   : > { %6738 = vset.pattern.permute.xlu1 %v11779_v28  ;;  %v7453_v44 = vadd.f32 %v2911_v46, %v1682_v62 }
 0x141   : > { %842 = vperm.xlu2 %6737, %v303_v63   ;;  %1007 = vperm.xlu1 %6738, %v210_v53   ;;  %v7422_v49 = vpop.permute.xlu1 %332 }
 0x142   : > { %1035 = vperm.xlu0 %6747, %v7425_v30   ;;  %v1743_v53 = vmul.f32 %v6973_v37, %v7422_v49  ;;  %11791 = vst [vmem:[#allocation37_spill] sm:$0xff] %v7453_v44 }
 0x143   : > { %v2695_v39 = vpop.f32.mrf.mxu2 }
 0x144   : > { %v2696_v43 = vadd.f32 %v2695_v39, %v7301_v1  ;;  %v7437_v58 = vpop.permute.xlu2 %347  ;;  %v7448_v39 = vpop.permute.xlu0 %971  ;;  %v1872_v47 = vadd.f32 %v6983_v42, %v1743_v53 }
 0x146   : > { %v2912_v8 = vmax.f32 %v2696_v43, 0.0  ;;  %v2001_v43 = vmul.f32 %v6992_v45, %v7448_v39 }
 0x148   : > { %2737 = vmatmul.bf16.gmra.mxu2 %v2428_v17  ;;  %v7458_v11 = vadd.f32 %v2912_v8, %v1683_v26  ;;  %v2129_v40 = vadd.f32 %v2001_v43, %v1872_v47 }
 0x149   : > { %6739 = vset.pattern.permute.xlu2 %v11779_v28  ;;  %1379 = vperm.xlu1 %6738, %v303_v63   ;;  %v1960_v63 = vadd.f32 %v6983_v42, %v1831_v3 }
 0x14a   : > { %11792 = vst [vmem:[#allocation38_spill] sm:$0xff] %v7458_v11  ;;  %1383 = vperm.xlu2 %6739, %v7044_v16   ;;  %v3133_v8 = vpack.c.bf16 %v7458_v11, %v7453_v44  ;;  %1043 = vperm.xlu0 %6747, %v7471_v31   ;;  %v2218_v16 = vadd.f32 %v2090_v33, %v1961_v23  ;;  %v212_v44 = vld [vmem:[%s6889_s21 + $0x58] sm:$0xff]  ;;  %v2257_v50 = vmax.f32 %v2129_v40, 0.0  ;;  %v7489_v33 = vld [vmem:[%s6889_s21 + $0x388] sm:$0xff] }
 0x14b   : > { %v2698_v46 = vpop.f32.mrf.mxu2  ;;  %v7473_v53 = vpop.permute.xlu1 %975  ;;  %v2217_v62 = vadd.f32 %v2089_v9, %v1960_v63  ;;  %v1556_v9 = vsel %vm1485_vm0, %v7069_v32, 0.0  ;;  %v1833_v32 = vmul.f32 %v6973_v37, %v7336_v7 }
 0x14c   : > { %v2002_v57 = vmul.f32 %v6992_v45, %v7473_v53  ;;  %3407 = vmatmul.bf16.gmra.mxu3 %v3133_v8  ;;  %v7479_v17 = vpop.permute.xlu2 %812  ;;  %v2699_v11 = vadd.f32 %v2698_v46, %v7301_v1  ;;  %v2346_v43 = vmax.f32 %v2218_v16, 0.0  ;;  %v305_v16 = vld [vmem:[%s6889_s21 + $0x340] sm:$0xff] }
 0x14d   : > { %11793 = vst [vmem:[#allocation39_spill] sm:$0xff] %v7479_v17  ;;  %v2345_v8 = vmax.f32 %v2217_v62, 0.0 }
 0x14e   : > { %v2130_v26 = vadd.f32 %v2002_v57, %v1873_v56  ;;  %v1557_v56 = vsel %vm1485_vm0, %v7067_v29, 0.0  ;;  %v2913_v46 = vmax.f32 %v2699_v11, 0.0  ;;  %v1684_v29 = vsel %vm1484_vm1, %v7049_v18, %v1556_v9 }
 0x14f   : > { %v2429_v57 = vpack.c.bf16 %v2346_v43, %v2345_v8  ;;  %v1685_v11 = vsel %vm1484_vm1, %v7005_v51, %v1557_v56  ;;  %v2091_v8 = vmul.f32 %v6992_v45, %v7235_v35  ;;  %v1962_v51 = vadd.f32 %v6983_v42, %v1833_v32 }
 0x150   : > { %v2258_v0 = vmax.f32 %v2130_v26, 0.0  ;;  %v7511_v40 = vadd.f32 %v2913_v46, %v1684_v29 }
 0x151   : > { %6740 = vset.pattern.permute.xlu1 %v11775_v2 }
 0x152   : > { %6741 = vset.pattern.permute.xlu2 %v11775_v2  ;;  %382 = vperm.xlu1 %6740, %v7291_v27   ;;  %v2385_v3 = vpack.c.bf16 %v2258_v0, %v2257_v50  ;;  %v1834_v27 = vmul.f32 %v6973_v37, %v7269_v41  ;;  %11795 = vst [vmem:[#allocation41_spill] sm:$0xff] %v7511_v40 }
 0x153   : > { %v2700_v47 = vpop.f32.mrf.mxu2  ;;  %387 = vperm.xlu2 %6741, %v212_v44   ;;  %v7486_v23 = vpop.permute.xlu1 %1347  ;;  %1423 = vperm.xlu0 %6747, %v7489_v33  }
 0x154   : > { %11794 = vst [vmem:[#allocation40_spill] sm:$0xff] %v7486_v23  ;;  %v2701_v0 = vadd.f32 %v2700_v47, %v7301_v1  ;;  %2522 = vmatmul.bf16.vlgmr.msra.gmra.mxu0 %v2385_v3  ;;  %v1963_v26 = vadd.f32 %v6983_v42, %v1834_v27  ;;  %v2092_v3 = vmul.f32 %v6992_v45, %v7364_v38  ;;  %v7526_v47 = vld [vmem:[%s6889_s21 + $0xa0] sm:$0xff] }
 0x155   : > { %v7501_v50 = vpop.permute.xlu2 %1355  ;;  %v2219_v27 = vadd.f32 %v2091_v8, %v1962_v51  ;;  %v1558_v8 = vsel %vm1485_vm0, %v7080_v52, 0.0 }
 0x156   : > { %v2914_v63 = vmax.f32 %v2701_v0, 0.0  ;;  %v2220_v56 = vadd.f32 %v2092_v3, %v1963_v26  ;;  %v1559_v26 = vsel %vm1485_vm0, %v7040_v12, 0.0 }
 0x158   : > { %2742 = vmatmul.bf16.gmra.mxu2 %v2429_v57  ;;  %v7514_v62 = vadd.f32 %v2914_v63, %v1685_v11  ;;  %v1746_v63 = vmul.f32 %v6973_v37, %v7437_v58  ;;  %v2348_v32 = vmax.f32 %v2220_v56, 0.0 }
 0x15a   : > { %11796 = vst [vmem:[#allocation42_spill] sm:$0xff] %v7514_v62  ;;  %6742 = vset.pattern.permute.xlu1 %v11779_v28  ;;  %v3134_v18 = vpack.c.bf16 %v7514_v62, %v7511_v40  ;;  %v1875_v51 = vadd.f32 %v6983_v42, %v1746_v63 }
 0x15b   : > { %v2703_v43 = vpop.f32.mrf.mxu2  ;;  %852 = vperm.xlu2 %6741, %v305_v16   ;;  %1015 = vperm.xlu1 %6742, %v212_v44   ;;  %v7538_v44 = vpop.permute.xlu0 %979 }
 0x15c   : > { %3412 = vmatmul.bf16.gmra.mxu3 %v3134_v18  ;;  %v7528_v9 = vpop.permute.xlu1 %342  ;;  %1051 = vperm.xlu0 %6747, %v7526_v47   ;;  %v2704_v57 = vadd.f32 %v2703_v43, %v7301_v1  ;;  %v2003_v29 = vmul.f32 %v6992_v45, %v7538_v44  ;;  %v2347_v18 = vmax.f32 %v2219_v27, 0.0  ;;  %v1836_v27 = vmul.f32 %v6973_v37, %v7401_v55 }
 0x15d   : > { %v1745_v46 = vmul.f32 %v6973_v37, %v7528_v9 }
 0x15e   : > { %v7533_v0 = vpop.permute.xlu2 %357  ;;  %v2915_v43 = vmax.f32 %v2704_v57, 0.0  ;;  %v2430_v12 = vpack.c.bf16 %v2348_v32, %v2347_v18  ;;  %v1835_v32 = vmul.f32 %v6973_v37, %v7285_v5 }
 0x15f   : > { %11797 = vst [vmem:[#allocation43_spill] sm:$0xff] %v7533_v0  ;;  %v1874_v11 = vadd.f32 %v6983_v42, %v1745_v46 }
 0x161   : > { %v2131_v63 = vadd.f32 %v2003_v29, %v1874_v11  ;;  %v2094_v29 = vmul.f32 %v6992_v45, %v7417_v4  ;;  %v1965_v11 = vadd.f32 %v6983_v42, %v1836_v27 }
 0x163   : > { %v2705_v3 = vpop.f32.mrf.mxu2  ;;  %6744 = vset.pattern.permute.xlu2 %v11779_v28  ;;  %6743 = vset.pattern.permute.xlu1 %v11775_v2  ;;  %v2259_v40 = vmax.f32 %v2131_v63, 0.0  ;;  %v2222_v27 = vadd.f32 %v2094_v29, %v1965_v11 }
 0x164   : > { %v2706_v56 = vadd.f32 %v2705_v3, %v7301_v1  ;;  %1387 = vperm.xlu2 %6744, %v305_v16   ;;  %857 = vperm.xlu1 %6743, %v7315_v22   ;;  %v1687_v22 = vsel %vm1484_vm1, %v7083_v54, %v1559_v26  ;;  %v1686_v16 = vsel %vm1484_vm1, %v7018_v61, %v1558_v8  ;;  %v214_v26 = vld [vmem:[%s6889_s21 + $0x68] sm:$0xff] }
 0x165   : > { %v7554_v46 = vpop.permute.xlu1 %983  ;;  %6763 = vset.pattern.permute.xlu0 %v11775_v2  ;;  %v7571_v3 = vadd.f32 %v2915_v43, %v1686_v16  ;;  %v1964_v43 = vadd.f32 %v6983_v42, %v1835_v32  ;;  %v7591_v16 = vpop.permute.xlu0 %1359  ;;  %v307_v32 = vld [vmem:[%s6889_s21 + $0x350] sm:$0xff] }
 0x166   : > { %v2916_v62 = vmax.f32 %v2706_v56, 0.0  ;;  %v2004_v52 = vmul.f32 %v6992_v45, %v7554_v46  ;;  %v7561_v57 = vpop.permute.xlu2 %822 }
 0x167   : > { %11798 = vst [vmem:[#allocation44_spill] sm:$0xff] %v7561_v57 }
 0x168   : > { %11799 = vst [vmem:[#allocation45_spill] sm:$0xff] %v7571_v3  ;;  %2747 = vmatmul.bf16.gmra.mxu2 %v2430_v12  ;;  %v7573_v18 = vadd.f32 %v2916_v62, %v1687_v22  ;;  %v2132_v56 = vadd.f32 %v2004_v52, %v1875_v51  ;;  %v2093_v62 = vmul.f32 %v6992_v45, %v7312_v34 }
 0x16a   : > { %11800 = vst [vmem:[#allocation46_spill] sm:$0xff] %v7573_v18  ;;  %v3135_v54 = vpack.c.bf16 %v7573_v18, %v7571_v3  ;;  %v2260_v61 = vmax.f32 %v2132_v56, 0.0  ;;  %v2221_v63 = vadd.f32 %v2093_v62, %v1964_v43  ;;  %v2350_v56 = vmax.f32 %v2222_v27, 0.0  ;;  %v11802_v43 = vld [vmem:[#allocation27_spill] sm:$0xff]  ;;  %v11804_v27 = vld [vmem:[#allocation5_spill] sm:$0xff] }
 0x16b   : > { %v2708_v8 = vpop.f32.mrf.mxu2 }
 0x16c   : > { %3417 = vmatmul.bf16.gmra.mxu3 %v3135_v54  ;;  %6745 = vset.pattern.permute.xlu2 %v11775_v2  ;;  %v2386_v51 = vpack.c.bf16 %v2260_v61, %v2259_v40  ;;  %v2709_v22 = vadd.f32 %v2708_v8, %v7301_v1  ;;  %v1560_v40 = vsel %vm1485_vm0, %v7098_v6, 0.0  ;;  %v2349_v11 = vmax.f32 %v2221_v63, 0.0 }
 0x16d   : > { %392 = vperm.xlu1 %6743, %v7354_v19   ;;  %397 = vperm.xlu2 %6745, %v214_v26   ;;  %v1561_v19 = vsel %vm1485_vm0, %v7112_v21, 0.0  ;;  %v1838_v8 = vmul.f32 %v6973_v37, %v11802_v43  ;;  %v1688_v18 = vsel %vm1484_vm1, %v11804_v27, %v1560_v40  ;;  %v11805_v21 = vld [vmem:[#allocation2_spill] sm:$0xff]  ;;  %v1837_v63 = vmul.f32 %v6973_v37, %v7366_v60  ;;  %v6633_v40 = vld [vmem:[%s11555_s2 + $0xa8] sm:$0xff] }
 0x16e   : > { %2527 = vmatmul.bf16.gmra.mxu0 %v2386_v51  ;;  %v7586_v12 = vpop.permute.xlu1 %817  ;;  %v2917_v61 = vmax.f32 %v2709_v22, 0.0  ;;  %v2431_v6 = vpack.c.bf16 %v2350_v56, %v2349_v11  ;;  %v1689_v22 = vsel %vm1484_vm1, %v11805_v21, %v1561_v19  ;;  %v2096_v19 = vmul.f32 %v6992_v45, %v7411_v48  ;;  %3818 = vmatpush.bf16.msrb.mxu2 %v6633_v40  ;;  %v6830_v40 = vld [vmem:[%s6889_s21 + $0x358] sm:$0xff] }
 0x16f   : > { %v7588_v52 = vpop.permute.xlu2 %1367  ;;  %v1967_v11 = vadd.f32 %v6983_v42, %v1838_v8  ;;  %v1966_v21 = vadd.f32 %v6983_v42, %v1837_v63 }
 0x170   : > { %11801 = vst [vmem:[#allocation47_spill] sm:$0xff] %v7588_v52 }
 0x171   : > { %v2224_v3 = vadd.f32 %v2096_v19, %v1967_v11  ;;  %v11812_v19 = vld [vmem:[#allocation4_spill] sm:$0xff] }
 0x173   : > { %v2710_v54 = vpop.f32.mrf.mxu2  ;;  %v2352_v11 = vmax.f32 %v2224_v3, 0.0 }
 0x174   : > { %v2711_v29 = vadd.f32 %v2710_v54, %v7301_v1  ;;  %v7614_v54 = vadd.f32 %v2917_v61, %v1688_v18  ;;  %v2095_v18 = vmul.f32 %v6992_v45, %v7486_v23  ;;  %v1748_v61 = vmul.f32 %v6973_v37, %v7533_v0 }
 0x175   : > { %6746 = vset.pattern.permute.xlu1 %v11779_v28  ;;  %862 = vperm.xlu2 %6745, %v307_v32  }
 0x176   : > { %v2918_v62 = vmax.f32 %v2711_v29, 0.0  ;;  %1023 = vperm.xlu1 %6746, %v214_v26   ;;  %v7604_v51 = vpop.permute.xlu1 %352  ;;  %11806 = vst [vmem:[#allocation5_spill] sm:$0xff] %v7614_v54  ;;  %v2223_v43 = vadd.f32 %v2095_v18, %v1966_v21  ;;  %v1877_v60 = vadd.f32 %v6983_v42, %v1748_v61  ;;  %v11813_v18 = vld [vmem:[#allocation7_spill] sm:$0xff] }
 0x177   : > { %11803 = vst [vmem:[#allocation48_spill] sm:$0xff] %v7604_v51  ;;  %v1747_v29 = vmul.f32 %v6973_v37, %v7604_v51  ;;  %v1563_v61 = vsel %vm1485_vm0, %v11813_v18, 0.0  ;;  %v216_v51 = vld [vmem:[%s6889_s21 + $0x78] sm:$0xff]  ;;  %v309_v18 = vld [vmem:[%s6889_s21 + $0x360] sm:$0xff] }
 0x178   : > { %2752 = vmatmul.bf16.gmra.mxu2 %v2431_v6  ;;  %v7618_v26 = vadd.f32 %v2918_v62, %v1689_v22  ;;  %v7620_v56 = vpop.permute.xlu2 %367  ;;  %v7634_v6 = vpop.permute.xlu0 %987  ;;  %v2351_v48 = vmax.f32 %v2223_v43, 0.0  ;;  %v11814_v43 = vld [vmem:[#allocation9_spill] sm:$0xff] }
 0x179   : > { %11808 = vst [vmem:[#allocation49_spill] sm:$0xff] %v7620_v56  ;;  %v2005_v8 = vmul.f32 %v6992_v45, %v7634_v6  ;;  %v1876_v22 = vadd.f32 %v6983_v42, %v1747_v29 }
 0x17a   : > { %11807 = vst [vmem:[#allocation2_spill] sm:$0xff] %v7618_v26  ;;  %v3136_v62 = vpack.c.bf16 %v7618_v26, %v7614_v54  ;;  %v2432_v3 = vpack.c.bf16 %v2352_v11, %v2351_v48 }
 0x17b   : > { %11809 = vst [vmem:[#allocation50_spill] sm:$0xff] %v7634_v6  ;;  %v2713_v27 = vpop.f32.mrf.mxu2  ;;  %v2133_v29 = vadd.f32 %v2005_v8, %v1876_v22  ;;  %v1840_v8 = vmul.f32 %v6973_v37, %v7586_v12  ;;  %v11815_v22 = vld [vmem:[#allocation3_spill] sm:$0xff] }
 0x17c   : > { %3422 = vmatmul.bf16.gmra.mxu3 %v3136_v62  ;;  %v2714_v63 = vadd.f32 %v2713_v27, %v7301_v1 }
 0x17d   : > { %6748 = vset.pattern.permute.xlu2 %v11779_v28  ;;  %v2261_v0 = vmax.f32 %v2133_v29, 0.0 }
 0x17e   : > { %1395 = vperm.xlu1 %6746, %v307_v32   ;;  %1399 = vperm.xlu2 %6748, %v6830_v40   ;;  %v1562_v32 = vsel %vm1485_vm0, %v11812_v19, 0.0  ;;  %v2919_v40 = vmax.f32 %v2714_v63, 0.0  ;;  %v1969_v19 = vadd.f32 %v6983_v42, %v1840_v8  ;;  %v11821_v8 = vld [vmem:[#allocation10_spill] sm:$0xff] }
 0x17f   : > { %v7643_v26 = vpop.permute.xlu1 %991  ;;  %v1690_v63 = vsel %vm1484_vm1, %v11815_v22, %v1562_v32  ;;  %v1564_v22 = vsel %vm1485_vm0, %v11821_v8, 0.0 }
 0x180   : > { %11810 = vst [vmem:[#allocation51_spill] sm:$0xff] %v7643_v26  ;;  %v2006_v54 = vmul.f32 %v6992_v45, %v7643_v26  ;;  %v7648_v23 = vpop.permute.xlu2 %832 }
 0x181   : > { %11811 = vst [vmem:[#allocation52_spill] sm:$0xff] %v7648_v23 }
 0x182   : > { %v2134_v62 = vadd.f32 %v2006_v54, %v1877_v60  ;;  %v1691_v54 = vsel %vm1484_vm1, %v11814_v43, %v1563_v61 }
 0x183   : > { %v2715_v21 = vpop.f32.mrf.mxu2 }
 0x184   : > { %v2716_v27 = vadd.f32 %v2715_v21, %v7301_v1  ;;  %v2262_v6 = vmax.f32 %v2134_v62, 0.0  ;;  %v7671_v62 = vadd.f32 %v2919_v40, %v1690_v63  ;;  %v7690_v40 = vld [vmem:[%s6889_s21 + $0x378] sm:$0xff] }
 0x185   : > { %887 = vperm.xlu0 %6763, %v7690_v40  }
 0x186   : > { %v2920_v26 = vmax.f32 %v2716_v27, 0.0  ;;  %6749 = vset.pattern.permute.xlu1 %v11775_v2  ;;  %6750 = vset.pattern.permute.xlu2 %v11775_v2  ;;  %v2387_v60 = vpack.c.bf16 %v2262_v6, %v2261_v0  ;;  %11817 = vst [vmem:[#allocation7_spill] sm:$0xff] %v7671_v62  ;;  %v1839_v0 = vmul.f32 %v6973_v37, %v7479_v17 }
 0x187   : > { %402 = vperm.xlu1 %6749, %v7369_v10   ;;  %407 = vperm.xlu2 %6750, %v216_v51   ;;  %v7669_v29 = vpop.permute.xlu1 %1363  ;;  %v2098_v10 = vmul.f32 %v6992_v45, %v7591_v16 }
 0x188   : > { %11816 = vst [vmem:[#allocation4_spill] sm:$0xff] %v7669_v29  ;;  %2532 = vmatmul.bf16.gmra.mxu0 %v2387_v60  ;;  %2757 = vmatmul.bf16.gmra.mxu2 %v2432_v3  ;;  %v7673_v48 = vadd.f32 %v2920_v26, %v1691_v54  ;;  %v1968_v61 = vadd.f32 %v6983_v42, %v1839_v0  ;;  %v6643_v3 = vld [vmem:[%s11555_s2 + $0xf8] sm:$0xff] }
 0x189   : > { %v7677_v6 = vpop.permute.xlu2 %1371  ;;  %v2097_v26 = vmul.f32 %v6992_v45, %v7501_v50  ;;  %v2226_v21 = vadd.f32 %v2098_v10, %v1969_v19  ;;  %4531 = vmatpush.bf16.msrb.mxu3 %v6643_v3  ;;  %v1750_v19 = vmul.f32 %v6973_v37, %v7620_v56 }
 0x18a   : > { %11818 = vst [vmem:[#allocation9_spill] sm:$0xff] %v7673_v48  ;;  %v3137_v11 = vpack.c.bf16 %v7673_v48, %v7671_v62 }
 0x18b   : > { %11819 = vst [vmem:[#allocation3_spill] sm:$0xff] %v7677_v6  ;;  %v2718_v32 = vpop.f32.mrf.mxu2  ;;  %v2225_v43 = vadd.f32 %v2097_v26, %v1968_v61  ;;  %v7712_v26 = vpop.permute.xlu0 %995  ;;  %v1879_v56 = vadd.f32 %v6983_v42, %v1750_v19 }
 0x18c   : > { %3427 = vmatmul.bf16.gmra.mxu3 %v3137_v11  ;;  %v2719_v27 = vadd.f32 %v2718_v32, %v7301_v1  ;;  %v11823_v11 = vld [vmem:[#allocation15_spill] sm:$0xff]  ;;  %v2007_v8 = vmul.f32 %v6992_v45, %v7712_v26 }
 0x18d   : > { %v1565_v10 = vsel %vm1485_vm0, %v11823_v11, 0.0  ;;  %11824 = vst [vmem:[#allocation15_spill] sm:$0xff] %v7712_v26  ;;  %v2353_v3 = vmax.f32 %v2225_v43, 0.0  ;;  %v11826_v11 = vld [vmem:[#allocation29_spill] sm:$0xff] }
 0x18e   : > { %v2921_v32 = vmax.f32 %v2719_v27, 0.0  ;;  %v1842_v17 = vmul.f32 %v6973_v37, %v11826_v11  ;;  %v311_v11 = vld [vmem:[%s6889_s21 + $0x370] sm:$0xff] }
 0x18f   : > { %6751 = vset.pattern.permute.xlu1 %v11779_v28  ;;  %872 = vperm.xlu2 %6750, %v309_v18  }
 0x190   : > { %1031 = vperm.xlu1 %6751, %v216_v51   ;;  %v7693_v60 = vpop.permute.xlu1 %362  ;;  %v2354_v51 = vmax.f32 %v2226_v21, 0.0  ;;  %v11825_v21 = vld [vmem:[#allocation12_spill] sm:$0xff] }
 0x191   : > { %11820 = vst [vmem:[#allocation53_spill] sm:$0xff] %v7693_v60  ;;  %v1749_v54 = vmul.f32 %v6973_v37, %v7693_v60  ;;  %v1692_v60 = vsel %vm1484_vm1, %v11825_v21, %v1564_v22  ;;  %v1841_v22 = vmul.f32 %v6973_v37, %v7561_v57  ;;  %v11848_v57 = vld [vmem:[#allocation14_spill] sm:$0xff] }
 0x192   : > { %v2433_v27 = vpack.c.bf16 %v2354_v51, %v2353_v3  ;;  %v7727_v26 = vadd.f32 %v2921_v32, %v1692_v60  ;;  %v2099_v32 = vmul.f32 %v6992_v45, %v7669_v29 }
 0x193   : > { %v2720_v63 = vpop.f32.mrf.mxu2  ;;  %v7704_v0 = vpop.permute.xlu2 %377  ;;  %v1878_v48 = vadd.f32 %v6983_v42, %v1749_v54  ;;  %v1970_v21 = vadd.f32 %v6983_v42, %v1841_v22 }
 0x194   : > { %11822 = vst [vmem:[#allocation10_spill] sm:$0xff] %v7704_v0  ;;  %v2721_v61 = vadd.f32 %v2720_v63, %v7301_v1  ;;  %v11827_v63 = vld [vmem:[#allocation6_spill] sm:$0xff] }
 0x195   : > { %v1693_v43 = vsel %vm1484_vm1, %v11827_v63, %v1565_v10  ;;  %11828 = vst [vmem:[#allocation12_spill] sm:$0xff] %v7727_v26  ;;  %v2135_v19 = vadd.f32 %v2007_v8, %v1878_v48  ;;  %v2227_v48 = vadd.f32 %v2099_v32, %v1970_v21 }
 0x196   : > { %v2922_v62 = vmax.f32 %v2721_v61, 0.0 }
 0x197   : > { %6753 = vset.pattern.permute.xlu2 %v11779_v28  ;;  %v2263_v63 = vmax.f32 %v2135_v19, 0.0  ;;  %v11832_v19 = vld [vmem:[#allocation11_spill] sm:$0xff] }
 0x198   : > { %6752 = vset.pattern.permute.xlu1 %v11775_v2  ;;  %1403 = vperm.xlu2 %6753, %v309_v18   ;;  %v7730_v54 = vadd.f32 %v2922_v62, %v1693_v43  ;;  %v1971_v18 = vadd.f32 %v6983_v42, %v1842_v17  ;;  %v2100_v62 = vmul.f32 %v6992_v45, %v7588_v52 }
 0x199   : > { %877 = vperm.xlu1 %6752, %v7409_v20   ;;  %2762 = vmatmul.bf16.gmra.mxu2 %v2433_v27  ;;  %v7735_v51 = vpop.permute.xlu1 %999  ;;  %v218_v27 = vld [vmem:[%s6889_s21 + $0x88] sm:$0xff] }
 0x19a   : > { %11829 = vst [vmem:[#allocation6_spill] sm:$0xff] %v7730_v54  ;;  %v2008_v10 = vmul.f32 %v6992_v45, %v7735_v51  ;;  %v3138_v60 = vpack.c.bf16 %v7730_v54, %v7727_v26  ;;  %v2228_v54 = vadd.f32 %v2100_v62, %v1971_v18  ;;  %v7753_v26 = vpop.permute.xlu0 %1375  ;;  %v1567_v18 = vsel %vm1485_vm0, %v11832_v19, 0.0  ;;  %v11833_v62 = vld [vmem:[#allocation18_spill] sm:$0xff] }
 0x19b   : > { %v2723_v61 = vpop.f32.mrf.mxu2  ;;  %v7746_v20 = vpop.permute.xlu2 %842  ;;  %11830 = vst [vmem:[#allocation54_spill] sm:$0xff] %v7753_v26  ;;  %v1566_v32 = vsel %vm1485_vm0, %v11833_v62, 0.0 }
 0x19c   : > { %3432 = vmatmul.bf16.gmra.mxu3 %v3138_v60  ;;  %v2136_v3 = vadd.f32 %v2008_v10, %v1879_v56  ;;  %v2724_v17 = vadd.f32 %v2723_v61, %v7301_v1  ;;  %v2355_v10 = vmax.f32 %v2227_v48, 0.0  ;;  %v2356_v60 = vmax.f32 %v2228_v54, 0.0  ;;  %v11835_v48 = vld [vmem:[#allocation8_spill] sm:$0xff] }
 0x19d   : > { %v1694_v54 = vsel %vm1484_vm1, %v11835_v48, %v1566_v32  ;;  %v1752_v48 = vmul.f32 %v6973_v37, %v7704_v0 }
 0x19e   : > { %v2264_v43 = vmax.f32 %v2136_v3, 0.0  ;;  %v2923_v61 = vmax.f32 %v2724_v17, 0.0  ;;  %v2434_v19 = vpack.c.bf16 %v2356_v60, %v2355_v10  ;;  %v2102_v10 = vmul.f32 %v6992_v45, %v7753_v26 }
 0x1a0   : > { %6754 = vset.pattern.permute.xlu2 %v11775_v2  ;;  %v2388_v8 = vpack.c.bf16 %v2264_v43, %v2263_v63  ;;  %v11834_v63 = vld [vmem:[#allocation13_spill] sm:$0xff]  ;;  %v7775_v62 = vadd.f32 %v2923_v61, %v1694_v54 }
 0x1a1   : > { %412 = vperm.xlu1 %6752, %v7425_v30   ;;  %417 = vperm.xlu2 %6754, %v218_v27   ;;  %v1695_v43 = vsel %vm1484_vm1, %v11834_v63, %v1567_v18 }
 0x1a2   : > { %2537 = vmatmul.bf16.gmra.mxu0 %v2388_v8  ;;  %v7755_v56 = vpop.permute.xlu1 %837  ;;  %11836 = vst [vmem:[#allocation11_spill] sm:$0xff] %v7775_v62 }
 0x1a3   : > { %11831 = vst [vmem:[#allocation55_spill] sm:$0xff] %v7755_v56  ;;  %v2725_v22 = vpop.f32.mrf.mxu2  ;;  %v1844_v8 = vmul.f32 %v6973_v37, %v7755_v56  ;;  %v6831_v56 = vld [vmem:[%s11554_s1] sm:$0xff] }
 0x1a4   : > { %v2726_v30 = vadd.f32 %v2725_v22, %v7301_v1  ;;  %v7764_v3 = vpop.permute.xlu2 %1383  ;;  %v1843_v22 = vmul.f32 %v6973_v37, %v7648_v23  ;;  %v7808_v23 = vperm.slane %v6831_v56, 4 }
 0x1a5   : > { %v1973_v60 = vadd.f32 %v6983_v42, %v1844_v8 }
 0x1a6   : > { %v2924_v21 = vmax.f32 %v2726_v30, 0.0  ;;  %v7789_v30 = vpop.permute.xlu0 %1003  ;;  %v1972_v63 = vadd.f32 %v6983_v42, %v1843_v22  ;;  %v1881_v22 = vadd.f32 %v6983_v42, %v1752_v48  ;;  %11841 = vst [vmem:[#allocation57_spill] sm:$0xff] %v7808_v23  ;;  %v11844_v48 = vld [vmem:[#allocation21_spill] sm:$0xff] }
 0x1a7   : > { %11839 = vst [vmem:[#allocation8_spill] sm:$0xff] %v7789_v30  ;;  %v1569_v0 = vsel %vm1485_vm0, %v11844_v48, 0.0 }
 0x1a8   : > { %v7777_v17 = vadd.f32 %v2924_v21, %v1695_v43 }
 0x1a9   : > { %6755 = vset.pattern.permute.xlu1 %v11779_v28  ;;  %2767 = vmatmul.bf16.gmra.mxu2 %v2434_v19  ;;  %v2230_v19 = vadd.f32 %v2102_v10, %v1973_v60 }
 0x1aa   : > { %11837 = vst [vmem:[#allocation18_spill] sm:$0xff] %v7777_v17  ;;  %882 = vperm.xlu2 %6754, %v311_v11   ;;  %1039 = vperm.xlu1 %6755, %v218_v27   ;;  %v7782_v18 = vpop.permute.xlu1 %372  ;;  %v3139_v32 = vpack.c.bf16 %v7777_v17, %v7775_v62  ;;  %v2101_v27 = vmul.f32 %v6992_v45, %v7677_v6 }
 0x1ab   : > { %11838 = vst [vmem:[#allocation13_spill] sm:$0xff] %v7782_v18  ;;  %v2728_v61 = vpop.f32.mrf.mxu2  ;;  %v1751_v21 = vmul.f32 %v6973_v37, %v7782_v18  ;;  %v2009_v17 = vmul.f32 %v6992_v45, %v7789_v30 }
 0x1ac   : > { %3437 = vmatmul.bf16.gmra.mxu3 %v3139_v32  ;;  %v2729_v54 = vadd.f32 %v2728_v61, %v7301_v1  ;;  %v2229_v32 = vadd.f32 %v2101_v27, %v1972_v63  ;;  %v11842_v61 = vld [vmem:[#allocation16_spill] sm:$0xff]  ;;  %v2358_v27 = vmax.f32 %v2230_v19, 0.0 }
 0x1ad   : > { %v7796_v43 = vpop.permute.xlu2 %387  ;;  %v1880_v62 = vadd.f32 %v6983_v42, %v1751_v21  ;;  %v1568_v10 = vsel %vm1485_vm0, %v11842_v61, 0.0 }
 0x1ae   : > { %11840 = vst [vmem:[#allocation56_spill] sm:$0xff] %v7796_v43  ;;  %v2925_v60 = vmax.f32 %v2729_v54, 0.0  ;;  %v2357_v61 = vmax.f32 %v2229_v32, 0.0  ;;  %v7826_v54 = vld [vmem:[%s6889_s21 + $0x398] sm:$0xff]  ;;  %v7831_v19 = vpop.permute.xlu0 %1011 }
 0x1af   : > { %v3398_v8 = vpop.f32.mrf.mxu3  ;;  %v2137_v18 = vadd.f32 %v2009_v17, %v1880_v62  ;;  %907 = vperm.xlu0 %6763, %v7826_v54   ;;  %v1846_v62 = vmul.f32 %v6973_v37, %v7344_v36 }
 0x1b0   : > { %v3399_v48 = vadd.f32 %v3398_v8, %v7808_v23 }
 0x1b1   : > { %v2265_v29 = vmax.f32 %v2137_v18, 0.0  ;;  %v1975_v18 = vadd.f32 %v6983_v42, %v1846_v62 }
 0x1b2   : > { %6756 = vset.pattern.permute.xlu2 %v11779_v28  ;;  %1411 = vperm.xlu1 %6755, %v311_v11  }
 0x1b3   : > { %1415 = vperm.xlu2 %6756, %v7690_v40   ;;  %v2730_v21 = vpop.f32.mrf.mxu2  ;;  %v7815_v63 = vpop.permute.xlu1 %1007  ;;  %v11846_v40 = vld [vmem:[#allocation19_spill] sm:$0xff] }
 0x1b4   : > { %11843 = vst [vmem:[#allocation16_spill] sm:$0xff] %v7815_v63  ;;  %v2731_v56 = vadd.f32 %v2730_v21, %v7301_v1  ;;  %v2010_v11 = vmul.f32 %v6992_v45, %v7815_v63  ;;  %v1696_v26 = vsel %vm1484_vm1, %v11846_v40, %v1568_v10  ;;  %v2435_v63 = vpack.c.bf16 %v2358_v27, %v2357_v61 }
 0x1b5   : > { %v7823_v6 = vpop.permute.xlu2 %852  ;;  %v7837_v17 = vadd.f32 %v2925_v60, %v1696_v26  ;;  %v1697_v10 = vsel %vm1484_vm1, %v11848_v57, %v1569_v0  ;;  %v6632_v0 = vld [vmem:[%s11555_s2 + $0xa0] sm:$0xff] }
 0x1b6   : > { %11845 = vst [vmem:[#allocation21_spill] sm:$0xff] %v7823_v6  ;;  %v2926_v30 = vmax.f32 %v2731_v56, 0.0  ;;  %v2138_v21 = vadd.f32 %v2010_v11, %v1881_v22  ;;  %v1845_v22 = vmul.f32 %v6973_v37, %v7746_v20  ;;  %v220_v56 = vld [vmem:[%s6889_s21 + $0x98] sm:$0xff]  ;;  %v3622_v11 = vmax.f32 %v3399_v48, 0.0  ;;  %3819 = vmatpush.bf16.msrb.mxu2 %v6632_v0 }
 0x1b7   : > { %11847 = vst [vmem:[#allocation19_spill] sm:$0xff] %v7837_v17  ;;  %v3400_v32 = vpop.f32.mrf.mxu3  ;;  %v7867_v48 = vld [vmem:[%s6889_s21 + $0x3b8] sm:$0xff]  ;;  %v1570_v0 = vsel %vm1485_vm0, %v7185_v24, 0.0 }
 0x1b8   : > { %v3401_v40 = vadd.f32 %v3400_v32, %v7808_v23  ;;  %v2266_v52 = vmax.f32 %v2138_v21, 0.0  ;;  %v7843_v8 = vadd.f32 %v2926_v30, %v1697_v10  ;;  %v2104_v30 = vmul.f32 %v6992_v45, %v7764_v3  ;;  %927 = vperm.xlu0 %6763, %v7867_v48   ;;  %v7872_v10 = vpop.permute.xlu0 %1391  ;;  %v11855_v24 = vld [vmem:[#allocation17_spill] sm:$0xff] }
 0x1b9   : > { %2772 = vmatmul.bf16.gmra.mxu2 %v2435_v63  ;;  %v1974_v61 = vadd.f32 %v6983_v42, %v1845_v22  ;;  %11852 = vst [vmem:[#allocation60_spill] sm:$0xff] %v7872_v10 }
 0x1ba   : > { %11849 = vst [vmem:[#allocation14_spill] sm:$0xff] %v7843_v8  ;;  %v3623_v26 = vmax.f32 %v3401_v40, 0.0  ;;  %6757 = vset.pattern.permute.xlu1 %v11775_v2  ;;  %v2389_v60 = vpack.c.bf16 %v2266_v52, %v2265_v29  ;;  %v3140_v57 = vpack.c.bf16 %v7843_v8, %v7837_v17 }
 0x1bb   : > { %6758 = vset.pattern.permute.xlu2 %v11775_v2  ;;  %422 = vperm.xlu1 %6757, %v7471_v31   ;;  %v2733_v63 = vpop.f32.mrf.mxu2  ;;  %v7859_v27 = vpop.permute.xlu1 %1379  ;;  %v2232_v31 = vadd.f32 %v2104_v30, %v1975_v18 }
 0x1bc   : > { %427 = vperm.xlu2 %6758, %v220_v56   ;;  %v2103_v52 = vmul.f32 %v6992_v45, %v7859_v27  ;;  %2542 = vmatmul.bf16.gmra.mxu0 %v2389_v60  ;;  %v7863_v29 = vpack.c.bf16 %v3623_v26, %v3622_v11  ;;  %v2734_v40 = vadd.f32 %v2733_v63, %v7301_v1  ;;  %v313_v11 = vld [vmem:[%s6889_s21 + $0x380] sm:$0xff] }
 0x1bd   : > { %3442 = vmatmul.bf16.gmra.mxu3 %v3140_v57  ;;  %v2360_v60 = vmax.f32 %v2232_v31, 0.0  ;;  %v1571_v57 = vsel %vm1485_vm0, %v7183_v14, 0.0  ;;  %v11854_v14 = vld [vmem:[#allocation23_spill] sm:$0xff] }
 0x1be   : > { %11850 = vst [vmem:[#allocation58_spill] sm:$0xff] %v7863_v29  ;;  %v7869_v21 = vpop.permute.xlu2 %1387  ;;  %v2231_v62 = vadd.f32 %v2103_v52, %v1974_v61  ;;  %v2927_v18 = vmax.f32 %v2734_v40, 0.0  ;;  %v324_v52 = vld [vmem:[%s6889_s21 + $0x3d8] sm:$0xff]  ;;  %v1699_v8 = vsel %vm1484_vm1, %v11854_v14, %v1571_v57  ;;  %v1698_v40 = vsel %vm1484_vm1, %v11855_v24, %v1570_v0 }
 0x1bf   : > { %11851 = vst [vmem:[#allocation59_spill] sm:$0xff] %v7869_v21  ;;  %v3403_v32 = vpop.f32.mrf.mxu3  ;;  %v2011_v57 = vmul.f32 %v6992_v45, %v7831_v19 }
 0x1c0   : > { %v2359_v26 = vmax.f32 %v2231_v62, 0.0  ;;  %v3404_v61 = vadd.f32 %v3403_v32, %v7808_v23  ;;  %947 = vperm.xlu0 %6763, %v324_v52   ;;  %v1754_v32 = vmul.f32 %v6973_v37, %v7796_v43  ;;  %v7907_v14 = vpop.permute.xlu0 %1019 }
 0x1c2   : > { %v2436_v17 = vpack.c.bf16 %v2360_v60, %v2359_v26  ;;  %v3624_v0 = vmax.f32 %v3404_v61, 0.0 }
 0x1c3   : > { %6759 = vset.pattern.permute.xlu1 %v11779_v28  ;;  %v2735_v22 = vpop.f32.mrf.mxu2 }
 0x1c4   : > { %v2736_v30 = vadd.f32 %v2735_v22, %v7301_v1  ;;  %892 = vperm.xlu2 %6758, %v313_v11   ;;  %1047 = vperm.xlu1 %6759, %v220_v56   ;;  %v7884_v63 = vpop.permute.xlu1 %382 }
 0x1c5   : > { %11853 = vst [vmem:[#allocation61_spill] sm:$0xff] %v7884_v63  ;;  %v1753_v31 = vmul.f32 %v6973_v37, %v7884_v63 }
 0x1c6   : > { %v2928_v62 = vmax.f32 %v2736_v30, 0.0  ;;  %v7900_v30 = vadd.f32 %v2927_v18, %v1698_v40  ;;  %v1883_v40 = vadd.f32 %v6983_v42, %v1754_v32 }
 0x1c7   : > { %v3405_v22 = vpop.f32.mrf.mxu3  ;;  %v7896_v56 = vpop.permute.xlu2 %397  ;;  %v1882_v24 = vadd.f32 %v6983_v42, %v1753_v31 }
 0x1c8   : > { %11856 = vst [vmem:[#allocation23_spill] sm:$0xff] %v7900_v30  ;;  %v3406_v29 = vadd.f32 %v3405_v22, %v7808_v23  ;;  %v7903_v52 = vadd.f32 %v2928_v62, %v1699_v8  ;;  %6781 = vset.pattern.permute.xlu0 %v11779_v28  ;;  %v7924_v62 = vld [vmem:[%s6889_s21 + $0xb0] sm:$0xff] }
 0x1c9   : > { %2777 = vmatmul.bf16.gmra.mxu2 %v2436_v17  ;;  %v2139_v61 = vadd.f32 %v2011_v57, %v1882_v24  ;;  %1059 = vperm.xlu0 %6781, %v7924_v62   ;;  %v1847_v57 = vmul.f32 %v6973_v37, %v7823_v6 }
 0x1ca   : > { %11857 = vst [vmem:[#allocation17_spill] sm:$0xff] %v7903_v52  ;;  %v3625_v26 = vmax.f32 %v3406_v29, 0.0  ;;  %v3141_v60 = vpack.c.bf16 %v7903_v52, %v7900_v30  ;;  %v222_v30 = vld [vmem:[%s6889_s21 + $0xa8] sm:$0xff] }
 0x1cb   : > { %v2738_v18 = vpop.f32.mrf.mxu2  ;;  %v2267_v24 = vmax.f32 %v2139_v61, 0.0  ;;  %v1976_v61 = vadd.f32 %v6983_v42, %v1847_v57 }
 0x1cc   : > { %6761 = vset.pattern.permute.xlu2 %v11779_v28  ;;  %6760 = vset.pattern.permute.xlu1 %v11775_v2  ;;  %v7915_v8 = vpack.c.bf16 %v3625_v26, %v3624_v0 }
 0x1cd   : > { %3447 = vmatmul.bf16.gmra.mxu3 %v3141_v60  ;;  %1419 = vperm.xlu2 %6761, %v313_v11   ;;  %v7917_v17 = vpop.permute.xlu1 %1015  ;;  %v2739_v11 = vadd.f32 %v2738_v18, %v7301_v1  ;;  %v1572_v60 = vsel %vm1485_vm0, %v7201_v13, 0.0  ;;  %v1573_v18 = vsel %vm1485_vm0, %v7281_v25, 0.0  ;;  %v11860_v13 = vld [vmem:[#allocation26_spill] sm:$0xff] }
 0x1ce   : > { %11858 = vst [vmem:[#allocation62_spill] sm:$0xff] %v7915_v8  ;;  %897 = vperm.xlu1 %6760, %v7489_v33   ;;  %v2012_v29 = vmul.f32 %v6992_v45, %v7917_v17  ;;  %v6642_v33 = vld [vmem:[%s11555_s2 + $0xf0] sm:$0xff] }
 0x1cf   : > { %v3408_v31 = vpop.f32.mrf.mxu3  ;;  %v7926_v22 = vpop.permute.xlu2 %862  ;;  %4532 = vmatpush.bf16.msrb.mxu3 %v6642_v33  ;;  %v1700_v33 = vsel %vm1484_vm1, %v11860_v13, %v1572_v60 }
 0x1d0   : > { %11859 = vst [vmem:[#allocation63_spill] sm:$0xff] %v7926_v22  ;;  %v2140_v32 = vadd.f32 %v2012_v29, %v1883_v40  ;;  %v7942_v40 = vpop.permute.xlu0 %1027  ;;  %v2929_v29 = vmax.f32 %v2739_v11, 0.0  ;;  %v3409_v63 = vadd.f32 %v3408_v31, %v7808_v23 }
 0x1d1   : > { %v2523_v0 = vpop.f32.mrf.mxu0 }
 0x1d2   : > { %v2268_v26 = vmax.f32 %v2140_v32, 0.0  ;;  %v2105_v32 = vmul.f32 %v6992_v45, %v7869_v21  ;;  %v2524_v57 = vadd.f32 %v2523_v0, %v7301_v1  ;;  %v11862_v21 = vld [vmem:[#allocation20_spill] sm:$0xff]  ;;  %v3626_v43 = vmax.f32 %v3409_v63, 0.0 }
 0x1d3   : > { %v2740_v52 = vpop.f32.mrf.mxu2  ;;  %v1701_v31 = vsel %vm1484_vm1, %v11862_v21, %v1573_v18 }
 0x1d4   : > { %v2741_v8 = vadd.f32 %v2740_v52, %v7301_v1  ;;  %v2390_v6 = vpack.c.bf16 %v2268_v26, %v2267_v24  ;;  %v2106_v52 = vmul.f32 %v6992_v45, %v7872_v10  ;;  %v2233_v0 = vadd.f32 %v2105_v32, %v1976_v61 }
 0x1d5   : > { %6762 = vset.pattern.permute.xlu2 %v11775_v2 }
 0x1d6   : > { %v2930_v25 = vmax.f32 %v2741_v8, 0.0  ;;  %432 = vperm.xlu1 %6760, %v7526_v47   ;;  %437 = vperm.xlu2 %6762, %v222_v30   ;;  %v7954_v11 = vpop.permute.xlu1 %857  ;;  %v7964_v8 = vadd.f32 %v2929_v29, %v1700_v33  ;;  %v1486_v33 = vsel %vm1485_vm0, %v7448_v39, 0.0  ;;  %v2361_v63 = vmax.f32 %v2233_v0, 0.0 }
 0x1d7   : > { %11861 = vst [vmem:[#allocation26_spill] sm:$0xff] %v7954_v11  ;;  %2547 = vmatmul.bf16.gmra.mxu0 %v2390_v6  ;;  %v1848_v24 = vmul.f32 %v6973_v37, %v7954_v11  ;;  %v3410_v26 = vpop.f32.mrf.mxu3  ;;  %v1487_v6 = vsel %vm1485_vm0, %v7473_v53, 0.0  ;;  %v315_v53 = vld [vmem:[%s6889_s21 + $0x390] sm:$0xff]  ;;  %v1614_v39 = vsel %vm1484_vm1, %v7422_v49, %v1486_v33 }
 0x1d8   : > { %11863 = vst [vmem:[#allocation20_spill] sm:$0xff] %v7964_v8  ;;  %v3411_v47 = vadd.f32 %v3410_v26, %v7808_v23  ;;  %v7967_v60 = vadd.f32 %v2930_v25, %v1701_v31  ;;  %v7973_v11 = vpop.permute.xlu2 %1399  ;;  %v2843_v25 = vmax.f32 %v2524_v57, 0.0  ;;  %v7994_v57 = vpop.permute.xlu0 %1407  ;;  %v11869_v33 = vld [vmem:[#allocation24_spill] sm:$0xff] }
 0x1d9   : > { %v1977_v13 = vadd.f32 %v6983_v42, %v1848_v24  ;;  %11865 = vst [vmem:[#allocation65_spill] sm:$0xff] %v7973_v11  ;;  %v2525_v10 = vpop.f32.mrf.mxu0  ;;  %v7983_v24 = vld [vmem:[%s6889_s21 + $0x3a8] sm:$0xff] }
 0x1da   : > { %11864 = vst [vmem:[#allocation64_spill] sm:$0xff] %v7967_v60  ;;  %v3627_v21 = vmax.f32 %v3411_v47, 0.0  ;;  %v2526_v18 = vadd.f32 %v2525_v10, %v7301_v1  ;;  %v3142_v29 = vpack.c.bf16 %v7967_v60, %v7964_v8  ;;  %v1615_v10 = vsel %vm1484_vm1, %v7351_v59, %v1487_v6  ;;  %1439 = vperm.xlu0 %6781, %v7983_v24  }
 0x1db   : > { %v2743_v26 = vpop.f32.mrf.mxu2  ;;  %v2234_v61 = vadd.f32 %v2106_v52, %v1977_v13  ;;  %v7999_v52 = vadd.f32 %v2843_v25, %v1614_v39  ;;  %v1575_v25 = vsel %vm1485_vm0, %v11869_v33, 0.0 }
 0x1dc   : > { %v2844_v32 = vmax.f32 %v2526_v18, 0.0  ;;  %v7985_v31 = vpack.c.bf16 %v3627_v21, %v3626_v43  ;;  %v2744_v13 = vadd.f32 %v2743_v26, %v7301_v1 }
 0x1dd   : > { %3452 = vmatmul.bf16.gmra.mxu3 %v3142_v29  ;;  %v2362_v47 = vmax.f32 %v2234_v61, 0.0  ;;  %11868 = vst [vmem:[#allocation68_spill] sm:$0xff] %v7999_v52  ;;  %v1756_v29 = vmul.f32 %v6973_v37, %v7896_v56  ;;  %v11870_v61 = vld [vmem:[#allocation28_spill] sm:$0xff] }
 0x1de   : > { %11866 = vst [vmem:[#allocation66_spill] sm:$0xff] %v7985_v31  ;;  %6764 = vset.pattern.permute.xlu1 %v11779_v28  ;;  %902 = vperm.xlu2 %6762, %v315_v53   ;;  %v7997_v43 = vadd.f32 %v2844_v32, %v1615_v10  ;;  %v1574_v26 = vsel %vm1485_vm0, %v11870_v61, 0.0  ;;  %v2931_v32 = vmax.f32 %v2744_v13, 0.0  ;;  %v2013_v10 = vmul.f32 %v6992_v45, %v7907_v14  ;;  %v11871_v61 = vld [vmem:[#allocation22_spill] sm:$0xff] }
 0x1df   : > { %1055 = vperm.xlu1 %6764, %v222_v30   ;;  %v8001_v0 = vpop.permute.xlu1 %392  ;;  %v3413_v59 = vpop.f32.mrf.mxu3  ;;  %v2437_v6 = vpack.c.bf16 %v2362_v47, %v2361_v63  ;;  %v8020_v47 = vld [vmem:[%s6889_s21 + $0xc0] sm:$0xff]  ;;  %v1885_v33 = vadd.f32 %v6983_v42, %v1756_v29  ;;  %v1702_v13 = vsel %vm1484_vm1, %v11871_v61, %v1574_v26 }
 0x1e0   : > { %11867 = vst [vmem:[#allocation67_spill] sm:$0xff] %v7997_v43  ;;  %v1755_v49 = vmul.f32 %v6973_v37, %v8001_v0  ;;  %v3099_v21 = vpack.c.bf16 %v7997_v43, %v7999_v52  ;;  %v8036_v8 = vpop.permute.xlu0 %1035  ;;  %v8054_v43 = vld [vmem:[%s6889_s21 + $0xd0] sm:$0xff] }
 0x1e1   : > { %2782 = vmatmul.bf16.gmra.mxu2 %v2437_v6  ;;  %v8008_v18 = vpop.permute.xlu2 %407  ;;  %v3414_v6 = vadd.f32 %v3413_v59, %v7808_v23  ;;  %v8038_v59 = vadd.f32 %v2931_v32, %v1702_v13  ;;  %v11876_v32 = vld [vmem:[#allocation33_spill] sm:$0xff] }
 0x1e2   : > { %3237 = vmatmul.bf16.vlgmr.msra.gmra.mxu1 %v3099_v21  ;;  %v1884_v39 = vadd.f32 %v6983_v42, %v1755_v49  ;;  %1067 = vperm.xlu0 %6781, %v8020_v47  }
 0x1e3   : > { %v2745_v30 = vpop.f32.mrf.mxu2  ;;  %11873 = vst [vmem:[#allocation24_spill] sm:$0xff] %v8038_v59 }
 0x1e4   : > { %v2746_v63 = vadd.f32 %v2745_v30, %v7301_v1  ;;  %v11872_v30 = vld [vmem:[#allocation25_spill] sm:$0xff] }
 0x1e5   : > { %v1703_v60 = vsel %vm1484_vm1, %v11872_v30, %v1575_v25  ;;  %v2141_v25 = vadd.f32 %v2013_v10, %v1884_v39  ;;  %v1849_v10 = vmul.f32 %v6973_v37, %v7926_v22  ;;  %v2108_v39 = vmul.f32 %v6992_v45, %v7973_v11  ;;  %v8094_v22 = vld [vmem:[%s6889_s21 + $0x3c8] sm:$0xff] }
 0x1e6   : > { %v2932_v21 = vmax.f32 %v2746_v63, 0.0  ;;  %6765 = vset.pattern.permute.xlu2 %v11779_v28 }
 0x1e7   : > { %1427 = vperm.xlu1 %6764, %v315_v53   ;;  %1431 = vperm.xlu2 %6765, %v7826_v54   ;;  %v3415_v49 = vpop.f32.mrf.mxu3  ;;  %v3628_v54 = vmax.f32 %v3414_v6, 0.0  ;;  %v224_v6 = vld [vmem:[%s6889_s21 + $0xb8] sm:$0xff] }
 0x1e8   : > { %v8040_v63 = vadd.f32 %v2932_v21, %v1703_v60  ;;  %v3416_v29 = vadd.f32 %v3415_v49, %v7808_v23  ;;  %v8043_v31 = vpop.permute.xlu1 %1023  ;;  %v1850_v60 = vmul.f32 %v6973_v37, %v11876_v32 }
 0x1e9   : > { %v2014_v26 = vmul.f32 %v6992_v45, %v8043_v31  ;;  %v8047_v53 = vpop.permute.xlu2 %872 }
 0x1ea   : > { %11874 = vst [vmem:[#allocation28_spill] sm:$0xff] %v8040_v63  ;;  %v3629_v61 = vmax.f32 %v3416_v29, 0.0  ;;  %v3143_v30 = vpack.c.bf16 %v8040_v63, %v8038_v59  ;;  %v2269_v29 = vmax.f32 %v2141_v25, 0.0  ;;  %1075 = vperm.xlu0 %6781, %v8054_v43   ;;  %v1979_v59 = vadd.f32 %v6983_v42, %v1850_v60 }
 0x1eb   : > { %11875 = vst [vmem:[#allocation22_spill] sm:$0xff] %v8047_v53  ;;  %v2528_v21 = vpop.f32.mrf.mxu0  ;;  %v2748_v13 = vpop.f32.mrf.mxu2  ;;  %v2142_v49 = vadd.f32 %v2014_v26, %v1885_v33  ;;  %v1978_v25 = vadd.f32 %v6983_v42, %v1849_v10 }
 0x1ec   : > { %v8056_v52 = vpack.c.bf16 %v3629_v61, %v3628_v54  ;;  %v2529_v33 = vadd.f32 %v2528_v21, %v7301_v1  ;;  %v8078_v21 = vpop.permute.xlu0 %1043 }
 0x1ed   : > { %3457 = vmatmul.bf16.gmra.mxu3 %v3143_v30  ;;  %v2270_v63 = vmax.f32 %v2142_v49, 0.0  ;;  %v2236_v30 = vadd.f32 %v2108_v39, %v1979_v59  ;;  %v2749_v49 = vadd.f32 %v2748_v13, %v7301_v1  ;;  %v1577_v59 = vsel %vm1485_vm0, %v7364_v38, 0.0 }
 0x1ee   : > { %11877 = vst [vmem:[#allocation25_spill] sm:$0xff] %v8056_v52  ;;  %v1488_v13 = vsel %vm1485_vm0, %v7538_v44, 0.0  ;;  %v2845_v10 = vmax.f32 %v2529_v33, 0.0  ;;  %v317_v44 = vld [vmem:[%s6889_s21 + $0x3a0] sm:$0xff] }
 0x1ef   : > { %6766 = vset.pattern.permute.xlu1 %v11775_v2  ;;  %6767 = vset.pattern.permute.xlu2 %v11775_v2  ;;  %v3418_v26 = vpop.f32.mrf.mxu3  ;;  %v2391_v54 = vpack.c.bf16 %v2270_v63, %v2269_v29  ;;  %v1576_v63 = vsel %vm1485_vm0, %v7235_v35, 0.0  ;;  %v1489_v35 = vsel %vm1485_vm0, %v7554_v46, 0.0  ;;  %v1616_v46 = vsel %vm1484_vm1, %v7528_v9, %v1488_v13 }
 0x1f0   : > { %442 = vperm.xlu1 %6766, %v7924_v62   ;;  %447 = vperm.xlu2 %6767, %v224_v6   ;;  %v8069_v61 = vpop.permute.xlu1 %1395  ;;  %v1704_v38 = vsel %vm1484_vm1, %v7336_v7, %v1576_v63  ;;  %v8107_v11 = vadd.f32 %v2845_v10, %v1616_v46  ;;  %v3419_v7 = vadd.f32 %v3418_v26, %v7808_v23 }
 0x1f1   : > { %11878 = vst [vmem:[#allocation69_spill] sm:$0xff] %v8069_v61  ;;  %v2107_v60 = vmul.f32 %v6992_v45, %v8069_v61  ;;  %2552 = vmatmul.bf16.gmra.mxu0 %v2391_v54  ;;  %v2933_v61 = vmax.f32 %v2749_v49, 0.0 }
 0x1f2   : > { %v8080_v62 = vpop.permute.xlu2 %1403  ;;  %1455 = vperm.xlu0 %6781, %v8094_v22   ;;  %11879 = vst [vmem:[#allocation70_spill] sm:$0xff] %v8107_v11  ;;  %v3630_v13 = vmax.f32 %v3419_v7, 0.0  ;;  %v2015_v7 = vmul.f32 %v6992_v45, %v7942_v40 }
 0x1f3   : > { %v2235_v39 = vadd.f32 %v2107_v60, %v1978_v25  ;;  %v2530_v29 = vpop.f32.mrf.mxu0  ;;  %v2750_v54 = vpop.f32.mrf.mxu2  ;;  %v2364_v25 = vmax.f32 %v2236_v30, 0.0  ;;  %v1617_v30 = vsel %vm1484_vm1, %v7437_v58, %v1489_v35 }
 0x1f4   : > { %v2531_v52 = vadd.f32 %v2530_v29, %v7301_v1  ;;  %v2751_v32 = vadd.f32 %v2750_v54, %v7301_v1  ;;  %v1705_v29 = vsel %vm1484_vm1, %v7269_v41, %v1577_v59  ;;  %v6631_v59 = vld [vmem:[%s11555_s2 + $0x98] sm:$0xff] }
 0x1f5   : > { %v2363_v33 = vmax.f32 %v2235_v39, 0.0  ;;  %3820 = vmatpush.bf16.msrb.mxu2 %v6631_v59  ;;  %v1579_v59 = vsel %vm1485_vm0, %v7417_v4, 0.0 }
 0x1f6   : > { %v2846_v60 = vmax.f32 %v2531_v52, 0.0  ;;  %v2934_v54 = vmax.f32 %v2751_v32, 0.0  ;;  %v8119_v52 = vadd.f32 %v2933_v61, %v1704_v38  ;;  %v8135_v38 = vld [vmem:[%s6889_s21 + $0xe0] sm:$0xff]  ;;  %v1707_v4 = vsel %vm1484_vm1, %v7401_v55, %v1579_v59 }
 0x1f7   : > { %v3420_v49 = vpop.f32.mrf.mxu3  ;;  %v2438_v63 = vpack.c.bf16 %v2364_v25, %v2363_v33  ;;  %v8137_v33 = vpop.permute.xlu0 %1423  ;;  %v1758_v25 = vmul.f32 %v6973_v37, %v8008_v18  ;;  %v2109_v59 = vmul.f32 %v6992_v45, %v8080_v62 }
 0x1f8   : > { %v8113_v39 = vadd.f32 %v2934_v54, %v1705_v29  ;;  %6768 = vset.pattern.permute.xlu1 %v11779_v28  ;;  %v3421_v9 = vadd.f32 %v3420_v49, %v7808_v23  ;;  %912 = vperm.xlu2 %6767, %v317_v44   ;;  %v8117_v41 = vadd.f32 %v2846_v60, %v1617_v30 }
 0x1f9   : > { %11882 = vst [vmem:[#allocation73_spill] sm:$0xff] %v8119_v52  ;;  %1063 = vperm.xlu1 %6768, %v224_v6   ;;  %2787 = vmatmul.bf16.gmra.mxu2 %v2438_v63  ;;  %v8121_v32 = vpop.permute.xlu1 %402  ;;  %v1887_v49 = vadd.f32 %v6983_v42, %v1758_v25 }
 0x1fa   : > { %11880 = vst [vmem:[#allocation71_spill] sm:$0xff] %v8113_v39  ;;  %v3631_v26 = vmax.f32 %v3421_v9, 0.0  ;;  %v3100_v58 = vpack.c.bf16 %v8117_v41, %v8107_v11  ;;  %v1757_v10 = vmul.f32 %v6973_v37, %v8121_v32  ;;  %v3144_v61 = vpack.c.bf16 %v8113_v39, %v8119_v52  ;;  %1083 = vperm.xlu0 %6781, %v8135_v38   ;;  %v226_v39 = vld [vmem:[%s6889_s21 + $0xc8] sm:$0xff] }
 0x1fb   : > { %11881 = vst [vmem:[#allocation72_spill] sm:$0xff] %v8117_v41  ;;  %v2753_v35 = vpop.f32.mrf.mxu2  ;;  %v8132_v6 = vpop.permute.xlu2 %417 }
 0x1fc   : > { %3242 = vmatmul.bf16.gmra.mxu1 %v3100_v58  ;;  %v8142_v46 = vpack.c.bf16 %v3631_v26, %v3630_v13  ;;  %v1886_v60 = vadd.f32 %v6983_v42, %v1757_v10  ;;  %v2754_v54 = vadd.f32 %v2753_v35, %v7301_v1  ;;  %v1578_v58 = vsel %vm1485_vm0, %v7312_v34, 0.0  ;;  %v8166_v10 = vld [vmem:[%s6889_s21 + $0xf0] sm:$0xff] }
 0x1fd   : > { %3462 = vmatmul.bf16.gmra.mxu3 %v3144_v61  ;;  %v1851_v35 = vmul.f32 %v6973_v37, %v8047_v53  ;;  %v6641_v53 = vld [vmem:[%s11555_s2 + $0xe8] sm:$0xff] }
 0x1fe   : > { %11883 = vst [vmem:[#allocation74_spill] sm:$0xff] %v8142_v46  ;;  %v2143_v26 = vadd.f32 %v2015_v7, %v1886_v60  ;;  %v2935_v13 = vmax.f32 %v2754_v54, 0.0  ;;  %v1706_v54 = vsel %vm1484_vm1, %v7285_v5, %v1578_v58  ;;  %4533 = vmatpush.bf16.msrb.mxu3 %v6641_v53 }
 0x1ff   : > { %v3423_v29 = vpop.f32.mrf.mxu3  ;;  %v8171_v34 = vpop.permute.xlu0 %1051 }
 0x200   : > { %6770 = vset.pattern.permute.xlu2 %v11779_v28  ;;  %v3424_v60 = vadd.f32 %v3423_v29, %v7808_v23  ;;  %v2271_v52 = vmax.f32 %v2143_v26, 0.0 }
 0x201   : > { %6769 = vset.pattern.permute.xlu1 %v11775_v2  ;;  %1435 = vperm.xlu2 %6770, %v317_v44  }
 0x202   : > { %917 = vperm.xlu1 %6769, %v7983_v24   ;;  %v8152_v63 = vpop.permute.xlu1 %1031  ;;  %1091 = vperm.xlu0 %6781, %v8166_v10   ;;  %v3632_v5 = vmax.f32 %v3424_v60, 0.0 }
 0x203   : > { %v2016_v30 = vmul.f32 %v6992_v45, %v8152_v63  ;;  %v2755_v9 = vpop.f32.mrf.mxu2 }
 0x204   : > { %v2756_v44 = vadd.f32 %v2755_v9, %v7301_v1  ;;  %v8163_v24 = vpop.permute.xlu2 %882 }
 0x205   : > { %v2533_v61 = vpop.f32.mrf.mxu0  ;;  %v2144_v25 = vadd.f32 %v2016_v30, %v1887_v49  ;;  %v8181_v49 = vadd.f32 %v2935_v13, %v1706_v54 }
 0x206   : > { %v2936_v7 = vmax.f32 %v2756_v44, 0.0  ;;  %v1980_v44 = vadd.f32 %v6983_v42, %v1851_v35  ;;  %v2534_v13 = vadd.f32 %v2533_v61, %v7301_v1 }
 0x207   : > { %v3425_v9 = vpop.f32.mrf.mxu3  ;;  %v2272_v46 = vmax.f32 %v2144_v25, 0.0  ;;  %11884 = vst [vmem:[#allocation75_spill] sm:$0xff] %v8181_v49 }
 0x208   : > { %v8183_v30 = vadd.f32 %v2936_v7, %v1707_v4  ;;  %v3426_v29 = vadd.f32 %v3425_v9, %v7808_v23  ;;  %v11888_v7 = vld [vmem:[#allocation51_spill] sm:$0xff]  ;;  %v2110_v4 = vmul.f32 %v6992_v45, %v7994_v57  ;;  %v2237_v9 = vadd.f32 %v2109_v59, %v1980_v44 }
 0x209   : > { %6771 = vset.pattern.permute.xlu2 %v11775_v2  ;;  %v2392_v55 = vpack.c.bf16 %v2272_v46, %v2271_v52  ;;  %v8199_v46 = vld [vmem:[%s6889_s21 + $0x3e8] sm:$0xff] }
 0x20a   : > { %11885 = vst [vmem:[#allocation76_spill] sm:$0xff] %v8183_v30  ;;  %v3633_v58 = vmax.f32 %v3426_v29, 0.0  ;;  %452 = vperm.xlu1 %6769, %v8020_v47   ;;  %457 = vperm.xlu2 %6771, %v226_v39   ;;  %v3145_v26 = vpack.c.bf16 %v8183_v30, %v8181_v49  ;;  %v1491_v47 = vsel %vm1485_vm0, %v11888_v7, 0.0  ;;  %v11889_v7 = vld [vmem:[#allocation50_spill] sm:$0xff] }
 0x20b   : > { %2557 = vmatmul.bf16.gmra.mxu0 %v2392_v55  ;;  %v8194_v25 = vpop.permute.xlu1 %877  ;;  %v2758_v35 = vpop.f32.mrf.mxu2  ;;  %1471 = vperm.xlu0 %6781, %v8199_v46   ;;  %v1490_v30 = vsel %vm1485_vm0, %v11889_v7, 0.0  ;;  %v11892_v7 = vld [vmem:[#allocation48_spill] sm:$0xff] }
 0x20c   : > { %11886 = vst [vmem:[#allocation77_spill] sm:$0xff] %v8194_v25  ;;  %v1852_v52 = vmul.f32 %v6973_v37, %v8194_v25  ;;  %v8201_v60 = vpack.c.bf16 %v3633_v58, %v3632_v5  ;;  %v888_v58 = vpop.permute.xlu0 %887  ;;  %v2759_v44 = vadd.f32 %v2758_v35, %v7301_v1 }
 0x20d   : > { %3467 = vmatmul.bf16.gmra.mxu3 %v3145_v26  ;;  %v2535_v61 = vpop.f32.mrf.mxu0  ;;  %v8208_v54 = vpop.permute.xlu2 %1415  ;;  %v2847_v26 = vmax.f32 %v2534_v13, 0.0  ;;  %v1618_v13 = vsel %vm1484_vm1, %v11892_v7, %v1490_v30  ;;  %v11897_v30 = vld [vmem:[#allocation40_spill] sm:$0xff] }
 0x20e   : > { %11887 = vst [vmem:[#allocation78_spill] sm:$0xff] %v8201_v60  ;;  %v1981_v29 = vadd.f32 %v6983_v42, %v1852_v52  ;;  %v2536_v55 = vadd.f32 %v2535_v61, %v7301_v1  ;;  %v1597_v5 = vsel %vm1485_vm0, %v8208_v54, 0.0  ;;  %v319_v60 = vld [vmem:[%s6889_s21 + $0x3b0] sm:$0xff]  ;;  %v11891_v61 = vld [vmem:[#allocation43_spill] sm:$0xff]  ;;  %v1580_v7 = vsel %vm1485_vm0, %v11897_v30, 0.0 }
 0x20f   : > { %v3428_v49 = vpop.f32.mrf.mxu3  ;;  %v8222_v41 = vsel %vm1484_vm1, %v888_v58, %v1597_v5  ;;  %v1619_v11 = vsel %vm1484_vm1, %v11891_v61, %v1491_v47  ;;  %v2365_v5 = vmax.f32 %v2237_v9, 0.0  ;;  %v2937_v25 = vmax.f32 %v2759_v44, 0.0  ;;  %v11898_v44 = vld [vmem:[#allocation32_spill] sm:$0xff] }
 0x210   : > { %11890 = vst [vmem:[#allocation51_spill] sm:$0xff] %v8222_v41  ;;  %v2848_v59 = vmax.f32 %v2536_v55, 0.0  ;;  %v2238_v52 = vadd.f32 %v2110_v4, %v1981_v29  ;;  %v11894_v4 = vld [vmem:[#allocation36_spill] sm:$0xff]  ;;  %v8240_v29 = vadd.f32 %v2847_v26, %v1618_v13  ;;  %v3429_v53 = vadd.f32 %v3428_v49, %v7808_v23 }
 0x211   : > { %v1581_v47 = vsel %vm1485_vm0, %v11894_v4, 0.0 }
 0x212   : > { %6772 = vset.pattern.permute.xlu1 %v11779_v28  ;;  %922 = vperm.xlu2 %6771, %v319_v60   ;;  %v2366_v35 = vmax.f32 %v2238_v52, 0.0  ;;  %v8235_v55 = vadd.f32 %v2848_v59, %v1619_v11  ;;  %11895 = vst [vmem:[#allocation43_spill] sm:$0xff] %v8240_v29  ;;  %v8249_v59 = vld [vmem:[%s6889_s21 + $0x100] sm:$0xff] }
 0x213   : > { %1071 = vperm.xlu1 %6772, %v226_v39   ;;  %v8242_v61 = vpop.permute.xlu1 %412  ;;  %v2760_v41 = vpop.f32.mrf.mxu2  ;;  %1099 = vperm.xlu0 %6781, %v8249_v59  }
 0x214   : > { %11893 = vst [vmem:[#allocation50_spill] sm:$0xff] %v8235_v55  ;;  %v2761_v9 = vadd.f32 %v2760_v41, %v7301_v1  ;;  %v2439_v11 = vpack.c.bf16 %v2366_v35, %v2365_v5  ;;  %v1759_v52 = vmul.f32 %v6973_v37, %v8242_v61  ;;  %v3101_v39 = vpack.c.bf16 %v8235_v55, %v8240_v29  ;;  %v11899_v35 = vld [vmem:[#allocation27_spill] sm:$0xff] }
 0x215   : > { %11896 = vst [vmem:[#allocation48_spill] sm:$0xff] %v8242_v61  ;;  %v1760_v41 = vmul.f32 %v6973_v37, %v8132_v6  ;;  %v1708_v5 = vsel %vm1484_vm1, %v11898_v44, %v1580_v7  ;;  %v1709_v4 = vsel %vm1484_vm1, %v11899_v35, %v1581_v47  ;;  %v3634_v29 = vmax.f32 %v3429_v53, 0.0 }
 0x216   : > { %v2938_v26 = vmax.f32 %v2761_v9, 0.0  ;;  %2792 = vmatmul.bf16.gmra.mxu2 %v2439_v11  ;;  %v8257_v13 = vpop.permute.xlu2 %427  ;;  %3247 = vmatmul.bf16.gmra.mxu1 %v3101_v39  ;;  %v8267_v55 = vadd.f32 %v2937_v25, %v1708_v5  ;;  %v1888_v11 = vadd.f32 %v6983_v42, %v1759_v52  ;;  %v2017_v47 = vmul.f32 %v6992_v45, %v8036_v8 }
 0x217   : > { %v3430_v30 = vpop.f32.mrf.mxu3  ;;  %v1889_v39 = vadd.f32 %v6983_v42, %v1760_v41  ;;  %v1854_v25 = vmul.f32 %v6973_v37, %v888_v58  ;;  %v2112_v58 = vmul.f32 %v6992_v45, %v8208_v54  ;;  %v1582_v54 = vsel %vm1485_vm0, %v7501_v50, 0.0 }
 0x218   : > { %11900 = vst [vmem:[#allocation36_spill] sm:$0xff] %v8267_v55  ;;  %v8269_v49 = vadd.f32 %v2938_v26, %v1709_v4  ;;  %v3431_v9 = vadd.f32 %v3430_v30, %v7808_v23  ;;  %v2145_v35 = vadd.f32 %v2017_v47, %v1888_v11  ;;  %v1853_v30 = vmul.f32 %v6973_v37, %v8163_v24  ;;  %v228_v11 = vld [vmem:[%s6889_s21 + $0xd8] sm:$0xff] }
 0x219   : > { %v1983_v4 = vadd.f32 %v6983_v42, %v1854_v25 }
 0x21a   : > { %11901 = vst [vmem:[#allocation40_spill] sm:$0xff] %v8269_v49  ;;  %v3635_v61 = vmax.f32 %v3431_v9, 0.0  ;;  %6773 = vset.pattern.permute.xlu2 %v11779_v28  ;;  %v3146_v7 = vpack.c.bf16 %v8269_v49, %v8267_v55  ;;  %v11915_v55 = vld [vmem:[#allocation29_spill] sm:$0xff] }
 0x21b   : > { %1443 = vperm.xlu1 %6772, %v319_v60   ;;  %1447 = vperm.xlu2 %6773, %v7867_v48   ;;  %v2240_v25 = vadd.f32 %v2112_v58, %v1983_v4 }
 0x21c   : > { %v2763_v26 = vpop.f32.mrf.mxu2  ;;  %v1040_v44 = vpop.permute.xlu1 %1039  ;;  %v8281_v52 = vpack.c.bf16 %v3635_v61, %v3634_v29  ;;  %6790 = vset.pattern.permute.xlu0 %v11775_v2 }
 0x21d   : > { %v1503_v53 = vsel %vm1485_vm0, %v1040_v44, 0.0  ;;  %v2018_v5 = vmul.f32 %v6992_v45, %v1040_v44  ;;  %3472 = vmatmul.bf16.gmra.mxu3 %v3146_v7  ;;  %v2764_v9 = vadd.f32 %v2763_v26, %v7301_v1  ;;  %v2273_v7 = vmax.f32 %v2145_v35, 0.0 }
 0x21e   : > { %11902 = vst [vmem:[#allocation32_spill] sm:$0xff] %v8281_v52  ;;  %v8290_v48 = vsel %vm1484_vm1, %v8132_v6, %v1503_v53  ;;  %v8292_v60 = vpop.permute.xlu2 %892  ;;  %v6651_v6 = vld [vmem:[%s11555_s2 + $0x138] sm:$0xff]  ;;  %v1982_v44 = vadd.f32 %v6983_v42, %v1853_v30  ;;  %v11903_v30 = vld [vmem:[#allocation39_spill] sm:$0xff] }
 0x21f   : > { %v2146_v29 = vadd.f32 %v2018_v5, %v1889_v39  ;;  %v2538_v61 = vpop.f32.mrf.mxu0  ;;  %v3433_v41 = vpop.f32.mrf.mxu3  ;;  %v1583_v39 = vsel %vm1485_vm0, %v7591_v16, 0.0  ;;  %v2939_v50 = vmax.f32 %v2764_v9, 0.0  ;;  %5118 = vmatpush.bf16.msrb.mxu0 %v6651_v6 }
 0x220   : > { %v2539_v53 = vadd.f32 %v2538_v61, %v7301_v1  ;;  %v1711_v4 = vsel %vm1484_vm1, %v7586_v12, %v1583_v39  ;;  %v3434_v61 = vadd.f32 %v3433_v41, %v7808_v23  ;;  %v1493_v41 = vsel %vm1485_vm0, %v7735_v51, 0.0 }
 0x221   : > { %v2274_v47 = vmax.f32 %v2146_v29, 0.0 }
 0x222   : > { %v2849_v6 = vmax.f32 %v2539_v53, 0.0 }
 0x223   : > { %6774 = vset.pattern.permute.xlu1 %v11775_v2  ;;  %6775 = vset.pattern.permute.xlu2 %v11775_v2  ;;  %v2393_v26 = vpack.c.bf16 %v2274_v47, %v2273_v7  ;;  %v11904_v7 = vld [vmem:[#allocation15_spill] sm:$0xff] }
 0x224   : > { %462 = vperm.xlu1 %6774, %v8054_v43   ;;  %467 = vperm.xlu2 %6775, %v228_v11   ;;  %v2765_v5 = vpop.f32.mrf.mxu2  ;;  %v1412_v35 = vpop.permute.xlu1 %1411  ;;  %v1710_v43 = vsel %vm1484_vm1, %v11903_v30, %v1582_v54  ;;  %v1492_v47 = vsel %vm1485_vm0, %v11904_v7, 0.0 }
 0x225   : > { %v2766_v29 = vadd.f32 %v2765_v5, %v7301_v1  ;;  %v1596_v16 = vsel %vm1485_vm0, %v1412_v35, 0.0  ;;  %v2111_v58 = vmul.f32 %v6992_v45, %v1412_v35  ;;  %2562 = vmatmul.bf16.gmra.mxu0 %v2393_v26  ;;  %v2368_v35 = vmax.f32 %v2240_v25, 0.0 }
 0x226   : > { %v8329_v9 = vsel %vm1484_vm1, %v8163_v24, %v1596_v16  ;;  %v8341_v16 = vadd.f32 %v2939_v50, %v1710_v43 }
 0x227   : > { %v2940_v26 = vmax.f32 %v2766_v29, 0.0  ;;  %v2239_v5 = vadd.f32 %v2111_v58, %v1982_v44  ;;  %v2540_v12 = vpop.f32.mrf.mxu0  ;;  %v3435_v39 = vpop.f32.mrf.mxu3  ;;  %v321_v44 = vld [vmem:[%s6889_s21 + $0x3c0] sm:$0xff]  ;;  %v3636_v58 = vmax.f32 %v3434_v61, 0.0 }
 0x228   : > { %v2541_v54 = vadd.f32 %v2540_v12, %v7301_v1  ;;  %v3436_v30 = vadd.f32 %v3435_v39, %v7808_v23  ;;  %v8339_v24 = vpop.permute.xlu2 %1419  ;;  %11905 = vst [vmem:[#allocation27_spill] sm:$0xff] %v8341_v16  ;;  %v11907_v12 = vld [vmem:[#allocation53_spill] sm:$0xff] }
 0x229   : > { %v8343_v49 = vadd.f32 %v2940_v26, %v1711_v4  ;;  %v2367_v29 = vmax.f32 %v2239_v5, 0.0  ;;  %v1598_v25 = vsel %vm1485_vm0, %v8339_v24, 0.0  ;;  %v1620_v50 = vsel %vm1484_vm1, %v11907_v12, %v1492_v47  ;;  %v11908_v26 = vld [vmem:[#allocation49_spill] sm:$0xff]  ;;  %v11912_v12 = vld [vmem:[#allocation47_spill] sm:$0xff] }
 0x22a   : > { %v2850_v7 = vmax.f32 %v2541_v54, 0.0  ;;  %v3637_v51 = vmax.f32 %v3436_v30, 0.0  ;;  %v8352_v53 = vsel %vm1484_vm1, %v8292_v60, %v1598_v25  ;;  %v1621_v5 = vsel %vm1484_vm1, %v11908_v26, %v1493_v41 }
 0x22b   : > { %11906 = vst [vmem:[#allocation39_spill] sm:$0xff] %v8343_v49  ;;  %v2440_v4 = vpack.c.bf16 %v2368_v35, %v2367_v29  ;;  %v3147_v43 = vpack.c.bf16 %v8343_v49, %v8341_v16  ;;  %v8362_v61 = vadd.f32 %v2849_v6, %v1620_v50  ;;  %v1504_v47 = vsel %vm1485_vm0, %v8078_v21, 0.0 }
 0x22c   : > { %6776 = vset.pattern.permute.xlu1 %v11779_v28  ;;  %932 = vperm.xlu2 %6775, %v321_v44   ;;  %v2768_v39 = vpop.f32.mrf.mxu2  ;;  %v8365_v54 = vadd.f32 %v2850_v7, %v1621_v5  ;;  %v8367_v30 = vpack.c.bf16 %v3637_v51, %v3636_v58  ;;  %v1762_v7 = vmul.f32 %v6973_v37, %v8257_v13  ;;  %v1585_v50 = vsel %vm1485_vm0, %v11912_v12, 0.0 }
 0x22d   : > { %11909 = vst [vmem:[#allocation15_spill] sm:$0xff] %v8362_v61  ;;  %1079 = vperm.xlu1 %6776, %v228_v11   ;;  %2797 = vmatmul.bf16.gmra.mxu2 %v2440_v4  ;;  %v423_v35 = vpop.permute.xlu1 %422  ;;  %v2769_v11 = vadd.f32 %v2768_v39, %v7301_v1  ;;  %v11913_v4 = vld [vmem:[#allocation4_spill] sm:$0xff]  ;;  %v2019_v5 = vmul.f32 %v6992_v45, %v8078_v21 }
 0x22e   : > { %11910 = vst [vmem:[#allocation53_spill] sm:$0xff] %v8365_v54  ;;  %3477 = vmatmul.bf16.gmra.mxu3 %v3147_v43  ;;  %v8374_v41 = vsel %vm1484_vm1, %v423_v35, %v1504_v47  ;;  %v3102_v6 = vpack.c.bf16 %v8365_v54, %v8362_v61  ;;  %v1761_v29 = vmul.f32 %v6973_v37, %v423_v35  ;;  %v1584_v43 = vsel %vm1485_vm0, %v11913_v4, 0.0  ;;  %v11925_v61 = vld [vmem:[#allocation10_spill] sm:$0xff] }
 0x22f   : > { %11911 = vst [vmem:[#allocation49_spill] sm:$0xff] %v8367_v30  ;;  %v3438_v25 = vpop.f32.mrf.mxu3  ;;  %v1891_v47 = vadd.f32 %v6983_v42, %v1762_v7  ;;  %v2941_v35 = vmax.f32 %v2769_v11, 0.0  ;;  %v11914_v7 = vld [vmem:[#allocation44_spill] sm:$0xff] }
 0x230   : > { %3252 = vmatmul.bf16.gmra.mxu1 %v3102_v6  ;;  %v8379_v58 = vpop.permute.xlu2 %437  ;;  %v1890_v51 = vadd.f32 %v6983_v42, %v1761_v29  ;;  %v3439_v6 = vadd.f32 %v3438_v25, %v7808_v23  ;;  %v1712_v11 = vsel %vm1484_vm1, %v11914_v7, %v1584_v43 }
 0x232   : > { %v2147_v16 = vadd.f32 %v2019_v5, %v1890_v51 }
 0x234   : > { %6778 = vset.pattern.permute.xlu2 %v11779_v28  ;;  %v2770_v26 = vpop.f32.mrf.mxu2 }
 0x235   : > { %6777 = vset.pattern.permute.xlu1 %v11775_v2  ;;  %v2771_v39 = vadd.f32 %v2770_v26, %v7301_v1  ;;  %1451 = vperm.xlu2 %6778, %v321_v44   ;;  %v1713_v44 = vsel %vm1484_vm1, %v11915_v55, %v1585_v50  ;;  %v2275_v50 = vmax.f32 %v2147_v16, 0.0  ;;  %v6630_v16 = vld [vmem:[%s11555_s2 + $0x90] sm:$0xff] }
 0x236   : > { %937 = vperm.xlu1 %6777, %v8094_v22   ;;  %v1048_v29 = vpop.permute.xlu1 %1047  ;;  %3821 = vmatpush.bf16.msrb.mxu2 %v6630_v16  ;;  %v2114_v16 = vmul.f32 %v6992_v45, %v8137_v33 }
 0x237   : > { %v2942_v12 = vmax.f32 %v2771_v39, 0.0  ;;  %v1505_v4 = vsel %vm1485_vm0, %v1048_v29, 0.0  ;;  %v2020_v49 = vmul.f32 %v6992_v45, %v1048_v29  ;;  %v3440_v21 = vpop.f32.mrf.mxu3  ;;  %v8416_v39 = vadd.f32 %v2941_v35, %v1712_v11 }
 0x238   : > { %v8411_v22 = vsel %vm1484_vm1, %v8257_v13, %v1505_v4  ;;  %v3441_v25 = vadd.f32 %v3440_v21, %v7808_v23  ;;  %v8414_v26 = vpop.permute.xlu2 %902  ;;  %v3638_v29 = vmax.f32 %v3439_v6, 0.0  ;;  %v1855_v13 = vmul.f32 %v6973_v37, %v8292_v60  ;;  %v230_v21 = vld [vmem:[%s6889_s21 + $0xe8] sm:$0xff] }
 0x239   : > { %11916 = vst [vmem:[#allocation47_spill] sm:$0xff] %v8416_v39  ;;  %v8418_v51 = vadd.f32 %v2942_v12, %v1713_v44  ;;  %v2148_v5 = vadd.f32 %v2020_v49, %v1891_v47  ;;  %v2543_v43 = vpop.f32.mrf.mxu0  ;;  %v908_v47 = vpop.permute.xlu0 %907  ;;  %v1599_v60 = vsel %vm1485_vm0, %v8137_v33, 0.0 }
 0x23a   : > { %v3639_v7 = vmax.f32 %v3441_v25, 0.0  ;;  %v2544_v49 = vadd.f32 %v2543_v43, %v7301_v1  ;;  %v1984_v6 = vadd.f32 %v6983_v42, %v1855_v13 }
 0x23b   : > { %11917 = vst [vmem:[#allocation4_spill] sm:$0xff] %v8418_v51  ;;  %v3148_v55 = vpack.c.bf16 %v8418_v51, %v8416_v39  ;;  %v2276_v30 = vmax.f32 %v2148_v5, 0.0 }
 0x23c   : > { %v2773_v4 = vpop.f32.mrf.mxu2  ;;  %v8425_v52 = vpack.c.bf16 %v3639_v7, %v3638_v29  ;;  %v11920_v7 = vld [vmem:[#allocation16_spill] sm:$0xff] }
 0x23d   : > { %6779 = vset.pattern.permute.xlu2 %v11775_v2  ;;  %v2394_v35 = vpack.c.bf16 %v2276_v30, %v2275_v50  ;;  %v2113_v30 = vmul.f32 %v6992_v45, %v8339_v24  ;;  %v2774_v44 = vadd.f32 %v2773_v4, %v7301_v1  ;;  %v1495_v24 = vsel %vm1485_vm0, %v11920_v7, 0.0  ;;  %v11921_v4 = vld [vmem:[#allocation54_spill] sm:$0xff] }
 0x23e   : > { %11918 = vst [vmem:[#allocation44_spill] sm:$0xff] %v8425_v52  ;;  %472 = vperm.xlu1 %6777, %v8135_v38   ;;  %3482 = vmatmul.bf16.gmra.mxu3 %v3148_v55  ;;  %v11919_v38 = vld [vmem:[#allocation8_spill] sm:$0xff]  ;;  %v2851_v55 = vmax.f32 %v2544_v49, 0.0  ;;  %v11923_v49 = vld [vmem:[#allocation3_spill] sm:$0xff] }
 0x23f   : > { %477 = vperm.xlu2 %6779, %v230_v21   ;;  %2567 = vmatmul.bf16.gmra.mxu0 %v2394_v35  ;;  %v1494_v11 = vsel %vm1485_vm0, %v11919_v38, 0.0  ;;  %v1587_v35 = vsel %vm1485_vm0, %v11921_v4, 0.0  ;;  %v1586_v38 = vsel %vm1485_vm0, %v11923_v49, 0.0  ;;  %v2241_v51 = vadd.f32 %v2113_v30, %v1984_v6  ;;  %v323_v52 = vld [vmem:[%s6889_s21 + $0x3d0] sm:$0xff] }
 0x240   : > { %v898_v12 = vpop.permute.xlu1 %897  ;;  %v2943_v54 = vmax.f32 %v2774_v44, 0.0  ;;  %v11929_v44 = vld [vmem:[#allocation55_spill] sm:$0xff] }
 0x241   : > { %v8445_v25 = vsel %vm1484_vm1, %v898_v12, %v1599_v60  ;;  %v1856_v5 = vmul.f32 %v6973_v37, %v898_v12  ;;  %v2545_v43 = vpop.f32.mrf.mxu0  ;;  %v8448_v29 = vpop.permute.xlu2 %1431 }
 0x242   : > { %v2546_v50 = vadd.f32 %v2545_v43, %v7301_v1  ;;  %v1601_v13 = vsel %vm1485_vm0, %v8448_v29, 0.0  ;;  %v11924_v43 = vld [vmem:[#allocation13_spill] sm:$0xff] }
 0x243   : > { %v1985_v60 = vadd.f32 %v6983_v42, %v1856_v5  ;;  %v8465_v12 = vsel %vm1484_vm1, %v908_v47, %v1601_v13  ;;  %v1622_v7 = vsel %vm1484_vm1, %v11924_v43, %v1494_v11  ;;  %v1623_v13 = vsel %vm1484_vm1, %v11925_v61, %v1495_v24 }
 0x244   : > { %11922 = vst [vmem:[#allocation29_spill] sm:$0xff] %v8465_v12  ;;  %v2852_v39 = vmax.f32 %v2546_v50, 0.0  ;;  %v2775_v4 = vpop.f32.mrf.mxu2  ;;  %v8478_v23 = vadd.f32 %v2851_v55, %v1622_v7  ;;  %v11928_v12 = vld [vmem:[#allocation52_spill] sm:$0xff]  ;;  %v1715_v50 = vsel %vm1484_vm1, %v11929_v44, %v1587_v35  ;;  %v1506_v61 = vsel %vm1485_vm0, %v8171_v34, 0.0  ;;  %v6640_v44 = vld [vmem:[%s11555_s2 + $0xe0] sm:$0xff] }
 0x245   : > { %v2242_v33 = vadd.f32 %v2114_v16, %v1985_v60  ;;  %v2776_v5 = vadd.f32 %v2775_v4, %v7301_v1  ;;  %v1714_v6 = vsel %vm1484_vm1, %v11928_v12, %v1586_v38  ;;  %v2369_v24 = vmax.f32 %v2241_v51, 0.0  ;;  %v8502_v12 = vpop.permute.xlu0 %927  ;;  %4534 = vmatpush.bf16.msrb.mxu3 %v6640_v44 }
 0x246   : > { %11926 = vst [vmem:[#allocation8_spill] sm:$0xff] %v8478_v23  ;;  %6780 = vset.pattern.permute.xlu1 %v11779_v28  ;;  %v8481_v49 = vadd.f32 %v2852_v39, %v1623_v13  ;;  %v8494_v16 = vadd.f32 %v2943_v54, %v1714_v6  ;;  %v1764_v54 = vmul.f32 %v6973_v37, %v8379_v58  ;;  %v6832_v6 = vld [vmem:[%s6889_s21 + $0x3d8] sm:$0xff] }
 0x247   : > { %v2944_v30 = vmax.f32 %v2776_v5, 0.0  ;;  %942 = vperm.xlu2 %6779, %v323_v52   ;;  %1087 = vperm.xlu1 %6780, %v230_v21   ;;  %v2370_v11 = vmax.f32 %v2242_v33, 0.0  ;;  %v2021_v33 = vmul.f32 %v6992_v45, %v8171_v34  ;;  %v1858_v13 = vmul.f32 %v6973_v37, %v908_v47 }
 0x248   : > { %11927 = vst [vmem:[#allocation16_spill] sm:$0xff] %v8481_v49  ;;  %v433_v55 = vpop.permute.xlu1 %432  ;;  %v3103_v39 = vpack.c.bf16 %v8481_v49, %v8478_v23  ;;  %v1893_v5 = vadd.f32 %v6983_v42, %v1764_v54 }
 0x249   : > { %11930 = vst [vmem:[#allocation54_spill] sm:$0xff] %v8494_v16  ;;  %v8496_v60 = vadd.f32 %v2944_v30, %v1715_v50  ;;  %v8500_v21 = vsel %vm1484_vm1, %v433_v55, %v1506_v61  ;;  %v1763_v35 = vmul.f32 %v6973_v37, %v433_v55  ;;  %v2441_v38 = vpack.c.bf16 %v2370_v11, %v2369_v24 }
 0x24a   : > { %3257 = vmatmul.bf16.gmra.mxu1 %v3103_v39  ;;  %v8505_v51 = vpop.permute.xlu2 %447  ;;  %v1589_v55 = vsel %vm1485_vm0, %v7764_v3, 0.0  ;;  %v1987_v39 = vadd.f32 %v6983_v42, %v1858_v13 }
 0x24b   : > { %11931 = vst [vmem:[#allocation3_spill] sm:$0xff] %v8496_v60  ;;  %v3149_v43 = vpack.c.bf16 %v8496_v60, %v8494_v16  ;;  %2802 = vmatmul.bf16.gmra.mxu2 %v2441_v38  ;;  %v1892_v4 = vadd.f32 %v6983_v42, %v1763_v35  ;;  %v2116_v35 = vmul.f32 %v6992_v45, %v8448_v29  ;;  %v11951_v16 = vld [vmem:[#allocation63_spill] sm:$0xff] }
 0x24c   : > { %v2778_v7 = vpop.f32.mrf.mxu2  ;;  %v1717_v29 = vsel %vm1484_vm1, %v7344_v36, %v1589_v55 }
 0x24d   : > { %v2779_v30 = vadd.f32 %v2778_v7, %v7301_v1  ;;  %v2149_v34 = vadd.f32 %v2021_v33, %v1892_v4  ;;  %v8532_v24 = vpop.permute.xlu0 %947  ;;  %v1857_v33 = vmul.f32 %v6973_v37, %v8414_v26  ;;  %v2244_v13 = vadd.f32 %v2116_v35, %v1987_v39 }
 0x24e   : > { %3487 = vmatmul.bf16.gmra.mxu3 %v3149_v43 }
 0x24f   : > { %6782 = vset.pattern.permute.xlu2 %v11779_v28  ;;  %1459 = vperm.xlu1 %6780, %v323_v52   ;;  %v2945_v7 = vmax.f32 %v2779_v30, 0.0  ;;  %v2277_v3 = vmax.f32 %v2149_v34, 0.0 }
 0x250   : > { %1463 = vperm.xlu2 %6782, %v6832_v6  }
 0x251   : > { %v1056_v11 = vpop.permute.xlu1 %1055 }
 0x252   : > { %v1507_v50 = vsel %vm1485_vm0, %v1056_v11, 0.0  ;;  %v2022_v52 = vmul.f32 %v6992_v45, %v1056_v11  ;;  %v8525_v61 = vpop.permute.xlu2 %912  ;;  %v232_v11 = vld [vmem:[%s6889_s21 + $0xf8] sm:$0xff] }
 0x253   : > { %v8530_v47 = vsel %vm1484_vm1, %v8379_v58, %v1507_v50  ;;  %v1588_v58 = vsel %vm1485_vm0, %v7859_v27, 0.0 }
 0x254   : > { %v2150_v38 = vadd.f32 %v2022_v52, %v1893_v5  ;;  %v2548_v43 = vpop.f32.mrf.mxu0  ;;  %v2780_v54 = vpop.f32.mrf.mxu2  ;;  %v1716_v27 = vsel %vm1484_vm1, %v7746_v20, %v1588_v58  ;;  %v1986_v52 = vadd.f32 %v6983_v42, %v1857_v33 }
 0x255   : > { %v2781_v4 = vadd.f32 %v2780_v54, %v7301_v1  ;;  %v8556_v44 = vadd.f32 %v2945_v7, %v1716_v27  ;;  %v2549_v34 = vadd.f32 %v2548_v43, %v7301_v1  ;;  %v8578_v7 = vld [vmem:[%s6889_s21 + $0x3f8] sm:$0xff] }
 0x256   : > { %v2278_v6 = vmax.f32 %v2150_v38, 0.0  ;;  %v2372_v38 = vmax.f32 %v2244_v13, 0.0  ;;  %967 = vperm.xlu0 %6790, %v8578_v7   ;;  %v325_v13 = vld [vmem:[%s6889_s21 + $0x3e0] sm:$0xff] }
 0x257   : > { %v2946_v5 = vmax.f32 %v2781_v4, 0.0  ;;  %6783 = vset.pattern.permute.xlu1 %v11775_v2  ;;  %11932 = vst [vmem:[#allocation13_spill] sm:$0xff] %v8556_v44  ;;  %v1497_v4 = vsel %vm1485_vm0, %v7917_v17, 0.0 }
 0x258   : > { %482 = vperm.xlu1 %6783, %v8166_v10   ;;  %v2395_v30 = vpack.c.bf16 %v2278_v6, %v2277_v3  ;;  %6784 = vset.pattern.permute.xlu2 %v11775_v2  ;;  %v1060_v3 = vpop.permute.xlu0 %1059  ;;  %v1496_v6 = vsel %vm1485_vm0, %v7831_v19, 0.0 }
 0x259   : > { %v8558_v50 = vadd.f32 %v2946_v5, %v1717_v29  ;;  %v1428_v36 = vpop.permute.xlu1 %1427  ;;  %487 = vperm.xlu2 %6784, %v232_v11   ;;  %v2853_v29 = vmax.f32 %v2549_v34, 0.0  ;;  %v1508_v17 = vsel %vm1485_vm0, %v1060_v3, 0.0 }
 0x25a   : > { %v1600_v20 = vsel %vm1485_vm0, %v1428_v36, 0.0  ;;  %v2115_v10 = vmul.f32 %v6992_v45, %v1428_v36  ;;  %2572 = vmatmul.bf16.gmra.mxu0 %v2395_v30  ;;  %v11934_v36 = vld [vmem:[#allocation56_spill] sm:$0xff] }
 0x25b   : > { %11933 = vst [vmem:[#allocation10_spill] sm:$0xff] %v8558_v50  ;;  %v3150_v55 = vpack.c.bf16 %v8558_v50, %v8556_v44  ;;  %v8567_v39 = vpop.permute.xlu2 %1435  ;;  %v8572_v35 = vsel %vm1484_vm1, %v8414_v26, %v1600_v20  ;;  %v11935_v20 = vld [vmem:[#allocation61_spill] sm:$0xff] }
 0x25c   : > { %v2243_v54 = vadd.f32 %v2115_v10, %v1986_v52  ;;  %v2550_v43 = vpop.f32.mrf.mxu0  ;;  %v1602_v58 = vsel %vm1485_vm0, %v8567_v39, 0.0  ;;  %v1625_v52 = vsel %vm1484_vm1, %v11934_v36, %v1497_v4  ;;  %v1624_v19 = vsel %vm1484_vm1, %v11935_v20, %v1496_v6  ;;  %v6650_v10 = vld [vmem:[%s11555_s2 + $0x130] sm:$0xff] }
 0x25d   : > { %v2551_v33 = vadd.f32 %v2550_v43, %v7301_v1  ;;  %v8588_v26 = vsel %vm1484_vm1, %v8525_v61, %v1602_v58  ;;  %5119 = vmatpush.bf16.msrb.mxu0 %v6650_v10  ;;  %v1766_v6 = vmul.f32 %v6973_v37, %v8505_v51  ;;  %v11938_v36 = vld [vmem:[#allocation60_spill] sm:$0xff] }
 0x25e   : > { %v2371_v5 = vmax.f32 %v2243_v54, 0.0  ;;  %3492 = vmatmul.bf16.gmra.mxu3 %v3150_v55  ;;  %v8608_v55 = vadd.f32 %v2853_v29, %v1624_v19  ;;  %6794 = vset.pattern.permute.xlu0 %v11779_v28  ;;  %v2023_v29 = vmul.f32 %v6992_v45, %v1060_v3 }
 0x25f   : > { %v2854_v27 = vmax.f32 %v2551_v33, 0.0  ;;  %v8620_v33 = vld [vmem:[%s6889_s21 + $0x110] sm:$0xff] }
 0x260   : > { %6785 = vset.pattern.permute.xlu1 %v11779_v28  ;;  %v2442_v30 = vpack.c.bf16 %v2372_v38, %v2371_v5  ;;  %11937 = vst [vmem:[#allocation55_spill] sm:$0xff] %v8608_v55  ;;  %1107 = vperm.xlu0 %6794, %v8620_v33  }
 0x261   : > { %1095 = vperm.xlu1 %6785, %v232_v11   ;;  %v8603_v34 = vadd.f32 %v2854_v27, %v1625_v52  ;;  %952 = vperm.xlu2 %6784, %v325_v13   ;;  %v1591_v52 = vsel %vm1485_vm0, %v11938_v36, 0.0 }
 0x262   : > { %2807 = vmatmul.bf16.gmra.mxu2 %v2442_v30  ;;  %v443_v38 = vpop.permute.xlu1 %442 }
 0x263   : > { %11936 = vst [vmem:[#allocation52_spill] sm:$0xff] %v8603_v34  ;;  %v8612_v54 = vsel %vm1484_vm1, %v443_v38, %v1508_v17  ;;  %v1765_v43 = vmul.f32 %v6973_v37, %v443_v38  ;;  %v3104_v11 = vpack.c.bf16 %v8603_v34, %v8608_v55  ;;  %v1895_v17 = vadd.f32 %v6983_v42, %v1766_v6  ;;  %v8651_v6 = vld [vmem:[%s6889_s21 + $0x128] sm:$0xff]  ;;  %v252_v55 = vld [vmem:[%s6889_s21 + $0x198] sm:$0xff] }
 0x264   : > { %v2783_v58 = vpop.f32.mrf.mxu2  ;;  %v8617_v4 = vpop.permute.xlu2 %457 }
 0x265   : > { %3262 = vmatmul.bf16.gmra.mxu1 %v3104_v11  ;;  %v1894_v5 = vadd.f32 %v6983_v42, %v1765_v43  ;;  %v2784_v27 = vadd.f32 %v2783_v58, %v7301_v1  ;;  %v11939_v43 = vld [vmem:[#allocation59_spill] sm:$0xff] }
 0x266   : > { %v1590_v58 = vsel %vm1485_vm0, %v11939_v43, 0.0  ;;  %v1440_v43 = vpop.permute.xlu0 %1439 }
 0x267   : > { %v2151_v38 = vadd.f32 %v2023_v29, %v1894_v5  ;;  %v1859_v29 = vmul.f32 %v6973_v37, %v8525_v61  ;;  %v1603_v61 = vsel %vm1485_vm0, %v1440_v43, 0.0 }
 0x268   : > { %1119 = vperm.xlu0 %6794, %v8651_v6  }
 0x269   : > { %6786 = vset.pattern.permute.xlu1 %v11775_v2  ;;  %6787 = vset.pattern.permute.xlu2 %v11779_v28 }
 0x26a   : > { %957 = vperm.xlu1 %6786, %v8199_v46   ;;  %1467 = vperm.xlu2 %6787, %v325_v13   ;;  %v2947_v46 = vmax.f32 %v2784_v27, 0.0  ;;  %v11940_v27 = vld [vmem:[#allocation26_spill] sm:$0xff] }
 0x26b   : > { %v1064_v30 = vpop.permute.xlu1 %1063  ;;  %v1719_v50 = vsel %vm1484_vm1, %v11940_v27, %v1591_v52  ;;  %v234_v52 = vld [vmem:[%s6889_s21 + $0x108] sm:$0xff]  ;;  %v1988_v27 = vadd.f32 %v6983_v42, %v1859_v29 }
 0x26c   : > { %v1509_v3 = vsel %vm1485_vm0, %v1064_v30, 0.0  ;;  %v2024_v20 = vmul.f32 %v6992_v45, %v1064_v30  ;;  %v2785_v19 = vpop.f32.mrf.mxu2  ;;  %v8639_v10 = vpop.permute.xlu2 %922 }
 0x26d   : > { %v8647_v13 = vsel %vm1484_vm1, %v8505_v51, %v1509_v3  ;;  %v2786_v11 = vadd.f32 %v2785_v19, %v7301_v1  ;;  %v8659_v51 = vpop.f32.mrf.mxu3  ;;  %v11942_v3 = vld [vmem:[#allocation21_spill] sm:$0xff] }
 0x26e   : > { %v2152_v36 = vadd.f32 %v2024_v20, %v1895_v17  ;;  %v2553_v30 = vpop.f32.mrf.mxu0  ;;  %11941 = vst [vmem:[#allocation56_spill] sm:$0xff] %v8659_v51  ;;  %v1718_v19 = vsel %vm1484_vm1, %v11942_v3, %v1590_v58  ;;  %v2279_v17 = vmax.f32 %v2151_v38, 0.0  ;;  %v2117_v38 = vmul.f32 %v6992_v45, %v8567_v39 }
 0x26f   : > { %v2948_v5 = vmax.f32 %v2786_v11, 0.0  ;;  %v8664_v44 = vadd.f32 %v2947_v46, %v1718_v19 }
 0x270   : > { %v2280_v20 = vmax.f32 %v2152_v36, 0.0  ;;  %v8680_v36 = vld [vmem:[%s6889_s21 + $0x130] sm:$0xff]  ;;  %v2245_v19 = vadd.f32 %v2117_v38, %v1988_v27 }
 0x271   : > { %11943 = vst [vmem:[#allocation61_spill] sm:$0xff] %v8664_v44  ;;  %v8666_v60 = vadd.f32 %v2948_v5, %v1719_v50  ;;  %v2554_v50 = vadd.f32 %v2553_v30, %v7301_v1  ;;  %1123 = vperm.xlu0 %6794, %v8680_v36   ;;  %v1499_v30 = vsel %vm1485_vm0, %v8043_v31, 0.0  ;;  %v327_v27 = vld [vmem:[%s6889_s21 + $0x3f0] sm:$0xff] }
 0x272   : > { %492 = vperm.xlu1 %6786, %v8249_v59   ;;  %v2396_v11 = vpack.c.bf16 %v2280_v20, %v2279_v17  ;;  %6788 = vset.pattern.permute.xlu2 %v11775_v2  ;;  %v2118_v59 = vmul.f32 %v6992_v45, %v1440_v43  ;;  %v1498_v20 = vsel %vm1485_vm0, %v7907_v14, 0.0  ;;  %v1627_v31 = vsel %vm1484_vm1, %v7896_v56, %v1499_v30 }
 0x273   : > { %11944 = vst [vmem:[#allocation60_spill] sm:$0xff] %v8666_v60  ;;  %v3151_v58 = vpack.c.bf16 %v8666_v60, %v8664_v44  ;;  %497 = vperm.xlu2 %6788, %v234_v52   ;;  %v1626_v14 = vsel %vm1484_vm1, %v8001_v0, %v1498_v20  ;;  %v2373_v38 = vmax.f32 %v2245_v19, 0.0  ;;  %v1768_v20 = vmul.f32 %v6973_v37, %v8617_v4 }
 0x274   : > { %2577 = vmatmul.bf16.gmra.mxu0 %v2396_v11  ;;  %v918_v46 = vpop.permute.xlu1 %917 }
 0x275   : > { %v8685_v5 = vsel %vm1484_vm1, %v918_v46, %v1603_v61  ;;  %v1860_v29 = vmul.f32 %v6973_v37, %v918_v46  ;;  %3497 = vmatmul.bf16.gmra.mxu3 %v3151_v58  ;;  %v8688_v39 = vpop.permute.xlu2 %1447  ;;  %v2855_v61 = vmax.f32 %v2554_v50, 0.0  ;;  %v1068_v58 = vpop.permute.xlu0 %1067 }
 0x276   : > { %v2555_v3 = vpop.f32.mrf.mxu0  ;;  %v8699_v60 = vpop.f32.mrf.mxu3  ;;  %v1510_v44 = vsel %vm1485_vm0, %v1068_v58, 0.0 }
 0x277   : > { %v1989_v43 = vadd.f32 %v6983_v42, %v1860_v29  ;;  %v2556_v17 = vadd.f32 %v2555_v3, %v7301_v1  ;;  %11945 = vst [vmem:[#allocation59_spill] sm:$0xff] %v8699_v60  ;;  %v6629_v29 = vld [vmem:[%s11555_s2 + $0x88] sm:$0xff]  ;;  %v8716_v3 = vadd.f32 %v2855_v61, %v1626_v14 }
 0x278   : > { %3822 = vmatpush.bf16.msrb.mxu2 %v6629_v29  ;;  %v11950_v29 = vld [vmem:[#allocation69_spill] sm:$0xff] }
 0x279   : > { %v2246_v11 = vadd.f32 %v2118_v59, %v1989_v43  ;;  %v2856_v46 = vmax.f32 %v2556_v17, 0.0  ;;  %11947 = vst [vmem:[#allocation21_spill] sm:$0xff] %v8716_v3  ;;  %6800 = vset.pattern.permute.xlu0 %v11775_v2 }
 0x27a   : > { %6789 = vset.pattern.permute.xlu1 %v11779_v28 }
 0x27b   : > { %1103 = vperm.xlu1 %6789, %v234_v52   ;;  %v2374_v50 = vmax.f32 %v2246_v11, 0.0  ;;  %v8711_v59 = vadd.f32 %v2856_v46, %v1627_v31  ;;  %962 = vperm.xlu2 %6788, %v327_v27   ;;  %v11948_v46 = vld [vmem:[#allocation65_spill] sm:$0xff] }
 0x27c   : > { %v453_v43 = vpop.permute.xlu1 %452  ;;  %v2788_v17 = vpop.f32.mrf.mxu2  ;;  %v1593_v31 = vsel %vm1485_vm0, %v11948_v46, 0.0 }
 0x27d   : > { %11946 = vst [vmem:[#allocation26_spill] sm:$0xff] %v8711_v59  ;;  %v8720_v56 = vsel %vm1484_vm1, %v453_v43, %v1510_v44  ;;  %v2443_v30 = vpack.c.bf16 %v2374_v50, %v2373_v38  ;;  %v1767_v0 = vmul.f32 %v6973_v37, %v453_v43  ;;  %v3105_v52 = vpack.c.bf16 %v8711_v59, %v8716_v3  ;;  %v11985_v3 = vld [vmem:[#allocation29_spill] sm:$0xff] }
 0x27e   : > { %v8725_v19 = vpop.permute.xlu2 %467  ;;  %v2789_v61 = vadd.f32 %v2788_v17, %v7301_v1  ;;  %v2025_v44 = vmul.f32 %v6992_v45, %v1068_v58  ;;  %v8737_v14 = vpop.f32.mrf.mxu3  ;;  %v1897_v38 = vadd.f32 %v6983_v42, %v1768_v20  ;;  %v1592_v58 = vsel %vm1485_vm0, %v11950_v29, 0.0 }
 0x27f   : > { %2812 = vmatmul.bf16.gmra.mxu2 %v2443_v30  ;;  %3267 = vmatmul.bf16.gmra.mxu1 %v3105_v52  ;;  %v1896_v11 = vadd.f32 %v6983_v42, %v1767_v0  ;;  %11949 = vst [vmem:[#allocation65_spill] sm:$0xff] %v8737_v14 }
 0x280   : > { %v2949_v43 = vmax.f32 %v2789_v61, 0.0  ;;  %v1720_v61 = vsel %vm1484_vm1, %v11951_v16, %v1592_v58  ;;  %v236_v58 = vld [vmem:[%s6889_s21 + $0x118] sm:$0xff] }
 0x281   : > { %v2153_v0 = vadd.f32 %v2025_v44, %v1896_v11 }
 0x282   : > { %v8764_v51 = vadd.f32 %v2949_v43, %v1720_v61 }
 0x283   : > { %1475 = vperm.xlu1 %6789, %v327_v27   ;;  %6791 = vset.pattern.permute.xlu2 %v11779_v28  ;;  %v1862_v27 = vmul.f32 %v6973_v37, %v8502_v12  ;;  %v2281_v16 = vmax.f32 %v2153_v0, 0.0 }
 0x284   : > { %v2790_v50 = vpop.f32.mrf.mxu2  ;;  %1479 = vperm.xlu2 %6791, %v8578_v7   ;;  %11953 = vst [vmem:[#allocation69_spill] sm:$0xff] %v8764_v51 }
 0x285   : > { %v2791_v17 = vadd.f32 %v2790_v50, %v7301_v1  ;;  %v1072_v30 = vpop.permute.xlu1 %1071  ;;  %v11952_v50 = vld [vmem:[#allocation33_spill] sm:$0xff] }
 0x286   : > { %v1511_v52 = vsel %vm1485_vm0, %v1072_v30, 0.0  ;;  %v2026_v20 = vmul.f32 %v6992_v45, %v1072_v30  ;;  %v8750_v46 = vpop.permute.xlu2 %932  ;;  %v1721_v44 = vsel %vm1484_vm1, %v11952_v50, %v1593_v31  ;;  %v1991_v30 = vadd.f32 %v6983_v42, %v1862_v27 }
 0x287   : > { %v2950_v7 = vmax.f32 %v2791_v17, 0.0  ;;  %v8755_v29 = vsel %vm1484_vm1, %v8617_v4, %v1511_v52  ;;  %v1861_v4 = vmul.f32 %v6973_v37, %v8639_v10  ;;  %v2120_v52 = vmul.f32 %v6992_v45, %v8688_v39 }
 0x288   : > { %v2154_v11 = vadd.f32 %v2026_v20, %v1897_v38  ;;  %v2558_v14 = vpop.f32.mrf.mxu0  ;;  %v8779_v20 = vpop.f32.mrf.mxu3 }
 0x289   : > { %v8766_v17 = vadd.f32 %v2950_v7, %v1721_v44  ;;  %v2559_v27 = vadd.f32 %v2558_v14, %v7301_v1  ;;  %11955 = vst [vmem:[#allocation33_spill] sm:$0xff] %v8779_v20  ;;  %v1990_v0 = vadd.f32 %v6983_v42, %v1861_v4  ;;  %v2248_v7 = vadd.f32 %v2120_v52, %v1991_v30  ;;  %v6639_v14 = vld [vmem:[%s11555_s2 + $0xd8] sm:$0xff] }
 0x28a   : > { %v2282_v60 = vmax.f32 %v2154_v11, 0.0  ;;  %v1501_v4 = vsel %vm1485_vm0, %v8152_v63, 0.0  ;;  %4535 = vmatpush.bf16.msrb.mxu3 %v6639_v14 }
 0x28b   : > { %11954 = vst [vmem:[#allocation63_spill] sm:$0xff] %v8766_v17  ;;  %6792 = vset.pattern.permute.xlu1 %v11775_v2  ;;  %v3152_v31 = vpack.c.bf16 %v8766_v17, %v8764_v51  ;;  %v2857_v52 = vmax.f32 %v2559_v27, 0.0  ;;  %v1595_v17 = vsel %vm1485_vm0, %v7994_v57, 0.0 }
 0x28c   : > { %502 = vperm.xlu1 %6792, %v8620_v33   ;;  %v2397_v38 = vpack.c.bf16 %v2282_v60, %v2281_v16  ;;  %6793 = vset.pattern.permute.xlu2 %v11775_v2 }
 0x28d   : > { %v1444_v43 = vpop.permute.xlu1 %1443  ;;  %3502 = vmatmul.bf16.gmra.mxu3 %v3152_v31  ;;  %507 = vperm.xlu2 %6793, %v236_v58  }
 0x28e   : > { %v1604_v61 = vsel %vm1485_vm0, %v1444_v43, 0.0  ;;  %v2119_v33 = vmul.f32 %v6992_v45, %v1444_v43  ;;  %2582 = vmatmul.bf16.gmra.mxu0 %v2397_v38  ;;  %v237_v43 = vld [vmem:[%s6889_s21 + $0x120] sm:$0xff] }
 0x28f   : > { %v8785_v60 = vpop.permute.xlu2 %1451  ;;  %v8793_v50 = vsel %vm1484_vm1, %v8639_v10, %v1604_v61  ;;  %v2376_v10 = vmax.f32 %v2248_v7, 0.0  ;;  %v1076_v61 = vpop.permute.xlu0 %1075  ;;  %v1629_v7 = vsel %vm1484_vm1, %v8008_v18, %v1501_v4 }
 0x290   : > { %v2247_v44 = vadd.f32 %v2119_v33, %v1990_v0  ;;  %v2560_v11 = vpop.f32.mrf.mxu0  ;;  %v1606_v30 = vsel %vm1485_vm0, %v8785_v60, 0.0  ;;  %v1500_v0 = vsel %vm1485_vm0, %v7942_v40, 0.0  ;;  %v1512_v27 = vsel %vm1485_vm0, %v1076_v61, 0.0  ;;  %v8834_v18 = vpop.f32.mrf.mxu3 }
 0x291   : > { %v2561_v16 = vadd.f32 %v2560_v11, %v7301_v1  ;;  %v8805_v31 = vsel %vm1484_vm1, %v8750_v46, %v1606_v30  ;;  %v1628_v63 = vsel %vm1484_vm1, %v8121_v32, %v1500_v0  ;;  %v8825_v11 = vld [vmem:[%s6889_s21 + $0x148] sm:$0xff]  ;;  %11958 = vst [vmem:[#allocation81_spill] sm:$0xff] %v8834_v18 }
 0x292   : > { %v2375_v38 = vmax.f32 %v2247_v44, 0.0  ;;  %v8820_v44 = vadd.f32 %v2857_v52, %v1628_v63  ;;  %537 = vperm.xlu0 %6800, %v8825_v11  }
 0x293   : > { %v2858_v33 = vmax.f32 %v2561_v16, 0.0 }
 0x294   : > { %6795 = vset.pattern.permute.xlu1 %v11779_v28  ;;  %v2444_v14 = vpack.c.bf16 %v2376_v10, %v2375_v38  ;;  %11956 = vst [vmem:[#allocation79_spill] sm:$0xff] %v8820_v44  ;;  %v1770_v10 = vmul.f32 %v6973_v37, %v8725_v19  ;;  %v2027_v38 = vmul.f32 %v6992_v45, %v1076_v61 }
 0x295   : > { %1111 = vperm.xlu1 %6795, %v236_v58   ;;  %v8822_v40 = vadd.f32 %v2858_v33, %v1629_v7  ;;  %512 = vperm.xlu2 %6793, %v237_v43  }
 0x296   : > { %2817 = vmatmul.bf16.gmra.mxu2 %v2444_v14  ;;  %v463_v32 = vpop.permute.xlu1 %462  ;;  %v1899_v33 = vadd.f32 %v6983_v42, %v1770_v10 }
 0x297   : > { %11957 = vst [vmem:[#allocation80_spill] sm:$0xff] %v8822_v40  ;;  %v8830_v30 = vsel %vm1484_vm1, %v463_v32, %v1512_v27  ;;  %v3106_v16 = vpack.c.bf16 %v8822_v40, %v8820_v44  ;;  %v1769_v58 = vmul.f32 %v6973_v37, %v463_v32  ;;  %v8853_v32 = vld [vmem:[%s6889_s21 + $0x150] sm:$0xff]  ;;  %v248_v40 = vld [vmem:[%s6889_s21 + $0x178] sm:$0xff] }
 0x298   : > { %v8869_v10 = vpop.f32.mrf.mxu3  ;;  %v9146_v44 = vld [vmem:[%s6889_s21 + $0x1b0] sm:$0xff] }
 0x299   : > { %v8837_v4 = vpop.permute.xlu2 %477  ;;  %v2793_v52 = vpop.f32.mrf.mxu2  ;;  %3272 = vmatmul.bf16.gmra.mxu1 %v3106_v16  ;;  %v1898_v0 = vadd.f32 %v6983_v42, %v1769_v58  ;;  %11959 = vst [vmem:[#allocation82_spill] sm:$0xff] %v8869_v10 }
 0x29a   : > { %v2794_v63 = vadd.f32 %v2793_v52, %v7301_v1  ;;  %6804 = vset.pattern.permute.xlu0 %v11779_v28  ;;  %v1594_v52 = vsel %vm1485_vm0, %v8080_v62, 0.0  ;;  %v11960_v62 = vld [vmem:[#allocation77_spill] sm:$0xff] }
 0x29b   : > { %v2155_v14 = vadd.f32 %v2027_v38, %v1898_v0  ;;  %1139 = vperm.xlu0 %6804, %v8853_v32  }
 0x29c   : > { %v2951_v38 = vmax.f32 %v2794_v63, 0.0  ;;  %v1723_v63 = vsel %vm1484_vm1, %v11960_v62, %v1595_v17 }
 0x29d   : > { %6796 = vset.pattern.permute.xlu1 %v11775_v2  ;;  %6797 = vset.pattern.permute.xlu2 %v11779_v28  ;;  %v2283_v20 = vmax.f32 %v2155_v14, 0.0  ;;  %v240_v14 = vld [vmem:[%s6889_s21 + $0x138] sm:$0xff] }
 0x29e   : > { %517 = vperm.xlu1 %6796, %v8651_v6   ;;  %1115 = vperm.xlu2 %6797, %v237_v43   ;;  %v6649_v43 = vld [vmem:[%s11555_s2 + $0x128] sm:$0xff] }
 0x29f   : > { %v1080_v27 = vpop.permute.xlu1 %1079  ;;  %5120 = vmatpush.bf16.msrb.mxu0 %v6649_v43 }
 0x2a0   : > { %v1513_v61 = vsel %vm1485_vm0, %v1080_v27, 0.0  ;;  %v2028_v7 = vmul.f32 %v6992_v45, %v1080_v27  ;;  %v8907_v62 = vpop.f32.mrf.mxu3 }
 0x2a1   : > { %v8858_v16 = vsel %vm1484_vm1, %v8725_v19, %v1513_v61  ;;  %v8860_v58 = vpop.permute.xlu2 %942  ;;  %v2795_v6 = vpop.f32.mrf.mxu2  ;;  %v1863_v61 = vmul.f32 %v6973_v37, %v8750_v46  ;;  %11964 = vst [vmem:[#allocation83_spill] sm:$0xff] %v8907_v62 }
 0x2a2   : > { %v2156_v0 = vadd.f32 %v2028_v7, %v1899_v33  ;;  %v2796_v19 = vadd.f32 %v2795_v6, %v7301_v1  ;;  %v2563_v27 = vpop.f32.mrf.mxu0  ;;  %v1456_v33 = vpop.permute.xlu0 %1455  ;;  %v11961_v7 = vld [vmem:[#allocation22_spill] sm:$0xff] }
 0x2a3   : > { %v1722_v6 = vsel %vm1484_vm1, %v11961_v7, %v1594_v52  ;;  %v1607_v46 = vsel %vm1485_vm0, %v1456_v33, 0.0  ;;  %v1992_v17 = vadd.f32 %v6983_v42, %v1863_v61  ;;  %v2564_v52 = vadd.f32 %v2563_v27, %v7301_v1 }
 0x2a4   : > { %v2284_v51 = vmax.f32 %v2156_v0, 0.0  ;;  %v2952_v18 = vmax.f32 %v2796_v19, 0.0  ;;  %v8885_v43 = vadd.f32 %v2951_v38, %v1722_v6  ;;  %v2121_v0 = vmul.f32 %v6992_v45, %v8785_v60 }
 0x2a5   : > { %v2122_v60 = vmul.f32 %v6992_v45, %v1456_v33  ;;  %v241_v33 = vld [vmem:[%s6889_s21 + $0x140] sm:$0xff] }
 0x2a6   : > { %11962 = vst [vmem:[#allocation77_spill] sm:$0xff] %v8885_v43  ;;  %v8887_v10 = vadd.f32 %v2952_v18, %v1723_v63  ;;  %522 = vperm.xlu1 %6796, %v8680_v36   ;;  %v2398_v57 = vpack.c.bf16 %v2284_v51, %v2283_v20  ;;  %6798 = vset.pattern.permute.xlu2 %v11775_v2  ;;  %v2859_v63 = vmax.f32 %v2564_v52, 0.0 }
 0x2a7   : > { %527 = vperm.xlu2 %6798, %v240_v14   ;;  %v2249_v19 = vadd.f32 %v2121_v0, %v1992_v17  ;;  %v11965_v17 = vld [vmem:[#allocation48_spill] sm:$0xff] }
 0x2a8   : > { %11963 = vst [vmem:[#allocation22_spill] sm:$0xff] %v8887_v10  ;;  %2587 = vmatmul.bf16.gmra.mxu0 %v2398_v57  ;;  %v938_v38 = vpop.permute.xlu1 %937  ;;  %v3153_v18 = vpack.c.bf16 %v8887_v10, %v8885_v43  ;;  %v1502_v57 = vsel %vm1485_vm0, %v8036_v8, 0.0 }
 0x2a9   : > { %v8900_v51 = vsel %vm1484_vm1, %v938_v38, %v1607_v46  ;;  %v1864_v36 = vmul.f32 %v6973_v37, %v938_v38  ;;  %v8911_v46 = vld [vmem:[%s6889_s21 + $0x168] sm:$0xff]  ;;  %v1630_v0 = vsel %vm1484_vm1, %v11965_v17, %v1502_v57 }
 0x2aa   : > { %v2565_v20 = vpop.f32.mrf.mxu0  ;;  %3507 = vmatmul.bf16.gmra.mxu3 %v3153_v18  ;;  %v8905_v61 = vpop.permute.xlu2 %1463  ;;  %1151 = vperm.xlu0 %6804, %v8911_v46   ;;  %v2377_v18 = vmax.f32 %v2249_v19, 0.0 }
 0x2ab   : > { %v1993_v27 = vadd.f32 %v6983_v42, %v1864_v36  ;;  %v2566_v7 = vadd.f32 %v2565_v20, %v7301_v1  ;;  %v1084_v52 = vpop.permute.xlu0 %1083  ;;  %v6659_v20 = vld [vmem:[%s11556_s3 + $0x38] sm:$0xff] }
 0x2ac   : > { %v1514_v8 = vsel %vm1485_vm0, %v1084_v52, 0.0  ;;  %5831 = vmatpush.bf16.msrb.mxu1 %v6659_v20 }
 0x2ad   : > { %v2250_v6 = vadd.f32 %v2122_v60, %v1993_v27  ;;  %v2860_v38 = vmax.f32 %v2566_v7, 0.0  ;;  %v8927_v60 = vadd.f32 %v2859_v63, %v1630_v0  ;;  %v1772_v63 = vmul.f32 %v6973_v37, %v8837_v4  ;;  %v8947_v0 = vpop.f32.mrf.mxu3 }
 0x2ae   : > { %6799 = vset.pattern.permute.xlu1 %v11779_v28  ;;  %11968 = vst [vmem:[#allocation85_spill] sm:$0xff] %v8947_v0 }
 0x2af   : > { %1127 = vperm.xlu1 %6799, %v240_v14   ;;  %v2378_v36 = vmax.f32 %v2250_v6, 0.0  ;;  %532 = vperm.xlu2 %6798, %v241_v33   ;;  %11966 = vst [vmem:[#allocation48_spill] sm:$0xff] %v8927_v60  ;;  %v8930_v10 = vadd.f32 %v2860_v38, %v8290_v48  ;;  %v8945_v38 = vld [vmem:[%s6889_s21 + $0x170] sm:$0xff]  ;;  %v1901_v20 = vadd.f32 %v6983_v42, %v1772_v63 }
 0x2b0   : > { %v473_v27 = vpop.permute.xlu1 %472  ;;  %v2798_v7 = vpop.f32.mrf.mxu2 }
 0x2b1   : > { %11967 = vst [vmem:[#allocation84_spill] sm:$0xff] %v8930_v10  ;;  %v8934_v14 = vsel %vm1484_vm1, %v473_v27, %v1514_v8  ;;  %v2445_v19 = vpack.c.bf16 %v2378_v36, %v2377_v18  ;;  %v1771_v6 = vmul.f32 %v6973_v37, %v473_v27  ;;  %v3107_v57 = vpack.c.bf16 %v8930_v10, %v8927_v60  ;;  %v245_v10 = vld [vmem:[%s6889_s21 + $0x160] sm:$0xff] }
 0x2b2   : > { %v2799_v48 = vadd.f32 %v2798_v7, %v7301_v1  ;;  %1155 = vperm.xlu0 %6804, %v8945_v38   ;;  %v2029_v36 = vmul.f32 %v6992_v45, %v1084_v52 }
 0x2b3   : > { %2822 = vmatmul.bf16.gmra.mxu2 %v2445_v19  ;;  %v8939_v17 = vpop.permute.xlu2 %487  ;;  %3277 = vmatmul.bf16.gmra.mxu1 %v3107_v57  ;;  %v1900_v18 = vadd.f32 %v6983_v42, %v1771_v6 }
 0x2b4   : > { %v2953_v27 = vmax.f32 %v2799_v48, 0.0 }
 0x2b5   : > { %v2157_v57 = vadd.f32 %v2029_v36, %v1900_v18  ;;  %v6628_v18 = vld [vmem:[%s11555_s2 + $0x80] sm:$0xff] }
 0x2b6   : > { %v8972_v36 = vadd.f32 %v2953_v27, %v8329_v9  ;;  %3823 = vmatpush.bf16.msrb.mxu2 %v6628_v18  ;;  %v8986_v27 = vpop.f32.mrf.mxu3  ;;  %v1092_v18 = vpop.permute.xlu0 %1091 }
 0x2b7   : > { %1131 = vperm.xlu1 %6799, %v241_v33   ;;  %6801 = vset.pattern.permute.xlu2 %v11779_v28  ;;  %11972 = vst [vmem:[#allocation87_spill] sm:$0xff] %v8986_v27 }
 0x2b8   : > { %v2800_v8 = vpop.f32.mrf.mxu2  ;;  %1135 = vperm.xlu2 %6801, %v8825_v11   ;;  %v1866_v11 = vmul.f32 %v6973_v37, %v8532_v24  ;;  %11969 = vst [vmem:[#allocation86_spill] sm:$0xff] %v8972_v36 }
 0x2b9   : > { %v2801_v7 = vadd.f32 %v2800_v8, %v7301_v1  ;;  %v1088_v19 = vpop.permute.xlu1 %1087 }
 0x2ba   : > { %v1515_v6 = vsel %vm1485_vm0, %v1088_v19, 0.0  ;;  %v2030_v43 = vmul.f32 %v6992_v45, %v1088_v19  ;;  %6810 = vset.pattern.permute.xlu0 %v11775_v2 }
 0x2bb   : > { %v2954_v33 = vmax.f32 %v2801_v7, 0.0  ;;  %v8962_v52 = vsel %vm1484_vm1, %v8837_v4, %v1515_v6  ;;  %v8964_v63 = vpop.permute.xlu2 %952  ;;  %v11970_v7 = vld [vmem:[#allocation51_spill] sm:$0xff]  ;;  %v1865_v4 = vmul.f32 %v6973_v37, %v8860_v58  ;;  %v2124_v6 = vmul.f32 %v6992_v45, %v8905_v61 }
 0x2bc   : > { %v2158_v48 = vadd.f32 %v2030_v43, %v1901_v20  ;;  %v2568_v8 = vpop.f32.mrf.mxu0  ;;  %v2285_v43 = vmax.f32 %v2157_v57, 0.0  ;;  %v1995_v20 = vadd.f32 %v6983_v42, %v1866_v11 }
 0x2bd   : > { %v8975_v19 = vadd.f32 %v2954_v33, %v11970_v7  ;;  %v244_v7 = vld [vmem:[%s6889_s21 + $0x158] sm:$0xff]  ;;  %v2569_v57 = vadd.f32 %v2568_v8, %v7301_v1  ;;  %v1994_v0 = vadd.f32 %v6983_v42, %v1865_v4 }
 0x2be   : > { %v2286_v62 = vmax.f32 %v2158_v48, 0.0 }
 0x2bf   : > { %11971 = vst [vmem:[#allocation51_spill] sm:$0xff] %v8975_v19  ;;  %6802 = vset.pattern.permute.xlu1 %v11775_v2  ;;  %v3154_v9 = vpack.c.bf16 %v8975_v19, %v8972_v36  ;;  %v2252_v19 = vadd.f32 %v2124_v6, %v1995_v20 }
 0x2c0   : > { %542 = vperm.xlu1 %6802, %v8853_v32   ;;  %v2399_v33 = vpack.c.bf16 %v2286_v62, %v2285_v43  ;;  %6803 = vset.pattern.permute.xlu2 %v11775_v2 }
 0x2c1   : > { %v1460_v48 = vpop.permute.xlu1 %1459  ;;  %3512 = vmatmul.bf16.gmra.mxu3 %v3154_v9  ;;  %547 = vperm.xlu2 %6803, %v244_v7   ;;  %v2861_v9 = vmax.f32 %v2569_v57, 0.0  ;;  %v2380_v6 = vmax.f32 %v2252_v19, 0.0  ;;  %v9017_v19 = vpop.f32.mrf.mxu3  ;;  %v1516_v57 = vsel %vm1485_vm0, %v1092_v18, 0.0 }
 0x2c2   : > { %v1608_v11 = vsel %vm1485_vm0, %v1460_v48, 0.0  ;;  %v2123_v36 = vmul.f32 %v6992_v45, %v1460_v48  ;;  %2592 = vmatmul.bf16.gmra.mxu0 %v2399_v33  ;;  %11975 = vst [vmem:[#allocation90_spill] sm:$0xff] %v9017_v19 }
 0x2c3   : > { %v8999_v32 = vsel %vm1484_vm1, %v8860_v58, %v1608_v11 }
 0x2c4   : > { %v2251_v62 = vadd.f32 %v2123_v36, %v1994_v0  ;;  %v2570_v8 = vpop.f32.mrf.mxu0  ;;  %v1468_v43 = vpop.permute.xlu2 %1467  ;;  %v9012_v0 = vadd.f32 %v2861_v9, %v8374_v41 }
 0x2c5   : > { %v2571_v27 = vadd.f32 %v2570_v8, %v7301_v1  ;;  %v1610_v4 = vsel %vm1485_vm0, %v1468_v43, 0.0  ;;  %v1774_v8 = vmul.f32 %v6973_v37, %v8939_v17 }
 0x2c6   : > { %v2379_v20 = vmax.f32 %v2251_v62, 0.0  ;;  %v9008_v33 = vsel %vm1484_vm1, %v8964_v63, %v1610_v4  ;;  %11973 = vst [vmem:[#allocation88_spill] sm:$0xff] %v9012_v0 }
 0x2c7   : > { %v2862_v48 = vmax.f32 %v2571_v27, 0.0 }
 0x2c8   : > { %6805 = vset.pattern.permute.xlu1 %v11779_v28  ;;  %v2446_v58 = vpack.c.bf16 %v2380_v6, %v2379_v20  ;;  %v2031_v6 = vmul.f32 %v6992_v45, %v1092_v18  ;;  %v1903_v20 = vadd.f32 %v6983_v42, %v1774_v8 }
 0x2c9   : > { %1143 = vperm.xlu1 %6805, %v244_v7   ;;  %v9015_v36 = vadd.f32 %v2862_v48, %v8411_v22  ;;  %552 = vperm.xlu2 %6803, %v245_v10   ;;  %v1472_v7 = vpop.permute.xlu0 %1471  ;;  %v6638_v48 = vld [vmem:[%s11555_s2 + $0xd0] sm:$0xff] }
 0x2ca   : > { %2827 = vmatmul.bf16.gmra.mxu2 %v2446_v58  ;;  %v483_v11 = vpop.permute.xlu1 %482  ;;  %4536 = vmatpush.bf16.msrb.mxu3 %v6638_v48 }
 0x2cb   : > { %11974 = vst [vmem:[#allocation89_spill] sm:$0xff] %v9015_v36  ;;  %v9023_v27 = vsel %vm1484_vm1, %v483_v11, %v1516_v57  ;;  %v3108_v41 = vpack.c.bf16 %v9015_v36, %v9012_v0  ;;  %v1773_v22 = vmul.f32 %v6973_v37, %v483_v11  ;;  %v9042_v57 = vld [vmem:[%s6889_s21 + $0x188] sm:$0xff]  ;;  %v9044_v11 = vpop.f32.mrf.mxu3 }
 0x2cc   : > { %11976 = vst [vmem:[#allocation91_spill] sm:$0xff] %v9044_v11  ;;  %577 = vperm.xlu0 %6810, %v9042_v57  }
 0x2cd   : > { %3282 = vmatmul.bf16.gmra.mxu1 %v3108_v41  ;;  %v9028_v62 = vpop.permute.xlu2 %497  ;;  %v1902_v4 = vadd.f32 %v6983_v42, %v1773_v22 }
 0x2ce   : > { %v2803_v9 = vpop.f32.mrf.mxu2 }
 0x2cf   : > { %v2159_v41 = vadd.f32 %v2031_v6, %v1902_v4  ;;  %v2804_v22 = vadd.f32 %v2803_v9, %v7301_v1  ;;  %v1867_v9 = vmul.f32 %v6973_v37, %v8964_v63  ;;  %v2125_v63 = vmul.f32 %v6992_v45, %v1468_v43 }
 0x2d1   : > { %6806 = vset.pattern.permute.xlu1 %v11775_v2  ;;  %6807 = vset.pattern.permute.xlu2 %v11779_v28  ;;  %v9058_v11 = vpop.permute.xlu0 %1099  ;;  %v2955_v48 = vmax.f32 %v2804_v22, 0.0  ;;  %v2287_v60 = vmax.f32 %v2159_v41, 0.0  ;;  %v1611_v22 = vsel %vm1485_vm0, %v1472_v7, 0.0 }
 0x2d2   : > { %557 = vperm.xlu1 %6806, %v8911_v46   ;;  %1147 = vperm.xlu2 %6807, %v245_v10  }
 0x2d3   : > { %v1096_v58 = vpop.permute.xlu1 %1095 }
 0x2d4   : > { %v1517_v18 = vsel %vm1485_vm0, %v1096_v58, 0.0  ;;  %v2032_v8 = vmul.f32 %v6992_v45, %v1096_v58  ;;  %v9062_v58 = vpop.f32.mrf.mxu1  ;;  %6814 = vset.pattern.permute.xlu0 %v11779_v28 }
 0x2d5   : > { %v9054_v10 = vsel %vm1484_vm1, %v8939_v17, %v1517_v18  ;;  %v9056_v46 = vpop.permute.xlu2 %962 }
 0x2d6   : > { %v2160_v4 = vadd.f32 %v2032_v8, %v1903_v20  ;;  %v2805_v6 = vpop.f32.mrf.mxu2  ;;  %v1996_v20 = vadd.f32 %v6983_v42, %v1867_v9  ;;  %v9073_v8 = vadd.f32 %v2955_v48, %v8352_v53  ;;  %v9089_v53 = vpop.f32.mrf.mxu3 }
 0x2d7   : > { %v2573_v19 = vpop.f32.mrf.mxu0  ;;  %v2806_v0 = vadd.f32 %v2805_v6, %v7301_v1  ;;  %11979 = vst [vmem:[#allocation94_spill] sm:$0xff] %v9089_v53 }
 0x2d8   : > { %v2288_v36 = vmax.f32 %v2160_v4, 0.0  ;;  %11977 = vst [vmem:[#allocation92_spill] sm:$0xff] %v9073_v8  ;;  %v2126_v4 = vmul.f32 %v6992_v45, %v1472_v7  ;;  %v2253_v9 = vadd.f32 %v2125_v63, %v1996_v20  ;;  %v249_v20 = vld [vmem:[%s6889_s21 + $0x180] sm:$0xff] }
 0x2d9   : > { %v2956_v17 = vmax.f32 %v2806_v0, 0.0  ;;  %v9080_v0 = vld [vmem:[%s6889_s21 + $0x190] sm:$0xff] }
 0x2da   : > { %562 = vperm.xlu1 %6806, %v8945_v38   ;;  %v2400_v18 = vpack.c.bf16 %v2288_v36, %v2287_v60  ;;  %6808 = vset.pattern.permute.xlu2 %v11775_v2  ;;  %v2574_v38 = vadd.f32 %v2573_v19, %v7301_v1  ;;  %v2381_v63 = vmax.f32 %v2253_v9, 0.0  ;;  %v9122_v9 = vld [vmem:[%s6889_s21 + $0x1a8] sm:$0xff] }
 0x2db   : > { %567 = vperm.xlu2 %6808, %v248_v40   ;;  %v9076_v41 = vadd.f32 %v2956_v17, %v8445_v25  ;;  %1171 = vperm.xlu0 %6814, %v9080_v0  }
 0x2dc   : > { %2597 = vmatmul.bf16.gmra.mxu0 %v2400_v18  ;;  %v958_v60 = vpop.permute.xlu1 %957  ;;  %v968_v18 = vpop.permute.xlu0 %967 }
 0x2dd   : > { %11978 = vst [vmem:[#allocation93_spill] sm:$0xff] %v9076_v41  ;;  %v9085_v43 = vsel %vm1484_vm1, %v958_v60, %v1611_v22  ;;  %v1868_v36 = vmul.f32 %v6973_v37, %v958_v60  ;;  %v3155_v25 = vpack.c.bf16 %v9076_v41, %v9073_v8  ;;  %v2863_v22 = vmax.f32 %v2574_v38, 0.0  ;;  %v9102_v8 = vpop.f32.mrf.mxu1  ;;  %v6648_v38 = vld [vmem:[%s11555_s2 + $0x120] sm:$0xff] }
 0x2de   : > { %v1480_v19 = vpop.permute.xlu2 %1479  ;;  %5121 = vmatpush.bf16.msrb.mxu0 %v6648_v38 }
 0x2df   : > { %v1997_v6 = vadd.f32 %v6983_v42, %v1868_v36  ;;  %v2575_v48 = vpop.f32.mrf.mxu0  ;;  %v1613_v17 = vsel %vm1485_vm0, %v1480_v19, 0.0  ;;  %3517 = vmatmul.bf16.gmra.mxu3 %v3155_v25  ;;  %v9110_v25 = vadd.f32 %v2863_v22, %v8500_v21  ;;  %v9127_v21 = vpop.f32.mrf.mxu3 }
 0x2e0   : > { %v2576_v60 = vadd.f32 %v2575_v48, %v7301_v1  ;;  %v9100_v53 = vsel %vm1484_vm1, %v968_v18, %v1613_v17  ;;  %11982 = vst [vmem:[#allocation97_spill] sm:$0xff] %v9127_v21 }
 0x2e1   : > { %v2254_v41 = vadd.f32 %v2126_v4, %v1997_v6  ;;  %11980 = vst [vmem:[#allocation95_spill] sm:$0xff] %v9110_v25 }
 0x2e2   : > { %v2864_v7 = vmax.f32 %v2576_v60, 0.0  ;;  %6809 = vset.pattern.permute.xlu1 %v11779_v28 }
 0x2e3   : > { %1159 = vperm.xlu1 %6809, %v248_v40   ;;  %v2382_v36 = vmax.f32 %v2254_v41, 0.0  ;;  %572 = vperm.xlu2 %6808, %v249_v20  }
 0x2e4   : > { %v9112_v48 = vpop.permute.xlu1 %492  ;;  %v9115_v4 = vadd.f32 %v2864_v7, %v8530_v47  ;;  %1183 = vperm.xlu0 %6814, %v9122_v9   ;;  %v1776_v47 = vmul.f32 %v6973_v37, %v9028_v62 }
 0x2e5   : > { %v2808_v6 = vpop.f32.mrf.mxu2  ;;  %v2447_v17 = vpack.c.bf16 %v2382_v36, %v2381_v63  ;;  %v1775_v40 = vmul.f32 %v6973_v37, %v9112_v48  ;;  %v9132_v7 = vpop.f32.mrf.mxu1  ;;  %v2033_v36 = vmul.f32 %v6992_v45, %v9058_v11 }
 0x2e6   : > { %11981 = vst [vmem:[#allocation96_spill] sm:$0xff] %v9115_v4  ;;  %v3109_v41 = vpack.c.bf16 %v9115_v4, %v9110_v25  ;;  %v2809_v22 = vadd.f32 %v2808_v6, %v7301_v1  ;;  %v1905_v38 = vadd.f32 %v6983_v42, %v1776_v47 }
 0x2e7   : > { %2832 = vmatmul.bf16.gmra.mxu2 %v2447_v17  ;;  %v9124_v60 = vpop.permute.xlu2 %507  ;;  %v1904_v63 = vadd.f32 %v6983_v42, %v1775_v40  ;;  %v1870_v17 = vmul.f32 %v6973_v37, %v968_v18 }
 0x2e8   : > { %3287 = vmatmul.bf16.gmra.mxu1 %v3109_v41  ;;  %v2957_v41 = vmax.f32 %v2809_v22, 0.0 }
 0x2e9   : > { %v2161_v4 = vadd.f32 %v2033_v36, %v1904_v63  ;;  %v1999_v63 = vadd.f32 %v6983_v42, %v1870_v17  ;;  %v6658_v36 = vld [vmem:[%s11556_s3 + $0x30] sm:$0xff] }
 0x2ea   : > { %v9166_v59 = vadd.f32 %v2957_v41, %v8572_v35  ;;  %5832 = vmatpush.bf16.msrb.mxu1 %v6658_v36 }
 0x2eb   : > { %1163 = vperm.xlu1 %6809, %v249_v20   ;;  %6811 = vset.pattern.permute.xlu2 %v11779_v28 }
 0x2ec   : > { %1167 = vperm.xlu2 %6811, %v9042_v57   ;;  %1187 = vperm.xlu0 %6814, %v9146_v44   ;;  %v2128_v57 = vmul.f32 %v6992_v45, %v1480_v19  ;;  %11984 = vst [vmem:[#allocation99_spill] sm:$0xff] %v9166_v59 }
 0x2ed   : > { %v2810_v21 = vpop.f32.mrf.mxu2  ;;  %v1104_v6 = vpop.permute.xlu1 %1103 }
 0x2ee   : > { %v2811_v25 = vadd.f32 %v2810_v21, %v7301_v1  ;;  %v1519_v20 = vsel %vm1485_vm0, %v1104_v6, 0.0  ;;  %v2034_v40 = vmul.f32 %v6992_v45, %v1104_v6  ;;  %v1869_v6 = vmul.f32 %v6973_v37, %v9056_v46  ;;  %v9172_v17 = vpop.f32.mrf.mxu1 }
 0x2ef   : > { %v9151_v47 = vsel %vm1484_vm1, %v9028_v62, %v1519_v20  ;;  %v9153_v18 = vpop.permute.xlu2 %512  ;;  %v9163_v20 = vpop.f32.mrf.mxu3 }
 0x2f0   : > { %v2958_v22 = vmax.f32 %v2811_v25, 0.0  ;;  %v2162_v21 = vadd.f32 %v2034_v40, %v1905_v38  ;;  %11983 = vst [vmem:[#allocation98_spill] sm:$0xff] %v9163_v20  ;;  %v2289_v38 = vmax.f32 %v2161_v4, 0.0  ;;  %v2256_v40 = vadd.f32 %v2128_v57, %v1999_v63 }
 0x2f1   : > { %v2578_v62 = vpop.f32.mrf.mxu0 }
 0x2f2   : > { %v9169_v19 = vadd.f32 %v2958_v22, %v11985_v3  ;;  %v2290_v25 = vmax.f32 %v2162_v21, 0.0  ;;  %v1998_v3 = vadd.f32 %v6983_v42, %v1869_v6  ;;  %v2579_v4 = vadd.f32 %v2578_v62, %v7301_v1 }
 0x2f3   : > { %6812 = vset.pattern.permute.xlu1 %v11775_v2  ;;  %v2384_v63 = vmax.f32 %v2256_v40, 0.0 }
 0x2f4   : > { %11986 = vst [vmem:[#allocation29_spill] sm:$0xff] %v9169_v19  ;;  %582 = vperm.xlu1 %6812, %v9080_v0   ;;  %v2401_v34 = vpack.c.bf16 %v2290_v25, %v2289_v38  ;;  %v3156_v20 = vpack.c.bf16 %v9169_v19, %v9166_v59  ;;  %6813 = vset.pattern.permute.xlu2 %v11775_v2  ;;  %v1108_v0 = vpop.permute.xlu0 %1107  ;;  %v2865_v25 = vmax.f32 %v2579_v4, 0.0 }
 0x2f5   : > { %v1476_v35 = vpop.permute.xlu1 %1475  ;;  %587 = vperm.xlu2 %6813, %v252_v55   ;;  %6820 = vset.pattern.permute.xlu0 %v11775_v2 }
 0x2f6   : > { %v1612_v41 = vsel %vm1485_vm0, %v1476_v35, 0.0  ;;  %v2127_v57 = vmul.f32 %v6992_v45, %v1476_v35  ;;  %2602 = vmatmul.bf16.gmra.mxu0 %v2401_v34  ;;  %3522 = vmatmul.bf16.gmra.mxu3 %v3156_v20  ;;  %v9202_v35 = vpop.f32.mrf.mxu1 }
 0x2f7   : > { %v9188_v22 = vsel %vm1484_vm1, %v9056_v46, %v1612_v41  ;;  %v253_v46 = vld [vmem:[%s6889_s21 + $0x1a0] sm:$0xff]  ;;  %v9204_v40 = vpop.f32.mrf.mxu3 }
 0x2f8   : > { %v2255_v21 = vadd.f32 %v2127_v57, %v1998_v3  ;;  %v9190_v36 = vpop.permute.xlu2 %1115  ;;  %11988 = vst [vmem:[#allocation101_spill] sm:$0xff] %v9204_v40  ;;  %v1520_v3 = vsel %vm1485_vm0, %v1108_v0, 0.0  ;;  %v9210_v57 = vadd.f32 %v2865_v25, %v8612_v54  ;;  %v1778_v54 = vmul.f32 %v6973_v37, %v9124_v60 }
 0x2f9   : > { %v2580_v6 = vpop.f32.mrf.mxu0  ;;  %v1522_v62 = vsel %vm1485_vm0, %v9190_v36, 0.0 }
 0x2fa   : > { %v2383_v34 = vmax.f32 %v2255_v21, 0.0  ;;  %v2581_v20 = vadd.f32 %v2580_v6, %v7301_v1  ;;  %v9199_v38 = vsel %vm1484_vm1, %v9153_v18, %v1522_v62  ;;  %11989 = vst [vmem:[#allocation102_spill] sm:$0xff] %v9210_v57 }
 0x2fb   : > { %11987 = vst [vmem:[#allocation100_spill] sm:$0xff] %v9199_v38 }
 0x2fc   : > { %v2866_v41 = vmax.f32 %v2581_v20, 0.0  ;;  %6815 = vset.pattern.permute.xlu1 %v11779_v28  ;;  %v2448_v4 = vpack.c.bf16 %v2384_v63, %v2383_v34  ;;  %v1120_v63 = vpop.permute.xlu0 %1119  ;;  %v11992_v34 = vld [vmem:[#allocation57_spill] sm:$0xff] }
 0x2fd   : > { %1175 = vperm.xlu1 %6815, %v252_v55   ;;  %592 = vperm.xlu2 %6813, %v253_v46  }
 0x2fe   : > { %2837 = vmatmul.bf16.gmra.mxu2 %v2448_v4  ;;  %v503_v21 = vpop.permute.xlu1 %502  ;;  %v9213_v6 = vadd.f32 %v2866_v41, %v8647_v13  ;;  %v3241_v13 = vadd.f32 %v9102_v8, %v11992_v34  ;;  %v2035_v41 = vmul.f32 %v6992_v45, %v1108_v0  ;;  %v3239_v4 = vadd.f32 %v9062_v58, %v11992_v34 }
 0x2ff   : > { %v9217_v62 = vsel %vm1484_vm1, %v503_v21, %v1520_v3  ;;  %v1777_v19 = vmul.f32 %v6973_v37, %v503_v21  ;;  %v9234_v21 = vpop.f32.mrf.mxu1  ;;  %v9236_v59 = vpop.f32.mrf.mxu3 }
 0x300   : > { %11990 = vst [vmem:[#allocation103_spill] sm:$0xff] %v9213_v6  ;;  %v3110_v20 = vpack.c.bf16 %v9213_v6, %v9210_v57 }
 0x301   : > { %11991 = vst [vmem:[#allocation104_spill] sm:$0xff] %v9217_v62  ;;  %v9222_v55 = vpop.permute.xlu2 %527  ;;  %v1906_v3 = vadd.f32 %v6983_v42, %v1777_v19  ;;  %v3559_v19 = vmax.f32 %v3241_v13, 0.0 }
 0x302   : > { %v2813_v25 = vpop.f32.mrf.mxu2  ;;  %3292 = vmatmul.bf16.gmra.mxu1 %v3110_v20  ;;  %11993 = vst [vmem:[#allocation57_spill] sm:$0xff] %v9236_v59  ;;  %v1907_v20 = vadd.f32 %v6983_v42, %v1778_v54  ;;  %v3558_v54 = vmax.f32 %v3239_v4, 0.0 }
 0x303   : > { %v2814_v8 = vadd.f32 %v2813_v25, %v7301_v1  ;;  %v2163_v40 = vadd.f32 %v2035_v41, %v1906_v3 }
 0x304   : > { %v9251_v49 = vpop.permute.xlu0 %1123  ;;  %v3686_v3 = vpack.c.bf16 %v3559_v19, %v3558_v54  ;;  %v6637_v54 = vld [vmem:[%s11555_s2 + $0xc8] sm:$0xff] }
 0x305   : > { %6816 = vset.pattern.permute.xlu1 %v11775_v2  ;;  %6817 = vset.pattern.permute.xlu2 %v11779_v28  ;;  %v2959_v25 = vmax.f32 %v2814_v8, 0.0  ;;  %v1523_v8 = vsel %vm1485_vm0, %v1120_v63, 0.0 }
 0x306   : > { %597 = vperm.xlu1 %6816, %v9122_v9   ;;  %1179 = vperm.xlu2 %6817, %v253_v46  }
 0x307   : > { %v1112_v0 = vpop.permute.xlu1 %1111  ;;  %v9254_v62 = vpop.f32.mrf.mxu1  ;;  %4537 = vmatpush.bf16.msrb.mxu3 %v6637_v54 }
 0x308   : > { %v1521_v6 = vsel %vm1485_vm0, %v1112_v0, 0.0  ;;  %v2036_v57 = vmul.f32 %v6992_v45, %v1112_v0  ;;  %v2291_v0 = vmax.f32 %v2163_v40, 0.0  ;;  %v9267_v40 = vpop.f32.mrf.mxu3 }
 0x309   : > { %v9247_v58 = vsel %vm1484_vm1, %v9124_v60, %v1521_v6  ;;  %v9249_v59 = vpop.permute.xlu2 %532  ;;  %v9260_v6 = vadd.f32 %v2959_v25, %v8588_v26  ;;  %11996 = vst [vmem:[#allocation107_spill] sm:$0xff] %v9267_v40 }
 0x30a   : > { %v2164_v9 = vadd.f32 %v2036_v57, %v1907_v20  ;;  %v2815_v46 = vpop.f32.mrf.mxu2  ;;  %v1779_v57 = vmul.f32 %v6973_v37, %v9153_v18  ;;  %v256_v20 = vld [vmem:[%s6889_s21 + $0x1b8] sm:$0xff] }
 0x30b   : > { %v2816_v13 = vadd.f32 %v2815_v46, %v7301_v1  ;;  %v2583_v41 = vpop.f32.mrf.mxu0  ;;  %11994 = vst [vmem:[#allocation105_spill] sm:$0xff] %v9260_v6  ;;  %v2038_v46 = vmul.f32 %v6992_v45, %v1120_v63 }
 0x30c   : > { %v2292_v23 = vmax.f32 %v2164_v9, 0.0  ;;  %v1908_v9 = vadd.f32 %v6983_v42, %v1779_v57 }
 0x30d   : > { %v2960_v38 = vmax.f32 %v2816_v13, 0.0 }
 0x30e   : > { %602 = vperm.xlu1 %6816, %v9146_v44   ;;  %3824 = vmatmul.bf16.vlgmr.msrb.gmra.mxu2 %v3686_v3  ;;  %v2402_v60 = vpack.c.bf16 %v2292_v23, %v2291_v0  ;;  %v2584_v44 = vadd.f32 %v2583_v41, %v7301_v1  ;;  %v9289_v41 = vpop.permute.xlu0 %537  ;;  %v258_v3 = vld [vmem:[%s6889_s21 + $0x1c8] sm:$0xff]  ;;  %v2037_v0 = vmul.f32 %v6992_v45, %v9190_v36  ;;  %v257_v36 = vld [vmem:[%s6889_s21 + $0x1c0] sm:$0xff] }
 0x30f   : > { %v9263_v4 = vadd.f32 %v2960_v38, %v8685_v5  ;;  %6818 = vset.pattern.permute.xlu2 %v11775_v2  ;;  %v3246_v38 = vadd.f32 %v9172_v17, %v11992_v34  ;;  %617 = vperm.xlu0 %6820, %v258_v3  }
 0x310   : > { %2607 = vmatmul.bf16.gmra.mxu0 %v2402_v60  ;;  %v518_v23 = vpop.permute.xlu1 %517  ;;  %607 = vperm.xlu2 %6818, %v256_v20   ;;  %v2867_v60 = vmax.f32 %v2584_v44, 0.0  ;;  %v9307_v44 = vpop.f32.mrf.mxu1 }
 0x311   : > { %11995 = vst [vmem:[#allocation106_spill] sm:$0xff] %v9263_v4  ;;  %v9274_v26 = vsel %vm1484_vm1, %v518_v23, %v1523_v8  ;;  %v1780_v5 = vmul.f32 %v6973_v37, %v518_v23  ;;  %v3157_v18 = vpack.c.bf16 %v9263_v4, %v9260_v6  ;;  %v3244_v8 = vadd.f32 %v9132_v7, %v11992_v34 }
 0x312   : > { %v9281_v19 = vpop.permute.xlu2 %1135  ;;  %v9313_v54 = vadd.f32 %v2867_v60, %v8720_v56  ;;  %v259_v60 = vld [vmem:[%s6889_s21 + $0x1d0] sm:$0xff] }
 0x313   : > { %v1909_v25 = vadd.f32 %v6983_v42, %v1780_v5  ;;  %v2585_v13 = vpop.f32.mrf.mxu0  ;;  %3527 = vmatmul.bf16.gmra.mxu3 %v3157_v18  ;;  %v1527_v17 = vsel %vm1485_vm0, %v9281_v19, 0.0  ;;  %v3561_v18 = vmax.f32 %v3246_v38, 0.0 }
 0x314   : > { %v2586_v57 = vadd.f32 %v2585_v13, %v7301_v1  ;;  %v9301_v63 = vsel %vm1484_vm1, %v9289_v41, %v1527_v17  ;;  %v2165_v13 = vadd.f32 %v2037_v0, %v1908_v9  ;;  %v1524_v17 = vsel %vm1485_vm0, %v9251_v49, 0.0  ;;  %11997 = vst [vmem:[#allocation108_spill] sm:$0xff] %v9313_v54  ;;  %v9322_v9 = vpop.f32.mrf.mxu3 }
 0x315   : > { %v2166_v23 = vadd.f32 %v2038_v46, %v1909_v25  ;;  %v3560_v25 = vmax.f32 %v3244_v8, 0.0  ;;  %11999 = vst [vmem:[#allocation110_spill] sm:$0xff] %v9322_v9  ;;  %v260_v9 = vld [vmem:[%s6889_s21 + $0x1d8] sm:$0xff] }
 0x316   : > { %v2868_v5 = vmax.f32 %v2586_v57, 0.0  ;;  %6819 = vset.pattern.permute.xlu1 %v11779_v28  ;;  %v2293_v56 = vmax.f32 %v2165_v13, 0.0 }
 0x317   : > { %1191 = vperm.xlu1 %6819, %v256_v20   ;;  %v2294_v57 = vmax.f32 %v2166_v23, 0.0  ;;  %6824 = vset.pattern.permute.xlu0 %v11779_v28 }
 0x318   : > { %v9316_v7 = vadd.f32 %v2868_v5, %v8755_v29  ;;  %v523_v46 = vpop.permute.xlu1 %522  ;;  %612 = vperm.xlu2 %6818, %v257_v36   ;;  %v3687_v29 = vpack.c.bf16 %v3561_v18, %v3560_v25  ;;  %v1782_v5 = vmul.f32 %v6973_v37, %v9222_v55  ;;  %1203 = vperm.xlu0 %6824, %v259_v60   ;;  %v9333_v6 = vpop.f32.mrf.mxu1  ;;  %v1605_v18 = vsel %vm1485_vm0, %v8688_v39, 0.0 }
 0x319   : > { %v9320_v20 = vsel %vm1484_vm1, %v523_v46, %v1524_v17  ;;  %v2818_v38 = vpop.f32.mrf.mxu2  ;;  %v2403_v17 = vpack.c.bf16 %v2294_v57, %v2293_v56  ;;  %v1781_v23 = vmul.f32 %v6973_v37, %v523_v46 }
 0x31a   : > { %11998 = vst [vmem:[#allocation109_spill] sm:$0xff] %v9316_v7  ;;  %v3111_v0 = vpack.c.bf16 %v9316_v7, %v9313_v54  ;;  %v2819_v8 = vadd.f32 %v2818_v38, %v7301_v1  ;;  %v1911_v13 = vadd.f32 %v6983_v42, %v1782_v5 }
 0x31b   : > { %v9326_v4 = vpop.permute.xlu2 %547 }
 0x31c   : > { %3297 = vmatmul.bf16.gmra.mxu1 %v3111_v0  ;;  %v2961_v38 = vmax.f32 %v2819_v8, 0.0  ;;  %v9354_v5 = vpop.f32.mrf.mxu3 }
 0x31d   : > { %12000 = vst [vmem:[#allocation111_spill] sm:$0xff] %v9354_v5 }
 0x31e   : > { %3829 = vmatmul.bf16.gmra.mxu2 %v3687_v29  ;;  %v3251_v29 = vadd.f32 %v9234_v21, %v11992_v34 }
 0x31f   : > { %1195 = vperm.xlu1 %6819, %v257_v36  }
 0x320   : > { %2612 = vmatmul.bf16.gmra.mxu0 %v2403_v17  ;;  %6821 = vset.pattern.permute.xlu2 %v11779_v28  ;;  %v6647_v17 = vld [vmem:[%s11555_s2 + $0x118] sm:$0xff]  ;;  %v3563_v40 = vmax.f32 %v3251_v29, 0.0 }
 0x321   : > { %v2820_v25 = vpop.f32.mrf.mxu2  ;;  %v1128_v0 = vpop.permute.xlu1 %1127  ;;  %1199 = vperm.xlu2 %6821, %v258_v3   ;;  %v1910_v3 = vadd.f32 %v6983_v42, %v1781_v23  ;;  %v2039_v23 = vmul.f32 %v6992_v45, %v9251_v49  ;;  %5122 = vmatpush.bf16.msrb.mxu0 %v6647_v17  ;;  %v9394_v17 = vld [vmem:[%s6889_s21 + $0x1f0] sm:$0xff] }
 0x322   : > { %v2821_v36 = vadd.f32 %v2820_v25, %v7301_v1  ;;  %v1525_v57 = vsel %vm1485_vm0, %v1128_v0, 0.0  ;;  %v2040_v46 = vmul.f32 %v6992_v45, %v1128_v0  ;;  %v9361_v25 = vld [vmem:[%s6889_s21 + $0x1e8] sm:$0xff]  ;;  %v3249_v0 = vadd.f32 %v9202_v35, %v11992_v34 }
 0x323   : > { %v9348_v56 = vsel %vm1484_vm1, %v9222_v55, %v1525_v57  ;;  %v9350_v39 = vpop.permute.xlu2 %552  ;;  %v1733_v55 = vsel %vm1484_vm1, %v8502_v12, %v1605_v18  ;;  %1215 = vperm.xlu0 %6824, %v9361_v25   ;;  %v2167_v12 = vadd.f32 %v2039_v23, %v1910_v3 }
 0x324   : > { %v2962_v8 = vmax.f32 %v2821_v36, 0.0  ;;  %v9372_v36 = vadd.f32 %v2961_v38, %v8793_v50  ;;  %v2168_v5 = vadd.f32 %v2040_v46, %v1911_v13  ;;  %v3562_v49 = vmax.f32 %v3249_v0, 0.0  ;;  %v9381_v50 = vpop.f32.mrf.mxu1  ;;  %v1140_v0 = vpop.permute.xlu0 %1139 }
 0x325   : > { %v2588_v21 = vpop.f32.mrf.mxu0  ;;  %v2295_v3 = vmax.f32 %v2167_v12, 0.0  ;;  %v9402_v23 = vpop.f32.mrf.mxu3 }
 0x326   : > { %12001 = vst [vmem:[#allocation112_spill] sm:$0xff] %v9372_v36  ;;  %v9374_v57 = vadd.f32 %v2962_v8, %v1733_v55  ;;  %v2296_v38 = vmax.f32 %v2168_v5, 0.0  ;;  %v2589_v13 = vadd.f32 %v2588_v21, %v7301_v1  ;;  %v1784_v5 = vmul.f32 %v6973_v37, %v9289_v41 }
 0x327   : > { %6822 = vset.pattern.permute.xlu1 %v11775_v2  ;;  %12003 = vst [vmem:[#allocation114_spill] sm:$0xff] %v9402_v23  ;;  %v1783_v41 = vmul.f32 %v6973_v37, %v9249_v59 }
 0x328   : > { %12002 = vst [vmem:[#allocation113_spill] sm:$0xff] %v9374_v57  ;;  %v3158_v35 = vpack.c.bf16 %v9374_v57, %v9372_v36  ;;  %622 = vperm.xlu1 %6822, %v259_v60   ;;  %v3688_v60 = vpack.c.bf16 %v3563_v40, %v3562_v49  ;;  %v2404_v12 = vpack.c.bf16 %v2296_v38, %v2295_v3  ;;  %v1528_v57 = vsel %vm1485_vm0, %v1140_v0, 0.0 }
 0x329   : > { %v1132_v18 = vpop.permute.xlu1 %1131  ;;  %6823 = vset.pattern.permute.xlu2 %v11775_v2  ;;  %v2042_v3 = vmul.f32 %v6992_v45, %v9281_v19  ;;  %v1912_v19 = vadd.f32 %v6983_v42, %v1783_v41 }
 0x32a   : > { %v1526_v46 = vsel %vm1485_vm0, %v1132_v18, 0.0  ;;  %3532 = vmatmul.bf16.gmra.mxu3 %v3158_v35  ;;  %627 = vperm.xlu2 %6823, %v260_v9   ;;  %v2869_v35 = vmax.f32 %v2589_v13, 0.0  ;;  %v1913_v13 = vadd.f32 %v6983_v42, %v1784_v5 }
 0x32b   : > { %v9389_v29 = vsel %vm1484_vm1, %v9249_v59, %v1526_v46  ;;  %1219 = vperm.xlu0 %6824, %v9394_v17   ;;  %v2041_v59 = vmul.f32 %v6992_v45, %v1132_v18 }
 0x32c   : > { %v9391_v8 = vpop.permute.xlu2 %1147  ;;  %v9419_v38 = vadd.f32 %v2869_v35, %v8830_v30  ;;  %v3256_v30 = vadd.f32 %v9307_v44, %v11992_v34  ;;  %v2170_v5 = vadd.f32 %v2042_v3, %v1913_v13  ;;  %v261_v44 = vld [vmem:[%s6889_s21 + $0x1e0] sm:$0xff] }
 0x32d   : > { %v2590_v55 = vpop.f32.mrf.mxu0  ;;  %v1530_v21 = vsel %vm1485_vm0, %v9391_v8, 0.0  ;;  %v2169_v35 = vadd.f32 %v2041_v59, %v1912_v19  ;;  %v9445_v23 = vpop.f32.mrf.mxu3 }
 0x32e   : > { %v2591_v40 = vadd.f32 %v2590_v55, %v7301_v1  ;;  %3834 = vmatmul.bf16.gmra.mxu2 %v3688_v60  ;;  %v9408_v49 = vsel %vm1484_vm1, %v9350_v39, %v1530_v21  ;;  %v9416_v60 = vpop.f32.mrf.mxu1  ;;  %12004 = vst [vmem:[#allocation115_spill] sm:$0xff] %v9419_v38  ;;  %v3565_v36 = vmax.f32 %v3256_v30, 0.0 }
 0x32f   : > { %12006 = vst [vmem:[#allocation117_spill] sm:$0xff] %v9445_v23 }
 0x330   : > { %v2870_v46 = vmax.f32 %v2591_v40, 0.0  ;;  %2617 = vmatmul.bf16.gmra.mxu0 %v2404_v12  ;;  %6825 = vset.pattern.permute.xlu1 %v11779_v28  ;;  %v6657_v40 = vld [vmem:[%s11556_s3 + $0x28] sm:$0xff] }
 0x331   : > { %1207 = vperm.xlu1 %6825, %v260_v9   ;;  %5833 = vmatpush.bf16.msrb.mxu1 %v6657_v40  ;;  %v2297_v40 = vmax.f32 %v2169_v35, 0.0 }
 0x332   : > { %v9425_v55 = vadd.f32 %v2870_v46, %v8858_v16  ;;  %v543_v21 = vpop.permute.xlu1 %542  ;;  %v3254_v16 = vadd.f32 %v9254_v62, %v11992_v34  ;;  %632 = vperm.xlu2 %6823, %v261_v44  }
 0x333   : > { %v9432_v9 = vsel %vm1484_vm1, %v543_v21, %v1528_v57  ;;  %v9443_v57 = vpop.permute.xlu0 %1151 }
 0x334   : > { %12005 = vst [vmem:[#allocation116_spill] sm:$0xff] %v9425_v55  ;;  %v3112_v18 = vpack.c.bf16 %v9425_v55, %v9419_v38  ;;  %v3564_v41 = vmax.f32 %v3254_v16, 0.0  ;;  %v2298_v55 = vmax.f32 %v2170_v5, 0.0 }
 0x335   : > { %v9441_v46 = vpop.permute.xlu2 %567  ;;  %v9469_v7 = vpop.f32.mrf.mxu3 }
 0x336   : > { %v2823_v12 = vpop.f32.mrf.mxu2  ;;  %3302 = vmatmul.bf16.gmra.mxu1 %v3112_v18  ;;  %v9451_v3 = vpop.f32.mrf.mxu1  ;;  %v3689_v30 = vpack.c.bf16 %v3565_v36, %v3564_v41  ;;  %v1786_v18 = vmul.f32 %v6973_v37, %v9326_v4  ;;  %v2405_v5 = vpack.c.bf16 %v2298_v55, %v2297_v40  ;;  %v2043_v36 = vmul.f32 %v6992_v45, %v1140_v0 }
 0x337   : > { %v2824_v62 = vadd.f32 %v2823_v12, %v7301_v1  ;;  %12007 = vst [vmem:[#allocation118_spill] sm:$0xff] %v9469_v7  ;;  %v1531_v40 = vsel %vm1485_vm0, %v9443_v57, 0.0 }
 0x339   : > { %6826 = vset.pattern.permute.xlu1 %v11775_v2  ;;  %v2963_v12 = vmax.f32 %v2824_v62, 0.0  ;;  %v3261_v62 = vadd.f32 %v9381_v50, %v11992_v34 }
 0x33a   : > { %637 = vperm.xlu1 %6826, %v9361_v25   ;;  %v1785_v25 = vmul.f32 %v6973_v37, %v543_v21  ;;  %6827 = vset.pattern.permute.xlu2 %v11779_v28 }
 0x33b   : > { %v1144_v13 = vpop.permute.xlu1 %1143  ;;  %v9480_v0 = vadd.f32 %v2963_v12, %v8805_v31  ;;  %1211 = vperm.xlu2 %6827, %v261_v44   ;;  %v3567_v50 = vmax.f32 %v3261_v62, 0.0 }
 0x33c   : > { %v1529_v59 = vsel %vm1485_vm0, %v1144_v13, 0.0  ;;  %v1914_v21 = vadd.f32 %v6983_v42, %v1785_v25  ;;  %v2044_v55 = vmul.f32 %v6992_v45, %v1144_v13 }
 0x33d   : > { %v9458_v19 = vsel %vm1484_vm1, %v9326_v4, %v1529_v59  ;;  %v9463_v35 = vpop.permute.xlu2 %572  ;;  %v9467_v59 = vpop.permute.xlu0 %1155  ;;  %v1915_v4 = vadd.f32 %v6983_v42, %v1786_v18  ;;  %12008 = vst [vmem:[#allocation119_spill] sm:$0xff] %v9480_v0 }
 0x33e   : > { %v2825_v16 = vpop.f32.mrf.mxu2  ;;  %3839 = vmatmul.bf16.gmra.mxu2 %v3689_v30  ;;  %v9487_v13 = vpop.f32.mrf.mxu1  ;;  %v2171_v25 = vadd.f32 %v2043_v36, %v1914_v21 }
 0x33f   : > { %v2826_v23 = vadd.f32 %v2825_v16, %v7301_v1  ;;  %v2593_v38 = vpop.f32.mrf.mxu0  ;;  %v2172_v44 = vadd.f32 %v2044_v55, %v1915_v4  ;;  %v9507_v54 = vpop.f32.mrf.mxu3 }
 0x340   : > { %2622 = vmatmul.bf16.gmra.mxu0 %v2405_v5  ;;  %v2594_v30 = vadd.f32 %v2593_v38, %v7301_v1  ;;  %v264_v38 = vld [vmem:[%s6889_s21 + $0x1f8] sm:$0xff]  ;;  %12010 = vst [vmem:[#allocation121_spill] sm:$0xff] %v9507_v54  ;;  %v2299_v36 = vmax.f32 %v2171_v25, 0.0  ;;  %v1787_v25 = vmul.f32 %v6973_v37, %v9350_v39 }
 0x341   : > { %v2964_v41 = vmax.f32 %v2826_v23, 0.0  ;;  %v2300_v4 = vmax.f32 %v2172_v44, 0.0 }
 0x342   : > { %642 = vperm.xlu1 %6826, %v9394_v17   ;;  %v3259_v17 = vadd.f32 %v9333_v6, %v11992_v34  ;;  %v2871_v5 = vmax.f32 %v2594_v30, 0.0  ;;  %v1532_v30 = vsel %vm1485_vm0, %v9467_v59, 0.0 }
 0x343   : > { %v9483_v23 = vadd.f32 %v2964_v41, %v8900_v51  ;;  %6828 = vset.pattern.permute.xlu2 %v11775_v2 }
 0x344   : > { %v558_v18 = vpop.permute.xlu1 %557  ;;  %v3566_v7 = vmax.f32 %v3259_v17, 0.0  ;;  %v9517_v62 = vadd.f32 %v2871_v5, %v8934_v14  ;;  %647 = vperm.xlu2 %6828, %v264_v38   ;;  %v2406_v5 = vpack.c.bf16 %v2300_v4, %v2299_v36  ;;  %v3266_v36 = vadd.f32 %v9451_v3, %v11992_v34 }
 0x345   : > { %12009 = vst [vmem:[#allocation120_spill] sm:$0xff] %v9483_v23  ;;  %v9494_v31 = vsel %vm1484_vm1, %v558_v18, %v1531_v40  ;;  %v3159_v51 = vpack.c.bf16 %v9483_v23, %v9480_v0  ;;  %v9502_v6 = vpop.permute.xlu0 %577 }
 0x346   : > { %v9500_v41 = vpop.permute.xlu2 %1167  ;;  %12011 = vst [vmem:[#allocation122_spill] sm:$0xff] %v9517_v62  ;;  %v3270_v14 = vpop.f32.mrf.mxu1 }
 0x347   : > { %v2595_v16 = vpop.f32.mrf.mxu0  ;;  %3537 = vmatmul.bf16.gmra.mxu3 %v3159_v51  ;;  %v1535_v40 = vsel %vm1485_vm0, %v9500_v41, 0.0  ;;  %v9548_v4 = vpop.f32.mrf.mxu3 }
 0x348   : > { %v2596_v12 = vadd.f32 %v2595_v16, %v7301_v1  ;;  %v9513_v55 = vsel %vm1484_vm1, %v9502_v6, %v1535_v40  ;;  %v1788_v16 = vmul.f32 %v6973_v37, %v558_v18  ;;  %v2046_v18 = vmul.f32 %v6992_v45, %v9443_v57  ;;  %12013 = vst [vmem:[#allocation124_spill] sm:$0xff] %v9548_v4 }
 0x34a   : > { %v2872_v21 = vmax.f32 %v2596_v12, 0.0  ;;  %6829 = vset.pattern.permute.xlu1 %v11779_v28  ;;  %v3690_v28 = vpack.c.bf16 %v3567_v50, %v3566_v7  ;;  %v6636_v7 = vld [vmem:[%s11555_s2 + $0xc0] sm:$0xff]  ;;  %v1916_v50 = vadd.f32 %v6983_v42, %v1787_v25  ;;  %v2045_v12 = vmul.f32 %v6992_v45, %v9391_v8 }
 0x34b   : > { %1223 = vperm.xlu1 %6829, %v264_v38   ;;  %v1917_v38 = vadd.f32 %v6983_v42, %v1788_v16  ;;  %4538 = vmatpush.bf16.msrb.mxu3 %v6636_v7  ;;  %v3264_v8 = vadd.f32 %v9416_v60, %v11992_v34 }
 0x34c   : > { %v9523_v17 = vadd.f32 %v2872_v21, %v8962_v52  ;;  %v563_v51 = vpop.permute.xlu1 %562  ;;  %v1609_v21 = vsel %vm1485_vm0, %v8905_v61, 0.0  ;;  %v3569_v61 = vmax.f32 %v3266_v36, 0.0 }
 0x34d   : > { %v9529_v44 = vsel %vm1484_vm1, %v563_v51, %v1532_v30  ;;  %v2828_v2 = vpop.f32.mrf.mxu2  ;;  %v2173_v30 = vadd.f32 %v2045_v12, %v1916_v50  ;;  %v2174_v16 = vadd.f32 %v2046_v18, %v1917_v38  ;;  %v1737_v60 = vsel %vm1484_vm1, %v8532_v24, %v1609_v21 }
 0x34e   : > { %12012 = vst [vmem:[#allocation123_spill] sm:$0xff] %v9523_v17  ;;  %3844 = vmatmul.bf16.gmra.mxu2 %v3690_v28  ;;  %v3113_v52 = vpack.c.bf16 %v9523_v17, %v9517_v62  ;;  %v2829_v40 = vadd.f32 %v2828_v2, %v7301_v1  ;;  %v9555_v25 = vpop.f32.mrf.mxu1  ;;  %v3568_v50 = vmax.f32 %v3264_v8, 0.0  ;;  %v1790_v24 = vmul.f32 %v6973_v37, %v9441_v46 }
 0x34f   : > { %v9537_v39 = vpop.permute.xlu2 %587  ;;  %v2301_v38 = vmax.f32 %v2173_v30, 0.0  ;;  %v2302_v23 = vmax.f32 %v2174_v16, 0.0  ;;  %v9575_v0 = vpop.f32.mrf.mxu3 }
 0x350   : > { %2627 = vmatmul.bf16.gmra.mxu0 %v2406_v5  ;;  %3307 = vmatmul.bf16.gmra.mxu1 %v3113_v52  ;;  %v2965_v2 = vmax.f32 %v2829_v40, 0.0  ;;  %12016 = vst [vmem:[#allocation127_spill] sm:$0xff] %v9575_v0  ;;  %v1791_v0 = vmul.f32 %v6973_v37, %v9463_v35 }
 0x351   : > { %v2407_v8 = vpack.c.bf16 %v2302_v23, %v2301_v38  ;;  %v9597_v38 = vpop.permute.xlu0 %1171 }
 0x352   : > { %v9571_v40 = vadd.f32 %v2965_v2, %v8999_v32  ;;  %v1789_v2 = vmul.f32 %v6973_v37, %v563_v51 }
 0x354   : > { %12014 = vst [vmem:[#allocation125_spill] sm:$0xff] %v9571_v40  ;;  %v1918_v51 = vadd.f32 %v6983_v42, %v1789_v2 }
 0x355   : > { %v2830_v28 = vpop.f32.mrf.mxu2  ;;  %v1160_v57 = vpop.permute.xlu1 %1159 }
 0x356   : > { %v2831_v5 = vadd.f32 %v2830_v28, %v7301_v1  ;;  %v1533_v3 = vsel %vm1485_vm0, %v1160_v57, 0.0  ;;  %v3275_v16 = vpop.f32.mrf.mxu1 }
 0x357   : > { %v9563_v52 = vsel %vm1484_vm1, %v9441_v46, %v1533_v3  ;;  %v9568_v18 = vpop.permute.xlu2 %592  ;;  %v1919_v46 = vadd.f32 %v6983_v42, %v1790_v24 }
 0x358   : > { %v2966_v7 = vmax.f32 %v2831_v5, 0.0  ;;  %v3691_v5 = vpack.c.bf16 %v3569_v61, %v3568_v50  ;;  %v6646_v50 = vld [vmem:[%s11555_s2 + $0x110] sm:$0xff] }
 0x359   : > { %v2598_v12 = vpop.f32.mrf.mxu0  ;;  %5123 = vmatpush.bf16.msrb.mxu0 %v6646_v50 }
 0x35a   : > { %v9573_v28 = vadd.f32 %v2966_v7, %v1737_v60  ;;  %v2599_v21 = vadd.f32 %v2598_v12, %v7301_v1  ;;  %v2048_v7 = vmul.f32 %v6992_v45, %v1160_v57  ;;  %v3271_v12 = vadd.f32 %v3270_v14, %v11992_v34  ;;  %v9610_v14 = vpop.f32.mrf.mxu3 }
 0x35b   : > { %v1536_v57 = vsel %vm1485_vm0, %v9597_v38, 0.0  ;;  %12017 = vst [vmem:[#allocation128_spill] sm:$0xff] %v9610_v14 }
 0x35c   : > { %12015 = vst [vmem:[#allocation126_spill] sm:$0xff] %v9573_v28  ;;  %v3160_v36 = vpack.c.bf16 %v9573_v28, %v9571_v40  ;;  %v2873_v60 = vmax.f32 %v2599_v21, 0.0  ;;  %v3269_v21 = vadd.f32 %v9487_v13, %v11992_v34  ;;  %v3571_v50 = vmax.f32 %v3271_v12, 0.0 }
 0x35d   : > { %v1164_v3 = vpop.permute.xlu1 %1163  ;;  %v1792_v12 = vmul.f32 %v6973_v37, %v9502_v6 }
 0x35e   : > { %3542 = vmatmul.bf16.gmra.mxu3 %v3160_v36  ;;  %3849 = vmatmul.bf16.gmra.mxu2 %v3691_v5  ;;  %v1534_v32 = vsel %vm1485_vm0, %v1164_v3, 0.0  ;;  %v9615_v2 = vadd.f32 %v2873_v60, %v9023_v27  ;;  %v9629_v40 = vpop.f32.mrf.mxu1  ;;  %v2049_v6 = vmul.f32 %v6992_v45, %v1164_v3  ;;  %v3274_v3 = vadd.f32 %v9555_v25, %v11992_v34 }
 0x35f   : > { %v9587_v30 = vsel %vm1484_vm1, %v9463_v35, %v1534_v32  ;;  %v2176_v32 = vadd.f32 %v2048_v7, %v1919_v46  ;;  %v3570_v46 = vmax.f32 %v3269_v21, 0.0 }
 0x360   : > { %2632 = vmatmul.bf16.gmra.mxu0 %v2407_v8  ;;  %v9599_v36 = vpop.permute.xlu2 %1179  ;;  %v2047_v8 = vmul.f32 %v6992_v45, %v9467_v59  ;;  %12018 = vst [vmem:[#allocation129_spill] sm:$0xff] %v9615_v2 }
 0x361   : > { %v2600_v61 = vpop.f32.mrf.mxu0  ;;  %v1538_v24 = vsel %vm1485_vm0, %v9599_v36, 0.0  ;;  %v3692_v60 = vpack.c.bf16 %v3571_v50, %v3570_v46  ;;  %v9647_v50 = vpop.permute.xlu0 %1183  ;;  %v2050_v46 = vmul.f32 %v6992_v45, %v9500_v41 }
 0x362   : > { %v2601_v23 = vadd.f32 %v2600_v61, %v7301_v1  ;;  %v9627_v13 = vsel %vm1484_vm1, %v9568_v18, %v1538_v24  ;;  %v2175_v59 = vadd.f32 %v2047_v8, %v1918_v51  ;;  %v1539_v41 = vsel %vm1485_vm0, %v9647_v50, 0.0 }
 0x364   : > { %v2874_v5 = vmax.f32 %v2601_v23, 0.0 }
 0x366   : > { %v9618_v61 = vadd.f32 %v2874_v5, %v9054_v10  ;;  %v583_v23 = vpop.permute.xlu1 %582  ;;  %v2304_v10 = vmax.f32 %v2176_v32, 0.0  ;;  %v2303_v5 = vmax.f32 %v2175_v59, 0.0  ;;  %v3280_v35 = vpop.f32.mrf.mxu1  ;;  %v1920_v59 = vadd.f32 %v6983_v42, %v1791_v0 }
 0x367   : > { %v9622_v28 = vsel %vm1484_vm1, %v583_v23, %v1536_v57  ;;  %v9633_v57 = vpop.f32.mrf.mxu3 }
 0x368   : > { %12019 = vst [vmem:[#allocation130_spill] sm:$0xff] %v9618_v61  ;;  %v3114_v27 = vpack.c.bf16 %v9618_v61, %v9615_v2  ;;  %v2408_v24 = vpack.c.bf16 %v2304_v10, %v2303_v5 }
 0x369   : > { %12020 = vst [vmem:[#allocation131_spill] sm:$0xff] %v9633_v57 }
 0x36a   : > { %v2833_v7 = vpop.f32.mrf.mxu2  ;;  %3312 = vmatmul.bf16.gmra.mxu1 %v3114_v27  ;;  %v1921_v27 = vadd.f32 %v6983_v42, %v1792_v12  ;;  %v2177_v12 = vadd.f32 %v2049_v6, %v1920_v59  ;;  %v9664_v14 = vpop.permute.xlu2 %607 }
 0x36b   : > { %v2834_v51 = vadd.f32 %v2833_v7, %v7301_v1  ;;  %v6656_v7 = vld [vmem:[%s11556_s3 + $0x20] sm:$0xff] }
 0x36c   : > { %5834 = vmatpush.bf16.msrb.mxu1 %v6656_v7  ;;  %v2178_v57 = vadd.f32 %v2050_v46, %v1921_v27  ;;  %v3572_v27 = vmax.f32 %v3274_v3, 0.0  ;;  %v1794_v3 = vmul.f32 %v6973_v37, %v9537_v39 }
 0x36e   : > { %3854 = vmatmul.bf16.gmra.mxu2 %v3692_v60  ;;  %v2967_v60 = vmax.f32 %v2834_v51, 0.0  ;;  %v9681_v46 = vpop.f32.mrf.mxu1 }
 0x36f   : > { %v1176_v8 = vpop.permute.xlu1 %1175  ;;  %v9672_v7 = vpop.f32.mrf.mxu3 }
 0x370   : > { %2637 = vmatmul.bf16.gmra.mxu0 %v2408_v24  ;;  %v1537_v21 = vsel %vm1485_vm0, %v1176_v8, 0.0  ;;  %v9667_v51 = vadd.f32 %v2967_v60, %v9008_v33  ;;  %12023 = vst [vmem:[#allocation134_spill] sm:$0xff] %v9672_v7  ;;  %v2305_v33 = vmax.f32 %v2177_v12, 0.0  ;;  %v2306_v60 = vmax.f32 %v2178_v57, 0.0 }
 0x371   : > { %v9645_v32 = vsel %vm1484_vm1, %v9537_v39, %v1537_v21  ;;  %v3276_v21 = vadd.f32 %v3275_v16, %v11992_v34 }
 0x372   : > { %v2835_v10 = vpop.f32.mrf.mxu2  ;;  %12021 = vst [vmem:[#allocation132_spill] sm:$0xff] %v9667_v51  ;;  %v2409_v57 = vpack.c.bf16 %v2306_v60, %v2305_v33  ;;  %v2052_v60 = vmul.f32 %v6992_v45, %v1176_v8 }
 0x373   : > { %v2836_v5 = vadd.f32 %v2835_v10, %v7301_v1  ;;  %v2603_v24 = vpop.f32.mrf.mxu0  ;;  %v3573_v16 = vmax.f32 %v3276_v21, 0.0  ;;  %v9683_v21 = vpop.permute.xlu0 %1187 }
 0x374   : > { %v1540_v12 = vsel %vm1485_vm0, %v9683_v21, 0.0 }
 0x375   : > { %v2968_v0 = vmax.f32 %v2836_v5, 0.0  ;;  %v2604_v5 = vadd.f32 %v2603_v24, %v7301_v1  ;;  %v3693_v7 = vpack.c.bf16 %v3573_v16, %v3572_v27  ;;  %v2051_v27 = vmul.f32 %v6992_v45, %v9597_v38 }
 0x376   : > { %v3285_v38 = vpop.f32.mrf.mxu1 }
 0x377   : > { %v9670_v10 = vadd.f32 %v2968_v0, %v9085_v43  ;;  %v2875_v0 = vmax.f32 %v2604_v5, 0.0  ;;  %v9695_v5 = vpop.permute.xlu2 %612 }
 0x378   : > { %v598_v25 = vpop.permute.xlu1 %597 }
 0x379   : > { %12022 = vst [vmem:[#allocation133_spill] sm:$0xff] %v9670_v10  ;;  %v3161_v59 = vpack.c.bf16 %v9670_v10, %v9667_v51  ;;  %v9679_v6 = vsel %vm1484_vm1, %v598_v25, %v1539_v41  ;;  %v1518_v10 = vsel %vm1485_vm0, %v9058_v11, 0.0  ;;  %v1793_v41 = vmul.f32 %v6973_v37, %v583_v23 }
 0x37a   : > { %v1646_v16 = vsel %vm1484_vm1, %v9112_v48, %v1518_v10  ;;  %v1923_v10 = vadd.f32 %v6983_v42, %v1794_v3 }
 0x37b   : > { %v2605_v43 = vpop.f32.mrf.mxu0  ;;  %3547 = vmatmul.bf16.gmra.mxu3 %v3161_v59  ;;  %v9700_v59 = vpop.f32.mrf.mxu3  ;;  %v9702_v11 = vadd.f32 %v2875_v0, %v1646_v16 }
 0x37c   : > { %v2606_v24 = vadd.f32 %v2605_v43, %v7301_v1  ;;  %12024 = vst [vmem:[#allocation135_spill] sm:$0xff] %v9700_v59  ;;  %v3279_v43 = vadd.f32 %v9629_v40, %v11992_v34 }
 0x37d   : > { %12025 = vst [vmem:[#allocation136_spill] sm:$0xff] %v9702_v11 }
 0x37e   : > { %v2876_v51 = vmax.f32 %v2606_v24, 0.0  ;;  %3859 = vmatmul.bf16.gmra.mxu2 %v3693_v7  ;;  %v1922_v7 = vadd.f32 %v6983_v42, %v1793_v41  ;;  %v2180_v24 = vadd.f32 %v2052_v60, %v1923_v10  ;;  %v3574_v40 = vmax.f32 %v3279_v43, 0.0  ;;  %v9750_v59 = vpop.f32.mrf.mxu1 }
 0x380   : > { %v9705_v23 = vadd.f32 %v2876_v51, %v9151_v47  ;;  %2642 = vmatmul.bf16.gmra.mxu0 %v2409_v57  ;;  %v9707_v39 = vpop.permute.xlu1 %602  ;;  %v3281_v51 = vadd.f32 %v3280_v35, %v11992_v34  ;;  %v2179_v0 = vadd.f32 %v2051_v27, %v1922_v7  ;;  %v9725_v57 = vpop.permute.xlu2 %1199  ;;  %v2308_v10 = vmax.f32 %v2180_v24, 0.0 }
 0x381   : > { %v2838_v33 = vpop.f32.mrf.mxu2  ;;  %v9715_v48 = vsel %vm1484_vm1, %v9707_v39, %v1540_v12  ;;  %v1543_v8 = vsel %vm1485_vm0, %v9725_v57, 0.0  ;;  %v9730_v3 = vpop.permute.xlu0 %617  ;;  %v1796_v24 = vmul.f32 %v6973_v37, %v598_v25  ;;  %v2053_v25 = vmul.f32 %v6992_v45, %v9599_v36 }
 0x382   : > { %12026 = vst [vmem:[#allocation137_spill] sm:$0xff] %v9705_v23  ;;  %v3115_v47 = vpack.c.bf16 %v9705_v23, %v9702_v11  ;;  %v2839_v41 = vadd.f32 %v2838_v33, %v7301_v1  ;;  %v3575_v12 = vmax.f32 %v3281_v51, 0.0  ;;  %v9735_v35 = vsel %vm1484_vm1, %v9730_v3, %v1543_v8 }
 0x383   : > { %12027 = vst [vmem:[#allocation138_spill] sm:$0xff] %v9735_v35  ;;  %v2307_v16 = vmax.f32 %v2179_v0, 0.0  ;;  %v9739_v33 = vpop.f32.mrf.mxu3 }
 0x384   : > { %3317 = vmatmul.bf16.gmra.mxu1 %v3115_v47  ;;  %12028 = vst [vmem:[#allocation139_spill] sm:$0xff] %v9739_v33  ;;  %v2969_v60 = vmax.f32 %v2839_v41, 0.0  ;;  %v3694_v0 = vpack.c.bf16 %v3575_v12, %v3574_v40  ;;  %v1795_v33 = vmul.f32 %v6973_v37, %v9568_v18  ;;  %v1925_v18 = vadd.f32 %v6983_v42, %v1796_v24 }
 0x385   : > { %v2410_v4 = vpack.c.bf16 %v2308_v10, %v2307_v16  ;;  %v9779_v10 = vld [vmem:[%s11554_s1] sm:$0xff] }
 0x386   : > { %v1924_v40 = vadd.f32 %v6983_v42, %v1795_v33  ;;  %v9782_v33 = vperm.slane %v9779_v10, 5 }
 0x389   : > { %v2840_v7 = vpop.f32.mrf.mxu2  ;;  %v9737_v27 = vpop.permute.xlu1 %1191 }
 0x38a   : > { %v2841_v47 = vadd.f32 %v2840_v7, %v7301_v1  ;;  %v1541_v51 = vsel %vm1485_vm0, %v9737_v27, 0.0  ;;  %v9756_v7 = vadd.f32 %v2969_v60, %v9188_v22  ;;  %v2054_v22 = vmul.f32 %v6992_v45, %v9647_v50 }
 0x38b   : > { %v9748_v8 = vsel %vm1484_vm1, %v9664_v14, %v1541_v51  ;;  %v9761_v51 = vpop.permute.xlu2 %627  ;;  %v9773_v16 = vpop.f32.mrf.mxu3 }
 0x38c   : > { %v2970_v43 = vmax.f32 %v2841_v47, 0.0  ;;  %12029 = vst [vmem:[#allocation140_spill] sm:$0xff] %v9756_v7  ;;  %v3286_v47 = vadd.f32 %v3285_v38, %v11992_v34  ;;  %v2182_v24 = vadd.f32 %v2054_v22, %v1925_v18  ;;  %v12032_v38 = vld [vmem:[#allocation104_spill] sm:$0xff]  ;;  %v9808_v22 = vpop.permute.xlu0 %1203 }
 0x38d   : > { %v2608_v41 = vpop.f32.mrf.mxu0  ;;  %12031 = vst [vmem:[#allocation142_spill] sm:$0xff] %v9773_v16  ;;  %v3290_v16 = vpop.f32.mrf.mxu1 }
 0x38e   : > { %v9759_v54 = vadd.f32 %v2970_v43, %v9100_v53  ;;  %3864 = vmatmul.bf16.gmra.mxu2 %v3694_v0  ;;  %v3284_v43 = vadd.f32 %v9681_v46, %v11992_v34  ;;  %v2181_v0 = vadd.f32 %v2053_v25, %v1924_v40  ;;  %v3577_v23 = vmax.f32 %v3286_v47, 0.0 }
 0x390   : > { %12030 = vst [vmem:[#allocation141_spill] sm:$0xff] %v9759_v54  ;;  %2647 = vmatmul.bf16.gmra.mxu0 %v2410_v4  ;;  %v3162_v12 = vpack.c.bf16 %v9759_v54, %v9756_v7  ;;  %v2609_v4 = vadd.f32 %v2608_v41, %v7301_v1  ;;  %v3576_v61 = vmax.f32 %v3284_v43, 0.0  ;;  %v2309_v2 = vmax.f32 %v2181_v0, 0.0  ;;  %v12038_v0 = vld [vmem:[#allocation67_spill] sm:$0xff] }
 0x391   : > { %v3825_v53 = vpop.f32.mrf.mxu2  ;;  %v9771_v60 = vpop.permute.xlu1 %1195 }
 0x392   : > { %3552 = vmatmul.bf16.gmra.mxu3 %v3162_v12  ;;  %v1542_v36 = vsel %vm1485_vm0, %v9771_v60, 0.0  ;;  %v2877_v54 = vmax.f32 %v2609_v4, 0.0  ;;  %v3826_v12 = vadd.f32 %v3825_v53, %v9782_v33  ;;  %v3695_v47 = vpack.c.bf16 %v3577_v23, %v3576_v61 }
 0x393   : > { %v9790_v50 = vsel %vm1484_vm1, %v9695_v5, %v1542_v36  ;;  %v2310_v36 = vmax.f32 %v2182_v24, 0.0  ;;  %v9797_v62 = vpop.permute.xlu2 %632  ;;  %v1797_v61 = vmul.f32 %v6973_v37, %v9707_v39  ;;  %v6645_v39 = vld [vmem:[%s11555_s2 + $0x108] sm:$0xff] }
 0x394   : > { %v9800_v35 = vadd.f32 %v2877_v54, %v12032_v38  ;;  %v4145_v46 = vmax.f32 %v3826_v12, 0.0  ;;  %v1798_v54 = vmul.f32 %v6973_v37, %v9664_v14  ;;  %5124 = vmatpush.bf16.msrb.mxu0 %v6645_v39 }
 0x395   : > { %v2610_v41 = vpop.f32.mrf.mxu0  ;;  %v9825_v12 = vpop.f32.mrf.mxu1 }
 0x396   : > { %v2611_v7 = vadd.f32 %v2610_v41, %v7301_v1  ;;  %12033 = vst [vmem:[#allocation104_spill] sm:$0xff] %v9800_v35  ;;  %v2411_v41 = vpack.c.bf16 %v2310_v36, %v2309_v2  ;;  %v1927_v38 = vadd.f32 %v6983_v42, %v1798_v54 }
 0x398   : > { %v2878_v11 = vmax.f32 %v2611_v7, 0.0  ;;  %v9810_v7 = vpop.f32.mrf.mxu3 }
 0x399   : > { %v3827_v17 = vpop.f32.mrf.mxu2  ;;  %12035 = vst [vmem:[#allocation144_spill] sm:$0xff] %v9810_v7 }
 0x39a   : > { %v9803_v40 = vadd.f32 %v2878_v11, %v9247_v58  ;;  %v3828_v18 = vadd.f32 %v3827_v17, %v9782_v33  ;;  %v9806_v25 = vpop.permute.xlu1 %622  ;;  %v1544_v58 = vsel %vm1485_vm0, %v9808_v22, 0.0  ;;  %v12036_v17 = vld [vmem:[#allocation68_spill] sm:$0xff] }
 0x39b   : > { %v9820_v11 = vadd.f32 %v4145_v46, %v12036_v17  ;;  %v9834_v23 = vsel %vm1484_vm1, %v9806_v25, %v1544_v58  ;;  %v2056_v46 = vmul.f32 %v6992_v45, %v9737_v27  ;;  %v1926_v27 = vadd.f32 %v6983_v42, %v1797_v61  ;;  %v9866_v61 = vpop.permute.xlu0 %1215 }
 0x39c   : > { %12034 = vst [vmem:[#allocation143_spill] sm:$0xff] %v9803_v40  ;;  %v4146_v53 = vmax.f32 %v3828_v18, 0.0  ;;  %v3116_v4 = vpack.c.bf16 %v9803_v40, %v9800_v35  ;;  %v2055_v18 = vmul.f32 %v6992_v45, %v9683_v21  ;;  %v3289_v21 = vadd.f32 %v9750_v59, %v11992_v34 }
 0x39d   : > { %v2613_v43 = vpop.f32.mrf.mxu0  ;;  %12037 = vst [vmem:[#allocation68_spill] sm:$0xff] %v9820_v11  ;;  %v2184_v17 = vadd.f32 %v2056_v46, %v1927_v38  ;;  %v3295_v7 = vpop.f32.mrf.mxu1 }
 0x39e   : > { %v9823_v24 = vadd.f32 %v4146_v53, %v12038_v0  ;;  %3322 = vmatmul.bf16.gmra.mxu1 %v3116_v4  ;;  %3869 = vmatmul.bf16.gmra.mxu2 %v3695_v47  ;;  %v2614_v2 = vadd.f32 %v2613_v43, %v7301_v1  ;;  %v9847_v4 = vpop.permute.xlu2 %1211  ;;  %v3291_v47 = vadd.f32 %v3290_v16, %v11992_v34 }
 0x39f   : > { %v1546_v58 = vsel %vm1485_vm0, %v9847_v4, 0.0  ;;  %v2183_v38 = vadd.f32 %v2055_v18, %v1926_v27 }
 0x3a0   : > { %12039 = vst [vmem:[#allocation67_spill] sm:$0xff] %v9823_v24  ;;  %v4401_v14 = vpack.c.bf16 %v9823_v24, %v9820_v11  ;;  %2652 = vmatmul.bf16.gmra.mxu0 %v2411_v41  ;;  %v9850_v54 = vpop.f32.mrf.mxu3  ;;  %v2879_v0 = vmax.f32 %v2614_v2, 0.0  ;;  %v9873_v39 = vsel %vm1484_vm1, %v9797_v62, %v1546_v58  ;;  %v3579_v59 = vmax.f32 %v3291_v47, 0.0  ;;  %v12041_v11 = vld [vmem:[#allocation100_spill] sm:$0xff] }
 0x3a1   : > { %v3830_v36 = vpop.f32.mrf.mxu2  ;;  %12040 = vst [vmem:[#allocation145_spill] sm:$0xff] %v9850_v54  ;;  %v3578_v2 = vmax.f32 %v3289_v21, 0.0  ;;  %v2312_v24 = vmax.f32 %v2184_v17, 0.0  ;;  %v1547_v58 = vsel %vm1485_vm0, %v9866_v61, 0.0  ;;  %v2311_v47 = vmax.f32 %v2183_v38, 0.0 }
 0x3a2   : > { %4539 = vmatmul.bf16.vlgmr.msrb.gmra.mxu3 %v4401_v14  ;;  %v3831_v14 = vadd.f32 %v3830_v36, %v9782_v33 }
 0x3a3   : > { %v9845_v53 = vpop.permute.xlu1 %1207  ;;  %v3696_v27 = vpack.c.bf16 %v3579_v59, %v3578_v2  ;;  %v12047_v59 = vld [vmem:[#allocation72_spill] sm:$0xff]  ;;  %v9906_v2 = vpop.permute.xlu0 %1219 }
 0x3a4   : > { %v1545_v43 = vsel %vm1485_vm0, %v9845_v53, 0.0  ;;  %v4147_v35 = vmax.f32 %v3831_v14, 0.0  ;;  %v12045_v14 = vld [vmem:[#allocation70_spill] sm:$0xff] }
 0x3a5   : > { %v2615_v41 = vpop.f32.mrf.mxu0  ;;  %v9864_v16 = vsel %vm1484_vm1, %v9761_v51, %v1545_v43  ;;  %v9876_v43 = vadd.f32 %v2879_v0, %v12041_v11  ;;  %v1799_v11 = vmul.f32 %v6973_v37, %v9695_v5  ;;  %v2412_v5 = vpack.c.bf16 %v2312_v24, %v2311_v47 }
 0x3a6   : > { %v2616_v54 = vadd.f32 %v2615_v41, %v7301_v1  ;;  %v9901_v38 = vadd.f32 %v4147_v35, %v12045_v14  ;;  %v2058_v35 = vmul.f32 %v6992_v45, %v9725_v57  ;;  %v1548_v47 = vsel %vm1485_vm0, %v9906_v2, 0.0 }
 0x3a7   : > { %12042 = vst [vmem:[#allocation100_spill] sm:$0xff] %v9876_v43  ;;  %v3294_v57 = vadd.f32 %v9825_v12, %v11992_v34 }
 0x3a8   : > { %v2880_v46 = vmax.f32 %v2616_v54, 0.0  ;;  %v9898_v0 = vpop.f32.mrf.mxu3  ;;  %12046 = vst [vmem:[#allocation70_spill] sm:$0xff] %v9901_v38 }
 0x3a9   : > { %v3832_v40 = vpop.f32.mrf.mxu2  ;;  %12044 = vst [vmem:[#allocation147_spill] sm:$0xff] %v9898_v0  ;;  %v2057_v0 = vmul.f32 %v6992_v45, %v9771_v60 }
 0x3aa   : > { %v9879_v36 = vadd.f32 %v2880_v46, %v9274_v26  ;;  %v3833_v41 = vadd.f32 %v3832_v40, %v9782_v33  ;;  %v1800_v26 = vmul.f32 %v6973_v37, %v9730_v3 }
 0x3ac   : > { %12043 = vst [vmem:[#allocation146_spill] sm:$0xff] %v9879_v36  ;;  %v4148_v18 = vmax.f32 %v3833_v41, 0.0  ;;  %v3117_v54 = vpack.c.bf16 %v9879_v36, %v9876_v43  ;;  %v9887_v21 = vpop.permute.xlu1 %637  ;;  %v3298_v41 = vpop.f32.mrf.mxu1  ;;  %v3580_v36 = vmax.f32 %v3294_v57, 0.0  ;;  %v1801_v57 = vmul.f32 %v6973_v37, %v9806_v25 }
 0x3ad   : > { %v2618_v17 = vpop.f32.mrf.mxu0  ;;  %v9896_v40 = vsel %vm1484_vm1, %v9887_v21, %v1547_v58  ;;  %v1928_v58 = vadd.f32 %v6983_v42, %v1799_v11  ;;  %v3296_v11 = vadd.f32 %v3295_v7, %v11992_v34 }
 0x3ae   : > { %v9904_v46 = vadd.f32 %v4148_v18, %v12047_v59  ;;  %3327 = vmatmul.bf16.gmra.mxu1 %v3117_v54  ;;  %3874 = vmatmul.bf16.gmra.mxu2 %v3696_v27  ;;  %v1929_v18 = vadd.f32 %v6983_v42, %v1800_v26  ;;  %v2619_v24 = vadd.f32 %v2618_v17, %v7301_v1  ;;  %v6655_v27 = vld [vmem:[%s11556_s3 + $0x18] sm:$0xff] }
 0x3af   : > { %5835 = vmatpush.bf16.msrb.mxu1 %v6655_v27  ;;  %v2185_v26 = vadd.f32 %v2057_v0, %v1928_v58 }
 0x3b0   : > { %12048 = vst [vmem:[#allocation72_spill] sm:$0xff] %v9904_v46  ;;  %2657 = vmatmul.bf16.gmra.mxu0 %v2412_v5  ;;  %v4402_v3 = vpack.c.bf16 %v9904_v46, %v9901_v38  ;;  %v2186_v14 = vadd.f32 %v2058_v35, %v1929_v18  ;;  %v9933_v5 = vpop.f32.mrf.mxu3  ;;  %v3581_v38 = vmax.f32 %v3296_v11, 0.0 }
 0x3b1   : > { %v3835_v54 = vpop.f32.mrf.mxu2  ;;  %12049 = vst [vmem:[#allocation148_spill] sm:$0xff] %v9933_v5  ;;  %v2313_v43 = vmax.f32 %v2185_v26, 0.0  ;;  %v1802_v26 = vmul.f32 %v6973_v37, %v9761_v51 }
 0x3b2   : > { %4544 = vmatmul.bf16.gmra.mxu3 %v4402_v3  ;;  %v2881_v3 = vmax.f32 %v2619_v24, 0.0  ;;  %v3836_v46 = vadd.f32 %v3835_v54, %v9782_v33  ;;  %v2314_v0 = vmax.f32 %v2186_v14, 0.0  ;;  %v3697_v11 = vpack.c.bf16 %v3581_v38, %v3580_v36 }
 0x3b4   : > { %v9924_v60 = vpop.permute.xlu1 %642  ;;  %v9938_v58 = vadd.f32 %v2881_v3, %v9320_v20  ;;  %v4149_v35 = vmax.f32 %v3836_v46, 0.0  ;;  %v3300_v24 = vpop.f32.mrf.mxu1  ;;  %v12050_v46 = vld [vmem:[#allocation43_spill] sm:$0xff] }
 0x3b5   : > { %v2620_v17 = vpop.f32.mrf.mxu0  ;;  %v9931_v59 = vsel %vm1484_vm1, %v9924_v60, %v1548_v47 }
 0x3b6   : > { %v2621_v7 = vadd.f32 %v2620_v17, %v7301_v1  ;;  %v12052_v17 = vld [vmem:[#allocation50_spill] sm:$0xff] }
 0x3b8   : > { %v2882_v27 = vmax.f32 %v2621_v7, 0.0  ;;  %v2413_v7 = vpack.c.bf16 %v2314_v0, %v2313_v43  ;;  %v9968_v36 = vpop.f32.mrf.mxu3  ;;  %v1931_v43 = vadd.f32 %v6983_v42, %v1802_v26  ;;  %v2059_v0 = vmul.f32 %v6992_v45, %v9808_v22 }
 0x3b9   : > { %v3837_v12 = vpop.f32.mrf.mxu2  ;;  %12054 = vst [vmem:[#allocation149_spill] sm:$0xff] %v9968_v36 }
 0x3ba   : > { %v9941_v18 = vadd.f32 %v2882_v27, %v9348_v56  ;;  %v3838_v47 = vadd.f32 %v3837_v12, %v9782_v33  ;;  %v9953_v56 = vadd.f32 %v4149_v35, %v12050_v46  ;;  %v9958_v27 = vpop.permute.xlu2 %647  ;;  %v2060_v12 = vmul.f32 %v6992_v45, %v9845_v53 }
 0x3bc   : > { %v4150_v5 = vmax.f32 %v3838_v47, 0.0  ;;  %v3118_v54 = vpack.c.bf16 %v9941_v18, %v9938_v58  ;;  %12051 = vst [vmem:[#allocation43_spill] sm:$0xff] %v9953_v56  ;;  %v3303_v47 = vpop.f32.mrf.mxu1  ;;  %v2188_v46 = vadd.f32 %v2060_v12, %v1931_v43 }
 0x3bd   : > { %v2623_v20 = vpop.f32.mrf.mxu0  ;;  %v9950_v14 = vpop.permute.xlu1 %1223 }
 0x3be   : > { %v9956_v3 = vadd.f32 %v4150_v5, %v12052_v17  ;;  %3332 = vmatmul.bf16.gmra.mxu1 %v3118_v54  ;;  %3879 = vmatmul.bf16.gmra.mxu2 %v3697_v11  ;;  %v1549_v25 = vsel %vm1485_vm0, %v9950_v14, 0.0  ;;  %v1930_v5 = vadd.f32 %v6983_v42, %v1801_v57  ;;  %v2624_v15 = vadd.f32 %v2623_v20, %v7301_v1 }
 0x3bf   : > { %v9966_v51 = vsel %vm1484_vm1, %v9958_v27, %v1549_v25  ;;  %v3301_v54 = vadd.f32 %v3300_v24, %v11992_v34  ;;  %v3299_v11 = vadd.f32 %v3298_v41, %v11992_v34  ;;  %v2316_v20 = vmax.f32 %v2188_v46, 0.0  ;;  %v12056_v46 = vld [vmem:[#allocation15_spill] sm:$0xff] }
 0x3c0   : > { %12053 = vst [vmem:[#allocation50_spill] sm:$0xff] %v9956_v3  ;;  %2662 = vmatmul.bf16.gmra.mxu0 %v2413_v7  ;;  %v4403_v38 = vpack.c.bf16 %v9956_v3, %v9953_v56  ;;  %v2187_v17 = vadd.f32 %v2059_v0, %v1930_v5  ;;  %v2883_v7 = vmax.f32 %v2624_v15, 0.0  ;;  %v9983_v36 = vpop.f32.mrf.mxu3  ;;  %v1803_v15 = vmul.f32 %v6973_v37, %v9797_v62 }
 0x3c1   : > { %v3840_v35 = vpop.f32.mrf.mxu2  ;;  %v3583_v25 = vmax.f32 %v3301_v54, 0.0  ;;  %12055 = vst [vmem:[#allocation150_spill] sm:$0xff] %v9983_v36  ;;  %v3582_v3 = vmax.f32 %v3299_v11, 0.0  ;;  %v1804_v54 = vmul.f32 %v6973_v37, %v9887_v21  ;;  %v2061_v21 = vmul.f32 %v6992_v45, %v9847_v4 }
 0x3c2   : > { %4549 = vmatmul.bf16.gmra.mxu3 %v4403_v38  ;;  %v3841_v26 = vadd.f32 %v3840_v35, %v9782_v33  ;;  %v2315_v38 = vmax.f32 %v2187_v17, 0.0  ;;  %v9986_v24 = vadd.f32 %v2883_v7, %v9389_v29  ;;  %v1932_v62 = vadd.f32 %v6983_v42, %v1803_v15 }
 0x3c3   : > { %v3698_v35 = vpack.c.bf16 %v3583_v25, %v3582_v3  ;;  %v1933_v7 = vadd.f32 %v6983_v42, %v1804_v54 }
 0x3c4   : > { %v4151_v41 = vmax.f32 %v3841_v26, 0.0  ;;  %v3305_v11 = vpop.f32.mrf.mxu1  ;;  %v2062_v26 = vmul.f32 %v6992_v45, %v9866_v61 }
 0x3c5   : > { %v2625_v57 = vpop.f32.mrf.mxu0 }
 0x3c6   : > { %v2626_v53 = vadd.f32 %v2625_v57, %v7301_v1  ;;  %v9999_v17 = vadd.f32 %v4151_v41, %v12056_v46  ;;  %v2189_v41 = vadd.f32 %v2061_v21, %v1932_v62 }
 0x3c8   : > { %v2884_v22 = vmax.f32 %v2626_v53, 0.0  ;;  %v10012_v25 = vpop.f32.mrf.mxu3 }
 0x3c9   : > { %v3842_v56 = vpop.f32.mrf.mxu2  ;;  %12058 = vst [vmem:[#allocation15_spill] sm:$0xff] %v10012_v25 }
 0x3ca   : > { %v9989_v5 = vadd.f32 %v2884_v22, %v9301_v63  ;;  %v3843_v43 = vadd.f32 %v3842_v56, %v9782_v33  ;;  %v12057_v63 = vld [vmem:[#allocation53_spill] sm:$0xff]  ;;  %v2414_v56 = vpack.c.bf16 %v2316_v20, %v2315_v38  ;;  %v3306_v20 = vadd.f32 %v3305_v11, %v11992_v34 }
 0x3cb   : > { %v3304_v38 = vadd.f32 %v3303_v47, %v11992_v34 }
 0x3cc   : > { %v4152_v12 = vmax.f32 %v3843_v43, 0.0  ;;  %v3119_v0 = vpack.c.bf16 %v9989_v5, %v9986_v24  ;;  %v2190_v43 = vadd.f32 %v2062_v26, %v1933_v7  ;;  %v3585_v61 = vmax.f32 %v3306_v20, 0.0 }
 0x3cd   : > { %v2628_v29 = vpop.f32.mrf.mxu0  ;;  %v3584_v46 = vmax.f32 %v3304_v38, 0.0  ;;  %v1806_v20 = vmul.f32 %v6973_v37, %v9958_v27  ;;  %v2064_v27 = vmul.f32 %v6992_v45, %v9950_v14 }
 0x3ce   : > { %v10002_v57 = vadd.f32 %v4152_v12, %v12057_v63  ;;  %3337 = vmatmul.bf16.gmra.mxu1 %v3119_v0  ;;  %3884 = vmatmul.bf16.gmra.mxu2 %v3698_v35  ;;  %v2629_v22 = vadd.f32 %v2628_v29, %v7301_v1  ;;  %v3308_v12 = vpop.f32.mrf.mxu1  ;;  %v2317_v63 = vmax.f32 %v2189_v41, 0.0 }
 0x3d0   : > { %2667 = vmatmul.bf16.gmra.mxu0 %v2414_v56  ;;  %v4404_v3 = vpack.c.bf16 %v10002_v57, %v9999_v17  ;;  %v2885_v35 = vmax.f32 %v2629_v22, 0.0  ;;  %v2318_v56 = vmax.f32 %v2190_v43, 0.0  ;;  %v1805_v22 = vmul.f32 %v6973_v37, %v9924_v60  ;;  %v12061_v43 = vld [vmem:[#allocation16_spill] sm:$0xff] }
 0x3d1   : > { %v3845_v53 = vpop.f32.mrf.mxu2  ;;  %v2063_v37 = vmul.f32 %v6992_v45, %v9906_v2  ;;  %v3309_v2 = vadd.f32 %v3308_v12, %v11992_v34 }
 0x3d2   : > { %4554 = vmatmul.bf16.gmra.mxu3 %v4404_v3  ;;  %v3846_v4 = vadd.f32 %v3845_v53, %v9782_v33  ;;  %v10019_v3 = vpop.f32.mrf.mxu3  ;;  %v10022_v11 = vadd.f32 %v2885_v35, %v9432_v9  ;;  %v3699_v53 = vpack.c.bf16 %v3585_v61, %v3584_v46  ;;  %v12060_v9 = vld [vmem:[#allocation8_spill] sm:$0xff]  ;;  %v1934_v60 = vadd.f32 %v6983_v42, %v1805_v22  ;;  %v6644_v46 = vld [vmem:[%s11555_s2 + $0x100] sm:$0xff] }
 0x3d3   : > { %12059 = vst [vmem:[#allocation53_spill] sm:$0xff] %v10019_v3  ;;  %5125 = vmatpush.bf16.msrb.mxu0 %v6644_v46  ;;  %v12065_v46 = vld [vmem:[#allocation52_spill] sm:$0xff] }
 0x3d4   : > { %v4153_v47 = vmax.f32 %v3846_v4, 0.0 }
 0x3d5   : > { %v2630_v0 = vpop.f32.mrf.mxu0 }
 0x3d6   : > { %v2631_v15 = vadd.f32 %v2630_v0, %v7301_v1  ;;  %v10035_v41 = vadd.f32 %v4153_v47, %v12060_v9  ;;  %v2415_v0 = vpack.c.bf16 %v2318_v56, %v2317_v63  ;;  %v3310_v35 = vpop.f32.mrf.mxu1 }
 0x3d7   : > { %v3311_v56 = vadd.f32 %v3310_v35, %v11992_v34 }
 0x3d8   : > { %v2886_v54 = vmax.f32 %v2631_v15, 0.0  ;;  %v1935_v15 = vadd.f32 %v6983_v42, %v1806_v20  ;;  %v2191_v42 = vadd.f32 %v2063_v37, %v1934_v60 }
 0x3d9   : > { %v3847_v29 = vpop.f32.mrf.mxu2 }
 0x3da   : > { %v10025_v62 = vadd.f32 %v2886_v54, %v9458_v19  ;;  %v3848_v7 = vadd.f32 %v3847_v29, %v9782_v33  ;;  %v10052_v63 = vpop.f32.mrf.mxu3  ;;  %v2192_v29 = vadd.f32 %v2064_v27, %v1935_v15  ;;  %v2319_v22 = vmax.f32 %v2191_v42, 0.0 }
 0x3db   : > { %12062 = vst [vmem:[#allocation8_spill] sm:$0xff] %v10052_v63 }
 0x3dc   : > { %v4154_v21 = vmax.f32 %v3848_v7, 0.0  ;;  %v3120_v26 = vpack.c.bf16 %v10025_v62, %v10022_v11  ;;  %v2320_v20 = vmax.f32 %v2192_v29, 0.0 }
 0x3dd   : > { %v2633_v38 = vpop.f32.mrf.mxu0 }
 0x3de   : > { %v10038_v19 = vadd.f32 %v4154_v21, %v12061_v43  ;;  %3342 = vmatmul.bf16.gmra.mxu1 %v3120_v26  ;;  %3889 = vmatmul.bf16.gmra.mxu2 %v3699_v53  ;;  %v2634_v54 = vadd.f32 %v2633_v38, %v7301_v1  ;;  %v3587_v26 = vmax.f32 %v3311_v56, 0.0  ;;  %v3586_v38 = vmax.f32 %v3309_v2, 0.0 }
 0x3e0   : > { %2672 = vmatmul.bf16.gmra.mxu0 %v2415_v0  ;;  %v4405_v4 = vpack.c.bf16 %v10038_v19, %v10035_v41  ;;  %v2887_v7 = vmax.f32 %v2634_v54, 0.0  ;;  %v3700_v37 = vpack.c.bf16 %v3587_v26, %v3586_v38 }
 0x3e1   : > { %v3850_v61 = vpop.f32.mrf.mxu2 }
 0x3e2   : > { %4559 = vmatmul.bf16.gmra.mxu3 %v4405_v4  ;;  %v3851_v45 = vadd.f32 %v3850_v61, %v9782_v33  ;;  %v10059_v43 = vadd.f32 %v2887_v7, %v9408_v49  ;;  %v10065_v4 = vpop.f32.mrf.mxu3  ;;  %v12064_v61 = vld [vmem:[#allocation55_spill] sm:$0xff] }
 0x3e3   : > { %12063 = vst [vmem:[#allocation16_spill] sm:$0xff] %v10065_v4 }
 0x3e4   : > { %v4155_v0 = vmax.f32 %v3851_v45, 0.0 }
 0x3e5   : > { %v2635_v47 = vpop.f32.mrf.mxu0 }
 0x3e6   : > { %v2636_v14 = vadd.f32 %v2635_v47, %v7301_v1  ;;  %v10070_v54 = vadd.f32 %v4155_v0, %v12064_v61  ;;  %v6654_v47 = vld [vmem:[%s11556_s3 + $0x10] sm:$0xff] }
 0x3e7   : > { %v3313_v21 = vpop.f32.mrf.mxu1  ;;  %5836 = vmatpush.bf16.msrb.mxu1 %v6654_v47 }
 0x3e8   : > { %v2888_v53 = vmax.f32 %v2636_v14, 0.0  ;;  %v3314_v45 = vadd.f32 %v3313_v21, %v11992_v34 }
 0x3e9   : > { %v3852_v9 = vpop.f32.mrf.mxu2 }
 0x3ea   : > { %v10062_v35 = vadd.f32 %v2888_v53, %v9494_v31  ;;  %v3853_v12 = vadd.f32 %v3852_v9, %v9782_v33  ;;  %v2416_v31 = vpack.c.bf16 %v2320_v20, %v2319_v22  ;;  %v10083_v26 = vpop.f32.mrf.mxu3  ;;  %v3588_v0 = vmax.f32 %v3314_v45, 0.0 }
 0x3eb   : > { %12066 = vst [vmem:[#allocation55_spill] sm:$0xff] %v10083_v26 }
 0x3ec   : > { %v4156_v60 = vmax.f32 %v3853_v12, 0.0  ;;  %v3121_v15 = vpack.c.bf16 %v10062_v35, %v10059_v43 }
 0x3ed   : > { %v2638_v27 = vpop.f32.mrf.mxu0 }
 0x3ee   : > { %v10073_v49 = vadd.f32 %v4156_v60, %v12065_v46  ;;  %3347 = vmatmul.bf16.gmra.mxu1 %v3121_v15  ;;  %3894 = vmatmul.bf16.gmra.mxu2 %v3700_v37  ;;  %v2639_v2 = vadd.f32 %v2638_v27, %v7301_v1 }
 0x3ef   : > { %v3315_v42 = vpop.f32.mrf.mxu1 }
 0x3f0   : > { %2677 = vmatmul.bf16.gmra.mxu0 %v2416_v31  ;;  %v4406_v56 = vpack.c.bf16 %v10073_v49, %v10070_v54  ;;  %v3316_v7 = vadd.f32 %v3315_v42, %v11992_v34  ;;  %v2889_v53 = vmax.f32 %v2639_v2, 0.0 }
 0x3f1   : > { %v3855_v29 = vpop.f32.mrf.mxu2 }
 0x3f2   : > { %4564 = vmatmul.bf16.gmra.mxu3 %v4406_v56  ;;  %v3856_v22 = vadd.f32 %v3855_v29, %v9782_v33  ;;  %v3589_v38 = vmax.f32 %v3316_v7, 0.0  ;;  %v10088_v60 = vadd.f32 %v2889_v53, %v9529_v44  ;;  %v12067_v56 = vld [vmem:[#allocation21_spill] sm:$0xff]  ;;  %v12068_v29 = vld [vmem:[#allocation26_spill] sm:$0xff] }
 0x3f4   : > { %v4157_v15 = vmax.f32 %v3856_v22, 0.0  ;;  %v3701_v46 = vpack.c.bf16 %v3589_v38, %v3588_v0 }
 0x3f5   : > { %v2640_v14 = vpop.f32.mrf.mxu0 }
 0x3f6   : > { %v2641_v20 = vadd.f32 %v2640_v14, %v7301_v1  ;;  %v10097_v42 = vadd.f32 %v4157_v15, %v12067_v56 }
 0x3f8   : > { %v2890_v9 = vmax.f32 %v2641_v20, 0.0 }
 0x3f9   : > { %v3857_v12 = vpop.f32.mrf.mxu2 }
 0x3fa   : > { %v10091_v37 = vadd.f32 %v2890_v9, %v9563_v52  ;;  %v3858_v21 = vadd.f32 %v3857_v12, %v9782_v33 }
 0x3fc   : > { %v4158_v27 = vmax.f32 %v3858_v21, 0.0  ;;  %v3122_v61 = vpack.c.bf16 %v10091_v37, %v10088_v60 }
 0x3fd   : > { %v2643_v31 = vpop.f32.mrf.mxu0 }
 0x3fe   : > { %v10100_v2 = vadd.f32 %v4158_v27, %v12068_v29  ;;  %3352 = vmatmul.bf16.gmra.mxu1 %v3122_v61  ;;  %v3548_v44 = vpop.f32.mrf.mxu3  ;;  %3899 = vmatmul.bf16.gmra.mxu2 %v3701_v46  ;;  %v2644_v47 = vadd.f32 %v2643_v31, %v7301_v1 }
 0x3ff   : > { %v3549_v53 = vadd.f32 %v3548_v44, %v11992_v34 }
 0x400   : > { %v4407_v52 = vpack.c.bf16 %v10100_v2, %v10097_v42  ;;  %v2891_v14 = vmax.f32 %v2644_v47, 0.0 }
 0x401   : > { %v3318_v7 = vpop.f32.mrf.mxu1  ;;  %v3860_v45 = vpop.f32.mrf.mxu2  ;;  %v3682_v27 = vmax.f32 %v3549_v53, 0.0  ;;  %v12070_v53 = vld [vmem:[#allocation79_spill] sm:$0xff] }
 0x402   : > { %4569 = vmatmul.bf16.gmra.mxu3 %v4407_v52  ;;  %v3861_v20 = vadd.f32 %v3860_v45, %v9782_v33  ;;  %v3319_v12 = vadd.f32 %v3318_v7, %v11992_v34  ;;  %v10111_v21 = vadd.f32 %v2891_v14, %v9587_v30 }
 0x404   : > { %v4159_v56 = vmax.f32 %v3861_v20, 0.0  ;;  %v3590_v45 = vmax.f32 %v3319_v12, 0.0  ;;  %v12071_v20 = vld [vmem:[#allocation80_spill] sm:$0xff] }
 0x405   : > { %v2645_v22 = vpop.f32.mrf.mxu0 }
 0x406   : > { %v2646_v38 = vadd.f32 %v2645_v22, %v7301_v1  ;;  %v3550_v9 = vpop.f32.mrf.mxu3 }
 0x407   : > { %v3551_v0 = vadd.f32 %v3550_v9, %v11992_v34 }
 0x408   : > { %v2892_v15 = vmax.f32 %v2646_v38, 0.0  ;;  %v10123_v38 = vadd.f32 %v4159_v56, %v12070_v53 }
 0x409   : > { %v3683_v61 = vmax.f32 %v3551_v0, 0.0  ;;  %v3320_v46 = vpop.f32.mrf.mxu1  ;;  %v3862_v31 = vpop.f32.mrf.mxu2 }
 0x40a   : > { %v10114_v29 = vadd.f32 %v2892_v15, %v9513_v55  ;;  %v3321_v44 = vadd.f32 %v3320_v46, %v11992_v34  ;;  %v3863_v52 = vadd.f32 %v3862_v31, %v9782_v33 }
 0x40b   : > { %v10118_v47 = vpack.c.bf16 %v3683_v61, %v3682_v27 }
 0x40c   : > { %v3591_v7 = vmax.f32 %v3321_v44, 0.0  ;;  %v4160_v22 = vmax.f32 %v3863_v52, 0.0  ;;  %v3123_v30 = vpack.c.bf16 %v10114_v29, %v10111_v21 }
 0x40d   : > { %12069 = vst [vmem:[#allocation52_spill] sm:$0xff] %v10118_v47  ;;  %v2648_v14 = vpop.f32.mrf.mxu0 }
 0x40e   : > { %v10126_v9 = vadd.f32 %v4160_v22, %v12071_v20  ;;  %3357 = vmatmul.bf16.gmra.mxu1 %v3123_v30  ;;  %v3702_v55 = vpack.c.bf16 %v3591_v7, %v3590_v45  ;;  %v2649_v12 = vadd.f32 %v2648_v14, %v7301_v1 }
 0x410   : > { %3904 = vmatmul.bf16.gmra.mxu2 %v3702_v55  ;;  %v4408_v0 = vpack.c.bf16 %v10126_v9, %v10123_v38  ;;  %v2893_v46 = vmax.f32 %v2649_v12, 0.0  ;;  %v12072_v12 = vld [vmem:[#allocation48_spill] sm:$0xff] }
 0x411   : > { %v3865_v15 = vpop.f32.mrf.mxu2 }
 0x412   : > { %4574 = vmatmul.bf16.gmra.mxu3 %v4408_v0  ;;  %v3866_v31 = vadd.f32 %v3865_v15, %v9782_v33  ;;  %v10134_v22 = vadd.f32 %v2893_v46, %v9622_v28  ;;  %v12073_v28 = vld [vmem:[#allocation84_spill] sm:$0xff] }
 0x414   : > { %v4161_v45 = vmax.f32 %v3866_v31, 0.0 }
 0x415   : > { %v2650_v27 = vpop.f32.mrf.mxu0  ;;  %v3553_v61 = vpop.f32.mrf.mxu3 }
 0x416   : > { %v2651_v56 = vadd.f32 %v2650_v27, %v7301_v1  ;;  %v3554_v53 = vadd.f32 %v3553_v61, %v11992_v34  ;;  %v10144_v27 = vadd.f32 %v4161_v45, %v12072_v12 }
 0x418   : > { %v2894_v44 = vmax.f32 %v2651_v56, 0.0  ;;  %v3684_v31 = vmax.f32 %v3554_v53, 0.0 }
 0x419   : > { %v3867_v52 = vpop.f32.mrf.mxu2 }
 0x41a   : > { %v10137_v7 = vadd.f32 %v2894_v44, %v9645_v32  ;;  %v3868_v30 = vadd.f32 %v3867_v52, %v9782_v33 }
 0x41b   : > { %v3323_v14 = vpop.f32.mrf.mxu1 }
 0x41c   : > { %v4162_v20 = vmax.f32 %v3868_v30, 0.0  ;;  %v3124_v55 = vpack.c.bf16 %v10137_v7, %v10134_v22  ;;  %v3324_v44 = vadd.f32 %v3323_v14, %v11992_v34  ;;  %v10160_v14 = vperm.slane %v9779_v10, 6 }
 0x41d   : > { %v2653_v0 = vpop.f32.mrf.mxu0  ;;  %v3555_v15 = vpop.f32.mrf.mxu3 }
 0x41e   : > { %v10147_v46 = vadd.f32 %v4162_v20, %v12073_v28  ;;  %v3556_v32 = vadd.f32 %v3555_v15, %v11992_v34  ;;  %3362 = vmatmul.bf16.gmra.mxu1 %v3124_v55  ;;  %v2654_v30 = vadd.f32 %v2653_v0, %v7301_v1  ;;  %v3592_v12 = vmax.f32 %v3324_v44, 0.0 }
 0x420   : > { %v3685_v56 = vmax.f32 %v3556_v32, 0.0  ;;  %v4409_v61 = vpack.c.bf16 %v10147_v46, %v10144_v27  ;;  %v2895_v55 = vmax.f32 %v2654_v30, 0.0 }
 0x421   : > { %v3870_v52 = vpop.f32.mrf.mxu2 }
 0x422   : > { %4579 = vmatmul.bf16.gmra.mxu3 %v4409_v61  ;;  %v10154_v47 = vpack.c.bf16 %v3685_v56, %v3684_v31  ;;  %v3871_v53 = vadd.f32 %v3870_v52, %v9782_v33  ;;  %v10163_v31 = vadd.f32 %v2895_v55, %v9627_v13  ;;  %v12076_v13 = vld [vmem:[#allocation89_spill] sm:$0xff] }
 0x423   : > { %v3325_v45 = vpop.f32.mrf.mxu1 }
 0x424   : > { %12074 = vst [vmem:[#allocation21_spill] sm:$0xff] %v10154_v47  ;;  %v3326_v20 = vadd.f32 %v3325_v45, %v11992_v34  ;;  %v4163_v56 = vmax.f32 %v3871_v53, 0.0 }
 0x425   : > { %v2655_v28 = vpop.f32.mrf.mxu0  ;;  %v4540_v15 = vpop.f32.mrf.mxu3 }
 0x426   : > { %v3593_v32 = vmax.f32 %v3326_v20, 0.0  ;;  %v2656_v4 = vadd.f32 %v2655_v28, %v7301_v1  ;;  %v4541_v45 = vadd.f32 %v4540_v15, %v10160_v14  ;;  %v12075_v28 = vld [vmem:[#allocation88_spill] sm:$0xff] }
 0x428   : > { %v2896_v26 = vmax.f32 %v2656_v4, 0.0  ;;  %v3703_v0 = vpack.c.bf16 %v3593_v32, %v3592_v12  ;;  %v10173_v32 = vadd.f32 %v4163_v56, %v12075_v28  ;;  %v6653_v56 = vld [vmem:[%s11556_s3 + $0x8] sm:$0xff] }
 0x429   : > { %v3872_v61 = vpop.f32.mrf.mxu2  ;;  %5837 = vmatpush.bf16.msrb.mxu1 %v6653_v56 }
 0x42a   : > { %v10166_v44 = vadd.f32 %v2896_v26, %v9679_v6  ;;  %v3873_v30 = vadd.f32 %v3872_v61, %v9782_v33  ;;  %3909 = vmatmul.bf16.gmra.mxu2 %v3703_v0  ;;  %v4860_v26 = vmax.f32 %v4541_v45, 0.0 }
 0x42b   : > { %v3328_v52 = vpop.f32.mrf.mxu1 }
 0x42c   : > { %v4164_v20 = vmax.f32 %v3873_v30, 0.0  ;;  %v3125_v10 = vpack.c.bf16 %v10166_v44, %v10163_v31  ;;  %v3329_v0 = vadd.f32 %v3328_v52, %v11992_v34 }
 0x42d   : > { %v2658_v4 = vpop.f32.mrf.mxu0  ;;  %v4542_v12 = vpop.f32.mrf.mxu3 }
 0x42e   : > { %v10176_v55 = vadd.f32 %v4164_v20, %v12076_v13  ;;  %v4543_v6 = vadd.f32 %v4542_v12, %v10160_v14  ;;  %3367 = vmatmul.bf16.gmra.mxu1 %v3125_v10  ;;  %v2659_v30 = vadd.f32 %v2658_v4, %v7301_v1  ;;  %v3594_v45 = vmax.f32 %v3329_v0, 0.0 }
 0x430   : > { %v4861_v53 = vmax.f32 %v4543_v6, 0.0  ;;  %v4410_v15 = vpack.c.bf16 %v10176_v55, %v10173_v32  ;;  %v2897_v13 = vmax.f32 %v2659_v30, 0.0 }
 0x431   : > { %v3875_v61 = vpop.f32.mrf.mxu2 }
 0x432   : > { %v4988_v47 = vpack.c.bf16 %v4861_v53, %v4860_v26  ;;  %4584 = vmatmul.bf16.gmra.mxu3 %v4410_v15  ;;  %v3876_v52 = vadd.f32 %v3875_v61, %v9782_v33  ;;  %v10190_v3 = vadd.f32 %v2897_v13, %v9715_v48  ;;  %v12078_v48 = vld [vmem:[#allocation96_spill] sm:$0xff] }
 0x433   : > { %v3330_v20 = vpop.f32.mrf.mxu1 }
 0x434   : > { %v3331_v12 = vadd.f32 %v3330_v20, %v11992_v34  ;;  %5126 = vmatmul.bf16.vlgmr.msrb.gmra.mxu0 %v4988_v47  ;;  %v4165_v63 = vmax.f32 %v3876_v52, 0.0 }
 0x435   : > { %v2660_v10 = vpop.f32.mrf.mxu0  ;;  %v4545_v28 = vpop.f32.mrf.mxu3 }
 0x436   : > { %v3595_v6 = vmax.f32 %v3331_v12, 0.0  ;;  %v2661_v4 = vadd.f32 %v2660_v10, %v7301_v1  ;;  %v4546_v30 = vadd.f32 %v4545_v28, %v10160_v14  ;;  %v12077_v10 = vld [vmem:[#allocation95_spill] sm:$0xff] }
 0x438   : > { %v2898_v26 = vmax.f32 %v2661_v4, 0.0  ;;  %v3704_v53 = vpack.c.bf16 %v3595_v6, %v3594_v45  ;;  %v10200_v6 = vadd.f32 %v4165_v63, %v12077_v10  ;;  %v4862_v52 = vmax.f32 %v4546_v30, 0.0 }
 0x439   : > { %v3877_v15 = vpop.f32.mrf.mxu2 }
 0x43a   : > { %v10193_v20 = vadd.f32 %v2898_v26, %v9748_v8  ;;  %v3878_v47 = vadd.f32 %v3877_v15, %v9782_v33  ;;  %3914 = vmatmul.bf16.gmra.mxu2 %v3704_v53 }
 0x43b   : > { %v3333_v0 = vpop.f32.mrf.mxu1 }
 0x43c   : > { %v4166_v61 = vmax.f32 %v3878_v47, 0.0  ;;  %v3126_v56 = vpack.c.bf16 %v10193_v20, %v10190_v3  ;;  %v3334_v26 = vadd.f32 %v3333_v0, %v11992_v34 }
 0x43d   : > { %v2663_v12 = vpop.f32.mrf.mxu0  ;;  %v4547_v45 = vpop.f32.mrf.mxu3 }
 0x43e   : > { %v10203_v13 = vadd.f32 %v4166_v61, %v12078_v48  ;;  %v4548_v8 = vadd.f32 %v4547_v45, %v10160_v14  ;;  %3372 = vmatmul.bf16.gmra.mxu1 %v3126_v56  ;;  %v2664_v15 = vadd.f32 %v2663_v12, %v7301_v1  ;;  %v3596_v61 = vmax.f32 %v3334_v26, 0.0 }
 0x440   : > { %12079 = vst [vmem:[#allocation26_spill] sm:$0xff] %v10203_v13  ;;  %v4863_v4 = vmax.f32 %v4548_v8, 0.0  ;;  %v4411_v28 = vpack.c.bf16 %v10203_v13, %v10200_v6  ;;  %v2899_v56 = vmax.f32 %v2664_v15, 0.0 }
 0x441   : > { %v3880_v53 = vpop.f32.mrf.mxu2 }
 0x442   : > { %4589 = vmatmul.bf16.gmra.mxu3 %v4411_v28  ;;  %v4989_v47 = vpack.c.bf16 %v4863_v4, %v4862_v52  ;;  %v3881_v30 = vadd.f32 %v3880_v53, %v9782_v33  ;;  %v10214_v12 = vadd.f32 %v2899_v56, %v9790_v50  ;;  %v12080_v4 = vld [vmem:[#allocation138_spill] sm:$0xff]  ;;  %v12084_v50 = vld [vmem:[#allocation103_spill] sm:$0xff] }
 0x443   : > { %v3335_v63 = vpop.f32.mrf.mxu1 }
 0x444   : > { %v3336_v10 = vadd.f32 %v3335_v63, %v11992_v34  ;;  %5131 = vmatmul.bf16.gmra.mxu0 %v4989_v47  ;;  %v4167_v52 = vmax.f32 %v3881_v30, 0.0 }
 0x445   : > { %v2665_v48 = vpop.f32.mrf.mxu0  ;;  %v4550_v45 = vpop.f32.mrf.mxu3 }
 0x446   : > { %v3597_v8 = vmax.f32 %v3336_v10, 0.0  ;;  %v2666_v36 = vadd.f32 %v2665_v48, %v7301_v1  ;;  %v4551_v15 = vadd.f32 %v4550_v45, %v10160_v14 }
 0x448   : > { %v2900_v25 = vmax.f32 %v2666_v36, 0.0  ;;  %v3705_v0 = vpack.c.bf16 %v3597_v8, %v3596_v61  ;;  %v12082_v61 = vld [vmem:[#allocation102_spill] sm:$0xff] }
 0x449   : > { %v3882_v13 = vpop.f32.mrf.mxu2  ;;  %v10224_v48 = vadd.f32 %v4167_v52, %v12082_v61 }
 0x44a   : > { %v10217_v28 = vadd.f32 %v2900_v25, %v12080_v4  ;;  %v3883_v26 = vadd.f32 %v3882_v13, %v9782_v33  ;;  %3919 = vmatmul.bf16.gmra.mxu2 %v3705_v0  ;;  %v4864_v13 = vmax.f32 %v4551_v15, 0.0 }
 0x44b   : > { %v3338_v47 = vpop.f32.mrf.mxu1  ;;  %12083 = vst [vmem:[#allocation80_spill] sm:$0xff] %v10224_v48 }
 0x44c   : > { %12081 = vst [vmem:[#allocation79_spill] sm:$0xff] %v10217_v28  ;;  %v4168_v53 = vmax.f32 %v3883_v26, 0.0  ;;  %v3127_v63 = vpack.c.bf16 %v10217_v28, %v10214_v12  ;;  %v3339_v8 = vadd.f32 %v3338_v47, %v11992_v34 }
 0x44d   : > { %v2668_v36 = vpop.f32.mrf.mxu0  ;;  %v4552_v10 = vpop.f32.mrf.mxu3 }
 0x44e   : > { %v10227_v56 = vadd.f32 %v4168_v53, %v12084_v50  ;;  %v4553_v25 = vadd.f32 %v4552_v10, %v10160_v14  ;;  %3377 = vmatmul.bf16.gmra.mxu1 %v3127_v63  ;;  %v2669_v4 = vadd.f32 %v2668_v36, %v7301_v1  ;;  %v3598_v53 = vmax.f32 %v3339_v8, 0.0 }
 0x450   : > { %12085 = vst [vmem:[#allocation48_spill] sm:$0xff] %v10227_v56  ;;  %v4865_v30 = vmax.f32 %v4553_v25, 0.0  ;;  %v4412_v45 = vpack.c.bf16 %v10227_v56, %v10224_v48  ;;  %v2901_v63 = vmax.f32 %v2669_v4, 0.0 }
 0x451   : > { %v3885_v0 = vpop.f32.mrf.mxu2 }
 0x452   : > { %4594 = vmatmul.bf16.gmra.mxu3 %v4412_v45  ;;  %v4990_v26 = vpack.c.bf16 %v4865_v30, %v4864_v13  ;;  %v3886_v15 = vadd.f32 %v3885_v0, %v9782_v33  ;;  %v10238_v36 = vadd.f32 %v2901_v63, %v9834_v23  ;;  %v12088_v23 = vld [vmem:[#allocation109_spill] sm:$0xff] }
 0x453   : > { %v3340_v52 = vpop.f32.mrf.mxu1 }
 0x454   : > { %v3341_v61 = vadd.f32 %v3340_v52, %v11992_v34  ;;  %5136 = vmatmul.bf16.gmra.mxu0 %v4990_v26  ;;  %v4169_v13 = vmax.f32 %v3886_v15, 0.0 }
 0x455   : > { %v2670_v50 = vpop.f32.mrf.mxu0  ;;  %v4555_v10 = vpop.f32.mrf.mxu3 }
 0x456   : > { %v3599_v25 = vmax.f32 %v3341_v61, 0.0  ;;  %v2671_v56 = vadd.f32 %v2670_v50, %v7301_v1  ;;  %v4556_v4 = vadd.f32 %v4555_v10, %v10160_v14  ;;  %v12086_v61 = vld [vmem:[#allocation108_spill] sm:$0xff] }
 0x458   : > { %v2902_v48 = vmax.f32 %v2671_v56, 0.0  ;;  %v3706_v47 = vpack.c.bf16 %v3599_v25, %v3598_v53  ;;  %v10248_v53 = vadd.f32 %v4169_v13, %v12086_v61 }
 0x459   : > { %v3887_v28 = vpop.f32.mrf.mxu2 }
 0x45a   : > { %v10241_v30 = vadd.f32 %v2902_v48, %v9864_v16  ;;  %v3888_v45 = vadd.f32 %v3887_v28, %v9782_v33  ;;  %3924 = vmatmul.bf16.gmra.mxu2 %v3706_v47  ;;  %12087 = vst [vmem:[#allocation84_spill] sm:$0xff] %v10248_v53  ;;  %v4866_v28 = vmax.f32 %v4556_v4, 0.0 }
 0x45b   : > { %v3343_v8 = vpop.f32.mrf.mxu1 }
 0x45c   : > { %v4170_v0 = vmax.f32 %v3888_v45, 0.0  ;;  %v3128_v26 = vpack.c.bf16 %v10241_v30, %v10238_v36  ;;  %v3344_v63 = vadd.f32 %v3343_v8, %v11992_v34 }
 0x45d   : > { %v2673_v56 = vpop.f32.mrf.mxu0  ;;  %v4557_v52 = vpop.f32.mrf.mxu3 }
 0x45e   : > { %v10251_v50 = vadd.f32 %v4170_v0, %v12088_v23  ;;  %v4558_v16 = vadd.f32 %v4557_v52, %v10160_v14  ;;  %3382 = vmatmul.bf16.gmra.mxu1 %v3128_v26  ;;  %v2674_v25 = vadd.f32 %v2673_v56, %v7301_v1  ;;  %v3600_v0 = vmax.f32 %v3344_v63, 0.0 }
 0x460   : > { %12089 = vst [vmem:[#allocation88_spill] sm:$0xff] %v10251_v50  ;;  %v4867_v48 = vmax.f32 %v4558_v16, 0.0  ;;  %v4413_v10 = vpack.c.bf16 %v10251_v50, %v10248_v53  ;;  %v2903_v26 = vmax.f32 %v2674_v25, 0.0 }
 0x461   : > { %v3890_v15 = vpop.f32.mrf.mxu2 }
 0x462   : > { %4599 = vmatmul.bf16.gmra.mxu3 %v4413_v10  ;;  %v4991_v47 = vpack.c.bf16 %v4867_v48, %v4866_v28  ;;  %v3891_v4 = vadd.f32 %v3890_v15, %v9782_v33  ;;  %v10262_v56 = vadd.f32 %v2903_v26, %v9873_v39  ;;  %v12093_v39 = vld [vmem:[#allocation116_spill] sm:$0xff] }
 0x463   : > { %v3345_v13 = vpop.f32.mrf.mxu1 }
 0x464   : > { %v3346_v45 = vadd.f32 %v3345_v13, %v11992_v34  ;;  %5141 = vmatmul.bf16.gmra.mxu0 %v4991_v47  ;;  %v4171_v28 = vmax.f32 %v3891_v4, 0.0  ;;  %v6652_v4 = vld [vmem:[%s11556_s3] sm:$0xff] }
 0x465   : > { %v2675_v61 = vpop.f32.mrf.mxu0  ;;  %v4560_v52 = vpop.f32.mrf.mxu3  ;;  %5838 = vmatpush.bf16.msrb.mxu1 %v6652_v4 }
 0x466   : > { %v3601_v23 = vmax.f32 %v3346_v45, 0.0  ;;  %v2676_v16 = vadd.f32 %v2675_v61, %v7301_v1  ;;  %v4561_v25 = vadd.f32 %v4560_v52, %v10160_v14 }
 0x468   : > { %v2904_v50 = vmax.f32 %v2676_v16, 0.0  ;;  %v3707_v8 = vpack.c.bf16 %v3601_v23, %v3600_v0  ;;  %v12091_v0 = vld [vmem:[#allocation115_spill] sm:$0xff] }
 0x469   : > { %v3892_v53 = vpop.f32.mrf.mxu2  ;;  %v10272_v61 = vadd.f32 %v4171_v28, %v12091_v0 }
 0x46a   : > { %v10265_v48 = vadd.f32 %v2904_v50, %v9896_v40  ;;  %v3893_v10 = vadd.f32 %v3892_v53, %v9782_v33  ;;  %3929 = vmatmul.bf16.gmra.mxu2 %v3707_v8  ;;  %v4868_v53 = vmax.f32 %v4561_v25, 0.0 }
 0x46b   : > { %v3348_v63 = vpop.f32.mrf.mxu1  ;;  %12092 = vst [vmem:[#allocation95_spill] sm:$0xff] %v10272_v61 }
 0x46c   : > { %12090 = vst [vmem:[#allocation89_spill] sm:$0xff] %v10265_v48  ;;  %v4172_v15 = vmax.f32 %v3893_v10, 0.0  ;;  %v3129_v47 = vpack.c.bf16 %v10265_v48, %v10262_v56  ;;  %v3349_v23 = vadd.f32 %v3348_v63, %v11992_v34 }
 0x46d   : > { %v2678_v13 = vpop.f32.mrf.mxu0  ;;  %v4562_v45 = vpop.f32.mrf.mxu3 }
 0x46e   : > { %v10275_v26 = vadd.f32 %v4172_v15, %v12093_v39  ;;  %v4563_v40 = vadd.f32 %v4562_v45, %v10160_v14  ;;  %3387 = vmatmul.bf16.gmra.mxu1 %v3129_v47  ;;  %v2679_v8 = vadd.f32 %v2678_v13, %v7301_v1  ;;  %v3602_v25 = vmax.f32 %v3349_v23, 0.0 }
 0x470   : > { %12094 = vst [vmem:[#allocation96_spill] sm:$0xff] %v10275_v26  ;;  %v4869_v50 = vmax.f32 %v4563_v40, 0.0  ;;  %v4414_v52 = vpack.c.bf16 %v10275_v26, %v10272_v61  ;;  %v2905_v0 = vmax.f32 %v2679_v8, 0.0  ;;  %v12095_v8 = vld [vmem:[#allocation122_spill] sm:$0xff] }
 0x471   : > { %v3895_v16 = vpop.f32.mrf.mxu2 }
 0x472   : > { %4604 = vmatmul.bf16.gmra.mxu3 %v4414_v52  ;;  %v4992_v28 = vpack.c.bf16 %v4869_v50, %v4868_v53  ;;  %v3896_v39 = vadd.f32 %v3895_v16, %v9782_v33  ;;  %v10289_v13 = vadd.f32 %v2905_v0, %v9931_v59  ;;  %v12097_v59 = vld [vmem:[#allocation123_spill] sm:$0xff] }
 0x473   : > { %v3350_v10 = vpop.f32.mrf.mxu1 }
 0x474   : > { %v3351_v15 = vadd.f32 %v3350_v10, %v11992_v34  ;;  %5146 = vmatmul.bf16.gmra.mxu0 %v4992_v28  ;;  %v4173_v53 = vmax.f32 %v3896_v39, 0.0 }
 0x475   : > { %v2680_v47 = vpop.f32.mrf.mxu0  ;;  %v4565_v45 = vpop.f32.mrf.mxu3 }
 0x476   : > { %v3603_v40 = vmax.f32 %v3351_v15, 0.0  ;;  %v2681_v26 = vadd.f32 %v2680_v47, %v7301_v1  ;;  %v4566_v23 = vadd.f32 %v4565_v45, %v10160_v14  ;;  %v10299_v28 = vadd.f32 %v4173_v53, %v12095_v8 }
 0x478   : > { %v2906_v63 = vmax.f32 %v2681_v26, 0.0  ;;  %v3708_v61 = vpack.c.bf16 %v3603_v40, %v3602_v25  ;;  %12096 = vst [vmem:[#allocation138_spill] sm:$0xff] %v10299_v28  ;;  %v4870_v15 = vmax.f32 %v4566_v23, 0.0 }
 0x479   : > { %v3897_v48 = vpop.f32.mrf.mxu2 }
 0x47a   : > { %v10292_v50 = vadd.f32 %v2906_v63, %v9966_v51  ;;  %v3898_v52 = vadd.f32 %v3897_v48, %v9782_v33  ;;  %3934 = vmatmul.bf16.gmra.mxu2 %v3708_v61 }
 0x47b   : > { %v3353_v4 = vpop.f32.mrf.mxu1 }
 0x47c   : > { %v4174_v16 = vmax.f32 %v3898_v52, 0.0  ;;  %v3130_v1 = vpack.c.bf16 %v10292_v50, %v10289_v13  ;;  %v3354_v47 = vadd.f32 %v3353_v4, %v11992_v34 }
 0x47d   : > { %v4567_v26 = vpop.f32.mrf.mxu3 }
 0x47e   : > { %v10302_v10 = vadd.f32 %v4174_v16, %v12097_v59  ;;  %v4568_v51 = vadd.f32 %v4567_v26, %v10160_v14  ;;  %3392 = vmatmul.bf16.gmra.mxu1 %v3130_v1  ;;  %v3604_v63 = vmax.f32 %v3354_v47, 0.0 }
 0x480   : > { %12098 = vst [vmem:[#allocation102_spill] sm:$0xff] %v10302_v10  ;;  %v4871_v48 = vmax.f32 %v4568_v51, 0.0  ;;  %v4415_v61 = vpack.c.bf16 %v10302_v10, %v10299_v28  ;;  %v12107_v10 = vld [vmem:[#allocation104_spill] sm:$0xff] }
 0x481   : > { %v3900_v25 = vpop.f32.mrf.mxu2 }
 0x482   : > { %4609 = vmatmul.bf16.gmra.mxu3 %v4415_v61  ;;  %v4993_v45 = vpack.c.bf16 %v4871_v48, %v4870_v15  ;;  %v3901_v53 = vadd.f32 %v3900_v25, %v9782_v33  ;;  %v12099_v15 = vld [vmem:[#allocation129_spill] sm:$0xff]  ;;  %v12101_v61 = vld [vmem:[#allocation130_spill] sm:$0xff] }
 0x483   : > { %v3355_v0 = vpop.f32.mrf.mxu1 }
 0x484   : > { %v3356_v39 = vadd.f32 %v3355_v0, %v11992_v34  ;;  %5151 = vmatmul.bf16.gmra.mxu0 %v4993_v45  ;;  %v4175_v1 = vmax.f32 %v3901_v53, 0.0 }
 0x485   : > { %v4570_v40 = vpop.f32.mrf.mxu3 }
 0x486   : > { %v3605_v52 = vmax.f32 %v3356_v39, 0.0  ;;  %v4571_v4 = vadd.f32 %v4570_v40, %v10160_v14  ;;  %v10313_v48 = vadd.f32 %v4175_v1, %v12099_v15 }
 0x488   : > { %v3709_v16 = vpack.c.bf16 %v3605_v52, %v3604_v63  ;;  %12100 = vst [vmem:[#allocation103_spill] sm:$0xff] %v10313_v48  ;;  %v4872_v47 = vmax.f32 %v4571_v4, 0.0 }
 0x489   : > { %v3902_v23 = vpop.f32.mrf.mxu2 }
 0x48a   : > { %v3903_v26 = vadd.f32 %v3902_v23, %v9782_v33  ;;  %3939 = vmatmul.bf16.gmra.mxu2 %v3709_v16 }
 0x48b   : > { %v3358_v8 = vpop.f32.mrf.mxu1 }
 0x48c   : > { %v4176_v59 = vmax.f32 %v3903_v26, 0.0  ;;  %v3359_v63 = vadd.f32 %v3358_v8, %v11992_v34 }
 0x48d   : > { %v4572_v51 = vpop.f32.mrf.mxu3 }
 0x48e   : > { %v10316_v45 = vadd.f32 %v4176_v59, %v12101_v61  ;;  %v4573_v25 = vadd.f32 %v4572_v51, %v10160_v14  ;;  %v3606_v1 = vmax.f32 %v3359_v63, 0.0 }
 0x490   : > { %12102 = vst [vmem:[#allocation108_spill] sm:$0xff] %v10316_v45  ;;  %v4873_v0 = vmax.f32 %v4573_v25, 0.0  ;;  %v4416_v39 = vpack.c.bf16 %v10316_v45, %v10313_v48 }
 0x492   : > { %4614 = vmatmul.bf16.gmra.mxu3 %v4416_v39  ;;  %v4994_v53 = vpack.c.bf16 %v4873_v0, %v4872_v47 }
 0x493   : > { %v3360_v40 = vpop.f32.mrf.mxu1  ;;  %v3905_v52 = vpop.f32.mrf.mxu2 }
 0x494   : > { %v3361_v16 = vadd.f32 %v3360_v40, %v11992_v34  ;;  %5156 = vmatmul.bf16.gmra.mxu0 %v4994_v53  ;;  %v3906_v59 = vadd.f32 %v3905_v52, %v9782_v33  ;;  %v12103_v40 = vld [vmem:[#allocation136_spill] sm:$0xff] }
 0x495   : > { %v4575_v23 = vpop.f32.mrf.mxu3 }
 0x496   : > { %v3607_v26 = vmax.f32 %v3361_v16, 0.0  ;;  %v4177_v61 = vmax.f32 %v3906_v59, 0.0  ;;  %v4576_v25 = vadd.f32 %v4575_v23, %v10160_v14  ;;  %v12105_v16 = vld [vmem:[#allocation137_spill] sm:$0xff] }
 0x498   : > { %v3710_v51 = vpack.c.bf16 %v3607_v26, %v3606_v1  ;;  %v10328_v53 = vadd.f32 %v4177_v61, %v12103_v40  ;;  %v4874_v63 = vmax.f32 %v4576_v25, 0.0 }
 0x49a   : > { %3944 = vmatmul.bf16.gmra.mxu2 %v3710_v51  ;;  %12104 = vst [vmem:[#allocation109_spill] sm:$0xff] %v10328_v53 }
 0x49b   : > { %v3363_v4 = vpop.f32.mrf.mxu1  ;;  %v3907_v15 = vpop.f32.mrf.mxu2 }
 0x49c   : > { %v3908_v8 = vadd.f32 %v3907_v15, %v9782_v33  ;;  %v3364_v1 = vadd.f32 %v3363_v4, %v11992_v34 }
 0x49d   : > { %v4577_v47 = vpop.f32.mrf.mxu3 }
 0x49e   : > { %v4178_v0 = vmax.f32 %v3908_v8, 0.0  ;;  %v4578_v39 = vadd.f32 %v4577_v47, %v10160_v14  ;;  %v3608_v8 = vmax.f32 %v3364_v1, 0.0  ;;  %v6834_v1 = vld [vmem:[%s11554_s1] sm:$0xff] }
 0x4a0   : > { %v10331_v45 = vadd.f32 %v4178_v0, %v12105_v16  ;;  %v4875_v52 = vmax.f32 %v4578_v39, 0.0 }
 0x4a2   : > { %12106 = vst [vmem:[#allocation115_spill] sm:$0xff] %v10331_v45  ;;  %v4417_v26 = vpack.c.bf16 %v10331_v45, %v10328_v53  ;;  %v4995_v23 = vpack.c.bf16 %v4875_v52, %v4874_v63 }
 0x4a3   : > { %v3365_v59 = vpop.f32.mrf.mxu1 }
 0x4a4   : > { %v3366_v51 = vadd.f32 %v3365_v59, %v11992_v34  ;;  %4619 = vmatmul.bf16.gmra.mxu3 %v4417_v26  ;;  %5161 = vmatmul.bf16.gmra.mxu0 %v4995_v23  ;;  %v10344_v23 = vperm.slane %v6834_v1, 7 }
 0x4a5   : > { %v4580_v15 = vpop.f32.mrf.mxu3 }
 0x4a6   : > { %v3609_v61 = vmax.f32 %v3366_v51, 0.0  ;;  %v4581_v0 = vadd.f32 %v4580_v15, %v10160_v14 }
 0x4a8   : > { %v3711_v47 = vpack.c.bf16 %v3609_v61, %v3608_v8  ;;  %v4876_v16 = vmax.f32 %v4581_v0, 0.0 }
 0x4aa   : > { %3949 = vmatmul.bf16.gmra.mxu2 %v3711_v47 }
 0x4ab   : > { %v3368_v25 = vpop.f32.mrf.mxu1 }
 0x4ac   : > { %v3369_v63 = vadd.f32 %v3368_v25, %v11992_v34 }
 0x4ad   : > { %v3910_v39 = vpop.f32.mrf.mxu2  ;;  %v4582_v40 = vpop.f32.mrf.mxu3 }
 0x4ae   : > { %v4583_v4 = vadd.f32 %v4582_v40, %v10160_v14  ;;  %v3911_v26 = vadd.f32 %v3910_v39, %v9782_v33  ;;  %v3610_v8 = vmax.f32 %v3369_v63, 0.0 }
 0x4b0   : > { %v4877_v45 = vmax.f32 %v4583_v4, 0.0  ;;  %v4179_v0 = vmax.f32 %v3911_v26, 0.0 }
 0x4b1   : > { %v5127_v52 = vpop.f32.mrf.mxu0 }
 0x4b2   : > { %v4996_v59 = vpack.c.bf16 %v4877_v45, %v4876_v16  ;;  %v5128_v25 = vadd.f32 %v5127_v52, %v10344_v23  ;;  %v10350_v1 = vadd.f32 %v4179_v0, %v12107_v10  ;;  %v12109_v16 = vld [vmem:[#allocation143_spill] sm:$0xff] }
 0x4b3   : > { %v3370_v51 = vpop.f32.mrf.mxu1  ;;  %v12112_v10 = vld [vmem:[#allocation67_spill] sm:$0xff] }
 0x4b4   : > { %v3371_v15 = vadd.f32 %v3370_v51, %v11992_v34  ;;  %5166 = vmatmul.bf16.gmra.mxu0 %v4996_v59  ;;  %12108 = vst [vmem:[#allocation116_spill] sm:$0xff] %v10350_v1  ;;  %v5447_v45 = vmax.f32 %v5128_v25, 0.0 }
 0x4b5   : > { %v3912_v61 = vpop.f32.mrf.mxu2  ;;  %v4585_v47 = vpop.f32.mrf.mxu3 }
 0x4b6   : > { %v3611_v40 = vmax.f32 %v3371_v15, 0.0  ;;  %v3913_v39 = vadd.f32 %v3912_v61, %v9782_v33  ;;  %v4586_v26 = vadd.f32 %v4585_v47, %v10160_v14  ;;  %v12111_v61 = vld [vmem:[#allocation68_spill] sm:$0xff] }
 0x4b8   : > { %v4180_v4 = vmax.f32 %v3913_v39, 0.0  ;;  %v3712_v53 = vpack.c.bf16 %v3611_v40, %v3610_v8  ;;  %v5575_v40 = vadd.f32 %v5447_v45, %v12111_v61  ;;  %v4878_v39 = vmax.f32 %v4586_v26, 0.0 }
 0x4b9   : > { %v5129_v48 = vpop.f32.mrf.mxu0 }
 0x4ba   : > { %v10353_v28 = vadd.f32 %v4180_v4, %v12109_v16  ;;  %v5130_v63 = vadd.f32 %v5129_v48, %v10344_v23  ;;  %3954 = vmatmul.bf16.gmra.mxu2 %v3712_v53 }
 0x4bb   : > { %v3373_v59 = vpop.f32.mrf.mxu1 }
 0x4bc   : > { %12110 = vst [vmem:[#allocation122_spill] sm:$0xff] %v10353_v28  ;;  %v5448_v52 = vmax.f32 %v5130_v63, 0.0  ;;  %v4418_v51 = vpack.c.bf16 %v10353_v28, %v10350_v1  ;;  %v3374_v53 = vadd.f32 %v3373_v59, %v11992_v34 }
 0x4bd   : > { %v3915_v15 = vpop.f32.mrf.mxu2  ;;  %v4587_v8 = vpop.f32.mrf.mxu3 }
 0x4be   : > { %v5576_v0 = vadd.f32 %v5448_v52, %v12112_v10  ;;  %v4588_v25 = vadd.f32 %v4587_v8, %v10160_v14  ;;  %4624 = vmatmul.bf16.gmra.mxu3 %v4418_v51  ;;  %v3916_v47 = vadd.f32 %v3915_v15, %v9782_v33  ;;  %v3612_v45 = vmax.f32 %v3374_v53, 0.0 }
 0x4c0   : > { %v5703_v4 = vpack.c.bf16 %v5576_v0, %v5575_v40  ;;  %v4879_v48 = vmax.f32 %v4588_v25, 0.0  ;;  %v4181_v10 = vmax.f32 %v3916_v47, 0.0  ;;  %v12113_v25 = vld [vmem:[#allocation100_spill] sm:$0xff] }
 0x4c1   : > { %v5132_v16 = vpop.f32.mrf.mxu0 }
 0x4c2   : > { %5839 = vmatmul.bf16.vlgmr.msrb.gmra.mxu1 %v5703_v4  ;;  %v4997_v63 = vpack.c.bf16 %v4879_v48, %v4878_v39  ;;  %v5133_v51 = vadd.f32 %v5132_v16, %v10344_v23  ;;  %v10368_v15 = vadd.f32 %v4181_v10, %v12113_v25  ;;  %v12115_v4 = vld [vmem:[#allocation146_spill] sm:$0xff]  ;;  %v12118_v10 = vld [vmem:[#allocation72_spill] sm:$0xff] }
 0x4c3   : > { %v3375_v28 = vpop.f32.mrf.mxu1 }
 0x4c4   : > { %v3376_v1 = vadd.f32 %v3375_v28, %v11992_v34  ;;  %5171 = vmatmul.bf16.gmra.mxu0 %v4997_v63  ;;  %12114 = vst [vmem:[#allocation123_spill] sm:$0xff] %v10368_v15  ;;  %v5449_v39 = vmax.f32 %v5133_v51, 0.0 }
 0x4c5   : > { %v3917_v61 = vpop.f32.mrf.mxu2  ;;  %v4590_v52 = vpop.f32.mrf.mxu3 }
 0x4c6   : > { %v3613_v26 = vmax.f32 %v3376_v1, 0.0  ;;  %v3918_v8 = vadd.f32 %v3917_v61, %v9782_v33  ;;  %v4591_v47 = vadd.f32 %v4590_v52, %v10160_v14  ;;  %v12117_v61 = vld [vmem:[#allocation70_spill] sm:$0xff] }
 0x4c8   : > { %v4182_v40 = vmax.f32 %v3918_v8, 0.0  ;;  %v3713_v59 = vpack.c.bf16 %v3613_v26, %v3612_v45  ;;  %v5577_v26 = vadd.f32 %v5449_v39, %v12117_v61 }
 0x4c9   : > { %v5134_v0 = vpop.f32.mrf.mxu0 }
 0x4ca   : > { %v10371_v48 = vadd.f32 %v4182_v40, %v12115_v4  ;;  %v5135_v28 = vadd.f32 %v5134_v0, %v10344_v23  ;;  %3959 = vmatmul.bf16.gmra.mxu2 %v3713_v59  ;;  %v4880_v40 = vmax.f32 %v4591_v47, 0.0 }
 0x4cb   : > { %v3378_v53 = vpop.f32.mrf.mxu1 }
 0x4cc   : > { %12116 = vst [vmem:[#allocation129_spill] sm:$0xff] %v10371_v48  ;;  %v5450_v16 = vmax.f32 %v5135_v28, 0.0  ;;  %v4419_v1 = vpack.c.bf16 %v10371_v48, %v10368_v15  ;;  %v3379_v59 = vadd.f32 %v3378_v53, %v11992_v34 }
 0x4cd   : > { %v3920_v63 = vpop.f32.mrf.mxu2  ;;  %v4592_v45 = vpop.f32.mrf.mxu3 }
 0x4ce   : > { %v5578_v8 = vadd.f32 %v5450_v16, %v12118_v10  ;;  %v4593_v51 = vadd.f32 %v4592_v45, %v10160_v14  ;;  %4629 = vmatmul.bf16.gmra.mxu3 %v4419_v1  ;;  %v3921_v52 = vadd.f32 %v3920_v63, %v9782_v33  ;;  %v3614_v39 = vmax.f32 %v3379_v59, 0.0 }
 0x4d0   : > { %v4881_v25 = vmax.f32 %v4593_v51, 0.0  ;;  %v5704_v0 = vpack.c.bf16 %v5578_v8, %v5577_v26  ;;  %v4183_v10 = vmax.f32 %v3921_v52, 0.0 }
 0x4d1   : > { %v5137_v4 = vpop.f32.mrf.mxu0 }
 0x4d2   : > { %5844 = vmatmul.bf16.gmra.mxu1 %v5704_v0  ;;  %v4998_v28 = vpack.c.bf16 %v4881_v25, %v4880_v40  ;;  %v5138_v1 = vadd.f32 %v5137_v4, %v10344_v23  ;;  %v10386_v63 = vadd.f32 %v4183_v10, %v9938_v58  ;;  %v12120_v58 = vld [vmem:[#allocation50_spill] sm:$0xff] }
 0x4d3   : > { %v3380_v48 = vpop.f32.mrf.mxu1 }
 0x4d4   : > { %v3381_v15 = vadd.f32 %v3380_v48, %v11992_v34  ;;  %5176 = vmatmul.bf16.gmra.mxu0 %v4998_v28  ;;  %v5451_v51 = vmax.f32 %v5138_v1, 0.0  ;;  %v12119_v28 = vld [vmem:[#allocation43_spill] sm:$0xff] }
 0x4d5   : > { %v3922_v61 = vpop.f32.mrf.mxu2  ;;  %v4595_v16 = vpop.f32.mrf.mxu3 }
 0x4d6   : > { %v3615_v47 = vmax.f32 %v3381_v15, 0.0  ;;  %v3923_v45 = vadd.f32 %v3922_v61, %v9782_v33  ;;  %v4596_v0 = vadd.f32 %v4595_v16, %v10160_v14 }
 0x4d8   : > { %v4184_v26 = vmax.f32 %v3923_v45, 0.0  ;;  %v3714_v53 = vpack.c.bf16 %v3615_v47, %v3614_v39  ;;  %v5579_v39 = vadd.f32 %v5451_v51, %v12119_v28 }
 0x4d9   : > { %v5139_v8 = vpop.f32.mrf.mxu0 }
 0x4da   : > { %v10389_v40 = vadd.f32 %v4184_v26, %v9941_v18  ;;  %v5140_v48 = vadd.f32 %v5139_v8, %v10344_v23  ;;  %3964 = vmatmul.bf16.gmra.mxu2 %v3714_v53  ;;  %v4882_v18 = vmax.f32 %v4596_v0, 0.0 }
 0x4db   : > { %v3383_v25 = vpop.f32.mrf.mxu1 }
 0x4dc   : > { %v5452_v59 = vmax.f32 %v5140_v48, 0.0  ;;  %v4420_v15 = vpack.c.bf16 %v10389_v40, %v10386_v63  ;;  %v3384_v45 = vadd.f32 %v3383_v25, %v11992_v34 }
 0x4dd   : > { %v3925_v4 = vpop.f32.mrf.mxu2  ;;  %v4597_v52 = vpop.f32.mrf.mxu3 }
 0x4de   : > { %v5580_v61 = vadd.f32 %v5452_v59, %v12120_v58  ;;  %v4598_v10 = vadd.f32 %v4597_v52, %v10160_v14  ;;  %4634 = vmatmul.bf16.gmra.mxu3 %v4420_v15  ;;  %v3926_v16 = vadd.f32 %v3925_v4, %v9782_v33  ;;  %v3616_v51 = vmax.f32 %v3384_v45, 0.0 }
 0x4e0   : > { %v4883_v1 = vmax.f32 %v4598_v10, 0.0  ;;  %v5705_v47 = vpack.c.bf16 %v5580_v61, %v5579_v39  ;;  %v4185_v58 = vmax.f32 %v3926_v16, 0.0 }
 0x4e1   : > { %v5142_v26 = vpop.f32.mrf.mxu0 }
 0x4e2   : > { %5849 = vmatmul.bf16.gmra.mxu1 %v5705_v47  ;;  %v4999_v53 = vpack.c.bf16 %v4883_v1, %v4882_v18  ;;  %v5143_v15 = vadd.f32 %v5142_v26, %v10344_v23  ;;  %v10404_v4 = vadd.f32 %v4185_v58, %v9986_v24 }
 0x4e3   : > { %v3385_v8 = vpop.f32.mrf.mxu1 }
 0x4e4   : > { %v3386_v48 = vadd.f32 %v3385_v8, %v11992_v34  ;;  %5181 = vmatmul.bf16.gmra.mxu0 %v4999_v53  ;;  %v5453_v10 = vmax.f32 %v5143_v15, 0.0 }
 0x4e5   : > { %v3927_v28 = vpop.f32.mrf.mxu2  ;;  %v4600_v59 = vpop.f32.mrf.mxu3 }
 0x4e6   : > { %v3617_v0 = vmax.f32 %v3386_v48, 0.0  ;;  %v3928_v52 = vadd.f32 %v3927_v28, %v9782_v33  ;;  %v4601_v45 = vadd.f32 %v4600_v59, %v10160_v14  ;;  %v5581_v48 = vadd.f32 %v5453_v10, %v9999_v17 }
 0x4e8   : > { %v4186_v39 = vmax.f32 %v3928_v52, 0.0  ;;  %v3715_v25 = vpack.c.bf16 %v3617_v0, %v3616_v51 }
 0x4e9   : > { %v5144_v61 = vpop.f32.mrf.mxu0 }
 0x4ea   : > { %v10407_v18 = vadd.f32 %v4186_v39, %v9989_v5  ;;  %v5145_v1 = vadd.f32 %v5144_v61, %v10344_v23  ;;  %3969 = vmatmul.bf16.gmra.mxu2 %v3715_v25  ;;  %v4884_v5 = vmax.f32 %v4601_v45, 0.0 }
 0x4eb   : > { %v3388_v47 = vpop.f32.mrf.mxu1 }
 0x4ec   : > { %v5454_v26 = vmax.f32 %v5145_v1, 0.0  ;;  %v4421_v16 = vpack.c.bf16 %v10407_v18, %v10404_v4  ;;  %v3389_v15 = vadd.f32 %v3388_v47, %v11992_v34 }
 0x4ed   : > { %v3930_v53 = vpop.f32.mrf.mxu2  ;;  %v4602_v8 = vpop.f32.mrf.mxu3 }
 0x4ee   : > { %v5582_v24 = vadd.f32 %v5454_v26, %v10002_v57  ;;  %v4603_v51 = vadd.f32 %v4602_v8, %v10160_v14  ;;  %4639 = vmatmul.bf16.gmra.mxu3 %v4421_v16  ;;  %v3931_v59 = vadd.f32 %v3930_v53, %v9782_v33  ;;  %v3618_v17 = vmax.f32 %v3389_v15, 0.0 }
 0x4f0   : > { %v4885_v28 = vmax.f32 %v4603_v51, 0.0  ;;  %v5706_v58 = vpack.c.bf16 %v5582_v24, %v5581_v48  ;;  %v4187_v10 = vmax.f32 %v3931_v59, 0.0 }
 0x4f1   : > { %v5147_v0 = vpop.f32.mrf.mxu0 }
 0x4f2   : > { %5854 = vmatmul.bf16.gmra.mxu1 %v5706_v58  ;;  %v5000_v52 = vpack.c.bf16 %v4885_v28, %v4884_v5  ;;  %v5148_v1 = vadd.f32 %v5147_v0, %v10344_v23  ;;  %v10422_v53 = vadd.f32 %v4187_v10, %v10022_v11 }
 0x4f3   : > { %v3390_v39 = vpop.f32.mrf.mxu1 }
 0x4f4   : > { %v3391_v25 = vadd.f32 %v3390_v39, %v11992_v34  ;;  %5186 = vmatmul.bf16.gmra.mxu0 %v5000_v52  ;;  %v5455_v48 = vmax.f32 %v5148_v1, 0.0 }
 0x4f5   : > { %v3932_v61 = vpop.f32.mrf.mxu2  ;;  %v4605_v57 = vpop.f32.mrf.mxu3 }
 0x4f6   : > { %v3619_v45 = vmax.f32 %v3391_v25, 0.0  ;;  %v3933_v26 = vadd.f32 %v3932_v61, %v9782_v33  ;;  %v4606_v28 = vadd.f32 %v4605_v57, %v10160_v14  ;;  %v5583_v52 = vadd.f32 %v5455_v48, %v10035_v41 }
 0x4f8   : > { %v4188_v16 = vmax.f32 %v3933_v26, 0.0  ;;  %v3716_v47 = vpack.c.bf16 %v3619_v45, %v3618_v17 }
 0x4f9   : > { %v5149_v8 = vpop.f32.mrf.mxu0 }
 0x4fa   : > { %v10425_v24 = vadd.f32 %v4188_v16, %v10025_v62  ;;  %v5150_v51 = vadd.f32 %v5149_v8, %v10344_v23  ;;  %3974 = vmatmul.bf16.gmra.mxu2 %v3716_v47  ;;  %v4886_v62 = vmax.f32 %v4606_v28, 0.0 }
 0x4fb   : > { %v3393_v5 = vpop.f32.mrf.mxu1 }
 0x4fc   : > { %v5456_v58 = vmax.f32 %v5150_v51, 0.0  ;;  %v4422_v15 = vpack.c.bf16 %v10425_v24, %v10422_v53  ;;  %v3394_v61 = vadd.f32 %v3393_v5, %v11992_v34 }
 0x4fd   : > { %v3935_v0 = vpop.f32.mrf.mxu2  ;;  %v4607_v59 = vpop.f32.mrf.mxu3 }
 0x4fe   : > { %v5584_v11 = vadd.f32 %v5456_v58, %v10038_v19  ;;  %v4608_v39 = vadd.f32 %v4607_v59, %v10160_v14  ;;  %4644 = vmatmul.bf16.gmra.mxu3 %v4422_v15  ;;  %v3936_v57 = vadd.f32 %v3935_v0, %v9782_v33  ;;  %v3620_v41 = vmax.f32 %v3394_v61, 0.0 }
 0x500   : > { %v4887_v25 = vmax.f32 %v4608_v39, 0.0  ;;  %v5707_v17 = vpack.c.bf16 %v5584_v11, %v5583_v52  ;;  %v4189_v47 = vmax.f32 %v3936_v57, 0.0 }
 0x501   : > { %v5152_v10 = vpop.f32.mrf.mxu0 }
 0x502   : > { %5859 = vmatmul.bf16.gmra.mxu1 %v5707_v17  ;;  %v5001_v1 = vpack.c.bf16 %v4887_v25, %v4886_v62  ;;  %v5153_v8 = vadd.f32 %v5152_v10, %v10344_v23  ;;  %v10440_v15 = vadd.f32 %v4189_v47, %v10059_v43 }
 0x503   : > { %v3395_v45 = vpop.f32.mrf.mxu1 }
 0x504   : > { %v3396_v26 = vadd.f32 %v3395_v45, %v11992_v34  ;;  %5191 = vmatmul.bf16.gmra.mxu0 %v5001_v1  ;;  %v5457_v0 = vmax.f32 %v5153_v8, 0.0 }
 0x505   : > { %v3937_v16 = vpop.f32.mrf.mxu2  ;;  %v4610_v19 = vpop.f32.mrf.mxu3 }
 0x506   : > { %v3621_v48 = vmax.f32 %v3396_v26, 0.0  ;;  %v3938_v51 = vadd.f32 %v3937_v16, %v9782_v33  ;;  %v4611_v11 = vadd.f32 %v4610_v19, %v10160_v14  ;;  %v5585_v61 = vadd.f32 %v5457_v0, %v10070_v54  ;;  %v12121_v0 = vld [vmem:[#allocation58_spill] sm:$0xff] }
 0x508   : > { %v4190_v28 = vmax.f32 %v3938_v51, 0.0  ;;  %v3717_v5 = vpack.c.bf16 %v3621_v48, %v3620_v41 }
 0x509   : > { %v5154_v58 = vpop.f32.mrf.mxu0 }
 0x50a   : > { %v10443_v59 = vadd.f32 %v4190_v28, %v10062_v35  ;;  %v5155_v52 = vadd.f32 %v5154_v58, %v10344_v23  ;;  %3979 = vmatmul.bf16.gmra.mxu2 %v3717_v5  ;;  %v4888_v35 = vmax.f32 %v4611_v11, 0.0 }
 0x50c   : > { %v5458_v39 = vmax.f32 %v5155_v52, 0.0  ;;  %v4423_v62 = vpack.c.bf16 %v10443_v59, %v10440_v15 }
 0x50d   : > { %v3940_v25 = vpop.f32.mrf.mxu2  ;;  %v4612_v17 = vpop.f32.mrf.mxu3 }
 0x50e   : > { %v5586_v43 = vadd.f32 %v5458_v39, %v10073_v49  ;;  %v4613_v10 = vadd.f32 %v4612_v17, %v10160_v14  ;;  %4649 = vmatmul.bf16.gmra.mxu3 %v4423_v62  ;;  %v3941_v26 = vadd.f32 %v3940_v25, %v9782_v33 }
 0x510   : > { %v4889_v57 = vmax.f32 %v4613_v10, 0.0  ;;  %v5708_v1 = vpack.c.bf16 %v5586_v43, %v5585_v61  ;;  %v4191_v47 = vmax.f32 %v3941_v26, 0.0 }
 0x511   : > { %v5157_v45 = vpop.f32.mrf.mxu0 }
 0x512   : > { %5864 = vmatmul.bf16.gmra.mxu1 %v5708_v1  ;;  %v5002_v41 = vpack.c.bf16 %v4889_v57, %v4888_v35  ;;  %v5158_v8 = vadd.f32 %v5157_v45, %v10344_v23  ;;  %v10456_v51 = vadd.f32 %v4191_v47, %v10088_v60 }
 0x514   : > { %5196 = vmatmul.bf16.gmra.mxu0 %v5002_v41  ;;  %v5459_v28 = vmax.f32 %v5158_v8, 0.0 }
 0x515   : > { %v3942_v16 = vpop.f32.mrf.mxu2  ;;  %v4615_v19 = vpop.f32.mrf.mxu3 }
 0x516   : > { %v3943_v54 = vadd.f32 %v3942_v16, %v9782_v33  ;;  %v4616_v52 = vadd.f32 %v4615_v19, %v10160_v14  ;;  %v5587_v17 = vadd.f32 %v5459_v28, %v10097_v42 }
 0x518   : > { %v4192_v49 = vmax.f32 %v3943_v54, 0.0 }
 0x519   : > { %v5159_v48 = vpop.f32.mrf.mxu0 }
 0x51a   : > { %v10459_v5 = vadd.f32 %v4192_v49, %v10091_v37  ;;  %v5160_v58 = vadd.f32 %v5159_v48, %v10344_v23  ;;  %3984 = vmatmul.bf16.gmra.mxu2 %v12121_v0  ;;  %v4890_v37 = vmax.f32 %v4616_v52, 0.0  ;;  %v12122_v48 = vld [vmem:[#allocation62_spill] sm:$0xff] }
 0x51c   : > { %v5460_v11 = vmax.f32 %v5160_v58, 0.0  ;;  %v4424_v39 = vpack.c.bf16 %v10459_v5, %v10456_v51 }
 0x51d   : > { %v3945_v62 = vpop.f32.mrf.mxu2  ;;  %v4617_v25 = vpop.f32.mrf.mxu3 }
 0x51e   : > { %v5588_v60 = vadd.f32 %v5460_v11, %v10100_v2  ;;  %v4618_v61 = vadd.f32 %v4617_v25, %v10160_v14  ;;  %4654 = vmatmul.bf16.gmra.mxu3 %v4424_v39  ;;  %v3946_v57 = vadd.f32 %v3945_v62, %v9782_v33 }
 0x520   : > { %v4891_v43 = vmax.f32 %v4618_v61, 0.0  ;;  %v5709_v10 = vpack.c.bf16 %v5588_v60, %v5587_v17  ;;  %v4193_v26 = vmax.f32 %v3946_v57, 0.0 }
 0x521   : > { %v5162_v35 = vpop.f32.mrf.mxu0 }
 0x522   : > { %5869 = vmatmul.bf16.gmra.mxu1 %v5709_v10  ;;  %v5003_v1 = vpack.c.bf16 %v4891_v43, %v4890_v37  ;;  %v5163_v41 = vadd.f32 %v5162_v35, %v10344_v23  ;;  %v10473_v47 = vadd.f32 %v4193_v26, %v10111_v21 }
 0x524   : > { %5201 = vmatmul.bf16.gmra.mxu0 %v5003_v1  ;;  %v5461_v8 = vmax.f32 %v5163_v41, 0.0 }
 0x525   : > { %v3947_v45 = vpop.f32.mrf.mxu2 }
 0x526   : > { %v3948_v42 = vadd.f32 %v3947_v45, %v9782_v33  ;;  %v5589_v52 = vadd.f32 %v5461_v8, %v10123_v38 }
 0x527   : > { %v4620_v16 = vpop.f32.mrf.mxu3 }
 0x528   : > { %v4194_v2 = vmax.f32 %v3948_v42, 0.0  ;;  %v4621_v11 = vadd.f32 %v4620_v16, %v10160_v14  ;;  %v12123_v42 = vld [vmem:[#allocation66_spill] sm:$0xff] }
 0x529   : > { %v5164_v19 = vpop.f32.mrf.mxu0 }
 0x52a   : > { %v10476_v54 = vadd.f32 %v4194_v2, %v10114_v29  ;;  %v5165_v49 = vadd.f32 %v5164_v19, %v10344_v23  ;;  %3989 = vmatmul.bf16.gmra.mxu2 %v12122_v48  ;;  %v4892_v17 = vmax.f32 %v4621_v11, 0.0 }
 0x52c   : > { %v5462_v28 = vmax.f32 %v5165_v49, 0.0  ;;  %v4425_v58 = vpack.c.bf16 %v10476_v54, %v10473_v47 }
 0x52d   : > { %v3950_v0 = vpop.f32.mrf.mxu2 }
 0x52e   : > { %v5590_v21 = vadd.f32 %v5462_v28, %v10126_v9  ;;  %4659 = vmatmul.bf16.gmra.mxu3 %v4425_v58  ;;  %v3951_v60 = vadd.f32 %v3950_v0, %v9782_v33 }
 0x52f   : > { %v4622_v39 = vpop.f32.mrf.mxu3 }
 0x530   : > { %v4623_v29 = vadd.f32 %v4622_v39, %v10160_v14  ;;  %v5710_v62 = vpack.c.bf16 %v5590_v21, %v5589_v52  ;;  %v4195_v10 = vmax.f32 %v3951_v60, 0.0 }
 0x531   : > { %v5167_v25 = vpop.f32.mrf.mxu0 }
 0x532   : > { %v4893_v61 = vmax.f32 %v4623_v29, 0.0  ;;  %5874 = vmatmul.bf16.gmra.mxu1 %v5710_v62  ;;  %v5168_v38 = vadd.f32 %v5167_v25, %v10344_v23  ;;  %v10490_v1 = vadd.f32 %v4195_v10, %v10134_v22 }
 0x534   : > { %v5004_v37 = vpack.c.bf16 %v4893_v61, %v4892_v17  ;;  %v5463_v45 = vmax.f32 %v5168_v38, 0.0 }
 0x535   : > { %v3952_v43 = vpop.f32.mrf.mxu2 }
 0x536   : > { %v3953_v35 = vadd.f32 %v3952_v43, %v9782_v33  ;;  %5206 = vmatmul.bf16.gmra.mxu0 %v5004_v37  ;;  %v5591_v22 = vadd.f32 %v5463_v45, %v10144_v27  ;;  %v12124_v43 = vld [vmem:[#allocation25_spill] sm:$0xff] }
 0x538   : > { %v4196_v9 = vmax.f32 %v3953_v35, 0.0 }
 0x539   : > { %v5169_v57 = vpop.f32.mrf.mxu0 }
 0x53a   : > { %v10493_v26 = vadd.f32 %v4196_v9, %v10137_v7  ;;  %v5170_v41 = vadd.f32 %v5169_v57, %v10344_v23  ;;  %3994 = vmatmul.bf16.gmra.mxu2 %v12123_v42 }
 0x53c   : > { %v5464_v16 = vmax.f32 %v5170_v41, 0.0  ;;  %v4426_v2 = vpack.c.bf16 %v10493_v26, %v10490_v1 }
 0x53d   : > { %v3955_v19 = vpop.f32.mrf.mxu2 }
 0x53e   : > { %v5592_v7 = vadd.f32 %v5464_v16, %v10147_v46  ;;  %4664 = vmatmul.bf16.gmra.mxu3 %v4426_v2  ;;  %v3956_v48 = vadd.f32 %v3955_v19, %v9782_v33 }
 0x53f   : > { %v5840_v8 = vpop.f32.mrf.mxu1 }
 0x540   : > { %6161 = vst.msk [vmem:[%s10504_s12] sm:$0xff] %vm6160_vm2, %v5840_v8  ;;  %v5711_v49 = vpack.c.bf16 %v5592_v7, %v5591_v22  ;;  %v4197_v0 = vmax.f32 %v3956_v48, 0.0 }
 0x541   : > { %v4625_v28 = vpop.f32.mrf.mxu3  ;;  %v5172_v58 = vpop.f32.mrf.mxu0 }
 0x542   : > { %5879 = vmatmul.bf16.gmra.mxu1 %v5711_v49  ;;  %v5173_v11 = vadd.f32 %v5172_v58, %v10344_v23  ;;  %v4626_v46 = vadd.f32 %v4625_v28, %v10160_v14  ;;  %v10517_v29 = vadd.f32 %v4197_v0, %v10163_v31 }
 0x544   : > { %v5465_v17 = vmax.f32 %v5173_v11, 0.0  ;;  %v4894_v10 = vmax.f32 %v4626_v46, 0.0  ;;  %v12125_v46 = vld [vmem:[#allocation74_spill] sm:$0xff] }
 0x545   : > { %v3957_v52 = vpop.f32.mrf.mxu2 }
 0x546   : > { %v3958_v21 = vadd.f32 %v3957_v52, %v9782_v33  ;;  %v5593_v57 = vadd.f32 %v5465_v17, %v10173_v32 }
 0x547   : > { %v5842_v27 = vpop.f32.mrf.mxu1 }
 0x548   : > { %v4198_v39 = vmax.f32 %v3958_v21, 0.0  ;;  %6162 = vst.msk [vmem:[%s10504_s12 + $0x8] sm:$0xff] %vm6160_vm2, %v5842_v27 }
 0x549   : > { %v4627_v62 = vpop.f32.mrf.mxu3  ;;  %v5174_v25 = vpop.f32.mrf.mxu0 }
 0x54a   : > { %v10520_v60 = vadd.f32 %v4198_v39, %v10166_v44  ;;  %v4628_v61 = vadd.f32 %v4627_v62, %v10160_v14  ;;  %v5175_v37 = vadd.f32 %v5174_v25, %v10344_v23  ;;  %3999 = vmatmul.bf16.gmra.mxu2 %v12124_v43 }
 0x54c   : > { %v4895_v38 = vmax.f32 %v4628_v61, 0.0  ;;  %v5466_v35 = vmax.f32 %v5175_v37, 0.0  ;;  %v4427_v31 = vpack.c.bf16 %v10520_v60, %v10517_v29  ;;  %v12126_v37 = vld [vmem:[#allocation26_spill] sm:$0xff] }
 0x54d   : > { %v3960_v9 = vpop.f32.mrf.mxu2 }
 0x54e   : > { %v5594_v45 = vadd.f32 %v5466_v35, %v10176_v55  ;;  %4669 = vmatmul.bf16.gmra.mxu3 %v4427_v31  ;;  %v5005_v44 = vpack.c.bf16 %v4895_v38, %v4894_v10  ;;  %v3961_v16 = vadd.f32 %v3960_v9, %v9782_v33 }
 0x54f   : > { %v5845_v41 = vpop.f32.mrf.mxu1 }
 0x550   : > { %6163 = vst.msk [vmem:[%s10504_s12 + $0x10] sm:$0xff] %vm6160_vm2, %v5845_v41  ;;  %5211 = vmatmul.bf16.gmra.mxu0 %v5005_v44  ;;  %v5712_v42 = vpack.c.bf16 %v5594_v45, %v5593_v57  ;;  %v4199_v22 = vmax.f32 %v3961_v16, 0.0 }
 0x551   : > { %v4630_v2 = vpop.f32.mrf.mxu3  ;;  %v5177_v19 = vpop.f32.mrf.mxu0 }
 0x552   : > { %5884 = vmatmul.bf16.gmra.mxu1 %v5712_v42  ;;  %v5178_v8 = vadd.f32 %v5177_v19, %v10344_v23  ;;  %v4631_v49 = vadd.f32 %v4630_v2, %v10160_v14  ;;  %v10538_v28 = vadd.f32 %v4199_v22, %v10190_v3 }
 0x554   : > { %v5467_v52 = vmax.f32 %v5178_v8, 0.0  ;;  %v4896_v39 = vmax.f32 %v4631_v49, 0.0  ;;  %v12127_v8 = vld [vmem:[#allocation79_spill] sm:$0xff] }
 0x555   : > { %v3962_v7 = vpop.f32.mrf.mxu2 }
 0x556   : > { %v3963_v32 = vadd.f32 %v3962_v7, %v9782_v33  ;;  %v5595_v61 = vadd.f32 %v5467_v52, %v10200_v6 }
 0x557   : > { %v5847_v55 = vpop.f32.mrf.mxu1 }
 0x558   : > { %v4200_v48 = vmax.f32 %v3963_v32, 0.0  ;;  %6164 = vst.msk [vmem:[%s10504_s12 + $0x18] sm:$0xff] %vm6160_vm2, %v5847_v55 }
 0x559   : > { %v4632_v58 = vpop.f32.mrf.mxu3  ;;  %v5179_v0 = vpop.f32.mrf.mxu0 }
 0x55a   : > { %v10541_v11 = vadd.f32 %v4200_v48, %v10193_v20  ;;  %v4633_v21 = vadd.f32 %v4632_v58, %v10160_v14  ;;  %v5180_v27 = vadd.f32 %v5179_v0, %v10344_v23  ;;  %4004 = vmatmul.bf16.gmra.mxu2 %v12125_v46  ;;  %v12128_v48 = vld [vmem:[#allocation78_spill] sm:$0xff] }
 0x55c   : > { %v4897_v62 = vmax.f32 %v4633_v21, 0.0  ;;  %v5468_v25 = vmax.f32 %v5180_v27, 0.0  ;;  %v4428_v3 = vpack.c.bf16 %v10541_v11, %v10538_v28  ;;  %v12129_v27 = vld [vmem:[#allocation80_spill] sm:$0xff] }
 0x55d   : > { %v3965_v17 = vpop.f32.mrf.mxu2 }
 0x55e   : > { %v5596_v43 = vadd.f32 %v5468_v25, %v12126_v37  ;;  %4674 = vmatmul.bf16.gmra.mxu3 %v4428_v3  ;;  %v5006_v20 = vpack.c.bf16 %v4897_v62, %v4896_v39  ;;  %v3966_v35 = vadd.f32 %v3965_v17, %v9782_v33  ;;  %v12130_v39 = vld [vmem:[#allocation48_spill] sm:$0xff] }
 0x55f   : > { %v5850_v10 = vpop.f32.mrf.mxu1 }
 0x560   : > { %6165 = vst.msk [vmem:[%s10504_s12 + $0x20] sm:$0xff] %vm6160_vm2, %v5850_v10  ;;  %5216 = vmatmul.bf16.gmra.mxu0 %v5006_v20  ;;  %v5713_v38 = vpack.c.bf16 %v5596_v43, %v5595_v61  ;;  %v4201_v57 = vmax.f32 %v3966_v35, 0.0 }
 0x561   : > { %v4635_v31 = vpop.f32.mrf.mxu3  ;;  %v5182_v9 = vpop.f32.mrf.mxu0 }
 0x562   : > { %5889 = vmatmul.bf16.gmra.mxu1 %v5713_v38  ;;  %v5183_v44 = vadd.f32 %v5182_v9, %v10344_v23  ;;  %v4636_v42 = vadd.f32 %v4635_v31, %v10160_v14  ;;  %v10559_v2 = vadd.f32 %v4201_v57, %v10214_v12 }
 0x564   : > { %v5469_v7 = vmax.f32 %v5183_v44, 0.0  ;;  %v4898_v58 = vmax.f32 %v4636_v42, 0.0 }
 0x565   : > { %v3967_v45 = vpop.f32.mrf.mxu2 }
 0x566   : > { %v3968_v6 = vadd.f32 %v3967_v45, %v9782_v33  ;;  %v5597_v46 = vadd.f32 %v5469_v7, %v12129_v27 }
 0x567   : > { %v5852_v41 = vpop.f32.mrf.mxu1 }
 0x568   : > { %v4202_v16 = vmax.f32 %v3968_v6, 0.0  ;;  %6166 = vst.msk [vmem:[%s10504_s12 + $0x28] sm:$0xff] %vm6160_vm2, %v5852_v41 }
 0x569   : > { %v4637_v19 = vpop.f32.mrf.mxu3  ;;  %v5184_v22 = vpop.f32.mrf.mxu0 }
 0x56a   : > { %v10562_v32 = vadd.f32 %v4202_v16, %v12127_v8  ;;  %v4638_v55 = vadd.f32 %v4637_v19, %v10160_v14  ;;  %v5185_v49 = vadd.f32 %v5184_v22, %v10344_v23  ;;  %4009 = vmatmul.bf16.gmra.mxu2 %v12128_v48  ;;  %v12131_v22 = vld [vmem:[#allocation32_spill] sm:$0xff] }
 0x56b   : > { %v12132_v48 = vld [vmem:[#allocation84_spill] sm:$0xff] }
 0x56c   : > { %v4899_v0 = vmax.f32 %v4638_v55, 0.0  ;;  %v5470_v52 = vmax.f32 %v5185_v49, 0.0  ;;  %v4429_v12 = vpack.c.bf16 %v10562_v32, %v10559_v2 }
 0x56d   : > { %v3970_v21 = vpop.f32.mrf.mxu2 }
 0x56e   : > { %v5598_v62 = vadd.f32 %v5470_v52, %v12130_v39  ;;  %4679 = vmatmul.bf16.gmra.mxu3 %v4429_v12  ;;  %v5007_v25 = vpack.c.bf16 %v4899_v0, %v4898_v58  ;;  %v3971_v61 = vadd.f32 %v3970_v21, %v9782_v33  ;;  %v12133_v0 = vld [vmem:[#allocation88_spill] sm:$0xff] }
 0x56f   : > { %v5855_v3 = vpop.f32.mrf.mxu1 }
 0x570   : > { %6167 = vst.msk [vmem:[%s10504_s12 + $0x30] sm:$0xff] %vm6160_vm2, %v5855_v3  ;;  %5221 = vmatmul.bf16.gmra.mxu0 %v5007_v25  ;;  %v5714_v17 = vpack.c.bf16 %v5598_v62, %v5597_v46  ;;  %v4203_v20 = vmax.f32 %v3971_v61, 0.0 }
 0x571   : > { %v4640_v37 = vpop.f32.mrf.mxu3  ;;  %v5187_v43 = vpop.f32.mrf.mxu0 }
 0x572   : > { %5894 = vmatmul.bf16.gmra.mxu1 %v5714_v17  ;;  %v5188_v38 = vadd.f32 %v5187_v43, %v10344_v23  ;;  %v4641_v9 = vadd.f32 %v4640_v37, %v10160_v14  ;;  %v10580_v45 = vadd.f32 %v4203_v20, %v10238_v36 }
 0x574   : > { %v5471_v41 = vmax.f32 %v5188_v38, 0.0  ;;  %v4900_v7 = vmax.f32 %v4641_v9, 0.0 }
 0x575   : > { %v3972_v10 = vpop.f32.mrf.mxu2 }
 0x576   : > { %v3973_v35 = vadd.f32 %v3972_v10, %v9782_v33  ;;  %v5599_v58 = vadd.f32 %v5471_v41, %v12132_v48 }
 0x577   : > { %v5857_v31 = vpop.f32.mrf.mxu1 }
 0x578   : > { %v4204_v57 = vmax.f32 %v3973_v35, 0.0  ;;  %6168 = vst.msk [vmem:[%s10504_s12 + $0x38] sm:$0xff] %vm6160_vm2, %v5857_v31  ;;  %v12134_v31 = vld [vmem:[#allocation89_spill] sm:$0xff] }
 0x579   : > { %v4642_v44 = vpop.f32.mrf.mxu3  ;;  %v5189_v6 = vpop.f32.mrf.mxu0 }
 0x57a   : > { %v10583_v42 = vadd.f32 %v4204_v57, %v10241_v30  ;;  %v4643_v16 = vadd.f32 %v4642_v44, %v10160_v14  ;;  %v5190_v19 = vadd.f32 %v5189_v6, %v10344_v23  ;;  %4014 = vmatmul.bf16.gmra.mxu2 %v12131_v22  ;;  %v12135_v6 = vld [vmem:[#allocation49_spill] sm:$0xff] }
 0x57c   : > { %v4901_v8 = vmax.f32 %v4643_v16, 0.0  ;;  %v5472_v55 = vmax.f32 %v5190_v19, 0.0  ;;  %v4430_v36 = vpack.c.bf16 %v10583_v42, %v10580_v45 }
 0x57d   : > { %v3975_v49 = vpop.f32.mrf.mxu2 }
 0x57e   : > { %v5600_v52 = vadd.f32 %v5472_v55, %v12133_v0  ;;  %4684 = vmatmul.bf16.gmra.mxu3 %v4430_v36  ;;  %v5008_v30 = vpack.c.bf16 %v4901_v8, %v4900_v7  ;;  %v3976_v27 = vadd.f32 %v3975_v49, %v9782_v33  ;;  %v12136_v7 = vld [vmem:[#allocation95_spill] sm:$0xff]  ;;  %v12137_v55 = vld [vmem:[#allocation96_spill] sm:$0xff] }
 0x57f   : > { %v5860_v12 = vpop.f32.mrf.mxu1 }
 0x580   : > { %6169 = vst.msk [vmem:[%s10504_s12 + $0x40] sm:$0xff] %vm6160_vm2, %v5860_v12  ;;  %5226 = vmatmul.bf16.gmra.mxu0 %v5008_v30  ;;  %v5715_v21 = vpack.c.bf16 %v5600_v52, %v5599_v58  ;;  %v4205_v62 = vmax.f32 %v3976_v27, 0.0 }
 0x581   : > { %v4645_v46 = vpop.f32.mrf.mxu3  ;;  %v5192_v39 = vpop.f32.mrf.mxu0 }
 0x582   : > { %5899 = vmatmul.bf16.gmra.mxu1 %v5715_v21  ;;  %v5193_v3 = vadd.f32 %v5192_v39, %v10344_v23  ;;  %v4646_v37 = vadd.f32 %v4645_v46, %v10160_v14  ;;  %v10601_v20 = vadd.f32 %v4205_v62, %v10262_v56 }
 0x584   : > { %v5473_v35 = vmax.f32 %v5193_v3, 0.0  ;;  %v4902_v41 = vmax.f32 %v4646_v37, 0.0 }
 0x585   : > { %v3977_v25 = vpop.f32.mrf.mxu2 }
 0x586   : > { %v3978_v17 = vadd.f32 %v3977_v25, %v9782_v33  ;;  %v5601_v8 = vadd.f32 %v5473_v35, %v12136_v7  ;;  %v12138_v35 = vld [vmem:[#allocation44_spill] sm:$0xff]  ;;  %v12141_v7 = vld [vmem:[#allocation59_spill] sm:$0xff] }
 0x587   : > { %v5862_v61 = vpop.f32.mrf.mxu1 }
 0x588   : > { %v4206_v43 = vmax.f32 %v3978_v17, 0.0  ;;  %6170 = vst.msk [vmem:[%s10504_s12 + $0x48] sm:$0xff] %vm6160_vm2, %v5862_v61 }
 0x589   : > { %v4647_v10 = vpop.f32.mrf.mxu3  ;;  %v5194_v38 = vpop.f32.mrf.mxu0 }
 0x58a   : > { %v10604_v9 = vadd.f32 %v4206_v43, %v12134_v31  ;;  %v4648_v57 = vadd.f32 %v4647_v10, %v10160_v14  ;;  %v5195_v44 = vadd.f32 %v5194_v38, %v10344_v23  ;;  %4019 = vmatmul.bf16.gmra.mxu2 %v12135_v6 }
 0x58c   : > { %v4903_v16 = vmax.f32 %v4648_v57, 0.0  ;;  %v5474_v19 = vmax.f32 %v5195_v44, 0.0  ;;  %v4431_v56 = vpack.c.bf16 %v10604_v9, %v10601_v20 }
 0x58d   : > { %v3980_v22 = vpop.f32.mrf.mxu2 }
 0x58e   : > { %v5602_v36 = vadd.f32 %v5474_v19, %v12137_v55  ;;  %4689 = vmatmul.bf16.gmra.mxu3 %v4431_v56  ;;  %v5009_v49 = vpack.c.bf16 %v4903_v16, %v4902_v41  ;;  %v3981_v0 = vadd.f32 %v3980_v22, %v9782_v33  ;;  %v12139_v41 = vld [vmem:[#allocation138_spill] sm:$0xff] }
 0x58f   : > { %v5865_v48 = vpop.f32.mrf.mxu1  ;;  %v12140_v19 = vld [vmem:[#allocation102_spill] sm:$0xff] }
 0x590   : > { %6171 = vst.msk [vmem:[%s10504_s12 + $0x50] sm:$0xff] %vm6160_vm2, %v5865_v48  ;;  %5231 = vmatmul.bf16.gmra.mxu0 %v5009_v49  ;;  %v5716_v58 = vpack.c.bf16 %v5602_v36, %v5601_v8  ;;  %v4207_v12 = vmax.f32 %v3981_v0, 0.0  ;;  %v3446_v8 = vadd.f32 %v12141_v7, %v11992_v34  ;;  %v12146_v7 = vld [vmem:[#allocation108_spill] sm:$0xff] }
 0x591   : > { %v4650_v52 = vpop.f32.mrf.mxu3  ;;  %v5197_v30 = vpop.f32.mrf.mxu0 }
 0x592   : > { %5904 = vmatmul.bf16.gmra.mxu1 %v5716_v58  ;;  %v5198_v27 = vadd.f32 %v5197_v30, %v10344_v23  ;;  %v4651_v62 = vadd.f32 %v4650_v52, %v10160_v14  ;;  %v10622_v3 = vadd.f32 %v4207_v12, %v10289_v13  ;;  %v12142_v58 = vld [vmem:[#allocation56_spill] sm:$0xff]  ;;  %v3641_v52 = vmax.f32 %v3446_v8, 0.0 }
 0x593   : > { %v3444_v0 = vadd.f32 %v12142_v58, %v11992_v34 }
 0x594   : > { %v5475_v37 = vmax.f32 %v5198_v27, 0.0  ;;  %v4904_v31 = vmax.f32 %v4651_v62, 0.0 }
 0x595   : > { %v3982_v21 = vpop.f32.mrf.mxu2 }
 0x596   : > { %v3983_v46 = vadd.f32 %v3982_v21, %v9782_v33  ;;  %v5603_v16 = vadd.f32 %v5475_v37, %v12139_v41  ;;  %v3640_v21 = vmax.f32 %v3444_v0, 0.0 }
 0x597   : > { %v5867_v39 = vpop.f32.mrf.mxu1 }
 0x598   : > { %v4208_v25 = vmax.f32 %v3983_v46, 0.0  ;;  %6172 = vst.msk [vmem:[%s10504_s12 + $0x58] sm:$0xff] %vm6160_vm2, %v5867_v39 }
 0x599   : > { %v4652_v17 = vpop.f32.mrf.mxu3  ;;  %v5199_v61 = vpop.f32.mrf.mxu0 }
 0x59a   : > { %v10625_v43 = vadd.f32 %v4208_v25, %v10292_v50  ;;  %v4653_v10 = vadd.f32 %v4652_v17, %v10160_v14  ;;  %v5200_v38 = vadd.f32 %v5199_v61, %v10344_v23  ;;  %4024 = vmatmul.bf16.gmra.mxu2 %v12138_v35  ;;  %v3727_v17 = vpack.c.bf16 %v3641_v52, %v3640_v21  ;;  %v12143_v61 = vld [vmem:[#allocation30_spill] sm:$0xff]  ;;  %v12148_v52 = vld [vmem:[#allocation65_spill] sm:$0xff] }
 0x59c   : > { %v4905_v57 = vmax.f32 %v4653_v10, 0.0  ;;  %v5476_v44 = vmax.f32 %v5200_v38, 0.0  ;;  %v4432_v13 = vpack.c.bf16 %v10625_v43, %v10622_v3 }
 0x59d   : > { %v3985_v6 = vpop.f32.mrf.mxu2 }
 0x59e   : > { %v5604_v56 = vadd.f32 %v5476_v44, %v12140_v19  ;;  %4694 = vmatmul.bf16.gmra.mxu3 %v4432_v13  ;;  %v5010_v50 = vpack.c.bf16 %v4905_v57, %v4904_v31  ;;  %v3986_v36 = vadd.f32 %v3985_v6, %v9782_v33  ;;  %v12144_v31 = vld [vmem:[#allocation31_spill] sm:$0xff] }
 0x59f   : > { %v5870_v22 = vpop.f32.mrf.mxu1 }
 0x5a0   : > { %6173 = vst.msk [vmem:[%s10504_s12 + $0x60] sm:$0xff] %vm6160_vm2, %v5870_v22  ;;  %5236 = vmatmul.bf16.gmra.mxu0 %v5010_v50  ;;  %v5717_v55 = vpack.c.bf16 %v5604_v56, %v5603_v16  ;;  %v4209_v30 = vmax.f32 %v3986_v36, 0.0  ;;  %v12145_v50 = vld [vmem:[#allocation103_spill] sm:$0xff] }
 0x5a1   : > { %v4655_v49 = vpop.f32.mrf.mxu3  ;;  %v5202_v48 = vpop.f32.mrf.mxu0 }
 0x5a2   : > { %5909 = vmatmul.bf16.gmra.mxu1 %v5717_v55  ;;  %v5203_v27 = vadd.f32 %v5202_v48, %v10344_v23  ;;  %v4656_v62 = vadd.f32 %v4655_v49, %v10160_v14  ;;  %v10647_v37 = vadd.f32 %v4209_v30, %v12143_v61  ;;  %v12147_v49 = vld [vmem:[#allocation33_spill] sm:$0xff]  ;;  %v3449_v30 = vadd.f32 %v12148_v52, %v11992_v34 }
 0x5a3   : > { %v3451_v48 = vadd.f32 %v12147_v49, %v11992_v34  ;;  %v12152_v52 = vld [vmem:[#allocation109_spill] sm:$0xff] }
 0x5a4   : > { %v5477_v35 = vmax.f32 %v5203_v27, 0.0  ;;  %v4906_v6 = vmax.f32 %v4656_v62, 0.0 }
 0x5a5   : > { %v3987_v12 = vpop.f32.mrf.mxu2  ;;  %v3643_v27 = vmax.f32 %v3451_v48, 0.0 }
 0x5a6   : > { %v3988_v46 = vadd.f32 %v3987_v12, %v9782_v33  ;;  %v5605_v22 = vadd.f32 %v5477_v35, %v12145_v50 }
 0x5a7   : > { %v5872_v39 = vpop.f32.mrf.mxu1 }
 0x5a8   : > { %v4210_v25 = vmax.f32 %v3988_v46, 0.0  ;;  %6174 = vst.msk [vmem:[%s10504_s12 + $0x68] sm:$0xff] %vm6160_vm2, %v5872_v39  ;;  %v3642_v39 = vmax.f32 %v3449_v30, 0.0 }
 0x5a9   : > { %v4657_v10 = vpop.f32.mrf.mxu3  ;;  %v5204_v38 = vpop.f32.mrf.mxu0 }
 0x5aa   : > { %v10650_v57 = vadd.f32 %v4210_v25, %v12144_v31  ;;  %v4658_v44 = vadd.f32 %v4657_v10, %v10160_v14  ;;  %v5205_v13 = vadd.f32 %v5204_v38, %v10344_v23  ;;  %4029 = vmatmul.bf16.gmra.mxu2 %v3727_v17  ;;  %v3728_v35 = vpack.c.bf16 %v3643_v27, %v3642_v39 }
 0x5ac   : > { %v4907_v41 = vmax.f32 %v4658_v44, 0.0  ;;  %v5478_v16 = vmax.f32 %v5205_v13, 0.0  ;;  %v4433_v19 = vpack.c.bf16 %v10650_v57, %v10647_v37  ;;  %v12149_v44 = vld [vmem:[#allocation34_spill] sm:$0xff] }
 0x5ad   : > { %v3990_v56 = vpop.f32.mrf.mxu2 }
 0x5ae   : > { %v5606_v8 = vadd.f32 %v5478_v16, %v12146_v7  ;;  %4699 = vmatmul.bf16.gmra.mxu3 %v4433_v19  ;;  %v5011_v55 = vpack.c.bf16 %v4907_v41, %v4906_v6  ;;  %v3991_v12 = vadd.f32 %v3990_v56, %v9782_v33  ;;  %v12150_v6 = vld [vmem:[#allocation35_spill] sm:$0xff] }
 0x5af   : > { %v5875_v36 = vpop.f32.mrf.mxu1 }
 0x5b0   : > { %6175 = vst.msk [vmem:[%s10504_s12 + $0x70] sm:$0xff] %vm6160_vm2, %v5875_v36  ;;  %5241 = vmatmul.bf16.gmra.mxu0 %v5011_v55  ;;  %v5718_v58 = vpack.c.bf16 %v5606_v8, %v5605_v22  ;;  %v4211_v62 = vmax.f32 %v3991_v12, 0.0  ;;  %v12153_v12 = vld [vmem:[#allocation115_spill] sm:$0xff] }
 0x5b1   : > { %v4660_v0 = vpop.f32.mrf.mxu3 }
 0x5b2   : > { %5914 = vmatmul.bf16.gmra.mxu1 %v5718_v58  ;;  %v4661_v17 = vadd.f32 %v4660_v0, %v10160_v14  ;;  %v10671_v13 = vadd.f32 %v4211_v62, %v12149_v44  ;;  %v12151_v58 = vld [vmem:[#allocation82_spill] sm:$0xff] }
 0x5b3   : > { %v5207_v21 = vpop.f32.mrf.mxu0  ;;  %v3456_v0 = vadd.f32 %v12151_v58, %v11992_v34 }
 0x5b4   : > { %v5208_v10 = vadd.f32 %v5207_v21, %v10344_v23  ;;  %v4908_v19 = vmax.f32 %v4661_v17, 0.0 }
 0x5b5   : > { %v3992_v46 = vpop.f32.mrf.mxu2  ;;  %v3645_v17 = vmax.f32 %v3456_v0, 0.0 }
 0x5b6   : > { %v3993_v25 = vadd.f32 %v3992_v46, %v9782_v33  ;;  %v5479_v50 = vmax.f32 %v5208_v10, 0.0  ;;  %v12154_v46 = vld [vmem:[#allocation81_spill] sm:$0xff] }
 0x5b7   : > { %v5877_v61 = vpop.f32.mrf.mxu1  ;;  %v3454_v39 = vadd.f32 %v12154_v46, %v11992_v34  ;;  %v12158_v46 = vld [vmem:[#allocation83_spill] sm:$0xff] }
 0x5b8   : > { %v4212_v38 = vmax.f32 %v3993_v25, 0.0  ;;  %6176 = vst.msk [vmem:[%s10504_s12 + $0x78] sm:$0xff] %vm6160_vm2, %v5877_v61  ;;  %v5607_v30 = vadd.f32 %v5479_v50, %v12152_v52 }
 0x5b9   : > { %v4662_v31 = vpop.f32.mrf.mxu3  ;;  %v3644_v10 = vmax.f32 %v3454_v39, 0.0  ;;  %v3459_v39 = vadd.f32 %v12158_v46, %v11992_v34 }
 0x5ba   : > { %v10674_v41 = vadd.f32 %v4212_v38, %v12150_v6  ;;  %v4663_v16 = vadd.f32 %v4662_v31, %v10160_v14  ;;  %4034 = vmatmul.bf16.gmra.mxu2 %v3728_v35 }
 0x5bb   : > { %v5209_v56 = vpop.f32.mrf.mxu0 }
 0x5bc   : > { %v4909_v22 = vmax.f32 %v4663_v16, 0.0  ;;  %v5210_v7 = vadd.f32 %v5209_v56, %v10344_v23  ;;  %v4434_v8 = vpack.c.bf16 %v10674_v41, %v10671_v13  ;;  %v3729_v16 = vpack.c.bf16 %v3645_v17, %v3644_v10  ;;  %v12155_v56 = vld [vmem:[#allocation37_spill] sm:$0xff] }
 0x5bd   : > { %v3995_v55 = vpop.f32.mrf.mxu2 }
 0x5be   : > { %v5480_v36 = vmax.f32 %v5210_v7, 0.0  ;;  %4704 = vmatmul.bf16.gmra.mxu3 %v4434_v8  ;;  %v5012_v49 = vpack.c.bf16 %v4909_v22, %v4908_v19  ;;  %v3996_v62 = vadd.f32 %v3995_v55, %v9782_v33  ;;  %v12156_v22 = vld [vmem:[#allocation38_spill] sm:$0xff] }
 0x5bf   : > { %v5880_v48 = vpop.f32.mrf.mxu1 }
 0x5c0   : > { %v5608_v21 = vadd.f32 %v5480_v36, %v12153_v12  ;;  %6177 = vst.msk [vmem:[%s10504_s12 + $0x80] sm:$0xff] %vm6160_vm2, %v5880_v48  ;;  %5246 = vmatmul.bf16.gmra.mxu0 %v5012_v49  ;;  %v4213_v38 = vmax.f32 %v3996_v62, 0.0 }
 0x5c1   : > { %v4665_v27 = vpop.f32.mrf.mxu3 }
 0x5c2   : > { %v5719_v25 = vpack.c.bf16 %v5608_v21, %v5607_v30  ;;  %v4666_v44 = vadd.f32 %v4665_v27, %v10160_v14  ;;  %v10694_v50 = vadd.f32 %v4213_v38, %v12155_v56  ;;  %v12157_v30 = vld [vmem:[#allocation85_spill] sm:$0xff]  ;;  %v3646_v38 = vmax.f32 %v3459_v39, 0.0 }
 0x5c3   : > { %v3461_v12 = vadd.f32 %v12157_v30, %v11992_v34 }
 0x5c4   : > { %5919 = vmatmul.bf16.gmra.mxu1 %v5719_v25  ;;  %v4910_v55 = vmax.f32 %v4666_v44, 0.0 }
 0x5c5   : > { %v3997_v61 = vpop.f32.mrf.mxu2  ;;  %v3647_v25 = vmax.f32 %v3461_v12, 0.0 }
 0x5c6   : > { %v3998_v35 = vadd.f32 %v3997_v61, %v9782_v33 }
 0x5c7   : > { %v5882_v31 = vpop.f32.mrf.mxu1 }
 0x5c8   : > { %v4214_v6 = vmax.f32 %v3998_v35, 0.0  ;;  %6178 = vst.msk [vmem:[%s10504_s12 + $0x88] sm:$0xff] %vm6160_vm2, %v5882_v31 }
 0x5c9   : > { %v4667_v19 = vpop.f32.mrf.mxu3 }
 0x5ca   : > { %v10697_v7 = vadd.f32 %v4214_v6, %v12156_v22  ;;  %v4668_v8 = vadd.f32 %v4667_v19, %v10160_v14  ;;  %4039 = vmatmul.bf16.gmra.mxu2 %v3729_v16  ;;  %v3730_v22 = vpack.c.bf16 %v3647_v25, %v3646_v38 }
 0x5cc   : > { %v4911_v36 = vmax.f32 %v4668_v8, 0.0  ;;  %v4435_v49 = vpack.c.bf16 %v10697_v7, %v10694_v50  ;;  %v12159_v8 = vld [vmem:[#allocation41_spill] sm:$0xff] }
 0x5cd   : > { %v4000_v48 = vpop.f32.mrf.mxu2  ;;  %v5212_v58 = vpop.f32.mrf.mxu0 }
 0x5ce   : > { %4709 = vmatmul.bf16.gmra.mxu3 %v4435_v49  ;;  %v5013_v0 = vpack.c.bf16 %v4911_v36, %v4910_v55  ;;  %v4001_v21 = vadd.f32 %v4000_v48, %v9782_v33  ;;  %v5213_v62 = vadd.f32 %v5212_v58, %v10344_v23  ;;  %v12160_v49 = vld [vmem:[#allocation116_spill] sm:$0xff]  ;;  %v12161_v58 = vld [vmem:[#allocation42_spill] sm:$0xff] }
 0x5cf   : > { %v5885_v52 = vpop.f32.mrf.mxu1 }
 0x5d0   : > { %6179 = vst.msk [vmem:[%s10504_s12 + $0x90] sm:$0xff] %vm6160_vm2, %v5885_v52  ;;  %5251 = vmatmul.bf16.gmra.mxu0 %v5013_v0  ;;  %v4215_v17 = vmax.f32 %v4001_v21, 0.0  ;;  %v5481_v35 = vmax.f32 %v5213_v62, 0.0  ;;  %v12162_v52 = vld [vmem:[#allocation122_spill] sm:$0xff] }
 0x5d1   : > { %v4670_v27 = vpop.f32.mrf.mxu3 }
 0x5d2   : > { %v4671_v16 = vadd.f32 %v4670_v27, %v10160_v14  ;;  %v10716_v55 = vadd.f32 %v4215_v17, %v12159_v8  ;;  %v5609_v48 = vadd.f32 %v5481_v35, %v12160_v49 }
 0x5d4   : > { %v4912_v21 = vmax.f32 %v4671_v16, 0.0 }
 0x5d5   : > { %v4002_v61 = vpop.f32.mrf.mxu2  ;;  %v5214_v10 = vpop.f32.mrf.mxu0 }
 0x5d6   : > { %v4003_v31 = vadd.f32 %v4002_v61, %v9782_v33  ;;  %v5215_v44 = vadd.f32 %v5214_v10, %v10344_v23  ;;  %v12163_v10 = vld [vmem:[#allocation90_spill] sm:$0xff] }
 0x5d7   : > { %v5887_v6 = vpop.f32.mrf.mxu1  ;;  %v3466_v38 = vadd.f32 %v12163_v10, %v11992_v34 }
 0x5d8   : > { %v4216_v19 = vmax.f32 %v4003_v31, 0.0  ;;  %v5482_v56 = vmax.f32 %v5215_v44, 0.0  ;;  %6180 = vst.msk [vmem:[%s10504_s12 + $0x98] sm:$0xff] %vm6160_vm2, %v5887_v6  ;;  %v12164_v44 = vld [vmem:[#allocation87_spill] sm:$0xff] }
 0x5d9   : > { %v4672_v36 = vpop.f32.mrf.mxu3  ;;  %v3464_v6 = vadd.f32 %v12164_v44, %v11992_v34 }
 0x5da   : > { %v10720_v0 = vadd.f32 %v4216_v19, %v12161_v58  ;;  %v5610_v30 = vadd.f32 %v5482_v56, %v12162_v52  ;;  %v4673_v12 = vadd.f32 %v4672_v36, %v10160_v14  ;;  %4044 = vmatmul.bf16.gmra.mxu2 %v3730_v22  ;;  %v3649_v19 = vmax.f32 %v3466_v38, 0.0  ;;  %v12168_v38 = vld [vmem:[#allocation129_spill] sm:$0xff] }
 0x5db   : > { %v3648_v36 = vmax.f32 %v3464_v6, 0.0 }
 0x5dc   : > { %v4913_v27 = vmax.f32 %v4673_v12, 0.0  ;;  %v4436_v46 = vpack.c.bf16 %v10720_v0, %v10716_v55  ;;  %v5720_v39 = vpack.c.bf16 %v5610_v30, %v5609_v48 }
 0x5dd   : > { %v4005_v62 = vpop.f32.mrf.mxu2  ;;  %v5217_v25 = vpop.f32.mrf.mxu0 }
 0x5de   : > { %4714 = vmatmul.bf16.gmra.mxu3 %v4436_v46  ;;  %5924 = vmatmul.bf16.gmra.mxu1 %v5720_v39  ;;  %v5014_v17 = vpack.c.bf16 %v4913_v27, %v4912_v21  ;;  %v4006_v35 = vadd.f32 %v4005_v62, %v9782_v33  ;;  %v5218_v16 = vadd.f32 %v5217_v25, %v10344_v23  ;;  %v12165_v46 = vld [vmem:[#allocation45_spill] sm:$0xff]  ;;  %v12166_v25 = vld [vmem:[#allocation123_spill] sm:$0xff] }
 0x5df   : > { %v5890_v61 = vpop.f32.mrf.mxu1  ;;  %v3731_v27 = vpack.c.bf16 %v3649_v19, %v3648_v36 }
 0x5e0   : > { %6181 = vst.msk [vmem:[%s10504_s12 + $0xa0] sm:$0xff] %vm6160_vm2, %v5890_v61  ;;  %5256 = vmatmul.bf16.gmra.mxu0 %v5014_v17  ;;  %v4217_v56 = vmax.f32 %v4006_v35, 0.0  ;;  %v5483_v49 = vmax.f32 %v5218_v16, 0.0  ;;  %v12167_v61 = vld [vmem:[#allocation46_spill] sm:$0xff] }
 0x5e1   : > { %v4675_v31 = vpop.f32.mrf.mxu3 }
 0x5e2   : > { %v4676_v30 = vadd.f32 %v4675_v31, %v10160_v14  ;;  %v10740_v39 = vadd.f32 %v4217_v56, %v12165_v46  ;;  %v5611_v17 = vadd.f32 %v5483_v49, %v12166_v25  ;;  %v12169_v49 = vld [vmem:[#allocation94_spill] sm:$0xff] }
 0x5e4   : > { %v4914_v31 = vmax.f32 %v4676_v30, 0.0  ;;  %v12170_v30 = vld [vmem:[#allocation91_spill] sm:$0xff] }
 0x5e5   : > { %v4007_v22 = vpop.f32.mrf.mxu2  ;;  %v5219_v8 = vpop.f32.mrf.mxu0 }
 0x5e6   : > { %v4008_v48 = vadd.f32 %v4007_v22, %v9782_v33  ;;  %v5220_v58 = vadd.f32 %v5219_v8, %v10344_v23 }
 0x5e7   : > { %v5892_v52 = vpop.f32.mrf.mxu1 }
 0x5e8   : > { %v4218_v12 = vmax.f32 %v4008_v48, 0.0  ;;  %v5484_v21 = vmax.f32 %v5220_v58, 0.0  ;;  %6182 = vst.msk [vmem:[%s10504_s12 + $0xa8] sm:$0xff] %vm6160_vm2, %v5892_v52  ;;  %v3471_v48 = vadd.f32 %v12169_v49, %v11992_v34  ;;  %v12172_v49 = vld [vmem:[#allocation2_spill] sm:$0xff] }
 0x5e9   : > { %v4677_v62 = vpop.f32.mrf.mxu3 }
 0x5ea   : > { %v10744_v10 = vadd.f32 %v4218_v12, %v12167_v61  ;;  %v5612_v35 = vadd.f32 %v5484_v21, %v12168_v38  ;;  %v4678_v44 = vadd.f32 %v4677_v62, %v10160_v14  ;;  %4049 = vmatmul.bf16.gmra.mxu2 %v3731_v27  ;;  %v3469_v12 = vadd.f32 %v12170_v30, %v11992_v34 }
 0x5eb   : > { %v3651_v27 = vmax.f32 %v3471_v48, 0.0 }
 0x5ec   : > { %v4915_v6 = vmax.f32 %v4678_v44, 0.0  ;;  %v4437_v16 = vpack.c.bf16 %v10744_v10, %v10740_v39  ;;  %v5721_v19 = vpack.c.bf16 %v5612_v35, %v5611_v17  ;;  %v3650_v17 = vmax.f32 %v3469_v12, 0.0 }
 0x5ed   : > { %v4010_v56 = vpop.f32.mrf.mxu2  ;;  %v5222_v22 = vpop.f32.mrf.mxu0 }
 0x5ee   : > { %4719 = vmatmul.bf16.gmra.mxu3 %v4437_v16  ;;  %5929 = vmatmul.bf16.gmra.mxu1 %v5721_v19  ;;  %v5015_v8 = vpack.c.bf16 %v4915_v6, %v4914_v31  ;;  %v4011_v58 = vadd.f32 %v4010_v56, %v9782_v33  ;;  %v5223_v21 = vadd.f32 %v5222_v22, %v10344_v23  ;;  %v12171_v56 = vld [vmem:[#allocation5_spill] sm:$0xff] }
 0x5ef   : > { %v5895_v36 = vpop.f32.mrf.mxu1  ;;  %v3732_v19 = vpack.c.bf16 %v3651_v27, %v3650_v17  ;;  %v12173_v17 = vld [vmem:[#allocation98_spill] sm:$0xff] }
 0x5f0   : > { %6183 = vst.msk [vmem:[%s10504_s12 + $0xb0] sm:$0xff] %vm6160_vm2, %v5895_v36  ;;  %5261 = vmatmul.bf16.gmra.mxu0 %v5015_v8  ;;  %v4219_v46 = vmax.f32 %v4011_v58, 0.0  ;;  %v5485_v61 = vmax.f32 %v5223_v21, 0.0 }
 0x5f1   : > { %v4680_v52 = vpop.f32.mrf.mxu3 }
 0x5f2   : > { %v4681_v31 = vadd.f32 %v4680_v52, %v10160_v14  ;;  %v10764_v22 = vadd.f32 %v4219_v46, %v12171_v56  ;;  %v5613_v36 = vadd.f32 %v5485_v61, %v10386_v63  ;;  %v3476_v61 = vadd.f32 %v12173_v17, %v11992_v34  ;;  %v12176_v17 = vld [vmem:[#allocation9_spill] sm:$0xff] }
 0x5f4   : > { %v4916_v52 = vmax.f32 %v4681_v31, 0.0 }
 0x5f5   : > { %v4012_v62 = vpop.f32.mrf.mxu2  ;;  %v5224_v25 = vpop.f32.mrf.mxu0 }
 0x5f6   : > { %v4013_v38 = vadd.f32 %v4012_v62, %v9782_v33  ;;  %v5225_v35 = vadd.f32 %v5224_v25, %v10344_v23 }
 0x5f7   : > { %v5897_v44 = vpop.f32.mrf.mxu1 }
 0x5f8   : > { %v4220_v6 = vmax.f32 %v4013_v38, 0.0  ;;  %v5486_v16 = vmax.f32 %v5225_v35, 0.0  ;;  %6184 = vst.msk [vmem:[%s10504_s12 + $0xb8] sm:$0xff] %vm6160_vm2, %v5897_v44  ;;  %v12174_v35 = vld [vmem:[#allocation97_spill] sm:$0xff] }
 0x5f9   : > { %v4682_v8 = vpop.f32.mrf.mxu3  ;;  %v3474_v44 = vadd.f32 %v12174_v35, %v11992_v34 }
 0x5fa   : > { %v10768_v48 = vadd.f32 %v4220_v6, %v12172_v49  ;;  %v5614_v58 = vadd.f32 %v5486_v16, %v10389_v40  ;;  %v4683_v30 = vadd.f32 %v4682_v8, %v10160_v14  ;;  %4054 = vmatmul.bf16.gmra.mxu2 %v3732_v19  ;;  %v3653_v6 = vmax.f32 %v3476_v61, 0.0 }
 0x5fb   : > { %v3652_v8 = vmax.f32 %v3474_v44, 0.0 }
 0x5fc   : > { %v4917_v12 = vmax.f32 %v4683_v30, 0.0  ;;  %v4438_v21 = vpack.c.bf16 %v10768_v48, %v10764_v22  ;;  %v5722_v27 = vpack.c.bf16 %v5614_v58, %v5613_v36 }
 0x5fd   : > { %v4015_v46 = vpop.f32.mrf.mxu2  ;;  %v5227_v62 = vpop.f32.mrf.mxu0 }
 0x5fe   : > { %4724 = vmatmul.bf16.gmra.mxu3 %v4438_v21  ;;  %5934 = vmatmul.bf16.gmra.mxu1 %v5722_v27  ;;  %v5016_v63 = vpack.c.bf16 %v4917_v12, %v4916_v52  ;;  %v4016_v40 = vadd.f32 %v4015_v46, %v9782_v33  ;;  %v5228_v31 = vadd.f32 %v5227_v62, %v10344_v23  ;;  %v12175_v46 = vld [vmem:[#allocation7_spill] sm:$0xff] }
 0x5ff   : > { %v5900_v25 = vpop.f32.mrf.mxu1  ;;  %v3733_v27 = vpack.c.bf16 %v3653_v6, %v3652_v8  ;;  %v12177_v8 = vld [vmem:[#allocation57_spill] sm:$0xff] }
 0x600   : > { %6185 = vst.msk [vmem:[%s10504_s12 + $0xc0] sm:$0xff] %vm6160_vm2, %v5900_v25  ;;  %5266 = vmatmul.bf16.gmra.mxu0 %v5016_v63  ;;  %v4221_v16 = vmax.f32 %v4016_v40, 0.0  ;;  %v5487_v36 = vmax.f32 %v5228_v31, 0.0 }
 0x601   : > { %v4685_v38 = vpop.f32.mrf.mxu3 }
 0x602   : > { %v4686_v52 = vadd.f32 %v4685_v38, %v10160_v14  ;;  %v10788_v62 = vadd.f32 %v4221_v16, %v12175_v46  ;;  %v5615_v25 = vadd.f32 %v5487_v36, %v10404_v4  ;;  %v3481_v36 = vadd.f32 %v12177_v8, %v11992_v34  ;;  %v12180_v8 = vld [vmem:[#allocation6_spill] sm:$0xff] }
 0x604   : > { %v4918_v38 = vmax.f32 %v4686_v52, 0.0 }
 0x605   : > { %v4017_v19 = vpop.f32.mrf.mxu2  ;;  %v5229_v56 = vpop.f32.mrf.mxu0 }
 0x606   : > { %v4018_v49 = vadd.f32 %v4017_v19, %v9782_v33  ;;  %v5230_v58 = vadd.f32 %v5229_v56, %v10344_v23 }
 0x607   : > { %v5902_v30 = vpop.f32.mrf.mxu1 }
 0x608   : > { %v4222_v12 = vmax.f32 %v4018_v49, 0.0  ;;  %v5488_v21 = vmax.f32 %v5230_v58, 0.0  ;;  %6186 = vst.msk [vmem:[%s10504_s12 + $0xc8] sm:$0xff] %vm6160_vm2, %v5902_v30  ;;  %v12178_v58 = vld [vmem:[#allocation101_spill] sm:$0xff] }
 0x609   : > { %v4687_v63 = vpop.f32.mrf.mxu3  ;;  %v3479_v30 = vadd.f32 %v12178_v58, %v11992_v34 }
 0x60a   : > { %v10792_v61 = vadd.f32 %v4222_v12, %v12176_v17  ;;  %v5616_v40 = vadd.f32 %v5488_v21, %v10407_v18  ;;  %v4688_v35 = vadd.f32 %v4687_v63, %v10160_v14  ;;  %4059 = vmatmul.bf16.gmra.mxu2 %v3733_v27  ;;  %v3655_v12 = vmax.f32 %v3481_v36, 0.0 }
 0x60b   : > { %v3654_v63 = vmax.f32 %v3479_v30, 0.0 }
 0x60c   : > { %v4919_v44 = vmax.f32 %v4688_v35, 0.0  ;;  %v4439_v31 = vpack.c.bf16 %v10792_v61, %v10788_v62  ;;  %v5723_v6 = vpack.c.bf16 %v5616_v40, %v5615_v25 }
 0x60d   : > { %v4020_v16 = vpop.f32.mrf.mxu2  ;;  %v5232_v19 = vpop.f32.mrf.mxu0 }
 0x60e   : > { %4729 = vmatmul.bf16.gmra.mxu3 %v4439_v31  ;;  %5939 = vmatmul.bf16.gmra.mxu1 %v5723_v6  ;;  %v5017_v4 = vpack.c.bf16 %v4919_v44, %v4918_v38  ;;  %v4021_v18 = vadd.f32 %v4020_v16, %v9782_v33  ;;  %v5233_v52 = vadd.f32 %v5232_v19, %v10344_v23  ;;  %v12179_v16 = vld [vmem:[#allocation12_spill] sm:$0xff] }
 0x60f   : > { %v5905_v56 = vpop.f32.mrf.mxu1  ;;  %v3734_v6 = vpack.c.bf16 %v3655_v12, %v3654_v63  ;;  %v12181_v63 = vld [vmem:[#allocation110_spill] sm:$0xff] }
 0x610   : > { %6187 = vst.msk [vmem:[%s10504_s12 + $0xd0] sm:$0xff] %vm6160_vm2, %v5905_v56  ;;  %5271 = vmatmul.bf16.gmra.mxu0 %v5017_v4  ;;  %v4223_v21 = vmax.f32 %v4021_v18, 0.0  ;;  %v5489_v25 = vmax.f32 %v5233_v52, 0.0 }
 0x611   : > { %v4690_v49 = vpop.f32.mrf.mxu3 }
 0x612   : > { %v4691_v38 = vadd.f32 %v4690_v49, %v10160_v14  ;;  %v10812_v19 = vadd.f32 %v4223_v21, %v12179_v16  ;;  %v5617_v56 = vadd.f32 %v5489_v25, %v10422_v53  ;;  %v3486_v25 = vadd.f32 %v12181_v63, %v11992_v34  ;;  %v12184_v63 = vld [vmem:[#allocation18_spill] sm:$0xff] }
 0x614   : > { %v4920_v49 = vmax.f32 %v4691_v38, 0.0 }
 0x615   : > { %v4022_v27 = vpop.f32.mrf.mxu2  ;;  %v5234_v46 = vpop.f32.mrf.mxu0 }
 0x616   : > { %v4023_v17 = vadd.f32 %v4022_v27, %v9782_v33  ;;  %v5235_v40 = vadd.f32 %v5234_v46, %v10344_v23 }
 0x617   : > { %v5907_v35 = vpop.f32.mrf.mxu1 }
 0x618   : > { %v4224_v44 = vmax.f32 %v4023_v17, 0.0  ;;  %v5490_v31 = vmax.f32 %v5235_v40, 0.0  ;;  %6188 = vst.msk [vmem:[%s10504_s12 + $0xd8] sm:$0xff] %vm6160_vm2, %v5907_v35  ;;  %v12182_v40 = vld [vmem:[#allocation107_spill] sm:$0xff] }
 0x619   : > { %v4692_v4 = vpop.f32.mrf.mxu3  ;;  %v3484_v35 = vadd.f32 %v12182_v40, %v11992_v34 }
 0x61a   : > { %v10816_v36 = vadd.f32 %v4224_v44, %v12180_v8  ;;  %v5618_v18 = vadd.f32 %v5490_v31, %v10425_v24  ;;  %v4693_v58 = vadd.f32 %v4692_v4, %v10160_v14  ;;  %4064 = vmatmul.bf16.gmra.mxu2 %v3734_v6  ;;  %v3657_v44 = vmax.f32 %v3486_v25, 0.0 }
 0x61b   : > { %v3656_v4 = vmax.f32 %v3484_v35, 0.0 }
 0x61c   : > { %v4921_v30 = vmax.f32 %v4693_v58, 0.0  ;;  %v4440_v52 = vpack.c.bf16 %v10816_v36, %v10812_v19  ;;  %v5724_v12 = vpack.c.bf16 %v5618_v18, %v5617_v56 }
 0x61d   : > { %v4025_v21 = vpop.f32.mrf.mxu2  ;;  %v5237_v27 = vpop.f32.mrf.mxu0 }
 0x61e   : > { %4734 = vmatmul.bf16.gmra.mxu3 %v4440_v52  ;;  %5944 = vmatmul.bf16.gmra.mxu1 %v5724_v12  ;;  %v5018_v53 = vpack.c.bf16 %v4921_v30, %v4920_v49  ;;  %v4026_v24 = vadd.f32 %v4025_v21, %v9782_v33  ;;  %v5238_v38 = vadd.f32 %v5237_v27, %v10344_v23  ;;  %v12183_v21 = vld [vmem:[#allocation11_spill] sm:$0xff] }
 0x61f   : > { %v5910_v46 = vpop.f32.mrf.mxu1  ;;  %v3735_v12 = vpack.c.bf16 %v3657_v44, %v3656_v4  ;;  %v12185_v4 = vld [vmem:[#allocation114_spill] sm:$0xff] }
 0x620   : > { %6189 = vst.msk [vmem:[%s10504_s12 + $0xe0] sm:$0xff] %vm6160_vm2, %v5910_v46  ;;  %5276 = vmatmul.bf16.gmra.mxu0 %v5018_v53  ;;  %v4225_v31 = vmax.f32 %v4026_v24, 0.0  ;;  %v5491_v56 = vmax.f32 %v5238_v38, 0.0 }
 0x621   : > { %v4695_v17 = vpop.f32.mrf.mxu3 }
 0x622   : > { %v4696_v49 = vadd.f32 %v4695_v17, %v10160_v14  ;;  %v10836_v27 = vadd.f32 %v4225_v31, %v12183_v21  ;;  %v5619_v46 = vadd.f32 %v5491_v56, %v10440_v15  ;;  %v3491_v56 = vadd.f32 %v12185_v4, %v11992_v34  ;;  %v12188_v4 = vld [vmem:[#allocation14_spill] sm:$0xff] }
 0x624   : > { %v4922_v17 = vmax.f32 %v4696_v49, 0.0 }
 0x625   : > { %v4027_v6 = vpop.f32.mrf.mxu2  ;;  %v5239_v16 = vpop.f32.mrf.mxu0 }
 0x626   : > { %v4028_v8 = vadd.f32 %v4027_v6, %v9782_v33  ;;  %v5240_v18 = vadd.f32 %v5239_v16, %v10344_v23 }
 0x627   : > { %v5912_v58 = vpop.f32.mrf.mxu1 }
 0x628   : > { %v4226_v30 = vmax.f32 %v4028_v8, 0.0  ;;  %v5492_v52 = vmax.f32 %v5240_v18, 0.0  ;;  %6190 = vst.msk [vmem:[%s10504_s12 + $0xe8] sm:$0xff] %vm6160_vm2, %v5912_v58  ;;  %v12186_v18 = vld [vmem:[#allocation111_spill] sm:$0xff] }
 0x629   : > { %v4697_v53 = vpop.f32.mrf.mxu3  ;;  %v3489_v58 = vadd.f32 %v12186_v18, %v11992_v34 }
 0x62a   : > { %v10840_v25 = vadd.f32 %v4226_v30, %v12184_v63  ;;  %v5620_v24 = vadd.f32 %v5492_v52, %v10443_v59  ;;  %v4698_v40 = vadd.f32 %v4697_v53, %v10160_v14  ;;  %4069 = vmatmul.bf16.gmra.mxu2 %v3735_v12  ;;  %v3659_v30 = vmax.f32 %v3491_v56, 0.0 }
 0x62b   : > { %v3658_v53 = vmax.f32 %v3489_v58, 0.0 }
 0x62c   : > { %v4923_v35 = vmax.f32 %v4698_v40, 0.0  ;;  %v4441_v38 = vpack.c.bf16 %v10840_v25, %v10836_v27  ;;  %v5725_v44 = vpack.c.bf16 %v5620_v24, %v5619_v46 }
 0x62d   : > { %v4030_v31 = vpop.f32.mrf.mxu2  ;;  %v5242_v6 = vpop.f32.mrf.mxu0 }
 0x62e   : > { %4739 = vmatmul.bf16.gmra.mxu3 %v4441_v38  ;;  %5949 = vmatmul.bf16.gmra.mxu1 %v5725_v44  ;;  %v5019_v15 = vpack.c.bf16 %v4923_v35, %v4922_v17  ;;  %v4031_v59 = vadd.f32 %v4030_v31, %v9782_v33  ;;  %v5243_v49 = vadd.f32 %v5242_v6, %v10344_v23  ;;  %v12187_v31 = vld [vmem:[#allocation19_spill] sm:$0xff] }
 0x62f   : > { %v5915_v16 = vpop.f32.mrf.mxu1  ;;  %v3736_v44 = vpack.c.bf16 %v3659_v30, %v3658_v53 }
 0x630   : > { %6191 = vst.msk [vmem:[%s10504_s12 + $0xf0] sm:$0xff] %vm6160_vm2, %v5915_v16  ;;  %5281 = vmatmul.bf16.gmra.mxu0 %v5019_v15  ;;  %v4227_v52 = vmax.f32 %v4031_v59, 0.0  ;;  %v5493_v46 = vmax.f32 %v5243_v49, 0.0 }
 0x631   : > { %v4700_v8 = vpop.f32.mrf.mxu3 }
 0x632   : > { %v4701_v17 = vadd.f32 %v4700_v8, %v10160_v14  ;;  %v10860_v6 = vadd.f32 %v4227_v52, %v12187_v31  ;;  %v5621_v16 = vadd.f32 %v5493_v46, %v10456_v51 }
 0x634   : > { %v4924_v8 = vmax.f32 %v4701_v17, 0.0 }
 0x635   : > { %v4032_v12 = vpop.f32.mrf.mxu2  ;;  %v5244_v21 = vpop.f32.mrf.mxu0 }
 0x636   : > { %v4033_v63 = vadd.f32 %v4032_v12, %v9782_v33  ;;  %v5245_v24 = vadd.f32 %v5244_v21, %v10344_v23  ;;  %v12189_v21 = vld [vmem:[#allocation118_spill] sm:$0xff] }
 0x637   : > { %v5917_v40 = vpop.f32.mrf.mxu1  ;;  %v3496_v53 = vadd.f32 %v12189_v21, %v11992_v34 }
 0x638   : > { %v4228_v35 = vmax.f32 %v4033_v63, 0.0  ;;  %v5494_v38 = vmax.f32 %v5245_v24, 0.0  ;;  %6192 = vst.msk [vmem:[%s10504_s12 + $0xf8] sm:$0xff] %vm6160_vm2, %v5917_v40  ;;  %v12190_v40 = vld [vmem:[#allocation117_spill] sm:$0xff] }
 0x639   : > { %v4702_v15 = vpop.f32.mrf.mxu3  ;;  %v3494_v17 = vadd.f32 %v12190_v40, %v11992_v34 }
 0x63a   : > { %v10864_v56 = vadd.f32 %v4228_v35, %v12188_v4  ;;  %v5622_v59 = vadd.f32 %v5494_v38, %v10459_v5  ;;  %v4703_v18 = vadd.f32 %v4702_v15, %v10160_v14  ;;  %4074 = vmatmul.bf16.gmra.mxu2 %v3736_v44  ;;  %v3661_v35 = vmax.f32 %v3496_v53, 0.0  ;;  %v12192_v53 = vld [vmem:[#allocation17_spill] sm:$0xff] }
 0x63c   : > { %v4925_v58 = vmax.f32 %v4703_v18, 0.0  ;;  %v4442_v49 = vpack.c.bf16 %v10864_v56, %v10860_v6  ;;  %v5726_v30 = vpack.c.bf16 %v5622_v59, %v5621_v16  ;;  %v3660_v16 = vmax.f32 %v3494_v17, 0.0 }
 0x63d   : > { %v4035_v52 = vpop.f32.mrf.mxu2  ;;  %v5247_v12 = vpop.f32.mrf.mxu0 }
 0x63e   : > { %4744 = vmatmul.bf16.gmra.mxu3 %v4442_v49  ;;  %5954 = vmatmul.bf16.gmra.mxu1 %v5726_v30  ;;  %v5020_v51 = vpack.c.bf16 %v4925_v58, %v4924_v8  ;;  %v4036_v5 = vadd.f32 %v4035_v52, %v9782_v33  ;;  %v5248_v46 = vadd.f32 %v5247_v12, %v10344_v23  ;;  %v12191_v30 = vld [vmem:[#allocation23_spill] sm:$0xff] }
 0x63f   : > { %v3737_v49 = vpack.c.bf16 %v3661_v35, %v3660_v16 }
 0x640   : > { %5286 = vmatmul.bf16.gmra.mxu0 %v5020_v51  ;;  %v4229_v38 = vmax.f32 %v4036_v5, 0.0  ;;  %v5495_v44 = vmax.f32 %v5248_v46, 0.0 }
 0x641   : > { %v4705_v63 = vpop.f32.mrf.mxu3  ;;  %v5920_v24 = vpop.f32.mrf.mxu1 }
 0x642   : > { %6193 = vst.msk [vmem:[%s10504_s12 + $0x100] sm:$0xff] %vm6160_vm2, %v5920_v24  ;;  %v4706_v18 = vadd.f32 %v4705_v63, %v10160_v14  ;;  %v10882_v52 = vadd.f32 %v4229_v38, %v12191_v30  ;;  %v5623_v12 = vadd.f32 %v5495_v44, %v10473_v47 }
 0x644   : > { %v4926_v63 = vmax.f32 %v4706_v18, 0.0 }
 0x645   : > { %v4037_v31 = vpop.f32.mrf.mxu2  ;;  %v5249_v15 = vpop.f32.mrf.mxu0 }
 0x646   : > { %v4038_v4 = vadd.f32 %v4037_v31, %v9782_v33  ;;  %v5250_v59 = vadd.f32 %v5249_v15, %v10344_v23  ;;  %v12193_v31 = vld [vmem:[#allocation124_spill] sm:$0xff] }
 0x647   : > { %v3501_v15 = vadd.f32 %v12193_v31, %v11992_v34 }
 0x648   : > { %v4230_v8 = vmax.f32 %v4038_v4, 0.0  ;;  %v5496_v58 = vmax.f32 %v5250_v59, 0.0  ;;  %v12194_v4 = vld [vmem:[#allocation121_spill] sm:$0xff] }
 0x649   : > { %v4707_v51 = vpop.f32.mrf.mxu3  ;;  %v5922_v21 = vpop.f32.mrf.mxu1  ;;  %v3499_v59 = vadd.f32 %v12194_v4, %v11992_v34 }
 0x64a   : > { %v10886_v5 = vadd.f32 %v4230_v8, %v12192_v53  ;;  %v5624_v46 = vadd.f32 %v5496_v58, %v10476_v54  ;;  %v4708_v24 = vadd.f32 %v4707_v51, %v10160_v14  ;;  %6194 = vst.msk [vmem:[%s10504_s12 + $0x108] sm:$0xff] %vm6160_vm2, %v5922_v21  ;;  %4079 = vmatmul.bf16.gmra.mxu2 %v3737_v49  ;;  %v3663_v8 = vmax.f32 %v3501_v15, 0.0 }
 0x64c   : > { %v4927_v40 = vmax.f32 %v4708_v24, 0.0  ;;  %v4443_v17 = vpack.c.bf16 %v10886_v5, %v10882_v52  ;;  %v5727_v35 = vpack.c.bf16 %v5624_v46, %v5623_v12  ;;  %v3662_v12 = vmax.f32 %v3499_v59, 0.0 }
 0x64d   : > { %v4040_v38 = vpop.f32.mrf.mxu2  ;;  %v5252_v47 = vpop.f32.mrf.mxu0 }
 0x64e   : > { %4749 = vmatmul.bf16.gmra.mxu3 %v4443_v17  ;;  %5959 = vmatmul.bf16.gmra.mxu1 %v5727_v35  ;;  %v5021_v44 = vpack.c.bf16 %v4927_v40, %v4926_v63  ;;  %v4041_v54 = vadd.f32 %v4040_v38, %v9782_v33  ;;  %v5253_v18 = vadd.f32 %v5252_v47, %v10344_v23  ;;  %v12195_v17 = vld [vmem:[#allocation20_spill] sm:$0xff] }
 0x64f   : > { %v3738_v40 = vpack.c.bf16 %v3663_v8, %v3662_v12 }
 0x650   : > { %5291 = vmatmul.bf16.gmra.mxu0 %v5021_v44  ;;  %v4231_v58 = vmax.f32 %v4041_v54, 0.0  ;;  %v5497_v51 = vmax.f32 %v5253_v18, 0.0  ;;  %v12196_v44 = vld [vmem:[#allocation64_spill] sm:$0xff] }
 0x651   : > { %v4710_v16 = vpop.f32.mrf.mxu3 }
 0x652   : > { %v4711_v46 = vadd.f32 %v4710_v16, %v10160_v14  ;;  %v10904_v35 = vadd.f32 %v4231_v58, %v12195_v17  ;;  %v5625_v47 = vadd.f32 %v5497_v51, %v10490_v1 }
 0x654   : > { %v4928_v59 = vmax.f32 %v4711_v46, 0.0 }
 0x655   : > { %v4042_v49 = vpop.f32.mrf.mxu2  ;;  %v5254_v30 = vpop.f32.mrf.mxu0 }
 0x656   : > { %v4043_v21 = vadd.f32 %v4042_v49, %v9782_v33  ;;  %v5255_v53 = vadd.f32 %v5254_v30, %v10344_v23 }
 0x658   : > { %v4232_v24 = vmax.f32 %v4043_v21, 0.0  ;;  %v5498_v63 = vmax.f32 %v5255_v53, 0.0  ;;  %v12198_v21 = vld [vmem:[#allocation127_spill] sm:$0xff] }
 0x659   : > { %v4712_v38 = vpop.f32.mrf.mxu3  ;;  %v3504_v53 = vadd.f32 %v12198_v21, %v11992_v34 }
 0x65a   : > { %v10908_v31 = vadd.f32 %v4232_v24, %v12196_v44  ;;  %v5626_v15 = vadd.f32 %v5498_v63, %v10493_v26  ;;  %v4713_v54 = vadd.f32 %v4712_v38, %v10160_v14  ;;  %4084 = vmatmul.bf16.gmra.mxu2 %v3738_v40  ;;  %v12197_v26 = vld [vmem:[#allocation128_spill] sm:$0xff] }
 0x65b   : > { %v5925_v4 = vpop.f32.mrf.mxu1  ;;  %v3506_v30 = vadd.f32 %v12197_v26, %v11992_v34  ;;  %v12200_v26 = vld [vmem:[#allocation28_spill] sm:$0xff] }
 0x65c   : > { %v4929_v16 = vmax.f32 %v4713_v54, 0.0  ;;  %6195 = vst.msk [vmem:[%s10504_s12 + $0x110] sm:$0xff] %vm6160_vm2, %v5925_v4  ;;  %v4444_v18 = vpack.c.bf16 %v10908_v31, %v10904_v35  ;;  %v5728_v8 = vpack.c.bf16 %v5626_v15, %v5625_v47  ;;  %v3664_v47 = vmax.f32 %v3504_v53, 0.0 }
 0x65d   : > { %v4045_v58 = vpop.f32.mrf.mxu2  ;;  %v5257_v1 = vpop.f32.mrf.mxu0  ;;  %v3665_v63 = vmax.f32 %v3506_v30, 0.0 }
 0x65e   : > { %4754 = vmatmul.bf16.gmra.mxu3 %v4444_v18  ;;  %5964 = vmatmul.bf16.gmra.mxu1 %v5728_v8  ;;  %v5022_v49 = vpack.c.bf16 %v4929_v16, %v4928_v59  ;;  %v4046_v12 = vadd.f32 %v4045_v58, %v9782_v33  ;;  %v5258_v46 = vadd.f32 %v5257_v1, %v10344_v23  ;;  %v12199_v8 = vld [vmem:[#allocation24_spill] sm:$0xff] }
 0x65f   : > { %v3739_v18 = vpack.c.bf16 %v3665_v63, %v3664_v47 }
 0x660   : > { %5296 = vmatmul.bf16.gmra.mxu0 %v5022_v49  ;;  %v4233_v40 = vmax.f32 %v4046_v12, 0.0  ;;  %v5499_v44 = vmax.f32 %v5258_v46, 0.0 }
 0x661   : > { %v4715_v51 = vpop.f32.mrf.mxu3 }
 0x662   : > { %v4716_v4 = vadd.f32 %v4715_v51, %v10160_v14  ;;  %v10928_v58 = vadd.f32 %v4233_v40, %v12199_v8  ;;  %v5627_v49 = vadd.f32 %v5499_v44, %v10517_v29 }
 0x663   : > { %v5927_v24 = vpop.f32.mrf.mxu1 }
 0x664   : > { %6196 = vst.msk [vmem:[%s10504_s12 + $0x118] sm:$0xff] %vm6160_vm2, %v5927_v24  ;;  %v4930_v46 = vmax.f32 %v4716_v4, 0.0 }
 0x665   : > { %v4047_v17 = vpop.f32.mrf.mxu2  ;;  %v5259_v38 = vpop.f32.mrf.mxu0 }
 0x666   : > { %v4048_v15 = vadd.f32 %v4047_v17, %v9782_v33  ;;  %v5260_v54 = vadd.f32 %v5259_v38, %v10344_v23 }
 0x668   : > { %v4234_v59 = vmax.f32 %v4048_v15, 0.0  ;;  %v5500_v16 = vmax.f32 %v5260_v54, 0.0  ;;  %v12202_v15 = vld [vmem:[#allocation131_spill] sm:$0xff] }
 0x669   : > { %v4717_v1 = vpop.f32.mrf.mxu3  ;;  %v3509_v54 = vadd.f32 %v12202_v15, %v11992_v34 }
 0x66a   : > { %v10932_v30 = vadd.f32 %v4234_v59, %v12200_v26  ;;  %v5628_v12 = vadd.f32 %v5500_v16, %v10520_v60  ;;  %v4718_v21 = vadd.f32 %v4717_v1, %v10160_v14  ;;  %4089 = vmatmul.bf16.gmra.mxu2 %v3739_v18  ;;  %v12201_v60 = vld [vmem:[#allocation134_spill] sm:$0xff] }
 0x66b   : > { %v5930_v53 = vpop.f32.mrf.mxu1  ;;  %v3511_v38 = vadd.f32 %v12201_v60, %v11992_v34  ;;  %v12204_v60 = vld [vmem:[#allocation71_spill] sm:$0xff] }
 0x66c   : > { %v4931_v51 = vmax.f32 %v4718_v21, 0.0  ;;  %6197 = vst.msk [vmem:[%s10504_s12 + $0x120] sm:$0xff] %vm6160_vm2, %v5930_v53  ;;  %v4445_v24 = vpack.c.bf16 %v10932_v30, %v10928_v58  ;;  %v5729_v63 = vpack.c.bf16 %v5628_v12, %v5627_v49  ;;  %v3666_v49 = vmax.f32 %v3509_v54, 0.0 }
 0x66d   : > { %v4050_v40 = vpop.f32.mrf.mxu2  ;;  %v5262_v29 = vpop.f32.mrf.mxu0  ;;  %v3667_v16 = vmax.f32 %v3511_v38, 0.0 }
 0x66e   : > { %4759 = vmatmul.bf16.gmra.mxu3 %v4445_v24  ;;  %5969 = vmatmul.bf16.gmra.mxu1 %v5729_v63  ;;  %v5023_v17 = vpack.c.bf16 %v4931_v51, %v4930_v46  ;;  %v4051_v47 = vadd.f32 %v4050_v40, %v9782_v33  ;;  %v5263_v4 = vadd.f32 %v5262_v29, %v10344_v23  ;;  %v12203_v63 = vld [vmem:[#allocation73_spill] sm:$0xff] }
 0x66f   : > { %v3740_v24 = vpack.c.bf16 %v3667_v16, %v3666_v49 }
 0x670   : > { %5301 = vmatmul.bf16.gmra.mxu0 %v5023_v17  ;;  %v4235_v18 = vmax.f32 %v4051_v47, 0.0  ;;  %v5501_v26 = vmax.f32 %v5263_v4, 0.0 }
 0x671   : > { %v4720_v44 = vpop.f32.mrf.mxu3 }
 0x672   : > { %v4721_v53 = vadd.f32 %v4720_v44, %v10160_v14  ;;  %v10952_v40 = vadd.f32 %v4235_v18, %v12203_v63  ;;  %v5629_v17 = vadd.f32 %v5501_v26, %v10538_v28 }
 0x673   : > { %v5932_v59 = vpop.f32.mrf.mxu1 }
 0x674   : > { %6198 = vst.msk [vmem:[%s10504_s12 + $0x128] sm:$0xff] %vm6160_vm2, %v5932_v59  ;;  %v4932_v4 = vmax.f32 %v4721_v53, 0.0 }
 0x675   : > { %v4052_v8 = vpop.f32.mrf.mxu2  ;;  %v5264_v1 = vpop.f32.mrf.mxu0 }
 0x676   : > { %v4053_v12 = vadd.f32 %v4052_v8, %v9782_v33  ;;  %v5265_v21 = vadd.f32 %v5264_v1, %v10344_v23 }
 0x678   : > { %v4236_v46 = vmax.f32 %v4053_v12, 0.0  ;;  %v5502_v51 = vmax.f32 %v5265_v21, 0.0  ;;  %v12206_v12 = vld [vmem:[#allocation135_spill] sm:$0xff] }
 0x679   : > { %v4722_v29 = vpop.f32.mrf.mxu3  ;;  %v3514_v21 = vadd.f32 %v12206_v12, %v11992_v34 }
 0x67a   : > { %v10956_v38 = vadd.f32 %v4236_v46, %v12204_v60  ;;  %v5630_v47 = vadd.f32 %v5502_v51, %v10541_v11  ;;  %v4723_v15 = vadd.f32 %v4722_v29, %v10160_v14  ;;  %4094 = vmatmul.bf16.gmra.mxu2 %v3740_v24  ;;  %v12205_v11 = vld [vmem:[#allocation139_spill] sm:$0xff] }
 0x67b   : > { %v5935_v54 = vpop.f32.mrf.mxu1  ;;  %v3516_v1 = vadd.f32 %v12205_v11, %v11992_v34  ;;  %v12208_v11 = vld [vmem:[#allocation76_spill] sm:$0xff] }
 0x67c   : > { %v4933_v44 = vmax.f32 %v4723_v15, 0.0  ;;  %6199 = vst.msk [vmem:[%s10504_s12 + $0x130] sm:$0xff] %vm6160_vm2, %v5935_v54  ;;  %v4446_v59 = vpack.c.bf16 %v10956_v38, %v10952_v40  ;;  %v5730_v16 = vpack.c.bf16 %v5630_v47, %v5629_v17  ;;  %v3668_v17 = vmax.f32 %v3514_v21, 0.0 }
 0x67d   : > { %v4055_v18 = vpop.f32.mrf.mxu2  ;;  %v5267_v28 = vpop.f32.mrf.mxu0  ;;  %v3669_v51 = vmax.f32 %v3516_v1, 0.0 }
 0x67e   : > { %4764 = vmatmul.bf16.gmra.mxu3 %v4446_v59  ;;  %5974 = vmatmul.bf16.gmra.mxu1 %v5730_v16  ;;  %v5024_v8 = vpack.c.bf16 %v4933_v44, %v4932_v4  ;;  %v4056_v49 = vadd.f32 %v4055_v18, %v9782_v33  ;;  %v5268_v53 = vadd.f32 %v5267_v28, %v10344_v23  ;;  %v12207_v16 = vld [vmem:[#allocation75_spill] sm:$0xff] }
 0x67f   : > { %v3741_v59 = vpack.c.bf16 %v3669_v51, %v3668_v17 }
 0x680   : > { %5306 = vmatmul.bf16.gmra.mxu0 %v5024_v8  ;;  %v4237_v24 = vmax.f32 %v4056_v49, 0.0  ;;  %v5503_v60 = vmax.f32 %v5268_v53, 0.0 }
 0x681   : > { %v4725_v26 = vpop.f32.mrf.mxu3 }
 0x682   : > { %v4726_v54 = vadd.f32 %v4725_v26, %v10160_v14  ;;  %v10976_v18 = vadd.f32 %v4237_v24, %v12207_v16  ;;  %v5631_v8 = vadd.f32 %v5503_v60, %v10559_v2 }
 0x683   : > { %v5937_v46 = vpop.f32.mrf.mxu1 }
 0x684   : > { %6200 = vst.msk [vmem:[%s10504_s12 + $0x138] sm:$0xff] %vm6160_vm2, %v5937_v46  ;;  %v4934_v53 = vmax.f32 %v4726_v54, 0.0 }
 0x685   : > { %v4057_v63 = vpop.f32.mrf.mxu2  ;;  %v5269_v29 = vpop.f32.mrf.mxu0 }
 0x686   : > { %v4058_v47 = vadd.f32 %v4057_v63, %v9782_v33  ;;  %v5270_v15 = vadd.f32 %v5269_v29, %v10344_v23 }
 0x688   : > { %v4238_v4 = vmax.f32 %v4058_v47, 0.0  ;;  %v5504_v44 = vmax.f32 %v5270_v15, 0.0  ;;  %v12210_v47 = vld [vmem:[#allocation142_spill] sm:$0xff] }
 0x689   : > { %v4727_v28 = vpop.f32.mrf.mxu3  ;;  %v3519_v15 = vadd.f32 %v12210_v47, %v11992_v34 }
 0x68a   : > { %v10980_v1 = vadd.f32 %v4238_v4, %v12208_v11  ;;  %v5632_v49 = vadd.f32 %v5504_v44, %v10562_v32  ;;  %v4728_v12 = vadd.f32 %v4727_v28, %v10160_v14  ;;  %4099 = vmatmul.bf16.gmra.mxu2 %v3741_v59  ;;  %v12209_v32 = vld [vmem:[#allocation144_spill] sm:$0xff] }
 0x68b   : > { %v5940_v21 = vpop.f32.mrf.mxu1  ;;  %v3521_v29 = vadd.f32 %v12209_v32, %v11992_v34  ;;  %v12212_v32 = vld [vmem:[#allocation40_spill] sm:$0xff] }
 0x68c   : > { %v4935_v26 = vmax.f32 %v4728_v12, 0.0  ;;  %6201 = vst.msk [vmem:[%s10504_s12 + $0x140] sm:$0xff] %vm6160_vm2, %v5940_v21  ;;  %v4447_v46 = vpack.c.bf16 %v10980_v1, %v10976_v18  ;;  %v5731_v51 = vpack.c.bf16 %v5632_v49, %v5631_v8  ;;  %v3670_v8 = vmax.f32 %v3519_v15, 0.0 }
 0x68d   : > { %v4060_v24 = vpop.f32.mrf.mxu2  ;;  %v5272_v2 = vpop.f32.mrf.mxu0  ;;  %v3671_v44 = vmax.f32 %v3521_v29, 0.0 }
 0x68e   : > { %4769 = vmatmul.bf16.gmra.mxu3 %v4447_v46  ;;  %5979 = vmatmul.bf16.gmra.mxu1 %v5731_v51  ;;  %v5025_v63 = vpack.c.bf16 %v4935_v26, %v4934_v53  ;;  %v4061_v17 = vadd.f32 %v4060_v24, %v9782_v33  ;;  %v5273_v54 = vadd.f32 %v5272_v2, %v10344_v23  ;;  %v12211_v51 = vld [vmem:[#allocation36_spill] sm:$0xff] }
 0x68f   : > { %v3742_v46 = vpack.c.bf16 %v3671_v44, %v3670_v8 }
 0x690   : > { %5311 = vmatmul.bf16.gmra.mxu0 %v5025_v63  ;;  %v4239_v59 = vmax.f32 %v4061_v17, 0.0  ;;  %v5505_v11 = vmax.f32 %v5273_v54, 0.0 }
 0x691   : > { %v4730_v60 = vpop.f32.mrf.mxu3 }
 0x692   : > { %v4731_v21 = vadd.f32 %v4730_v60, %v10160_v14  ;;  %v11000_v24 = vadd.f32 %v4239_v59, %v12211_v51  ;;  %v5633_v63 = vadd.f32 %v5505_v11, %v10580_v45 }
 0x693   : > { %v5942_v4 = vpop.f32.mrf.mxu1 }
 0x694   : > { %6202 = vst.msk [vmem:[%s10504_s12 + $0x148] sm:$0xff] %vm6160_vm2, %v5942_v4  ;;  %v4936_v54 = vmax.f32 %v4731_v21, 0.0 }
 0x695   : > { %v4062_v16 = vpop.f32.mrf.mxu2  ;;  %v5274_v28 = vpop.f32.mrf.mxu0 }
 0x696   : > { %v4063_v49 = vadd.f32 %v4062_v16, %v9782_v33  ;;  %v5275_v12 = vadd.f32 %v5274_v28, %v10344_v23 }
 0x698   : > { %v4240_v53 = vmax.f32 %v4063_v49, 0.0  ;;  %v5506_v26 = vmax.f32 %v5275_v12, 0.0  ;;  %v12214_v49 = vld [vmem:[#allocation145_spill] sm:$0xff] }
 0x699   : > { %v4732_v2 = vpop.f32.mrf.mxu3  ;;  %v3524_v12 = vadd.f32 %v12214_v49, %v11992_v34 }
 0x69a   : > { %v11004_v29 = vadd.f32 %v4240_v53, %v12212_v32  ;;  %v5634_v17 = vadd.f32 %v5506_v26, %v10583_v42  ;;  %v4733_v47 = vadd.f32 %v4732_v2, %v10160_v14  ;;  %4104 = vmatmul.bf16.gmra.mxu2 %v3742_v46  ;;  %v12213_v42 = vld [vmem:[#allocation147_spill] sm:$0xff] }
 0x69b   : > { %v5945_v15 = vpop.f32.mrf.mxu1  ;;  %v3526_v28 = vadd.f32 %v12213_v42, %v11992_v34  ;;  %v12216_v42 = vld [vmem:[#allocation39_spill] sm:$0xff] }
 0x69c   : > { %v4937_v60 = vmax.f32 %v4733_v47, 0.0  ;;  %6203 = vst.msk [vmem:[%s10504_s12 + $0x150] sm:$0xff] %vm6160_vm2, %v5945_v15  ;;  %v4448_v4 = vpack.c.bf16 %v11004_v29, %v11000_v24  ;;  %v5732_v44 = vpack.c.bf16 %v5634_v17, %v5633_v63  ;;  %v3672_v63 = vmax.f32 %v3524_v12, 0.0 }
 0x69d   : > { %v4065_v59 = vpop.f32.mrf.mxu2  ;;  %v5277_v45 = vpop.f32.mrf.mxu0  ;;  %v3673_v26 = vmax.f32 %v3526_v28, 0.0 }
 0x69e   : > { %4774 = vmatmul.bf16.gmra.mxu3 %v4448_v4  ;;  %5984 = vmatmul.bf16.gmra.mxu1 %v5732_v44  ;;  %v5026_v16 = vpack.c.bf16 %v4937_v60, %v4936_v54  ;;  %v4066_v8 = vadd.f32 %v4065_v59, %v9782_v33  ;;  %v5278_v21 = vadd.f32 %v5277_v45, %v10344_v23  ;;  %v12215_v44 = vld [vmem:[#allocation27_spill] sm:$0xff] }
 0x69f   : > { %v3743_v4 = vpack.c.bf16 %v3673_v26, %v3672_v63 }
 0x6a0   : > { %5316 = vmatmul.bf16.gmra.mxu0 %v5026_v16  ;;  %v4241_v46 = vmax.f32 %v4066_v8, 0.0  ;;  %v5507_v32 = vmax.f32 %v5278_v21, 0.0 }
 0x6a1   : > { %v4735_v11 = vpop.f32.mrf.mxu3 }
 0x6a2   : > { %v4736_v15 = vadd.f32 %v4735_v11, %v10160_v14  ;;  %v11024_v59 = vadd.f32 %v4241_v46, %v12215_v44  ;;  %v5635_v16 = vadd.f32 %v5507_v32, %v10601_v20 }
 0x6a3   : > { %v5947_v53 = vpop.f32.mrf.mxu1 }
 0x6a4   : > { %6204 = vst.msk [vmem:[%s10504_s12 + $0x158] sm:$0xff] %vm6160_vm2, %v5947_v53  ;;  %v4938_v21 = vmax.f32 %v4736_v15, 0.0 }
 0x6a5   : > { %v4067_v51 = vpop.f32.mrf.mxu2  ;;  %v5279_v2 = vpop.f32.mrf.mxu0 }
 0x6a6   : > { %v4068_v17 = vadd.f32 %v4067_v51, %v9782_v33  ;;  %v5280_v47 = vadd.f32 %v5279_v2, %v10344_v23 }
 0x6a8   : > { %v4242_v54 = vmax.f32 %v4068_v17, 0.0  ;;  %v5508_v60 = vmax.f32 %v5280_v47, 0.0  ;;  %v12218_v17 = vld [vmem:[#allocation148_spill] sm:$0xff] }
 0x6a9   : > { %v4737_v45 = vpop.f32.mrf.mxu3  ;;  %v3529_v47 = vadd.f32 %v12218_v17, %v11992_v34 }
 0x6aa   : > { %v11028_v28 = vadd.f32 %v4242_v54, %v12216_v42  ;;  %v5636_v8 = vadd.f32 %v5508_v60, %v10604_v9  ;;  %v4738_v49 = vadd.f32 %v4737_v45, %v10160_v14  ;;  %4109 = vmatmul.bf16.gmra.mxu2 %v3743_v4  ;;  %v12217_v9 = vld [vmem:[#allocation149_spill] sm:$0xff] }
 0x6ab   : > { %v5950_v12 = vpop.f32.mrf.mxu1  ;;  %v3531_v2 = vadd.f32 %v12217_v9, %v11992_v34  ;;  %v12220_v9 = vld [vmem:[#allocation4_spill] sm:$0xff] }
 0x6ac   : > { %v4939_v11 = vmax.f32 %v4738_v49, 0.0  ;;  %6205 = vst.msk [vmem:[%s10504_s12 + $0x160] sm:$0xff] %vm6160_vm2, %v5950_v12  ;;  %v4449_v53 = vpack.c.bf16 %v11028_v28, %v11024_v59  ;;  %v5733_v26 = vpack.c.bf16 %v5636_v8, %v5635_v16  ;;  %v3674_v16 = vmax.f32 %v3529_v47, 0.0 }
 0x6ad   : > { %v4070_v46 = vpop.f32.mrf.mxu2  ;;  %v5282_v20 = vpop.f32.mrf.mxu0  ;;  %v3675_v60 = vmax.f32 %v3531_v2, 0.0 }
 0x6ae   : > { %4779 = vmatmul.bf16.gmra.mxu3 %v4449_v53  ;;  %5989 = vmatmul.bf16.gmra.mxu1 %v5733_v26  ;;  %v5027_v51 = vpack.c.bf16 %v4939_v11, %v4938_v21  ;;  %v4071_v63 = vadd.f32 %v4070_v46, %v9782_v33  ;;  %v5283_v15 = vadd.f32 %v5282_v20, %v10344_v23  ;;  %v12219_v26 = vld [vmem:[#allocation47_spill] sm:$0xff] }
 0x6af   : > { %v3744_v53 = vpack.c.bf16 %v3675_v60, %v3674_v16 }
 0x6b0   : > { %5321 = vmatmul.bf16.gmra.mxu0 %v5027_v51  ;;  %v4243_v4 = vmax.f32 %v4071_v63, 0.0  ;;  %v5509_v42 = vmax.f32 %v5283_v15, 0.0 }
 0x6b1   : > { %v4740_v32 = vpop.f32.mrf.mxu3 }
 0x6b2   : > { %v4741_v12 = vadd.f32 %v4740_v32, %v10160_v14  ;;  %v11048_v46 = vadd.f32 %v4243_v4, %v12219_v26  ;;  %v5637_v51 = vadd.f32 %v5509_v42, %v10622_v3 }
 0x6b3   : > { %v5952_v54 = vpop.f32.mrf.mxu1 }
 0x6b4   : > { %6206 = vst.msk [vmem:[%s10504_s12 + $0x168] sm:$0xff] %vm6160_vm2, %v5952_v54  ;;  %v4940_v15 = vmax.f32 %v4741_v12, 0.0 }
 0x6b5   : > { %v4072_v44 = vpop.f32.mrf.mxu2  ;;  %v5284_v45 = vpop.f32.mrf.mxu0 }
 0x6b6   : > { %v4073_v8 = vadd.f32 %v4072_v44, %v9782_v33  ;;  %v5285_v49 = vadd.f32 %v5284_v45, %v10344_v23 }
 0x6b8   : > { %v4244_v21 = vmax.f32 %v4073_v8, 0.0  ;;  %v5510_v11 = vmax.f32 %v5285_v49, 0.0  ;;  %v12222_v8 = vld [vmem:[#allocation150_spill] sm:$0xff] }
 0x6b9   : > { %v4742_v20 = vpop.f32.mrf.mxu3  ;;  %v3534_v49 = vadd.f32 %v12222_v8, %v11992_v34 }
 0x6ba   : > { %v11052_v2 = vadd.f32 %v4244_v21, %v12220_v9  ;;  %v5638_v63 = vadd.f32 %v5510_v11, %v10625_v43  ;;  %v4743_v17 = vadd.f32 %v4742_v20, %v10160_v14  ;;  %4114 = vmatmul.bf16.gmra.mxu2 %v3744_v53  ;;  %v12221_v43 = vld [vmem:[#allocation15_spill] sm:$0xff] }
 0x6bb   : > { %v5955_v47 = vpop.f32.mrf.mxu1  ;;  %v3536_v45 = vadd.f32 %v12221_v43, %v11992_v34  ;;  %v12224_v43 = vld [vmem:[#allocation3_spill] sm:$0xff] }
 0x6bc   : > { %v4941_v32 = vmax.f32 %v4743_v17, 0.0  ;;  %6207 = vst.msk [vmem:[%s10504_s12 + $0x170] sm:$0xff] %vm6160_vm2, %v5955_v47  ;;  %v4450_v54 = vpack.c.bf16 %v11052_v2, %v11048_v46  ;;  %v5734_v60 = vpack.c.bf16 %v5638_v63, %v5637_v51  ;;  %v3676_v51 = vmax.f32 %v3534_v49, 0.0 }
 0x6bd   : > { %v4075_v4 = vpop.f32.mrf.mxu2  ;;  %v5287_v3 = vpop.f32.mrf.mxu0  ;;  %v3677_v11 = vmax.f32 %v3536_v45, 0.0 }
 0x6be   : > { %4784 = vmatmul.bf16.gmra.mxu3 %v4450_v54  ;;  %5994 = vmatmul.bf16.gmra.mxu1 %v5734_v60  ;;  %v5028_v44 = vpack.c.bf16 %v4941_v32, %v4940_v15  ;;  %v4076_v16 = vadd.f32 %v4075_v4, %v9782_v33  ;;  %v5288_v12 = vadd.f32 %v5287_v3, %v10344_v23  ;;  %v12223_v60 = vld [vmem:[#allocation54_spill] sm:$0xff] }
 0x6bf   : > { %v3745_v54 = vpack.c.bf16 %v3677_v11, %v3676_v51 }
 0x6c0   : > { %5326 = vmatmul.bf16.gmra.mxu0 %v5028_v44  ;;  %v4245_v53 = vmax.f32 %v4076_v16, 0.0  ;;  %v5511_v9 = vmax.f32 %v5288_v12, 0.0 }
 0x6c1   : > { %v4745_v42 = vpop.f32.mrf.mxu3 }
 0x6c2   : > { %v4746_v47 = vadd.f32 %v4745_v42, %v10160_v14  ;;  %v11072_v4 = vadd.f32 %v4245_v53, %v12223_v60  ;;  %v5639_v44 = vadd.f32 %v5511_v9, %v10647_v37 }
 0x6c3   : > { %v5957_v21 = vpop.f32.mrf.mxu1 }
 0x6c4   : > { %6208 = vst.msk [vmem:[%s10504_s12 + $0x178] sm:$0xff] %vm6160_vm2, %v5957_v21  ;;  %v4942_v12 = vmax.f32 %v4746_v47, 0.0 }
 0x6c5   : > { %v4077_v26 = vpop.f32.mrf.mxu2  ;;  %v5289_v20 = vpop.f32.mrf.mxu0 }
 0x6c6   : > { %v4078_v63 = vadd.f32 %v4077_v26, %v9782_v33  ;;  %v5290_v17 = vadd.f32 %v5289_v20, %v10344_v23 }
 0x6c8   : > { %v4246_v15 = vmax.f32 %v4078_v63, 0.0  ;;  %v5512_v32 = vmax.f32 %v5290_v17, 0.0  ;;  %v12226_v63 = vld [vmem:[#allocation53_spill] sm:$0xff] }
 0x6c9   : > { %v4747_v3 = vpop.f32.mrf.mxu3  ;;  %v3539_v17 = vadd.f32 %v12226_v63, %v11992_v34 }
 0x6ca   : > { %v11076_v45 = vadd.f32 %v4246_v15, %v12224_v43  ;;  %v5640_v16 = vadd.f32 %v5512_v32, %v10650_v57  ;;  %v4748_v8 = vadd.f32 %v4747_v3, %v10160_v14  ;;  %4119 = vmatmul.bf16.gmra.mxu2 %v3745_v54  ;;  %v12225_v57 = vld [vmem:[#allocation8_spill] sm:$0xff] }
 0x6cb   : > { %v5960_v49 = vpop.f32.mrf.mxu1  ;;  %v3541_v20 = vadd.f32 %v12225_v57, %v11992_v34  ;;  %v12228_v57 = vld [vmem:[#allocation10_spill] sm:$0xff] }
 0x6cc   : > { %v4943_v42 = vmax.f32 %v4748_v8, 0.0  ;;  %6209 = vst.msk [vmem:[%s10504_s12 + $0x180] sm:$0xff] %vm6160_vm2, %v5960_v49  ;;  %v4451_v21 = vpack.c.bf16 %v11076_v45, %v11072_v4  ;;  %v5735_v11 = vpack.c.bf16 %v5640_v16, %v5639_v44  ;;  %v3678_v44 = vmax.f32 %v3539_v17, 0.0 }
 0x6cd   : > { %v4080_v53 = vpop.f32.mrf.mxu2  ;;  %v5292_v37 = vpop.f32.mrf.mxu0  ;;  %v3679_v32 = vmax.f32 %v3541_v20, 0.0 }
 0x6ce   : > { %4789 = vmatmul.bf16.gmra.mxu3 %v4451_v21  ;;  %5999 = vmatmul.bf16.gmra.mxu1 %v5735_v11  ;;  %v5029_v26 = vpack.c.bf16 %v4943_v42, %v4942_v12  ;;  %v4081_v51 = vadd.f32 %v4080_v53, %v9782_v33  ;;  %v5293_v47 = vadd.f32 %v5292_v37, %v10344_v23  ;;  %v12227_v11 = vld [vmem:[#allocation13_spill] sm:$0xff] }
 0x6cf   : > { %v3746_v21 = vpack.c.bf16 %v3679_v32, %v3678_v44 }
 0x6d0   : > { %5331 = vmatmul.bf16.gmra.mxu0 %v5029_v26  ;;  %v4247_v54 = vmax.f32 %v4081_v51, 0.0  ;;  %v5513_v43 = vmax.f32 %v5293_v47, 0.0 }
 0x6d1   : > { %v4750_v9 = vpop.f32.mrf.mxu3 }
 0x6d2   : > { %v4751_v49 = vadd.f32 %v4750_v9, %v10160_v14  ;;  %v11096_v53 = vadd.f32 %v4247_v54, %v12227_v11  ;;  %v5641_v26 = vadd.f32 %v5513_v43, %v10671_v13 }
 0x6d3   : > { %v5962_v15 = vpop.f32.mrf.mxu1 }
 0x6d4   : > { %6210 = vst.msk [vmem:[%s10504_s12 + $0x188] sm:$0xff] %vm6160_vm2, %v5962_v15  ;;  %v4944_v47 = vmax.f32 %v4751_v49, 0.0 }
 0x6d5   : > { %v4082_v60 = vpop.f32.mrf.mxu2  ;;  %v5294_v3 = vpop.f32.mrf.mxu0 }
 0x6d6   : > { %v4083_v16 = vadd.f32 %v4082_v60, %v9782_v33  ;;  %v5295_v8 = vadd.f32 %v5294_v3, %v10344_v23 }
 0x6d8   : > { %v4248_v12 = vmax.f32 %v4083_v16, 0.0  ;;  %v5514_v42 = vmax.f32 %v5295_v8, 0.0  ;;  %v12230_v16 = vld [vmem:[#allocation16_spill] sm:$0xff] }
 0x6d9   : > { %v4752_v37 = vpop.f32.mrf.mxu3  ;;  %v3544_v8 = vadd.f32 %v12230_v16, %v11992_v34 }
 0x6da   : > { %v11100_v20 = vadd.f32 %v4248_v12, %v12228_v57  ;;  %v5642_v51 = vadd.f32 %v5514_v42, %v10674_v41  ;;  %v4753_v63 = vadd.f32 %v4752_v37, %v10160_v14  ;;  %4124 = vmatmul.bf16.gmra.mxu2 %v3746_v21  ;;  %v12229_v41 = vld [vmem:[#allocation55_spill] sm:$0xff] }
 0x6db   : > { %v5965_v17 = vpop.f32.mrf.mxu1  ;;  %v3546_v3 = vadd.f32 %v12229_v41, %v11992_v34 }
 0x6dc   : > { %v4945_v9 = vmax.f32 %v4753_v63, 0.0  ;;  %6211 = vst.msk [vmem:[%s10504_s12 + $0x190] sm:$0xff] %vm6160_vm2, %v5965_v17  ;;  %v4452_v15 = vpack.c.bf16 %v11100_v20, %v11096_v53  ;;  %v5736_v32 = vpack.c.bf16 %v5642_v51, %v5641_v26  ;;  %v3680_v26 = vmax.f32 %v3544_v8, 0.0 }
 0x6dd   : > { %v4085_v54 = vpop.f32.mrf.mxu2  ;;  %v5297_v13 = vpop.f32.mrf.mxu0  ;;  %v3681_v42 = vmax.f32 %v3546_v3, 0.0 }
 0x6de   : > { %4794 = vmatmul.bf16.gmra.mxu3 %v4452_v15  ;;  %6004 = vmatmul.bf16.gmra.mxu1 %v5736_v32  ;;  %v5030_v60 = vpack.c.bf16 %v4945_v9, %v4944_v47  ;;  %v4086_v44 = vadd.f32 %v4085_v54, %v9782_v33  ;;  %v5298_v49 = vadd.f32 %v5297_v13, %v10344_v23  ;;  %v12231_v15 = vld [vmem:[#allocation61_spill] sm:$0xff] }
 0x6df   : > { %v3747_v9 = vpack.c.bf16 %v3681_v42, %v3680_v26 }
 0x6e0   : > { %5336 = vmatmul.bf16.gmra.mxu0 %v5030_v60  ;;  %v4249_v21 = vmax.f32 %v4086_v44, 0.0  ;;  %v5515_v57 = vmax.f32 %v5298_v49, 0.0  ;;  %v12232_v60 = vld [vmem:[#allocation60_spill] sm:$0xff] }
 0x6e1   : > { %v4755_v43 = vpop.f32.mrf.mxu3 }
 0x6e2   : > { %v4756_v17 = vadd.f32 %v4755_v43, %v10160_v14  ;;  %v11120_v32 = vadd.f32 %v4249_v21, %v12231_v15  ;;  %v5643_v13 = vadd.f32 %v5515_v57, %v10694_v50 }
 0x6e3   : > { %v5967_v12 = vpop.f32.mrf.mxu1 }
 0x6e4   : > { %6212 = vst.msk [vmem:[%s10504_s12 + $0x198] sm:$0xff] %vm6160_vm2, %v5967_v12  ;;  %v4946_v43 = vmax.f32 %v4756_v17, 0.0 }
 0x6e5   : > { %v4087_v11 = vpop.f32.mrf.mxu2  ;;  %v5299_v37 = vpop.f32.mrf.mxu0 }
 0x6e6   : > { %v4088_v51 = vadd.f32 %v4087_v11, %v9782_v33  ;;  %v5300_v63 = vadd.f32 %v5299_v37, %v10344_v23 }
 0x6e8   : > { %v4250_v47 = vmax.f32 %v4088_v51, 0.0  ;;  %v5516_v34 = vmax.f32 %v5300_v63, 0.0 }
 0x6e9   : > { %v4757_v54 = vpop.f32.mrf.mxu3 }
 0x6ea   : > { %v11124_v41 = vadd.f32 %v4250_v47, %v12232_v60  ;;  %v5644_v3 = vadd.f32 %v5516_v34, %v10697_v7  ;;  %v4758_v44 = vadd.f32 %v4757_v54, %v10160_v14  ;;  %4129 = vmatmul.bf16.gmra.mxu2 %v3747_v9 }
 0x6eb   : > { %v5970_v16 = vpop.f32.mrf.mxu1 }
 0x6ec   : > { %v4947_v8 = vmax.f32 %v4758_v44, 0.0  ;;  %6213 = vst.msk [vmem:[%s10504_s12 + $0x1a0] sm:$0xff] %vm6160_vm2, %v5970_v16  ;;  %v4453_v49 = vpack.c.bf16 %v11124_v41, %v11120_v32  ;;  %v5737_v12 = vpack.c.bf16 %v5644_v3, %v5643_v13  ;;  %v12233_v13 = vld [vmem:[#allocation69_spill] sm:$0xff]  ;;  %v12234_v16 = vld [vmem:[#allocation63_spill] sm:$0xff] }
 0x6ed   : > { %v4090_v42 = vpop.f32.mrf.mxu2  ;;  %v5302_v50 = vpop.f32.mrf.mxu0 }
 0x6ee   : > { %4799 = vmatmul.bf16.gmra.mxu3 %v4453_v49  ;;  %6009 = vmatmul.bf16.gmra.mxu1 %v5737_v12  ;;  %v5031_v21 = vpack.c.bf16 %v4947_v8, %v4946_v43  ;;  %v4091_v7 = vadd.f32 %v4090_v42, %v9782_v33  ;;  %v5303_v37 = vadd.f32 %v5302_v50, %v10344_v23  ;;  %v12235_v12 = vld [vmem:[#allocation52_spill] sm:$0xff] }
 0x6f0   : > { %5341 = vmatmul.bf16.gmra.mxu0 %v5031_v21  ;;  %v4251_v57 = vmax.f32 %v4091_v7, 0.0  ;;  %v5517_v17 = vmax.f32 %v5303_v37, 0.0 }
 0x6f1   : > { %v4760_v11 = vpop.f32.mrf.mxu3 }
 0x6f2   : > { %v4761_v9 = vadd.f32 %v4760_v11, %v10160_v14  ;;  %v11140_v60 = vadd.f32 %v4251_v57, %v12233_v13  ;;  %v5645_v44 = vadd.f32 %v5517_v17, %v10716_v55 }
 0x6f3   : > { %v5972_v26 = vpop.f32.mrf.mxu1 }
 0x6f4   : > { %6214 = vst.msk [vmem:[%s10504_s12 + $0x1a8] sm:$0xff] %vm6160_vm2, %v5972_v26  ;;  %v4948_v50 = vmax.f32 %v4761_v9, 0.0 }
 0x6f5   : > { %v4092_v51 = vpop.f32.mrf.mxu2  ;;  %v5304_v63 = vpop.f32.mrf.mxu0 }
 0x6f6   : > { %v4093_v47 = vadd.f32 %v4092_v51, %v9782_v33  ;;  %v5305_v34 = vadd.f32 %v5304_v63, %v10344_v23 }
 0x6f8   : > { %v4252_v15 = vmax.f32 %v4093_v47, 0.0  ;;  %v5518_v54 = vmax.f32 %v5305_v34, 0.0 }
 0x6f9   : > { %v4762_v3 = vpop.f32.mrf.mxu3 }
 0x6fa   : > { %v11144_v43 = vadd.f32 %v4252_v15, %v12234_v16  ;;  %v5646_v8 = vadd.f32 %v5518_v54, %v10720_v0  ;;  %v4763_v49 = vadd.f32 %v4762_v3, %v10160_v14  ;;  %4134 = vmatmul.bf16.gmra.mxu2 %v12235_v12  ;;  %v12236_v16 = vld [vmem:[#allocation77_spill] sm:$0xff] }
 0x6fb   : > { %v5975_v42 = vpop.f32.mrf.mxu1 }
 0x6fc   : > { %v4949_v21 = vmax.f32 %v4763_v49, 0.0  ;;  %6215 = vst.msk [vmem:[%s10504_s12 + $0x1b0] sm:$0xff] %vm6160_vm2, %v5975_v42  ;;  %v4454_v7 = vpack.c.bf16 %v11144_v43, %v11140_v60  ;;  %v5738_v11 = vpack.c.bf16 %v5646_v8, %v5645_v44  ;;  %v12237_v42 = vld [vmem:[#allocation22_spill] sm:$0xff] }
 0x6fd   : > { %v4095_v55 = vpop.f32.mrf.mxu2  ;;  %v5307_v37 = vpop.f32.mrf.mxu0 }
 0x6fe   : > { %4804 = vmatmul.bf16.gmra.mxu3 %v4454_v7  ;;  %6014 = vmatmul.bf16.gmra.mxu1 %v5738_v11  ;;  %v5032_v26 = vpack.c.bf16 %v4949_v21, %v4948_v50  ;;  %v4096_v0 = vadd.f32 %v4095_v55, %v9782_v33  ;;  %v5308_v51 = vadd.f32 %v5307_v37, %v10344_v23  ;;  %v12238_v11 = vld [vmem:[#allocation21_spill] sm:$0xff] }
 0x700   : > { %5346 = vmatmul.bf16.gmra.mxu0 %v5032_v26  ;;  %v4253_v17 = vmax.f32 %v4096_v0, 0.0  ;;  %v5519_v9 = vmax.f32 %v5308_v51, 0.0 }
 0x701   : > { %v4765_v57 = vpop.f32.mrf.mxu3 }
 0x702   : > { %v4766_v13 = vadd.f32 %v4765_v57, %v10160_v14  ;;  %v11161_v8 = vadd.f32 %v4253_v17, %v12236_v16  ;;  %v5647_v12 = vadd.f32 %v5519_v9, %v10740_v39 }
 0x703   : > { %v5977_v63 = vpop.f32.mrf.mxu1 }
 0x704   : > { %6216 = vst.msk [vmem:[%s10504_s12 + $0x1b8] sm:$0xff] %vm6160_vm2, %v5977_v63  ;;  %v4950_v37 = vmax.f32 %v4766_v13, 0.0 }
 0x705   : > { %v4097_v47 = vpop.f32.mrf.mxu2  ;;  %v5309_v34 = vpop.f32.mrf.mxu0 }
 0x706   : > { %v4098_v15 = vadd.f32 %v4097_v47, %v9782_v33  ;;  %v5310_v54 = vadd.f32 %v5309_v34, %v10344_v23 }
 0x708   : > { %v4254_v3 = vmax.f32 %v4098_v15, 0.0  ;;  %v5520_v44 = vmax.f32 %v5310_v54, 0.0 }
 0x709   : > { %v4767_v49 = vpop.f32.mrf.mxu3 }
 0x70a   : > { %v11165_v50 = vadd.f32 %v4254_v3, %v12237_v42  ;;  %v5648_v21 = vadd.f32 %v5520_v44, %v10744_v10  ;;  %v4768_v7 = vadd.f32 %v4767_v49, %v10160_v14  ;;  %4139 = vmatmul.bf16.gmra.mxu2 %v12238_v11  ;;  %v12239_v42 = vld [vmem:[#allocation86_spill] sm:$0xff] }
 0x70b   : > { %v5980_v55 = vpop.f32.mrf.mxu1 }
 0x70c   : > { %v4951_v26 = vmax.f32 %v4768_v7, 0.0  ;;  %6217 = vst.msk [vmem:[%s10504_s12 + $0x1c0] sm:$0xff] %vm6160_vm2, %v5980_v55  ;;  %v4455_v0 = vpack.c.bf16 %v11165_v50, %v11161_v8  ;;  %v5739_v57 = vpack.c.bf16 %v5648_v21, %v5647_v12  ;;  %v12240_v55 = vld [vmem:[#allocation51_spill] sm:$0xff] }
 0x70d   : > { %v4100_v39 = vpop.f32.mrf.mxu2  ;;  %v5312_v51 = vpop.f32.mrf.mxu0 }
 0x70e   : > { %4809 = vmatmul.bf16.gmra.mxu3 %v4455_v0  ;;  %6019 = vmatmul.bf16.gmra.mxu1 %v5739_v57  ;;  %v5033_v63 = vpack.c.bf16 %v4951_v26, %v4950_v37  ;;  %v4101_v10 = vadd.f32 %v4100_v39, %v9782_v33  ;;  %v5313_v47 = vadd.f32 %v5312_v51, %v10344_v23 }
 0x710   : > { %5351 = vmatmul.bf16.gmra.mxu0 %v5033_v63  ;;  %v4255_v9 = vmax.f32 %v4101_v10, 0.0  ;;  %v5521_v13 = vmax.f32 %v5313_v47, 0.0 }
 0x711   : > { %v4770_v17 = vpop.f32.mrf.mxu3 }
 0x712   : > { %v4771_v16 = vadd.f32 %v4770_v17, %v10160_v14  ;;  %v11182_v21 = vadd.f32 %v4255_v9, %v12239_v42  ;;  %v5649_v11 = vadd.f32 %v5521_v13, %v10764_v22 }
 0x713   : > { %v5982_v34 = vpop.f32.mrf.mxu1 }
 0x714   : > { %6218 = vst.msk [vmem:[%s10504_s12 + $0x1c8] sm:$0xff] %vm6160_vm2, %v5982_v34  ;;  %v4952_v39 = vmax.f32 %v4771_v16, 0.0 }
 0x715   : > { %v4102_v15 = vpop.f32.mrf.mxu2  ;;  %v5314_v54 = vpop.f32.mrf.mxu0 }
 0x716   : > { %v4103_v3 = vadd.f32 %v4102_v15, %v9782_v33  ;;  %v5315_v44 = vadd.f32 %v5314_v54, %v10344_v23 }
 0x718   : > { %v4256_v49 = vmax.f32 %v4103_v3, 0.0  ;;  %v5522_v12 = vmax.f32 %v5315_v44, 0.0 }
 0x719   : > { %v4772_v7 = vpop.f32.mrf.mxu3 }
 0x71a   : > { %v11186_v37 = vadd.f32 %v4256_v49, %v12240_v55  ;;  %v5650_v26 = vadd.f32 %v5522_v12, %v10768_v48  ;;  %v4773_v0 = vadd.f32 %v4772_v7, %v10160_v14 }
 0x71b   : > { %v5985_v57 = vpop.f32.mrf.mxu1 }
 0x71c   : > { %v4953_v51 = vmax.f32 %v4773_v0, 0.0  ;;  %6219 = vst.msk [vmem:[%s10504_s12 + $0x1d0] sm:$0xff] %vm6160_vm2, %v5985_v57  ;;  %v4456_v63 = vpack.c.bf16 %v11186_v37, %v11182_v21  ;;  %v5740_v10 = vpack.c.bf16 %v5650_v26, %v5649_v11  ;;  %v12241_v11 = vld [vmem:[#allocation92_spill] sm:$0xff]  ;;  %v12242_v57 = vld [vmem:[#allocation93_spill] sm:$0xff] }
 0x71d   : > { %v4105_v17 = vpop.f32.mrf.mxu2  ;;  %v5317_v47 = vpop.f32.mrf.mxu0 }
 0x71e   : > { %4814 = vmatmul.bf16.gmra.mxu3 %v4456_v63  ;;  %6024 = vmatmul.bf16.gmra.mxu1 %v5740_v10  ;;  %v5034_v22 = vpack.c.bf16 %v4953_v51, %v4952_v39  ;;  %v4106_v48 = vadd.f32 %v4105_v17, %v9782_v33  ;;  %v5318_v9 = vadd.f32 %v5317_v47, %v10344_v23 }
 0x720   : > { %5356 = vmatmul.bf16.gmra.mxu0 %v5034_v22  ;;  %v4257_v54 = vmax.f32 %v4106_v48, 0.0  ;;  %v5523_v44 = vmax.f32 %v5318_v9, 0.0 }
 0x721   : > { %v4775_v34 = vpop.f32.mrf.mxu3 }
 0x722   : > { %v4776_v12 = vadd.f32 %v4775_v34, %v10160_v14  ;;  %v11202_v55 = vadd.f32 %v4257_v54, %v12241_v11  ;;  %v5651_v0 = vadd.f32 %v5523_v44, %v10788_v62 }
 0x723   : > { %v5987_v15 = vpop.f32.mrf.mxu1 }
 0x724   : > { %6220 = vst.msk [vmem:[%s10504_s12 + $0x1d8] sm:$0xff] %vm6160_vm2, %v5987_v15  ;;  %v4954_v17 = vmax.f32 %v4776_v12, 0.0 }
 0x725   : > { %v4107_v13 = vpop.f32.mrf.mxu2  ;;  %v5319_v3 = vpop.f32.mrf.mxu0 }
 0x726   : > { %v4108_v16 = vadd.f32 %v4107_v13, %v9782_v33  ;;  %v5320_v49 = vadd.f32 %v5319_v3, %v10344_v23 }
 0x728   : > { %v4258_v42 = vmax.f32 %v4108_v16, 0.0  ;;  %v5524_v7 = vmax.f32 %v5320_v49, 0.0 }
 0x729   : > { %v4777_v26 = vpop.f32.mrf.mxu3 }
 0x72a   : > { %v11206_v39 = vadd.f32 %v4258_v42, %v12242_v57  ;;  %v5652_v51 = vadd.f32 %v5524_v7, %v10792_v61  ;;  %v4778_v63 = vadd.f32 %v4777_v26, %v10160_v14 }
 0x72b   : > { %v5990_v10 = vpop.f32.mrf.mxu1 }
 0x72c   : > { %v4955_v47 = vmax.f32 %v4778_v63, 0.0  ;;  %6221 = vst.msk [vmem:[%s10504_s12 + $0x1e0] sm:$0xff] %vm6160_vm2, %v5990_v10  ;;  %v4457_v22 = vpack.c.bf16 %v11206_v39, %v11202_v55  ;;  %v5741_v48 = vpack.c.bf16 %v5652_v51, %v5651_v0  ;;  %v12243_v0 = vld [vmem:[#allocation99_spill] sm:$0xff]  ;;  %v12244_v10 = vld [vmem:[#allocation29_spill] sm:$0xff] }
 0x72d   : > { %v4110_v34 = vpop.f32.mrf.mxu2  ;;  %v5322_v9 = vpop.f32.mrf.mxu0 }
 0x72e   : > { %4819 = vmatmul.bf16.gmra.mxu3 %v4457_v22  ;;  %6029 = vmatmul.bf16.gmra.mxu1 %v5741_v48  ;;  %v5035_v62 = vpack.c.bf16 %v4955_v47, %v4954_v17  ;;  %v4111_v61 = vadd.f32 %v4110_v34, %v9782_v33  ;;  %v5323_v54 = vadd.f32 %v5322_v9, %v10344_v23 }
 0x730   : > { %5361 = vmatmul.bf16.gmra.mxu0 %v5035_v62  ;;  %v4259_v3 = vmax.f32 %v4111_v61, 0.0  ;;  %v5525_v49 = vmax.f32 %v5323_v54, 0.0 }
 0x731   : > { %v4780_v15 = vpop.f32.mrf.mxu3 }
 0x732   : > { %v4781_v7 = vadd.f32 %v4780_v15, %v10160_v14  ;;  %v11222_v57 = vadd.f32 %v4259_v3, %v12243_v0  ;;  %v5653_v63 = vadd.f32 %v5525_v49, %v10812_v19 }
 0x733   : > { %v5992_v13 = vpop.f32.mrf.mxu1 }
 0x734   : > { %6222 = vst.msk [vmem:[%s10504_s12 + $0x1e8] sm:$0xff] %vm6160_vm2, %v5992_v13  ;;  %v4956_v34 = vmax.f32 %v4781_v7, 0.0 }
 0x735   : > { %v4112_v44 = vpop.f32.mrf.mxu2  ;;  %v5324_v16 = vpop.f32.mrf.mxu0 }
 0x736   : > { %v4113_v12 = vadd.f32 %v4112_v44, %v9782_v33  ;;  %v5325_v42 = vadd.f32 %v5324_v16, %v10344_v23 }
 0x738   : > { %v4260_v11 = vmax.f32 %v4113_v12, 0.0  ;;  %v5526_v26 = vmax.f32 %v5325_v42, 0.0 }
 0x739   : > { %v4782_v51 = vpop.f32.mrf.mxu3 }
 0x73a   : > { %v11226_v17 = vadd.f32 %v4260_v11, %v12244_v10  ;;  %v5654_v47 = vadd.f32 %v5526_v26, %v10816_v36  ;;  %v4783_v22 = vadd.f32 %v4782_v51, %v10160_v14 }
 0x73b   : > { %v5995_v48 = vpop.f32.mrf.mxu1 }
 0x73c   : > { %v4957_v9 = vmax.f32 %v4783_v22, 0.0  ;;  %6223 = vst.msk [vmem:[%s10504_s12 + $0x1f0] sm:$0xff] %vm6160_vm2, %v5995_v48  ;;  %v4458_v62 = vpack.c.bf16 %v11226_v17, %v11222_v57  ;;  %v5742_v61 = vpack.c.bf16 %v5654_v47, %v5653_v63  ;;  %v12245_v63 = vld [vmem:[#allocation105_spill] sm:$0xff]  ;;  %v12246_v48 = vld [vmem:[#allocation106_spill] sm:$0xff] }
 0x73d   : > { %v4115_v15 = vpop.f32.mrf.mxu2  ;;  %v5327_v54 = vpop.f32.mrf.mxu0 }
 0x73e   : > { %4824 = vmatmul.bf16.gmra.mxu3 %v4458_v62  ;;  %6034 = vmatmul.bf16.gmra.mxu1 %v5742_v61  ;;  %v5036_v19 = vpack.c.bf16 %v4957_v9, %v4956_v34  ;;  %v4116_v36 = vadd.f32 %v4115_v15, %v9782_v33  ;;  %v5328_v3 = vadd.f32 %v5327_v54, %v10344_v23 }
 0x740   : > { %5366 = vmatmul.bf16.gmra.mxu0 %v5036_v19  ;;  %v4261_v16 = vmax.f32 %v4116_v36, 0.0  ;;  %v5527_v42 = vmax.f32 %v5328_v3, 0.0 }
 0x741   : > { %v4785_v13 = vpop.f32.mrf.mxu3 }
 0x742   : > { %v4786_v26 = vadd.f32 %v4785_v13, %v10160_v14  ;;  %v11242_v10 = vadd.f32 %v4261_v16, %v12245_v63  ;;  %v5655_v22 = vadd.f32 %v5527_v42, %v10836_v27 }
 0x743   : > { %v5997_v44 = vpop.f32.mrf.mxu1 }
 0x744   : > { %6224 = vst.msk [vmem:[%s10504_s12 + $0x1f8] sm:$0xff] %vm6160_vm2, %v5997_v44  ;;  %v4958_v15 = vmax.f32 %v4786_v26, 0.0 }
 0x745   : > { %v4117_v49 = vpop.f32.mrf.mxu2  ;;  %v5329_v12 = vpop.f32.mrf.mxu0 }
 0x746   : > { %v4118_v7 = vadd.f32 %v4117_v49, %v9782_v33  ;;  %v5330_v11 = vadd.f32 %v5329_v12, %v10344_v23 }
 0x748   : > { %v4262_v0 = vmax.f32 %v4118_v7, 0.0  ;;  %v5528_v51 = vmax.f32 %v5330_v11, 0.0 }
 0x749   : > { %v4787_v47 = vpop.f32.mrf.mxu3 }
 0x74a   : > { %v11246_v34 = vadd.f32 %v4262_v0, %v12246_v48  ;;  %v5656_v9 = vadd.f32 %v5528_v51, %v10840_v25  ;;  %v4788_v62 = vadd.f32 %v4787_v47, %v10160_v14 }
 0x74b   : > { %v6000_v61 = vpop.f32.mrf.mxu1 }
 0x74c   : > { %v4959_v54 = vmax.f32 %v4788_v62, 0.0  ;;  %6225 = vst.msk [vmem:[%s10504_s12 + $0x200] sm:$0xff] %vm6160_vm2, %v6000_v61  ;;  %v4459_v19 = vpack.c.bf16 %v11246_v34, %v11242_v10  ;;  %v5743_v36 = vpack.c.bf16 %v5656_v9, %v5655_v22  ;;  %v12247_v22 = vld [vmem:[#allocation112_spill] sm:$0xff]  ;;  %v12248_v61 = vld [vmem:[#allocation113_spill] sm:$0xff] }
 0x74d   : > { %v4120_v13 = vpop.f32.mrf.mxu2  ;;  %v5332_v3 = vpop.f32.mrf.mxu0 }
 0x74e   : > { %4829 = vmatmul.bf16.gmra.mxu3 %v4459_v19  ;;  %6039 = vmatmul.bf16.gmra.mxu1 %v5743_v36  ;;  %v5037_v27 = vpack.c.bf16 %v4959_v54, %v4958_v15  ;;  %v4121_v25 = vadd.f32 %v4120_v13, %v9782_v33  ;;  %v5333_v16 = vadd.f32 %v5332_v3, %v10344_v23 }
 0x750   : > { %5371 = vmatmul.bf16.gmra.mxu0 %v5037_v27  ;;  %v4263_v12 = vmax.f32 %v4121_v25, 0.0  ;;  %v5529_v11 = vmax.f32 %v5333_v16, 0.0 }
 0x751   : > { %v4790_v44 = vpop.f32.mrf.mxu3 }
 0x752   : > { %v4791_v51 = vadd.f32 %v4790_v44, %v10160_v14  ;;  %v11262_v48 = vadd.f32 %v4263_v12, %v12247_v22  ;;  %v5657_v62 = vadd.f32 %v5529_v11, %v10860_v6 }
 0x753   : > { %v6002_v49 = vpop.f32.mrf.mxu1 }
 0x754   : > { %6226 = vst.msk [vmem:[%s10504_s12 + $0x208] sm:$0xff] %vm6160_vm2, %v6002_v49  ;;  %v4960_v13 = vmax.f32 %v4791_v51, 0.0 }
 0x755   : > { %v4122_v42 = vpop.f32.mrf.mxu2  ;;  %v5334_v7 = vpop.f32.mrf.mxu0 }
 0x756   : > { %v4123_v26 = vadd.f32 %v4122_v42, %v9782_v33  ;;  %v5335_v0 = vadd.f32 %v5334_v7, %v10344_v23 }
 0x758   : > { %v4264_v63 = vmax.f32 %v4123_v26, 0.0  ;;  %v5530_v47 = vmax.f32 %v5335_v0, 0.0 }
 0x759   : > { %v4792_v9 = vpop.f32.mrf.mxu3 }
 0x75a   : > { %v11266_v15 = vadd.f32 %v4264_v63, %v12248_v61  ;;  %v5658_v54 = vadd.f32 %v5530_v47, %v10864_v56  ;;  %v4793_v19 = vadd.f32 %v4792_v9, %v10160_v14 }
 0x75b   : > { %v6005_v36 = vpop.f32.mrf.mxu1 }
 0x75c   : > { %v4961_v3 = vmax.f32 %v4793_v19, 0.0  ;;  %6227 = vst.msk [vmem:[%s10504_s12 + $0x210] sm:$0xff] %vm6160_vm2, %v6005_v36  ;;  %v4460_v27 = vpack.c.bf16 %v11266_v15, %v11262_v48  ;;  %v5744_v25 = vpack.c.bf16 %v5658_v54, %v5657_v62  ;;  %v12249_v62 = vld [vmem:[#allocation119_spill] sm:$0xff]  ;;  %v12250_v36 = vld [vmem:[#allocation120_spill] sm:$0xff] }
 0x75d   : > { %v4125_v44 = vpop.f32.mrf.mxu2  ;;  %v5337_v16 = vpop.f32.mrf.mxu0 }
 0x75e   : > { %4834 = vmatmul.bf16.gmra.mxu3 %v4460_v27  ;;  %6044 = vmatmul.bf16.gmra.mxu1 %v5744_v25  ;;  %v5038_v6 = vpack.c.bf16 %v4961_v3, %v4960_v13  ;;  %v4126_v56 = vadd.f32 %v4125_v44, %v9782_v33  ;;  %v5338_v12 = vadd.f32 %v5337_v16, %v10344_v23 }
 0x760   : > { %5376 = vmatmul.bf16.gmra.mxu0 %v5038_v6  ;;  %v4265_v7 = vmax.f32 %v4126_v56, 0.0  ;;  %v5531_v0 = vmax.f32 %v5338_v12, 0.0 }
 0x761   : > { %v4795_v49 = vpop.f32.mrf.mxu3 }
 0x762   : > { %v4796_v47 = vadd.f32 %v4795_v49, %v10160_v14  ;;  %v11282_v61 = vadd.f32 %v4265_v7, %v12249_v62  ;;  %v5659_v19 = vadd.f32 %v5531_v0, %v10882_v52 }
 0x763   : > { %v6007_v42 = vpop.f32.mrf.mxu1 }
 0x764   : > { %6228 = vst.msk [vmem:[%s10504_s12 + $0x218] sm:$0xff] %vm6160_vm2, %v6007_v42  ;;  %v4962_v44 = vmax.f32 %v4796_v47, 0.0 }
 0x765   : > { %v4127_v11 = vpop.f32.mrf.mxu2  ;;  %v5339_v26 = vpop.f32.mrf.mxu0 }
 0x766   : > { %v4128_v51 = vadd.f32 %v4127_v11, %v9782_v33  ;;  %v5340_v63 = vadd.f32 %v5339_v26, %v10344_v23 }
 0x768   : > { %v4266_v22 = vmax.f32 %v4128_v51, 0.0  ;;  %v5532_v9 = vmax.f32 %v5340_v63, 0.0 }
 0x769   : > { %v4797_v54 = vpop.f32.mrf.mxu3 }
 0x76a   : > { %v11286_v13 = vadd.f32 %v4266_v22, %v12250_v36  ;;  %v5660_v3 = vadd.f32 %v5532_v9, %v10886_v5  ;;  %v4798_v27 = vadd.f32 %v4797_v54, %v10160_v14 }
 0x76b   : > { %v6010_v25 = vpop.f32.mrf.mxu1 }
 0x76c   : > { %v4963_v16 = vmax.f32 %v4798_v27, 0.0  ;;  %6229 = vst.msk [vmem:[%s10504_s12 + $0x220] sm:$0xff] %vm6160_vm2, %v6010_v25  ;;  %v4461_v6 = vpack.c.bf16 %v11286_v13, %v11282_v61  ;;  %v5745_v56 = vpack.c.bf16 %v5660_v3, %v5659_v19  ;;  %v12251_v19 = vld [vmem:[#allocation125_spill] sm:$0xff]  ;;  %v12252_v25 = vld [vmem:[#allocation126_spill] sm:$0xff] }
 0x76d   : > { %v4130_v49 = vpop.f32.mrf.mxu2  ;;  %v5342_v12 = vpop.f32.mrf.mxu0 }
 0x76e   : > { %4839 = vmatmul.bf16.gmra.mxu3 %v4461_v6  ;;  %6049 = vmatmul.bf16.gmra.mxu1 %v5745_v56  ;;  %v5039_v52 = vpack.c.bf16 %v4963_v16, %v4962_v44  ;;  %v4131_v5 = vadd.f32 %v4130_v49, %v9782_v33  ;;  %v5343_v7 = vadd.f32 %v5342_v12, %v10344_v23 }
 0x770   : > { %5381 = vmatmul.bf16.gmra.mxu0 %v5039_v52  ;;  %v4267_v26 = vmax.f32 %v4131_v5, 0.0  ;;  %v5533_v63 = vmax.f32 %v5343_v7, 0.0 }
 0x771   : > { %v4800_v42 = vpop.f32.mrf.mxu3 }
 0x772   : > { %v4801_v9 = vadd.f32 %v4800_v42, %v10160_v14  ;;  %v11302_v36 = vadd.f32 %v4267_v26, %v12251_v19  ;;  %v5661_v27 = vadd.f32 %v5533_v63, %v10904_v35 }
 0x773   : > { %v6012_v11 = vpop.f32.mrf.mxu1 }
 0x774   : > { %6230 = vst.msk [vmem:[%s10504_s12 + $0x228] sm:$0xff] %vm6160_vm2, %v6012_v11  ;;  %v4964_v49 = vmax.f32 %v4801_v9, 0.0 }
 0x775   : > { %v4132_v0 = vpop.f32.mrf.mxu2  ;;  %v5344_v51 = vpop.f32.mrf.mxu0 }
 0x776   : > { %v4133_v47 = vadd.f32 %v4132_v0, %v9782_v33  ;;  %v5345_v22 = vadd.f32 %v5344_v51, %v10344_v23 }
 0x778   : > { %v4268_v62 = vmax.f32 %v4133_v47, 0.0  ;;  %v5534_v54 = vmax.f32 %v5345_v22, 0.0 }
 0x779   : > { %v4802_v3 = vpop.f32.mrf.mxu3 }
 0x77a   : > { %v11306_v44 = vadd.f32 %v4268_v62, %v12252_v25  ;;  %v5662_v16 = vadd.f32 %v5534_v54, %v10908_v31  ;;  %v4803_v6 = vadd.f32 %v4802_v3, %v10160_v14 }
 0x77b   : > { %v6015_v56 = vpop.f32.mrf.mxu1 }
 0x77c   : > { %v4965_v12 = vmax.f32 %v4803_v6, 0.0  ;;  %6231 = vst.msk [vmem:[%s10504_s12 + $0x230] sm:$0xff] %vm6160_vm2, %v6015_v56  ;;  %v4462_v52 = vpack.c.bf16 %v11306_v44, %v11302_v36  ;;  %v5746_v5 = vpack.c.bf16 %v5662_v16, %v5661_v27  ;;  %v12253_v27 = vld [vmem:[#allocation132_spill] sm:$0xff]  ;;  %v12254_v56 = vld [vmem:[#allocation133_spill] sm:$0xff] }
 0x77d   : > { %v4135_v42 = vpop.f32.mrf.mxu2  ;;  %v5347_v7 = vpop.f32.mrf.mxu0 }
 0x77e   : > { %v5040_v35 = vpack.c.bf16 %v4965_v12, %v4964_v49  ;;  %4844 = vmatmul.bf16.gmra.mxu3 %v4462_v52  ;;  %6054 = vmatmul.bf16.gmra.mxu1 %v5746_v5  ;;  %v4136_v31 = vadd.f32 %v4135_v42, %v9782_v33  ;;  %v5348_v26 = vadd.f32 %v5347_v7, %v10344_v23 }
 0x780   : > { %5386 = vmatmul.bf16.gmra.mxu0 %v5040_v35  ;;  %v4269_v51 = vmax.f32 %v4136_v31, 0.0  ;;  %v5535_v22 = vmax.f32 %v5348_v26, 0.0 }
 0x781   : > { %v4805_v11 = vpop.f32.mrf.mxu3 }
 0x782   : > { %v4806_v54 = vadd.f32 %v4805_v11, %v10160_v14  ;;  %v11322_v25 = vadd.f32 %v4269_v51, %v12253_v27  ;;  %v5663_v6 = vadd.f32 %v5535_v22, %v10928_v58 }
 0x783   : > { %v6017_v0 = vpop.f32.mrf.mxu1 }
 0x784   : > { %6232 = vst.msk [vmem:[%s10504_s12 + $0x238] sm:$0xff] %vm6160_vm2, %v6017_v0  ;;  %v4966_v42 = vmax.f32 %v4806_v54, 0.0 }
 0x785   : > { %v4137_v63 = vpop.f32.mrf.mxu2  ;;  %v5349_v47 = vpop.f32.mrf.mxu0 }
 0x786   : > { %v4138_v9 = vadd.f32 %v4137_v63, %v9782_v33  ;;  %v5350_v62 = vadd.f32 %v5349_v47, %v10344_v23 }
 0x788   : > { %v4270_v19 = vmax.f32 %v4138_v9, 0.0  ;;  %v5536_v3 = vmax.f32 %v5350_v62, 0.0 }
 0x789   : > { %v4807_v16 = vpop.f32.mrf.mxu3 }
 0x78a   : > { %v11326_v49 = vadd.f32 %v4270_v19, %v12254_v56  ;;  %v5664_v12 = vadd.f32 %v5536_v3, %v10932_v30  ;;  %v4808_v52 = vadd.f32 %v4807_v16, %v10160_v14 }
 0x78b   : > { %v6020_v5 = vpop.f32.mrf.mxu1 }
 0x78c   : > { %v4967_v7 = vmax.f32 %v4808_v52, 0.0  ;;  %6233 = vst.msk [vmem:[%s10504_s12 + $0x240] sm:$0xff] %vm6160_vm2, %v6020_v5  ;;  %v4463_v35 = vpack.c.bf16 %v11326_v49, %v11322_v25  ;;  %v5747_v31 = vpack.c.bf16 %v5664_v12, %v5663_v6  ;;  %v12255_v6 = vld [vmem:[#allocation140_spill] sm:$0xff]  ;;  %v12256_v5 = vld [vmem:[#allocation141_spill] sm:$0xff] }
 0x78d   : > { %v4140_v11 = vpop.f32.mrf.mxu2  ;;  %v5352_v26 = vpop.f32.mrf.mxu0 }
 0x78e   : > { %v5041_v58 = vpack.c.bf16 %v4967_v7, %v4966_v42  ;;  %4849 = vmatmul.bf16.gmra.mxu3 %v4463_v35  ;;  %6059 = vmatmul.bf16.gmra.mxu1 %v5747_v31  ;;  %v4141_v30 = vadd.f32 %v4140_v11, %v9782_v33  ;;  %v5353_v51 = vadd.f32 %v5352_v26, %v10344_v23 }
 0x790   : > { %5391 = vmatmul.bf16.gmra.mxu0 %v5041_v58  ;;  %v4271_v47 = vmax.f32 %v4141_v30, 0.0  ;;  %v5537_v62 = vmax.f32 %v5353_v51, 0.0 }
 0x791   : > { %v4810_v0 = vpop.f32.mrf.mxu3 }
 0x792   : > { %v4811_v3 = vadd.f32 %v4810_v0, %v10160_v14  ;;  %v11342_v56 = vadd.f32 %v4271_v47, %v12255_v6  ;;  %v5665_v52 = vadd.f32 %v5537_v62, %v10952_v40 }
 0x793   : > { %v6022_v63 = vpop.f32.mrf.mxu1 }
 0x794   : > { %6234 = vst.msk [vmem:[%s10504_s12 + $0x248] sm:$0xff] %vm6160_vm2, %v6022_v63  ;;  %v4968_v31 = vmax.f32 %v4811_v3, 0.0 }
 0x795   : > { %v4142_v22 = vpop.f32.mrf.mxu2  ;;  %v5354_v9 = vpop.f32.mrf.mxu0 }
 0x796   : > { %v4143_v54 = vadd.f32 %v4142_v22, %v9782_v33  ;;  %v5355_v19 = vadd.f32 %v5354_v9, %v10344_v23 }
 0x798   : > { %v4272_v27 = vmax.f32 %v4143_v54, 0.0  ;;  %v5538_v16 = vmax.f32 %v5355_v19, 0.0 }
 0x799   : > { %v4812_v12 = vpop.f32.mrf.mxu3 }
 0x79a   : > { %v11346_v42 = vadd.f32 %v4272_v27, %v12256_v5  ;;  %v5666_v7 = vadd.f32 %v5538_v16, %v10956_v38  ;;  %v4813_v33 = vadd.f32 %v4812_v12, %v10160_v14 }
 0x79b   : > { %v6025_v35 = vpop.f32.mrf.mxu1 }
 0x79c   : > { %v4969_v11 = vmax.f32 %v4813_v33, 0.0  ;;  %6235 = vst.msk [vmem:[%s10504_s12 + $0x250] sm:$0xff] %vm6160_vm2, %v6025_v35  ;;  %v4464_v26 = vpack.c.bf16 %v11346_v42, %v11342_v56  ;;  %v5748_v58 = vpack.c.bf16 %v5666_v7, %v5665_v52 }
 0x79d   : > { %v5357_v30 = vpop.f32.mrf.mxu0 }
 0x79e   : > { %v5042_v0 = vpack.c.bf16 %v4969_v11, %v4968_v31  ;;  %4854 = vmatmul.bf16.gmra.mxu3 %v4464_v26  ;;  %6064 = vmatmul.bf16.gmra.mxu1 %v5748_v58  ;;  %v5358_v38 = vadd.f32 %v5357_v30, %v10344_v23 }
 0x7a0   : > { %5396 = vmatmul.bf16.gmra.mxu0 %v5042_v0  ;;  %v5539_v47 = vmax.f32 %v5358_v38, 0.0 }
 0x7a1   : > { %v4815_v40 = vpop.f32.mrf.mxu3 }
 0x7a2   : > { %v4816_v9 = vadd.f32 %v4815_v40, %v10160_v14  ;;  %v5667_v19 = vadd.f32 %v5539_v47, %v10976_v18 }
 0x7a3   : > { %v6027_v51 = vpop.f32.mrf.mxu1 }
 0x7a4   : > { %6236 = vst.msk [vmem:[%s10504_s12 + $0x258] sm:$0xff] %vm6160_vm2, %v6027_v51  ;;  %v4970_v6 = vmax.f32 %v4816_v9, 0.0 }
 0x7a5   : > { %v5359_v63 = vpop.f32.mrf.mxu0 }
 0x7a6   : > { %v5360_v22 = vadd.f32 %v5359_v63, %v10344_v23 }
 0x7a8   : > { %v5540_v62 = vmax.f32 %v5360_v22, 0.0 }
 0x7a9   : > { %v4817_v54 = vpop.f32.mrf.mxu3 }
 0x7aa   : > { %v5668_v3 = vadd.f32 %v5540_v62, %v10980_v1  ;;  %v4818_v27 = vadd.f32 %v4817_v54, %v10160_v14 }
 0x7ab   : > { %v6030_v16 = vpop.f32.mrf.mxu1 }
 0x7ac   : > { %v4971_v12 = vmax.f32 %v4818_v27, 0.0  ;;  %6237 = vst.msk [vmem:[%s10504_s12 + $0x260] sm:$0xff] %vm6160_vm2, %v6030_v16  ;;  %v5749_v52 = vpack.c.bf16 %v5668_v3, %v5667_v19 }
 0x7ad   : > { %v5362_v5 = vpop.f32.mrf.mxu0 }
 0x7ae   : > { %v5043_v7 = vpack.c.bf16 %v4971_v12, %v4970_v6  ;;  %6069 = vmatmul.bf16.gmra.mxu1 %v5749_v52  ;;  %v5363_v35 = vadd.f32 %v5362_v5, %v10344_v23 }
 0x7b0   : > { %5401 = vmatmul.bf16.gmra.mxu0 %v5043_v7  ;;  %v5541_v1 = vmax.f32 %v5363_v35, 0.0 }
 0x7b1   : > { %v4820_v33 = vpop.f32.mrf.mxu3 }
 0x7b2   : > { %v4821_v26 = vadd.f32 %v4820_v33, %v10160_v14  ;;  %v5669_v0 = vadd.f32 %v5541_v1, %v11000_v24 }
 0x7b3   : > { %v6032_v31 = vpop.f32.mrf.mxu1 }
 0x7b4   : > { %6238 = vst.msk [vmem:[%s10504_s12 + $0x268] sm:$0xff] %vm6160_vm2, %v6032_v31  ;;  %v4972_v63 = vmax.f32 %v4821_v26, 0.0 }
 0x7b5   : > { %v5364_v18 = vpop.f32.mrf.mxu0 }
 0x7b6   : > { %v5365_v11 = vadd.f32 %v5364_v18, %v10344_v23 }
 0x7b8   : > { %v5542_v58 = vmax.f32 %v5365_v11, 0.0 }
 0x7b9   : > { %v4822_v30 = vpop.f32.mrf.mxu3 }
 0x7ba   : > { %v5670_v40 = vadd.f32 %v5542_v58, %v11004_v29  ;;  %v4823_v38 = vadd.f32 %v4822_v30, %v10160_v14 }
 0x7bb   : > { %v6035_v51 = vpop.f32.mrf.mxu1 }
 0x7bc   : > { %v4973_v47 = vmax.f32 %v4823_v38, 0.0  ;;  %6239 = vst.msk [vmem:[%s10504_s12 + $0x270] sm:$0xff] %vm6160_vm2, %v6035_v51  ;;  %v5750_v22 = vpack.c.bf16 %v5670_v40, %v5669_v0 }
 0x7bd   : > { %v5367_v9 = vpop.f32.mrf.mxu0 }
 0x7be   : > { %v5044_v62 = vpack.c.bf16 %v4973_v47, %v4972_v63  ;;  %6074 = vmatmul.bf16.gmra.mxu1 %v5750_v22  ;;  %v5368_v19 = vadd.f32 %v5367_v9, %v10344_v23 }
 0x7c0   : > { %5406 = vmatmul.bf16.gmra.mxu0 %v5044_v62  ;;  %v5543_v29 = vmax.f32 %v5368_v19, 0.0 }
 0x7c1   : > { %v4825_v54 = vpop.f32.mrf.mxu3 }
 0x7c2   : > { %v4826_v16 = vadd.f32 %v4825_v54, %v10160_v14  ;;  %v5671_v52 = vadd.f32 %v5543_v29, %v11024_v59 }
 0x7c3   : > { %v6037_v3 = vpop.f32.mrf.mxu1 }
 0x7c4   : > { %6240 = vst.msk [vmem:[%s10504_s12 + $0x278] sm:$0xff] %vm6160_vm2, %v6037_v3  ;;  %v4974_v35 = vmax.f32 %v4826_v16, 0.0 }
 0x7c5   : > { %v5369_v24 = vpop.f32.mrf.mxu0 }
 0x7c6   : > { %v5370_v27 = vadd.f32 %v5369_v24, %v10344_v23 }
 0x7c8   : > { %v5544_v6 = vmax.f32 %v5370_v27, 0.0 }
 0x7c9   : > { %v4827_v12 = vpop.f32.mrf.mxu3 }
 0x7ca   : > { %v5672_v5 = vadd.f32 %v5544_v6, %v11028_v28  ;;  %v4828_v7 = vadd.f32 %v4827_v12, %v10160_v14 }
 0x7cb   : > { %v6040_v33 = vpop.f32.mrf.mxu1 }
 0x7cc   : > { %v4975_v31 = vmax.f32 %v4828_v7, 0.0  ;;  %6241 = vst.msk [vmem:[%s10504_s12 + $0x280] sm:$0xff] %vm6160_vm2, %v6040_v33  ;;  %v5751_v18 = vpack.c.bf16 %v5672_v5, %v5671_v52 }
 0x7cd   : > { %v5372_v1 = vpop.f32.mrf.mxu0 }
 0x7ce   : > { %v5045_v11 = vpack.c.bf16 %v4975_v31, %v4974_v35  ;;  %6079 = vmatmul.bf16.gmra.mxu1 %v5751_v18  ;;  %v5373_v58 = vadd.f32 %v5372_v1, %v10344_v23 }
 0x7d0   : > { %5411 = vmatmul.bf16.gmra.mxu0 %v5045_v11  ;;  %v5545_v28 = vmax.f32 %v5373_v58, 0.0 }
 0x7d1   : > { %v4830_v26 = vpop.f32.mrf.mxu3 }
 0x7d2   : > { %v4831_v40 = vadd.f32 %v4830_v26, %v10160_v14  ;;  %v5673_v63 = vadd.f32 %v5545_v28, %v11048_v46 }
 0x7d3   : > { %v6042_v30 = vpop.f32.mrf.mxu1 }
 0x7d4   : > { %6242 = vst.msk [vmem:[%s10504_s12 + $0x288] sm:$0xff] %vm6160_vm2, %v6042_v30  ;;  %v4976_v62 = vmax.f32 %v4831_v40, 0.0 }
 0x7d5   : > { %v5374_v59 = vpop.f32.mrf.mxu0 }
 0x7d6   : > { %v5375_v0 = vadd.f32 %v5374_v59, %v10344_v23 }
 0x7d8   : > { %v5546_v38 = vmax.f32 %v5375_v0, 0.0 }
 0x7d9   : > { %v4832_v51 = vpop.f32.mrf.mxu3 }
 0x7da   : > { %v5674_v47 = vadd.f32 %v5546_v38, %v11052_v2  ;;  %v4833_v22 = vadd.f32 %v4832_v51, %v10160_v14 }
 0x7db   : > { %v6045_v9 = vpop.f32.mrf.mxu1 }
 0x7dc   : > { %v4977_v54 = vmax.f32 %v4833_v22, 0.0  ;;  %6243 = vst.msk [vmem:[%s10504_s12 + $0x290] sm:$0xff] %vm6160_vm2, %v6045_v9  ;;  %v5752_v19 = vpack.c.bf16 %v5674_v47, %v5673_v63 }
 0x7dd   : > { %v5377_v3 = vpop.f32.mrf.mxu0 }
 0x7de   : > { %v5046_v24 = vpack.c.bf16 %v4977_v54, %v4976_v62  ;;  %6084 = vmatmul.bf16.gmra.mxu1 %v5752_v19  ;;  %v5378_v27 = vadd.f32 %v5377_v3, %v10344_v23 }
 0x7e0   : > { %5416 = vmatmul.bf16.gmra.mxu0 %v5046_v24  ;;  %v5547_v2 = vmax.f32 %v5378_v27, 0.0 }
 0x7e1   : > { %v4835_v29 = vpop.f32.mrf.mxu3 }
 0x7e2   : > { %v4836_v12 = vadd.f32 %v4835_v29, %v10160_v14  ;;  %v5675_v7 = vadd.f32 %v5547_v2, %v11072_v4 }
 0x7e3   : > { %v6047_v16 = vpop.f32.mrf.mxu1 }
 0x7e4   : > { %6244 = vst.msk [vmem:[%s10504_s12 + $0x298] sm:$0xff] %vm6160_vm2, %v6047_v16  ;;  %v4978_v18 = vmax.f32 %v4836_v12, 0.0 }
 0x7e5   : > { %v5379_v46 = vpop.f32.mrf.mxu0 }
 0x7e6   : > { %v5380_v6 = vadd.f32 %v5379_v46, %v10344_v23 }
 0x7e8   : > { %v5548_v52 = vmax.f32 %v5380_v6, 0.0 }
 0x7e9   : > { %v4837_v5 = vpop.f32.mrf.mxu3 }
 0x7ea   : > { %v5676_v33 = vadd.f32 %v5548_v52, %v11076_v45  ;;  %v4838_v35 = vadd.f32 %v4837_v5, %v10160_v14 }
 0x7eb   : > { %v6050_v31 = vpop.f32.mrf.mxu1 }
 0x7ec   : > { %v4979_v1 = vmax.f32 %v4838_v35, 0.0  ;;  %6245 = vst.msk [vmem:[%s10504_s12 + $0x2a0] sm:$0xff] %vm6160_vm2, %v6050_v31  ;;  %v5753_v11 = vpack.c.bf16 %v5676_v33, %v5675_v7 }
 0x7ed   : > { %v5382_v26 = vpop.f32.mrf.mxu0 }
 0x7ee   : > { %v5047_v58 = vpack.c.bf16 %v4979_v1, %v4978_v18  ;;  %6089 = vmatmul.bf16.gmra.mxu1 %v5753_v11  ;;  %v5383_v59 = vadd.f32 %v5382_v26, %v10344_v23 }
 0x7f0   : > { %5421 = vmatmul.bf16.gmra.mxu0 %v5047_v58  ;;  %v5549_v45 = vmax.f32 %v5383_v59, 0.0 }
 0x7f1   : > { %v4840_v30 = vpop.f32.mrf.mxu3 }
 0x7f2   : > { %v4841_v40 = vadd.f32 %v4840_v30, %v10160_v14  ;;  %v5677_v63 = vadd.f32 %v5549_v45, %v11096_v53 }
 0x7f3   : > { %v6052_v28 = vpop.f32.mrf.mxu1 }
 0x7f4   : > { %6246 = vst.msk [vmem:[%s10504_s12 + $0x2a8] sm:$0xff] %vm6160_vm2, %v6052_v28  ;;  %v4980_v62 = vmax.f32 %v4841_v40, 0.0 }
 0x7f5   : > { %v5384_v4 = vpop.f32.mrf.mxu0 }
 0x7f6   : > { %v5385_v0 = vadd.f32 %v5384_v4, %v10344_v23 }
 0x7f8   : > { %v5550_v38 = vmax.f32 %v5385_v0, 0.0 }
 0x7f9   : > { %v4842_v51 = vpop.f32.mrf.mxu3 }
 0x7fa   : > { %v5678_v47 = vadd.f32 %v5550_v38, %v11100_v20  ;;  %v4843_v22 = vadd.f32 %v4842_v51, %v10160_v14 }
 0x7fb   : > { %v6055_v9 = vpop.f32.mrf.mxu1 }
 0x7fc   : > { %v4981_v54 = vmax.f32 %v4843_v22, 0.0  ;;  %6247 = vst.msk [vmem:[%s10504_s12 + $0x2b0] sm:$0xff] %vm6160_vm2, %v6055_v9  ;;  %v5754_v19 = vpack.c.bf16 %v5678_v47, %v5677_v63 }
 0x7fd   : > { %v5387_v3 = vpop.f32.mrf.mxu0 }
 0x7fe   : > { %v5048_v24 = vpack.c.bf16 %v4981_v54, %v4980_v62  ;;  %6094 = vmatmul.bf16.gmra.mxu1 %v5754_v19  ;;  %v5388_v27 = vadd.f32 %v5387_v3, %v10344_v23 }
 0x800   : > { %5426 = vmatmul.bf16.gmra.mxu0 %v5048_v24  ;;  %v5551_v20 = vmax.f32 %v5388_v27, 0.0 }
 0x801   : > { %v4845_v29 = vpop.f32.mrf.mxu3 }
 0x802   : > { %v4846_v2 = vadd.f32 %v4845_v29, %v10160_v14  ;;  %v5679_v52 = vadd.f32 %v5551_v20, %v11120_v32 }
 0x803   : > { %v6057_v16 = vpop.f32.mrf.mxu1 }
 0x804   : > { %6248 = vst.msk [vmem:[%s10504_s12 + $0x2b8] sm:$0xff] %vm6160_vm2, %v6057_v16  ;;  %v4982_v35 = vmax.f32 %v4846_v2, 0.0 }
 0x805   : > { %v5389_v53 = vpop.f32.mrf.mxu0 }
 0x806   : > { %v5390_v46 = vadd.f32 %v5389_v53, %v10344_v23 }
 0x808   : > { %v5552_v6 = vmax.f32 %v5390_v46, 0.0 }
 0x809   : > { %v4847_v12 = vpop.f32.mrf.mxu3 }
 0x80a   : > { %v5680_v5 = vadd.f32 %v5552_v6, %v11124_v41  ;;  %v4848_v7 = vadd.f32 %v4847_v12, %v10160_v14 }
 0x80b   : > { %v6060_v33 = vpop.f32.mrf.mxu1 }
 0x80c   : > { %v4983_v31 = vmax.f32 %v4848_v7, 0.0  ;;  %6249 = vst.msk [vmem:[%s10504_s12 + $0x2c0] sm:$0xff] %vm6160_vm2, %v6060_v33  ;;  %v5755_v18 = vpack.c.bf16 %v5680_v5, %v5679_v52 }
 0x80d   : > { %v5392_v1 = vpop.f32.mrf.mxu0 }
 0x80e   : > { %v5049_v11 = vpack.c.bf16 %v4983_v31, %v4982_v35  ;;  %6099 = vmatmul.bf16.gmra.mxu1 %v5755_v18  ;;  %v5393_v58 = vadd.f32 %v5392_v1, %v10344_v23 }
 0x810   : > { %5431 = vmatmul.bf16.gmra.mxu0 %v5049_v11  ;;  %v5553_v41 = vmax.f32 %v5393_v58, 0.0 }
 0x811   : > { %v4850_v26 = vpop.f32.mrf.mxu3 }
 0x812   : > { %v4851_v28 = vadd.f32 %v4850_v26, %v10160_v14  ;;  %v5681_v0 = vadd.f32 %v5553_v41, %v11140_v60 }
 0x813   : > { %v6062_v30 = vpop.f32.mrf.mxu1 }
 0x814   : > { %6250 = vst.msk [vmem:[%s10504_s12 + $0x2c8] sm:$0xff] %vm6160_vm2, %v6062_v30  ;;  %v4984_v63 = vmax.f32 %v4851_v28, 0.0 }
 0x815   : > { %v5394_v32 = vpop.f32.mrf.mxu0 }
 0x816   : > { %v5395_v59 = vadd.f32 %v5394_v32, %v10344_v23 }
 0x818   : > { %v5554_v4 = vmax.f32 %v5395_v59, 0.0 }
 0x819   : > { %v4852_v45 = vpop.f32.mrf.mxu3 }
 0x81a   : > { %v5682_v40 = vadd.f32 %v5554_v4, %v11144_v43  ;;  %v4853_v38 = vadd.f32 %v4852_v45, %v10160_v14 }
 0x81b   : > { %v6065_v51 = vpop.f32.mrf.mxu1 }
 0x81c   : > { %v4985_v47 = vmax.f32 %v4853_v38, 0.0  ;;  %6251 = vst.msk [vmem:[%s10504_s12 + $0x2d0] sm:$0xff] %vm6160_vm2, %v6065_v51  ;;  %v5756_v22 = vpack.c.bf16 %v5682_v40, %v5681_v0 }
 0x81d   : > { %v5397_v9 = vpop.f32.mrf.mxu0 }
 0x81e   : > { %v5050_v62 = vpack.c.bf16 %v4985_v47, %v4984_v63  ;;  %6104 = vmatmul.bf16.gmra.mxu1 %v5756_v22  ;;  %v5398_v19 = vadd.f32 %v5397_v9, %v10344_v23 }
 0x820   : > { %5436 = vmatmul.bf16.gmra.mxu0 %v5050_v62  ;;  %v5555_v43 = vmax.f32 %v5398_v19, 0.0 }
 0x821   : > { %v4855_v54 = vpop.f32.mrf.mxu3 }
 0x822   : > { %v4856_v29 = vadd.f32 %v4855_v54, %v10160_v14  ;;  %v5683_v53 = vadd.f32 %v5555_v43, %v11161_v8 }
 0x823   : > { %v6067_v3 = vpop.f32.mrf.mxu1 }
 0x824   : > { %6252 = vst.msk [vmem:[%s10504_s12 + $0x2d8] sm:$0xff] %vm6160_vm2, %v6067_v3  ;;  %v4986_v6 = vmax.f32 %v4856_v29, 0.0 }
 0x825   : > { %v5399_v60 = vpop.f32.mrf.mxu0 }
 0x826   : > { %v5400_v24 = vadd.f32 %v5399_v60, %v10344_v23 }
 0x828   : > { %v5556_v27 = vmax.f32 %v5400_v24, 0.0 }
 0x829   : > { %v4857_v16 = vpop.f32.mrf.mxu3 }
 0x82a   : > { %v5684_v20 = vadd.f32 %v5556_v27, %v11165_v50  ;;  %v4858_v46 = vadd.f32 %v4857_v16, %v10160_v14 }
 0x82b   : > { %v6070_v2 = vpop.f32.mrf.mxu1 }
 0x82c   : > { %v4987_v12 = vmax.f32 %v4858_v46, 0.0  ;;  %6253 = vst.msk [vmem:[%s10504_s12 + $0x2e0] sm:$0xff] %vm6160_vm2, %v6070_v2  ;;  %v5757_v52 = vpack.c.bf16 %v5684_v20, %v5683_v53 }
 0x82d   : > { %v5402_v5 = vpop.f32.mrf.mxu0 }
 0x82e   : > { %v5051_v7 = vpack.c.bf16 %v4987_v12, %v4986_v6  ;;  %6109 = vmatmul.bf16.gmra.mxu1 %v5757_v52  ;;  %v5403_v33 = vadd.f32 %v5402_v5, %v10344_v23 }
 0x830   : > { %5441 = vmatmul.bf16.gmra.mxu0 %v5051_v7  ;;  %v5557_v50 = vmax.f32 %v5403_v33, 0.0 }
 0x832   : > { %v5685_v18 = vadd.f32 %v5557_v50, %v11182_v21 }
 0x833   : > { %v6072_v35 = vpop.f32.mrf.mxu1 }
 0x834   : > { %6254 = vst.msk [vmem:[%s10504_s12 + $0x2e8] sm:$0xff] %vm6160_vm2, %v6072_v35 }
 0x835   : > { %v5404_v8 = vpop.f32.mrf.mxu0 }
 0x836   : > { %v5405_v14 = vadd.f32 %v5404_v8, %v10344_v23 }
 0x838   : > { %v5558_v31 = vmax.f32 %v5405_v14, 0.0 }
 0x83a   : > { %v5686_v1 = vadd.f32 %v5558_v31, %v11186_v37 }
 0x83b   : > { %v6075_v11 = vpop.f32.mrf.mxu1 }
 0x83c   : > { %6255 = vst.msk [vmem:[%s10504_s12 + $0x2f0] sm:$0xff] %vm6160_vm2, %v6075_v11  ;;  %v5758_v26 = vpack.c.bf16 %v5686_v1, %v5685_v18 }
 0x83d   : > { %v5407_v58 = vpop.f32.mrf.mxu0 }
 0x83e   : > { %6114 = vmatmul.bf16.gmra.mxu1 %v5758_v26  ;;  %v5408_v30 = vadd.f32 %v5407_v58, %v10344_v23 }
 0x840   : > { %v5559_v59 = vmax.f32 %v5408_v30, 0.0 }
 0x842   : > { %v5687_v37 = vadd.f32 %v5559_v59, %v11202_v55 }
 0x843   : > { %v6077_v32 = vpop.f32.mrf.mxu1 }
 0x844   : > { %6256 = vst.msk [vmem:[%s10504_s12 + $0x2f8] sm:$0xff] %vm6160_vm2, %v6077_v32 }
 0x845   : > { %v5409_v41 = vpop.f32.mrf.mxu0 }
 0x846   : > { %v5410_v28 = vadd.f32 %v5409_v41, %v10344_v23 }
 0x848   : > { %v5560_v21 = vmax.f32 %v5410_v28, 0.0 }
 0x84a   : > { %v5688_v4 = vadd.f32 %v5560_v21, %v11206_v39 }
 0x84b   : > { %v6080_v45 = vpop.f32.mrf.mxu1 }
 0x84c   : > { %6257 = vst.msk [vmem:[%s10504_s12 + $0x300] sm:$0xff] %vm6160_vm2, %v6080_v45  ;;  %v5759_v0 = vpack.c.bf16 %v5688_v4, %v5687_v37 }
 0x84d   : > { %v5412_v40 = vpop.f32.mrf.mxu0 }
 0x84e   : > { %6119 = vmatmul.bf16.gmra.mxu1 %v5759_v0  ;;  %v5413_v38 = vadd.f32 %v5412_v40, %v10344_v23 }
 0x850   : > { %v5561_v47 = vmax.f32 %v5413_v38, 0.0 }
 0x852   : > { %v5689_v39 = vadd.f32 %v5561_v47, %v11222_v57 }
 0x853   : > { %v6082_v51 = vpop.f32.mrf.mxu1 }
 0x854   : > { %6258 = vst.msk [vmem:[%s10504_s12 + $0x308] sm:$0xff] %vm6160_vm2, %v6082_v51 }
 0x855   : > { %v5414_v63 = vpop.f32.mrf.mxu0 }
 0x856   : > { %v5415_v22 = vadd.f32 %v5414_v63, %v10344_v23 }
 0x858   : > { %v5562_v55 = vmax.f32 %v5415_v22, 0.0 }
 0x85a   : > { %v5690_v9 = vadd.f32 %v5562_v55, %v11226_v17 }
 0x85b   : > { %v6085_v62 = vpop.f32.mrf.mxu1 }
 0x85c   : > { %6259 = vst.msk [vmem:[%s10504_s12 + $0x310] sm:$0xff] %vm6160_vm2, %v6085_v62  ;;  %v5760_v54 = vpack.c.bf16 %v5690_v9, %v5689_v39 }
 0x85d   : > { %v5417_v19 = vpop.f32.mrf.mxu0 }
 0x85e   : > { %6124 = vmatmul.bf16.gmra.mxu1 %v5760_v54  ;;  %v5418_v3 = vadd.f32 %v5417_v19, %v10344_v23 }
 0x860   : > { %v5563_v24 = vmax.f32 %v5418_v3, 0.0 }
 0x862   : > { %v5691_v17 = vadd.f32 %v5563_v24, %v11242_v10 }
 0x863   : > { %v6087_v60 = vpop.f32.mrf.mxu1 }
 0x864   : > { %6260 = vst.msk [vmem:[%s10504_s12 + $0x318] sm:$0xff] %vm6160_vm2, %v6087_v60 }
 0x865   : > { %v5419_v43 = vpop.f32.mrf.mxu0 }
 0x866   : > { %v5420_v29 = vadd.f32 %v5419_v43, %v10344_v23 }
 0x868   : > { %v5564_v57 = vmax.f32 %v5420_v29, 0.0 }
 0x86a   : > { %v5692_v27 = vadd.f32 %v5564_v57, %v11246_v34 }
 0x86b   : > { %v6090_v16 = vpop.f32.mrf.mxu1 }
 0x86c   : > { %6261 = vst.msk [vmem:[%s10504_s12 + $0x320] sm:$0xff] %vm6160_vm2, %v6090_v16  ;;  %v5761_v53 = vpack.c.bf16 %v5692_v27, %v5691_v17 }
 0x86d   : > { %v5422_v20 = vpop.f32.mrf.mxu0 }
 0x86e   : > { %6129 = vmatmul.bf16.gmra.mxu1 %v5761_v53  ;;  %v5423_v46 = vadd.f32 %v5422_v20, %v10344_v23 }
 0x870   : > { %v5565_v12 = vmax.f32 %v5423_v46, 0.0 }
 0x872   : > { %v5693_v34 = vadd.f32 %v5565_v12, %v11262_v48 }
 0x873   : > { %v6092_v2 = vpop.f32.mrf.mxu1 }
 0x874   : > { %6262 = vst.msk [vmem:[%s10504_s12 + $0x328] sm:$0xff] %vm6160_vm2, %v6092_v2 }
 0x875   : > { %v5424_v6 = vpop.f32.mrf.mxu0 }
 0x876   : > { %v5425_v52 = vadd.f32 %v5424_v6, %v10344_v23 }
 0x878   : > { %v5566_v10 = vmax.f32 %v5425_v52, 0.0 }
 0x87a   : > { %v5694_v5 = vadd.f32 %v5566_v10, %v11266_v15 }
 0x87b   : > { %v6095_v7 = vpop.f32.mrf.mxu1 }
 0x87c   : > { %6263 = vst.msk [vmem:[%s10504_s12 + $0x330] sm:$0xff] %vm6160_vm2, %v6095_v7  ;;  %v5762_v33 = vpack.c.bf16 %v5694_v5, %v5693_v34 }
 0x87d   : > { %v5427_v35 = vpop.f32.mrf.mxu0 }
 0x87e   : > { %6134 = vmatmul.bf16.gmra.mxu1 %v5762_v33  ;;  %v5428_v8 = vadd.f32 %v5427_v35, %v10344_v23 }
 0x880   : > { %v5567_v31 = vmax.f32 %v5428_v8, 0.0 }
 0x882   : > { %v5695_v15 = vadd.f32 %v5567_v31, %v11282_v61 }
 0x883   : > { %v6097_v50 = vpop.f32.mrf.mxu1 }
 0x884   : > { %6264 = vst.msk [vmem:[%s10504_s12 + $0x338] sm:$0xff] %vm6160_vm2, %v6097_v50 }
 0x885   : > { %v5429_v14 = vpop.f32.mrf.mxu0 }
 0x886   : > { %v5430_v18 = vadd.f32 %v5429_v14, %v10344_v23 }
 0x888   : > { %v5568_v48 = vmax.f32 %v5430_v18, 0.0 }
 0x88a   : > { %v5696_v1 = vadd.f32 %v5568_v48, %v11286_v13 }
 0x88b   : > { %v6100_v11 = vpop.f32.mrf.mxu1 }
 0x88c   : > { %6265 = vst.msk [vmem:[%s10504_s12 + $0x340] sm:$0xff] %vm6160_vm2, %v6100_v11  ;;  %v5763_v26 = vpack.c.bf16 %v5696_v1, %v5695_v15 }
 0x88d   : > { %v5432_v58 = vpop.f32.mrf.mxu0 }
 0x88e   : > { %6139 = vmatmul.bf16.gmra.mxu1 %v5763_v26  ;;  %v5433_v30 = vadd.f32 %v5432_v58, %v10344_v23 }
 0x890   : > { %v5569_v59 = vmax.f32 %v5433_v30, 0.0 }
 0x892   : > { %v5697_v13 = vadd.f32 %v5569_v59, %v11302_v36 }
 0x893   : > { %v6102_v32 = vpop.f32.mrf.mxu1 }
 0x894   : > { %6266 = vst.msk [vmem:[%s10504_s12 + $0x348] sm:$0xff] %vm6160_vm2, %v6102_v32 }
 0x895   : > { %v5434_v41 = vpop.f32.mrf.mxu0 }
 0x896   : > { %v5435_v28 = vadd.f32 %v5434_v41, %v10344_v23 }
 0x898   : > { %v5570_v61 = vmax.f32 %v5435_v28, 0.0 }
 0x89a   : > { %v5698_v21 = vadd.f32 %v5570_v61, %v11306_v44 }
 0x89b   : > { %v6105_v37 = vpop.f32.mrf.mxu1 }
 0x89c   : > { %6267 = vst.msk [vmem:[%s10504_s12 + $0x350] sm:$0xff] %vm6160_vm2, %v6105_v37  ;;  %v5764_v4 = vpack.c.bf16 %v5698_v21, %v5697_v13 }
 0x89d   : > { %v5437_v45 = vpop.f32.mrf.mxu0 }
 0x89e   : > { %6144 = vmatmul.bf16.gmra.mxu1 %v5764_v4  ;;  %v5438_v0 = vadd.f32 %v5437_v45, %v10344_v23 }
 0x8a0   : > { %v5571_v51 = vmax.f32 %v5438_v0, 0.0 }
 0x8a2   : > { %v5699_v44 = vadd.f32 %v5571_v51, %v11322_v25 }
 0x8a3   : > { %v6107_v40 = vpop.f32.mrf.mxu1 }
 0x8a4   : > { %6268 = vst.msk [vmem:[%s10504_s12 + $0x358] sm:$0xff] %vm6160_vm2, %v6107_v40 }
 0x8a5   : > { %v5439_v38 = vpop.f32.mrf.mxu0 }
 0x8a6   : > { %v5440_v63 = vadd.f32 %v5439_v38, %v10344_v23 }
 0x8a8   : > { %v5572_v36 = vmax.f32 %v5440_v63, 0.0 }
 0x8aa   : > { %v5700_v47 = vadd.f32 %v5572_v36, %v11326_v49 }
 0x8ab   : > { %v6110_v22 = vpop.f32.mrf.mxu1 }
 0x8ac   : > { %6269 = vst.msk [vmem:[%s10504_s12 + $0x360] sm:$0xff] %vm6160_vm2, %v6110_v22  ;;  %v5765_v55 = vpack.c.bf16 %v5700_v47, %v5699_v44 }
 0x8ad   : > { %v5442_v39 = vpop.f32.mrf.mxu0 }
 0x8ae   : > { %6149 = vmatmul.bf16.gmra.mxu1 %v5765_v55  ;;  %v5443_v9 = vadd.f32 %v5442_v39, %v10344_v23 }
 0x8b0   : > { %v5573_v19 = vmax.f32 %v5443_v9, 0.0 }
 0x8b2   : > { %v5701_v3 = vadd.f32 %v5573_v19, %v11342_v56 }
 0x8b3   : > { %v6112_v62 = vpop.f32.mrf.mxu1 }
 0x8b4   : > { %6270 = vst.msk [vmem:[%s10504_s12 + $0x368] sm:$0xff] %vm6160_vm2, %v6112_v62 }
 0x8b5   : > { %v5444_v54 = vpop.f32.mrf.mxu0 }
 0x8b6   : > { %v5445_v25 = vadd.f32 %v5444_v54, %v10344_v23 }
 0x8b8   : > { %v5574_v49 = vmax.f32 %v5445_v25, 0.0 }
 0x8ba   : > { %v5702_v60 = vadd.f32 %v5574_v49, %v11346_v42 }
 0x8bb   : > { %v6115_v43 = vpop.f32.mrf.mxu1 }
 0x8bc   : > { %6271 = vst.msk [vmem:[%s10504_s12 + $0x370] sm:$0xff] %vm6160_vm2, %v6115_v43  ;;  %v5766_v24 = vpack.c.bf16 %v5702_v60, %v5701_v3 }
 0x8be   : > { %6154 = vmatmul.bf16.gmra.mxu1 %v5766_v24 }
 0x8c3   : > { %v6117_v29 = vpop.f32.mrf.mxu1 }
 0x8c4   : > { %6272 = vst.msk [vmem:[%s10504_s12 + $0x378] sm:$0xff] %vm6160_vm2, %v6117_v29 }
 0x8cb   : > { %v6120_v57 = vpop.f32.mrf.mxu1 }
 0x8cc   : > { %6273 = vst.msk [vmem:[%s10504_s12 + $0x380] sm:$0xff] %vm6160_vm2, %v6120_v57 }
 0x8d3   : > { %v6122_v23 = vpop.f32.mrf.mxu1 }
 0x8d4   : > { %6274 = vst.msk [vmem:[%s10504_s12 + $0x388] sm:$0xff] %vm6160_vm2, %v6122_v23 }
 0x8db   : > { %v6125_v56 = vpop.f32.mrf.mxu1 }
 0x8dc   : > { %6275 = vst.msk [vmem:[%s10504_s12 + $0x390] sm:$0xff] %vm6160_vm2, %v6125_v56 }
 0x8e3   : > { %v6127_v42 = vpop.f32.mrf.mxu1 }
 0x8e4   : > { %6276 = vst.msk [vmem:[%s10504_s12 + $0x398] sm:$0xff] %vm6160_vm2, %v6127_v42 }
 0x8eb   : > { %v6130_v17 = vpop.f32.mrf.mxu1 }
 0x8ec   : > { %6277 = vst.msk [vmem:[%s10504_s12 + $0x3a0] sm:$0xff] %vm6160_vm2, %v6130_v17 }
 0x8f3   : > { %v6132_v27 = vpop.f32.mrf.mxu1 }
 0x8f4   : > { %6278 = vst.msk [vmem:[%s10504_s12 + $0x3a8] sm:$0xff] %vm6160_vm2, %v6132_v27 }
 0x8fb   : > { %v6135_v16 = vpop.f32.mrf.mxu1 }
 0x8fc   : > { %6279 = vst.msk [vmem:[%s10504_s12 + $0x3b0] sm:$0xff] %vm6160_vm2, %v6135_v16 }
 0x903   : > { %v6137_v53 = vpop.f32.mrf.mxu1 }
 0x904   : > { %6280 = vst.msk [vmem:[%s10504_s12 + $0x3b8] sm:$0xff] %vm6160_vm2, %v6137_v53 }
 0x90b   : > { %v6140_v20 = vpop.f32.mrf.mxu1 }
 0x90c   : > { %6281 = vst.msk [vmem:[%s10504_s12 + $0x3c0] sm:$0xff] %vm6160_vm2, %v6140_v20 }
 0x913   : > { %v6142_v46 = vpop.f32.mrf.mxu1 }
 0x914   : > { %6282 = vst.msk [vmem:[%s10504_s12 + $0x3c8] sm:$0xff] %vm6160_vm2, %v6142_v46 }
 0x91b   : > { %v6145_v2 = vpop.f32.mrf.mxu1 }
 0x91c   : > { %6283 = vst.msk [vmem:[%s10504_s12 + $0x3d0] sm:$0xff] %vm6160_vm2, %v6145_v2 }
 0x923   : > { %v6147_v6 = vpop.f32.mrf.mxu1 }
 0x924   : > { %6284 = vst.msk [vmem:[%s10504_s12 + $0x3d8] sm:$0xff] %vm6160_vm2, %v6147_v6 }
 0x92b   : > { %v6150_v12 = vpop.f32.mrf.mxu1 }
 0x92c   : > { %6285 = vst.msk [vmem:[%s10504_s12 + $0x3e0] sm:$0xff] %vm6160_vm2, %v6150_v12 }
 0x933   : > { %v6152_v52 = vpop.f32.mrf.mxu1 }
 0x934   : > { %6286 = vst.msk [vmem:[%s10504_s12 + $0x3e8] sm:$0xff] %vm6160_vm2, %v6152_v52 }
 0x93b   : > { %v6155_v10 = vpop.f32.mrf.mxu1 }
 0x93c   : > { %6287 = vst.msk [vmem:[%s10504_s12 + $0x3f0] sm:$0xff] %vm6160_vm2, %v6155_v10 }
 0x943   : > { %v6157_v34 = vpop.f32.mrf.mxu1 }
 0x944   : > { %6288 = vst.msk [vmem:[%s10504_s12 + $0x3f8] sm:$0xff] %vm6160_vm2, %v6157_v34 }
 0x945 PF: > { %s14_s15 = sadd.s32 1, %s6841_s15  }
 0x946   : > { %p11_p4 = scmp.ge.s32.totalorder %s14_s15, 6  }
 0x948   :  { %13 = sbr.rel (!%p11_p4) target bundleno = 1 (0x1), region = 70 }

</bundles_post_ra>
